<compile_context>
chip_gen: v7x
topology: tpu7x:2x2x1
jax: 0.10.0
libtpu: 0.0.40
codegen_flags: <defaults>
</compile_context>

<pallas_src>
import functools

import jax
import jax.numpy as jnp
from jax.experimental import pallas as pl
from jax.experimental.pallas import tpu as pltpu


# ---------------------------------------------------------------- utilities --
def _round_up(x, m):
    return ((x + m - 1) // m) * m


# ------------------------------------------------------------ Pallas kernel --
def _matmul_bias_act_kernel(a_ref, w_ref, b_ref, o_ref, *, relu):
    acc = jnp.dot(a_ref[...], w_ref[...], preferred_element_type=jnp.float32)
    acc = acc + b_ref[...]
    if relu:
        acc = jnp.maximum(acc, 0.0)
    o_ref[...] = acc.astype(o_ref.dtype)


def matmul_bias_act(a, w, b, *, relu, out_dtype):
    """a: (M, K) bf16, w: (K, N) bf16, b: (1, N) f32 -> (M, N) out_dtype.

    K and N are pre-padded to multiples of 128 (one-time, in prepare_params);
    M is always a multiple of 8 here and is never padded.  Everything fits in
    VMEM, so the grid has 1 step (2 for the two large-M decoder layers so a
    v7x megacore can split the M axis across its TensorCores).
    """
    M, K = a.shape
    _, N = w.shape
    n_blocks = 2 if M >= 2048 else 1
    tm = M // n_blocks

    return pl.pallas_call(
        functools.partial(_matmul_bias_act_kernel, relu=relu),
        out_shape=jax.ShapeDtypeStruct((M, N), out_dtype),
        grid_spec=pltpu.PrefetchScalarGridSpec(
            num_scalar_prefetch=0,
            grid=(n_blocks,),
            in_specs=[
                pl.BlockSpec((tm, K), lambda i: (i, 0)),
                pl.BlockSpec((K, N), lambda i: (0, 0)),   # resident weight
                pl.BlockSpec((1, N), lambda i: (0, 0)),   # resident bias
            ],
            out_specs=pl.BlockSpec((tm, N), lambda i: (i, 0)),
        ),
        compiler_params=pltpu.CompilerParams(
            dimension_semantics=("parallel",),
            vmem_limit_bytes=32 * 1024 * 1024,  # safe on v5e/v6e/v7x
        ),
    )(a, w, b)


# ------------------------------------------------------------- layer glue ----
def _patches_3x3(x, stride):
    """x: (N, H, W, C) NHWC -> (N*Ho*Wo, 9*C) patches of the zero-padded input."""
    N, H, W, C = x.shape
    Ho = (H - 1) // stride + 1
    Wo = (W - 1) // stride + 1
    xp = jnp.pad(x, ((0, 0), (1, 1), (1, 1), (0, 0)))
    taps = []
    for di in range(3):
        for dj in range(3):
            taps.append(
                xp[:, di:di + stride * (Ho - 1) + 1:stride,
                       dj:dj + stride * (Wo - 1) + 1:stride, :])
    patches = jnp.concatenate(taps, axis=-1).reshape(N * Ho * Wo, 9 * C)
    return patches, Ho, Wo


def _conv_core(x, w_mat, b_mat, nout_mat, stride, relu, out_dtype):
    N = x.shape[0]
    patches, Ho, Wo = _patches_3x3(x, stride)
    Kp = w_mat.shape[0]
    if patches.shape[1] != Kp:                     # pad K to the prepped 128-multiple
        patches = jnp.pad(patches, ((0, 0), (0, Kp - patches.shape[1])))
    out = matmul_bias_act(patches, w_mat, b_mat, relu=relu, out_dtype=out_dtype)
    return out.reshape(N, Ho, Wo, -1)[..., :nout_mat]


def conv2d_3x3(x, layer, cout, *, stride, relu, out_dtype):
    """PyTorch-semantics Conv2d(k=3, stride, padding=1) on NHWC input."""
    return _conv_core(x, layer["w"], layer["b"], cout, stride, relu, out_dtype)


def deconv4x4_s2(x, layer, cout, *, relu, out_dtype):
    """PyTorch-semantics ConvTranspose2d(k=4, stride=2, padding=1) on NHWC input."""
    N, H, W, _ = x.shape
    y = _conv_core(x, layer["w"], layer["b"], 4 * cout, 1, relu, out_dtype)
    # pixel-shuffle: (N, H, W, r, c, cout) -> (N, 2H, 2W, cout)
    y = y.reshape(N, H, W, 2, 2, cout).transpose(0, 1, 3, 2, 4, 5)
    return y.reshape(N, 2 * H, 2 * W, cout)


# ----------------------------------------------------- one-time weight prep --
def _prep_conv(w, b):
    """Conv2d weight (Co, Ci, 3, 3) -> (Kp, Np) bf16 matrix, K order (kh, kw, ci)."""
    Co, Ci, kh, kw = w.shape
    K = kh * kw * Ci
    Kp, Np = _round_up(K, 128), _round_up(Co, 128)
    wf = jnp.transpose(w, (2, 3, 1, 0)).reshape(K, Co)
    wf = jnp.pad(wf, ((0, Kp - K), (0, Np - Co))).astype(jnp.bfloat16)
    bf = jnp.pad(b, (0, Np - Co)).astype(jnp.float32).reshape(1, Np)
    return {"w": wf, "b": bf}


def _prep_deconv(w, b):
    """ConvTranspose2d weight (Ci, Co, 4, 4) -> sub-pixel (Kp, Np) bf16 matrix.

    Rows are ordered (di, dj, ci) over the 3x3 neighbourhood of the padded
    coarse input; columns are ordered (r, c, co) over the 4 output phases.
    """
    Ci, Co = w.shape[0], w.shape[1]
    zero = jnp.zeros((Ci, Co), w.dtype)
    rows = []
    for di in range(3):
        for dj in range(3):
            cols = []
            for r in range(2):
                for c in range(2):
                    if (di - r) in (0, 1) and (dj - c) in (0, 1):
                        cols.append(w[:, :, 3 + r - 2 * di, 3 + c - 2 * dj])
                    else:
                        cols.append(zero)
            rows.append(jnp.concatenate(cols, axis=1))       # (Ci, 4*Co)
    wf = jnp.concatenate(rows, axis=0)                        # (9*Ci, 4*Co)
    K, Nf = 9 * Ci, 4 * Co
    Kp, Np = _round_up(K, 128), _round_up(Nf, 128)
    wf = jnp.pad(wf, ((0, Kp - K), (0, Np - Nf))).astype(jnp.bfloat16)
    b4 = jnp.tile(b, 4)                                       # same bias per phase
    bf = jnp.pad(b4, (0, Np - Nf)).astype(jnp.float32).reshape(1, Np)
    return {"w": wf, "b": bf}


def prepare_params(params):
    prep = {}
    for name in ("e1", "e2", "e3"):
        prep[name] = _prep_conv(params[name + "_w"], params[name + "_b"])
    for name in ("d1", "d2", "d3", "d4", "d5"):
        prep[name] = _prep_deconv(params[name + "_w"], params[name + "_b"])
    return prep


# ------------------------------------------------------------------- model ---
def init_params(key):
    def winit(k, shape):
        fan_in = shape[1] * shape[2] * shape[3]
        return jax.random.normal(k, shape, jnp.float32) / jnp.sqrt(fan_in)

    keys = jax.random.split(key, 16)
    p = {}
    # encoder: Conv2d(1,32,3,p=1) -> Conv2d(32,64,3,s=2,p=1) -> Conv2d(64,128,3,s=2,p=1)
    p["e1_w"] = winit(keys[0], (32, 1, 3, 3));    p["e1_b"] = jnp.zeros((32,), jnp.float32)
    p["e2_w"] = winit(keys[1], (64, 32, 3, 3));   p["e2_b"] = jnp.zeros((64,), jnp.float32)
    p["e3_w"] = winit(keys[2], (128, 64, 3, 3));  p["e3_b"] = jnp.zeros((128,), jnp.float32)
    # decoder ConvTranspose2d weights are (C_in, C_out, 4, 4) in PyTorch layout
    p["d1_w"] = winit(keys[3], (128, 64, 4, 4));  p["d1_b"] = jnp.zeros((64,), jnp.float32)
    p["d2_w"] = winit(keys[4], (64, 32, 4, 4));   p["d2_b"] = jnp.zeros((32,), jnp.float32)
    p["d3_w"] = winit(keys[5], (32, 16, 4, 4));   p["d3_b"] = jnp.zeros((16,), jnp.float32)
    p["d4_w"] = winit(keys[6], (16, 8, 4, 4));    p["d4_b"] = jnp.zeros((8,), jnp.float32)
    p["d5_w"] = winit(keys[7], (8, 1, 4, 4));     p["d5_b"] = jnp.zeros((1,), jnp.float32)
    return p


@jax.jit
def eitnet_forward(prep, x):
    # NCHW -> NHWC once; bf16 activations internally (f32 accumulation on MXU).
    x = jnp.transpose(x, (0, 2, 3, 1)).astype(jnp.bfloat16)
    # encoder
    x = conv2d_3x3(x, prep["e1"], 32, stride=1, relu=True, out_dtype=jnp.bfloat16)
    x = conv2d_3x3(x, prep["e2"], 64, stride=2, relu=True, out_dtype=jnp.bfloat16)
    x = conv2d_3x3(x, prep["e3"], 128, stride=2, relu=True, out_dtype=jnp.bfloat16)
    # decoder (sub-pixel transposed convs)
    x = deconv4x4_s2(x, prep["d1"], 64, relu=True, out_dtype=jnp.bfloat16)
    x = deconv4x4_s2(x, prep["d2"], 32, relu=True, out_dtype=jnp.bfloat16)
    x = deconv4x4_s2(x, prep["d3"], 16, relu=True, out_dtype=jnp.bfloat16)
    x = deconv4x4_s2(x, prep["d4"], 8, relu=True, out_dtype=jnp.bfloat16)
    x = deconv4x4_s2(x, prep["d5"], 1, relu=False, out_dtype=jnp.float32)
    # NHWC -> NCHW once
    return jnp.transpose(x, (0, 3, 1, 2))


if __name__ == "__main__":
    key = jax.random.PRNGKey(0)
    pkey, xkey = jax.random.split(key)
    params = init_params(pkey)
    prep = prepare_params(params)   # one-time weight prep (sub-pixel, bf16, padded)
    x = jax.random.normal(xkey, (2, 1, 16, 16), jnp.float32)  # NCHW

    out = eitnet_forward(prep, x)
    out = jax.block_until_ready(out)

    assert out.shape == (2, 1, 128, 128), out.shape
    assert out.dtype == jnp.float32
    assert bool(jnp.all(jnp.isfinite(out)))
    print("KERNEL_OK")
</pallas_src>

<mosaic_0001>
module attributes {stable_mosaic.version = 11 : i64} {
  func.func @_matmul_bias_act_kernel(%arg0: i32, %arg1: memref<512x128xbf16, #tpu.memory_space<vmem>>, %arg2: memref<128x128xbf16, #tpu.memory_space<vmem>>, %arg3: memref<1x128xf32, #tpu.memory_space<vmem>>, %arg4: memref<512x128xbf16, #tpu.memory_space<vmem>>) attributes {dimension_semantics = [#tpu.dimension_semantics<parallel>], iteration_bounds = array<i64: 1>, scalar_prefetch = 0 : i64, scratch_operands = 0 : i64, tpu.core_type = #tpu.core_type<tc>, window_params = [{transform_indices = @transform_0, window_bounds = array<i64: 512, 128>}, {pipeline_mode = #tpu.pipeline_mode<synchronous>, transform_indices = @transform_1, window_bounds = array<i64: 128, 128>}, {pipeline_mode = #tpu.pipeline_mode<synchronous>, transform_indices = @transform_2, window_bounds = array<i64: 1, 128>}, {transform_indices = @transform_3, window_bounds = array<i64: 512, 128>}]} {
    %c0 = arith.constant 0 : index
    %c0_0 = arith.constant 0 : index
    %0 = vector.load %arg1[%c0, %c0_0] : memref<512x128xbf16, #tpu.memory_space<vmem>>, vector<512x128xbf16>
    %c0_1 = arith.constant 0 : index
    %c0_2 = arith.constant 0 : index
    %1 = vector.load %arg2[%c0_1, %c0_2] : memref<128x128xbf16, #tpu.memory_space<vmem>>, vector<128x128xbf16>
    %cst = arith.constant dense<0.000000e+00> : vector<512x128xf32>
    %2 = tpu.matmul %0, %1, %cst {dimension_numbers = #tpu.dot_dimension_numbers<[1], [0], [0], [1], [0, 0, 1, 1], [], []>} : vector<512x128xbf16>, vector<128x128xbf16>, vector<512x128xf32> -> vector<512x128xf32>
    %c0_3 = arith.constant 0 : index
    %c0_4 = arith.constant 0 : index
    %3 = vector.load %arg3[%c0_3, %c0_4] : memref<1x128xf32, #tpu.memory_space<vmem>>, vector<1x128xf32>
    %4 = vector.broadcast %3 : vector<1x128xf32> to vector<512x128xf32>
    %5 = arith.addf %2, %4 : vector<512x128xf32>
    %cst_5 = arith.constant 0.000000e+00 : f32
    %6 = vector.broadcast %cst_5 : f32 to vector<512x128xf32>
    %7 = arith.maximumf %5, %6 : vector<512x128xf32>
    %8 = arith.truncf %7 : vector<512x128xf32> to vector<512x128xbf16>
    %c0_6 = arith.constant 0 : index
    %c0_7 = arith.constant 0 : index
    %9 = vector.load %arg4[%c0_6, %c0_7] : memref<512x128xbf16, #tpu.memory_space<vmem>>, vector<512x128xbf16>
    tpu.vector_store %arg4[%c0_6, %c0_7], %8 {strides = array<i32>} : memref<512x128xbf16, #tpu.memory_space<vmem>>, vector<512x128xbf16>,
    return
  }
  func.func @transform_0(%arg0: i32) -> (i32, i32) {
    %c0_i32 = arith.constant 0 : i32
    %c0_i32_0 = arith.constant 0 : i32
    return %arg0, %c0_i32 : i32, i32
  }
  func.func @transform_1(%arg0: i32) -> (i32, i32) {
    %c0_i32 = arith.constant 0 : i32
    %c0_i32_0 = arith.constant 0 : i32
    %c0_i32_1 = arith.constant 0 : i32
    return %c0_i32, %c0_i32_0 : i32, i32
  }
  func.func @transform_2(%arg0: i32) -> (i32, i32) {
    %c0_i32 = arith.constant 0 : i32
    %c0_i32_0 = arith.constant 0 : i32
    %c0_i32_1 = arith.constant 0 : i32
    return %c0_i32, %c0_i32_0 : i32, i32
  }
  func.func @transform_3(%arg0: i32) -> (i32, i32) {
    %c0_i32 = arith.constant 0 : i32
    %c0_i32_0 = arith.constant 0 : i32
    return %arg0, %c0_i32 : i32, i32
  }
}

module attributes {stable_mosaic.version = 11 : i64} {
  func.func @_matmul_bias_act_kernel(%arg0: i32, %arg1: memref<128x384xbf16, #tpu.memory_space<vmem>>, %arg2: memref<384x128xbf16, #tpu.memory_space<vmem>>, %arg3: memref<1x128xf32, #tpu.memory_space<vmem>>, %arg4: memref<128x128xbf16, #tpu.memory_space<vmem>>) attributes {dimension_semantics = [#tpu.dimension_semantics<parallel>], iteration_bounds = array<i64: 1>, scalar_prefetch = 0 : i64, scratch_operands = 0 : i64, tpu.core_type = #tpu.core_type<tc>, window_params = [{transform_indices = @transform_0, window_bounds = array<i64: 128, 384>}, {pipeline_mode = #tpu.pipeline_mode<synchronous>, transform_indices = @transform_1, window_bounds = array<i64: 384, 128>}, {pipeline_mode = #tpu.pipeline_mode<synchronous>, transform_indices = @transform_2, window_bounds = array<i64: 1, 128>}, {transform_indices = @transform_3, window_bounds = array<i64: 128, 128>}]} {
    %c0 = arith.constant 0 : index
    %c0_0 = arith.constant 0 : index
    %0 = vector.load %arg1[%c0, %c0_0] : memref<128x384xbf16, #tpu.memory_space<vmem>>, vector<128x384xbf16>
    %c0_1 = arith.constant 0 : index
    %c0_2 = arith.constant 0 : index
    %1 = vector.load %arg2[%c0_1, %c0_2] : memref<384x128xbf16, #tpu.memory_space<vmem>>, vector<384x128xbf16>
    %cst = arith.constant dense<0.000000e+00> : vector<128x128xf32>
    %2 = tpu.matmul %0, %1, %cst {dimension_numbers = #tpu.dot_dimension_numbers<[1], [0], [0], [1], [0, 0, 1, 1], [], []>} : vector<128x384xbf16>, vector<384x128xbf16>, vector<128x128xf32> -> vector<128x128xf32>
    %c0_3 = arith.constant 0 : index
    %c0_4 = arith.constant 0 : index
    %3 = vector.load %arg3[%c0_3, %c0_4] : memref<1x128xf32, #tpu.memory_space<vmem>>, vector<1x128xf32>
    %4 = vector.broadcast %3 : vector<1x128xf32> to vector<128x128xf32>
    %5 = arith.addf %2, %4 : vector<128x128xf32>
    %cst_5 = arith.constant 0.000000e+00 : f32
    %6 = vector.broadcast %cst_5 : f32 to vector<128x128xf32>
    %7 = arith.maximumf %5, %6 : vector<128x128xf32>
    %8 = arith.truncf %7 : vector<128x128xf32> to vector<128x128xbf16>
    %c0_6 = arith.constant 0 : index
    %c0_7 = arith.constant 0 : index
    %9 = vector.load %arg4[%c0_6, %c0_7] : memref<128x128xbf16, #tpu.memory_space<vmem>>, vector<128x128xbf16>
    tpu.vector_store %arg4[%c0_6, %c0_7], %8 {strides = array<i32>} : memref<128x128xbf16, #tpu.memory_space<vmem>>, vector<128x128xbf16>,
    return
  }
  func.func @transform_0(%arg0: i32) -> (i32, i32) {
    %c0_i32 = arith.constant 0 : i32
    %c0_i32_0 = arith.constant 0 : i32
    return %arg0, %c0_i32 : i32, i32
  }
  func.func @transform_1(%arg0: i32) -> (i32, i32) {
    %c0_i32 = arith.constant 0 : i32
    %c0_i32_0 = arith.constant 0 : i32
    %c0_i32_1 = arith.constant 0 : i32
    return %c0_i32, %c0_i32_0 : i32, i32
  }
  func.func @transform_2(%arg0: i32) -> (i32, i32) {
    %c0_i32 = arith.constant 0 : i32
    %c0_i32_0 = arith.constant 0 : i32
    %c0_i32_1 = arith.constant 0 : i32
    return %c0_i32, %c0_i32_0 : i32, i32
  }
  func.func @transform_3(%arg0: i32) -> (i32, i32) {
    %c0_i32 = arith.constant 0 : i32
    %c0_i32_0 = arith.constant 0 : i32
    return %arg0, %c0_i32 : i32, i32
  }
}

module attributes {stable_mosaic.version = 11 : i64} {
  func.func @_matmul_bias_act_kernel(%arg0: i32, %arg1: memref<32x640xbf16, #tpu.memory_space<vmem>>, %arg2: memref<640x128xbf16, #tpu.memory_space<vmem>>, %arg3: memref<1x128xf32, #tpu.memory_space<vmem>>, %arg4: memref<32x128xbf16, #tpu.memory_space<vmem>>) attributes {dimension_semantics = [#tpu.dimension_semantics<parallel>], iteration_bounds = array<i64: 1>, scalar_prefetch = 0 : i64, scratch_operands = 0 : i64, tpu.core_type = #tpu.core_type<tc>, window_params = [{transform_indices = @transform_0, window_bounds = array<i64: 32, 640>}, {pipeline_mode = #tpu.pipeline_mode<synchronous>, transform_indices = @transform_1, window_bounds = array<i64: 640, 128>}, {pipeline_mode = #tpu.pipeline_mode<synchronous>, transform_indices = @transform_2, window_bounds = array<i64: 1, 128>}, {transform_indices = @transform_3, window_bounds = array<i64: 32, 128>}]} {
    %c0 = arith.constant 0 : index
    %c0_0 = arith.constant 0 : index
    %0 = vector.load %arg1[%c0, %c0_0] : memref<32x640xbf16, #tpu.memory_space<vmem>>, vector<32x640xbf16>
    %c0_1 = arith.constant 0 : index
    %c0_2 = arith.constant 0 : index
    %1 = vector.load %arg2[%c0_1, %c0_2] : memref<640x128xbf16, #tpu.memory_space<vmem>>, vector<640x128xbf16>
    %cst = arith.constant dense<0.000000e+00> : vector<32x128xf32>
    %2 = tpu.matmul %0, %1, %cst {dimension_numbers = #tpu.dot_dimension_numbers<[1], [0], [0], [1], [0, 0, 1, 1], [], []>} : vector<32x640xbf16>, vector<640x128xbf16>, vector<32x128xf32> -> vector<32x128xf32>
    %c0_3 = arith.constant 0 : index
    %c0_4 = arith.constant 0 : index
    %3 = vector.load %arg3[%c0_3, %c0_4] : memref<1x128xf32, #tpu.memory_space<vmem>>, vector<1x128xf32>
    %4 = vector.broadcast %3 : vector<1x128xf32> to vector<32x128xf32>
    %5 = arith.addf %2, %4 : vector<32x128xf32>
    %cst_5 = arith.constant 0.000000e+00 : f32
    %6 = vector.broadcast %cst_5 : f32 to vector<32x128xf32>
    %7 = arith.maximumf %5, %6 : vector<32x128xf32>
    %8 = arith.truncf %7 : vector<32x128xf32> to vector<32x128xbf16>
    %c0_6 = arith.constant 0 : index
    %c0_7 = arith.constant 0 : index
    %9 = vector.load %arg4[%c0_6, %c0_7] : memref<32x128xbf16, #tpu.memory_space<vmem>>, vector<32x128xbf16>
    tpu.vector_store %arg4[%c0_6, %c0_7], %8 {strides = array<i32>} : memref<32x128xbf16, #tpu.memory_space<vmem>>, vector<32x128xbf16>,
    return
  }
  func.func @transform_0(%arg0: i32) -> (i32, i32) {
    %c0_i32 = arith.constant 0 : i32
    %c0_i32_0 = arith.constant 0 : i32
    return %arg0, %c0_i32 : i32, i32
  }
  func.func @transform_1(%arg0: i32) -> (i32, i32) {
    %c0_i32 = arith.constant 0 : i32
    %c0_i32_0 = arith.constant 0 : i32
    %c0_i32_1 = arith.constant 0 : i32
    return %c0_i32, %c0_i32_0 : i32, i32
  }
  func.func @transform_2(%arg0: i32) -> (i32, i32) {
    %c0_i32 = arith.constant 0 : i32
    %c0_i32_0 = arith.constant 0 : i32
    %c0_i32_1 = arith.constant 0 : i32
    return %c0_i32, %c0_i32_0 : i32, i32
  }
  func.func @transform_3(%arg0: i32) -> (i32, i32) {
    %c0_i32 = arith.constant 0 : i32
    %c0_i32_0 = arith.constant 0 : i32
    return %arg0, %c0_i32 : i32, i32
  }
}

module attributes {stable_mosaic.version = 11 : i64} {
  func.func @_matmul_bias_act_kernel(%arg0: i32, %arg1: memref<32x1152xbf16, #tpu.memory_space<vmem>>, %arg2: memref<1152x256xbf16, #tpu.memory_space<vmem>>, %arg3: memref<1x256xf32, #tpu.memory_space<vmem>>, %arg4: memref<32x256xbf16, #tpu.memory_space<vmem>>) attributes {dimension_semantics = [#tpu.dimension_semantics<parallel>], iteration_bounds = array<i64: 1>, scalar_prefetch = 0 : i64, scratch_operands = 0 : i64, tpu.core_type = #tpu.core_type<tc>, window_params = [{transform_indices = @transform_0, window_bounds = array<i64: 32, 1152>}, {pipeline_mode = #tpu.pipeline_mode<synchronous>, transform_indices = @transform_1, window_bounds = array<i64: 1152, 256>}, {pipeline_mode = #tpu.pipeline_mode<synchronous>, transform_indices = @transform_2, window_bounds = array<i64: 1, 256>}, {transform_indices = @transform_3, window_bounds = array<i64: 32, 256>}]} {
    %c0 = arith.constant 0 : index
    %c0_0 = arith.constant 0 : index
    %0 = vector.load %arg1[%c0, %c0_0] : memref<32x1152xbf16, #tpu.memory_space<vmem>>, vector<32x1152xbf16>
    %c0_1 = arith.constant 0 : index
    %c0_2 = arith.constant 0 : index
    %1 = vector.load %arg2[%c0_1, %c0_2] : memref<1152x256xbf16, #tpu.memory_space<vmem>>, vector<1152x256xbf16>
    %cst = arith.constant dense<0.000000e+00> : vector<32x256xf32>
    %2 = tpu.matmul %0, %1, %cst {dimension_numbers = #tpu.dot_dimension_numbers<[1], [0], [0], [1], [0, 0, 1, 1], [], []>} : vector<32x1152xbf16>, vector<1152x256xbf16>, vector<32x256xf32> -> vector<32x256xf32>
    %c0_3 = arith.constant 0 : index
    %c0_4 = arith.constant 0 : index
    %3 = vector.load %arg3[%c0_3, %c0_4] : memref<1x256xf32, #tpu.memory_space<vmem>>, vector<1x256xf32>
    %4 = vector.broadcast %3 : vector<1x256xf32> to vector<32x256xf32>
    %5 = arith.addf %2, %4 : vector<32x256xf32>
    %cst_5 = arith.constant 0.000000e+00 : f32
    %6 = vector.broadcast %cst_5 : f32 to vector<32x256xf32>
    %7 = arith.maximumf %5, %6 : vector<32x256xf32>
    %8 = arith.truncf %7 : vector<32x256xf32> to vector<32x256xbf16>
    %c0_6 = arith.constant 0 : index
    %c0_7 = arith.constant 0 : index
    %9 = vector.load %arg4[%c0_6, %c0_7] : memref<32x256xbf16, #tpu.memory_space<vmem>>, vector<32x256xbf16>
    tpu.vector_store %arg4[%c0_6, %c0_7], %8 {strides = array<i32>} : memref<32x256xbf16, #tpu.memory_space<vmem>>, vector<32x256xbf16>,
    return
  }
  func.func @transform_0(%arg0: i32) -> (i32, i32) {
    %c0_i32 = arith.constant 0 : i32
    %c0_i32_0 = arith.constant 0 : i32
    return %arg0, %c0_i32 : i32, i32
  }
  func.func @transform_1(%arg0: i32) -> (i32, i32) {
    %c0_i32 = arith.constant 0 : i32
    %c0_i32_0 = arith.constant 0 : i32
    %c0_i32_1 = arith.constant 0 : i32
    return %c0_i32, %c0_i32_0 : i32, i32
  }
  func.func @transform_2(%arg0: i32) -> (i32, i32) {
    %c0_i32 = arith.constant 0 : i32
    %c0_i32_0 = arith.constant 0 : i32
    %c0_i32_1 = arith.constant 0 : i32
    return %c0_i32, %c0_i32_0 : i32, i32
  }
  func.func @transform_3(%arg0: i32) -> (i32, i32) {
    %c0_i32 = arith.constant 0 : i32
    %c0_i32_0 = arith.constant 0 : i32
    return %arg0, %c0_i32 : i32, i32
  }
}

module attributes {stable_mosaic.version = 11 : i64} {
  func.func @_matmul_bias_act_kernel(%arg0: i32, %arg1: memref<128x640xbf16, #tpu.memory_space<vmem>>, %arg2: memref<640x128xbf16, #tpu.memory_space<vmem>>, %arg3: memref<1x128xf32, #tpu.memory_space<vmem>>, %arg4: memref<128x128xbf16, #tpu.memory_space<vmem>>) attributes {dimension_semantics = [#tpu.dimension_semantics<parallel>], iteration_bounds = array<i64: 1>, scalar_prefetch = 0 : i64, scratch_operands = 0 : i64, tpu.core_type = #tpu.core_type<tc>, window_params = [{transform_indices = @transform_0, window_bounds = array<i64: 128, 640>}, {pipeline_mode = #tpu.pipeline_mode<synchronous>, transform_indices = @transform_1, window_bounds = array<i64: 640, 128>}, {pipeline_mode = #tpu.pipeline_mode<synchronous>, transform_indices = @transform_2, window_bounds = array<i64: 1, 128>}, {transform_indices = @transform_3, window_bounds = array<i64: 128, 128>}]} {
    %c0 = arith.constant 0 : index
    %c0_0 = arith.constant 0 : index
    %0 = vector.load %arg1[%c0, %c0_0] : memref<128x640xbf16, #tpu.memory_space<vmem>>, vector<128x640xbf16>
    %c0_1 = arith.constant 0 : index
    %c0_2 = arith.constant 0 : index
    %1 = vector.load %arg2[%c0_1, %c0_2] : memref<640x128xbf16, #tpu.memory_space<vmem>>, vector<640x128xbf16>
    %cst = arith.constant dense<0.000000e+00> : vector<128x128xf32>
    %2 = tpu.matmul %0, %1, %cst {dimension_numbers = #tpu.dot_dimension_numbers<[1], [0], [0], [1], [0, 0, 1, 1], [], []>} : vector<128x640xbf16>, vector<640x128xbf16>, vector<128x128xf32> -> vector<128x128xf32>
    %c0_3 = arith.constant 0 : index
    %c0_4 = arith.constant 0 : index
    %3 = vector.load %arg3[%c0_3, %c0_4] : memref<1x128xf32, #tpu.memory_space<vmem>>, vector<1x128xf32>
    %4 = vector.broadcast %3 : vector<1x128xf32> to vector<128x128xf32>
    %5 = arith.addf %2, %4 : vector<128x128xf32>
    %cst_5 = arith.constant 0.000000e+00 : f32
    %6 = vector.broadcast %cst_5 : f32 to vector<128x128xf32>
    %7 = arith.maximumf %5, %6 : vector<128x128xf32>
    %8 = arith.truncf %7 : vector<128x128xf32> to vector<128x128xbf16>
    %c0_6 = arith.constant 0 : index
    %c0_7 = arith.constant 0 : index
    %9 = vector.load %arg4[%c0_6, %c0_7] : memref<128x128xbf16, #tpu.memory_space<vmem>>, vector<128x128xbf16>
    tpu.vector_store %arg4[%c0_6, %c0_7], %8 {strides = array<i32>} : memref<128x128xbf16, #tpu.memory_space<vmem>>, vector<128x128xbf16>,
    return
  }
  func.func @transform_0(%arg0: i32) -> (i32, i32) {
    %c0_i32 = arith.constant 0 : i32
    %c0_i32_0 = arith.constant 0 : i32
    return %arg0, %c0_i32 : i32, i32
  }
  func.func @transform_1(%arg0: i32) -> (i32, i32) {
    %c0_i32 = arith.constant 0 : i32
    %c0_i32_0 = arith.constant 0 : i32
    %c0_i32_1 = arith.constant 0 : i32
    return %c0_i32, %c0_i32_0 : i32, i32
  }
  func.func @transform_2(%arg0: i32) -> (i32, i32) {
    %c0_i32 = arith.constant 0 : i32
    %c0_i32_0 = arith.constant 0 : i32
    %c0_i32_1 = arith.constant 0 : i32
    return %c0_i32, %c0_i32_0 : i32, i32
  }
  func.func @transform_3(%arg0: i32) -> (i32, i32) {
    %c0_i32 = arith.constant 0 : i32
    %c0_i32_0 = arith.constant 0 : i32
    return %arg0, %c0_i32 : i32, i32
  }
}

module attributes {stable_mosaic.version = 11 : i64} {
  func.func @_matmul_bias_act_kernel(%arg0: i32, %arg1: memref<512x384xbf16, #tpu.memory_space<vmem>>, %arg2: memref<384x128xbf16, #tpu.memory_space<vmem>>, %arg3: memref<1x128xf32, #tpu.memory_space<vmem>>, %arg4: memref<512x128xbf16, #tpu.memory_space<vmem>>) attributes {dimension_semantics = [#tpu.dimension_semantics<parallel>], iteration_bounds = array<i64: 1>, scalar_prefetch = 0 : i64, scratch_operands = 0 : i64, tpu.core_type = #tpu.core_type<tc>, window_params = [{transform_indices = @transform_0, window_bounds = array<i64: 512, 384>}, {pipeline_mode = #tpu.pipeline_mode<synchronous>, transform_indices = @transform_1, window_bounds = array<i64: 384, 128>}, {pipeline_mode = #tpu.pipeline_mode<synchronous>, transform_indices = @transform_2, window_bounds = array<i64: 1, 128>}, {transform_indices = @transform_3, window_bounds = array<i64: 512, 128>}]} {
    %c0 = arith.constant 0 : index
    %c0_0 = arith.constant 0 : index
    %0 = vector.load %arg1[%c0, %c0_0] : memref<512x384xbf16, #tpu.memory_space<vmem>>, vector<512x384xbf16>
    %c0_1 = arith.constant 0 : index
    %c0_2 = arith.constant 0 : index
    %1 = vector.load %arg2[%c0_1, %c0_2] : memref<384x128xbf16, #tpu.memory_space<vmem>>, vector<384x128xbf16>
    %cst = arith.constant dense<0.000000e+00> : vector<512x128xf32>
    %2 = tpu.matmul %0, %1, %cst {dimension_numbers = #tpu.dot_dimension_numbers<[1], [0], [0], [1], [0, 0, 1, 1], [], []>} : vector<512x384xbf16>, vector<384x128xbf16>, vector<512x128xf32> -> vector<512x128xf32>
    %c0_3 = arith.constant 0 : index
    %c0_4 = arith.constant 0 : index
    %3 = vector.load %arg3[%c0_3, %c0_4] : memref<1x128xf32, #tpu.memory_space<vmem>>, vector<1x128xf32>
    %4 = vector.broadcast %3 : vector<1x128xf32> to vector<512x128xf32>
    %5 = arith.addf %2, %4 : vector<512x128xf32>
    %cst_5 = arith.constant 0.000000e+00 : f32
    %6 = vector.broadcast %cst_5 : f32 to vector<512x128xf32>
    %7 = arith.maximumf %5, %6 : vector<512x128xf32>
    %8 = arith.truncf %7 : vector<512x128xf32> to vector<512x128xbf16>
    %c0_6 = arith.constant 0 : index
    %c0_7 = arith.constant 0 : index
    %9 = vector.load %arg4[%c0_6, %c0_7] : memref<512x128xbf16, #tpu.memory_space<vmem>>, vector<512x128xbf16>
    tpu.vector_store %arg4[%c0_6, %c0_7], %8 {strides = array<i32>} : memref<512x128xbf16, #tpu.memory_space<vmem>>, vector<512x128xbf16>,
    return
  }
  func.func @transform_0(%arg0: i32) -> (i32, i32) {
    %c0_i32 = arith.constant 0 : i32
    %c0_i32_0 = arith.constant 0 : i32
    return %arg0, %c0_i32 : i32, i32
  }
  func.func @transform_1(%arg0: i32) -> (i32, i32) {
    %c0_i32 = arith.constant 0 : i32
    %c0_i32_0 = arith.constant 0 : i32
    %c0_i32_1 = arith.constant 0 : i32
    return %c0_i32, %c0_i32_0 : i32, i32
  }
  func.func @transform_2(%arg0: i32) -> (i32, i32) {
    %c0_i32 = arith.constant 0 : i32
    %c0_i32_0 = arith.constant 0 : i32
    %c0_i32_1 = arith.constant 0 : i32
    return %c0_i32, %c0_i32_0 : i32, i32
  }
  func.func @transform_3(%arg0: i32) -> (i32, i32) {
    %c0_i32 = arith.constant 0 : i32
    %c0_i32_0 = arith.constant 0 : i32
    return %arg0, %c0_i32 : i32, i32
  }
}

module attributes {stable_mosaic.version = 11 : i64} {
  func.func @_matmul_bias_act_kernel(%arg0: i32, %arg1: memref<1024x256xbf16, #tpu.memory_space<vmem>>, %arg2: memref<256x128xbf16, #tpu.memory_space<vmem>>, %arg3: memref<1x128xf32, #tpu.memory_space<vmem>>, %arg4: memref<1024x128xbf16, #tpu.memory_space<vmem>>) attributes {dimension_semantics = [#tpu.dimension_semantics<parallel>], iteration_bounds = array<i64: 2>, scalar_prefetch = 0 : i64, scratch_operands = 0 : i64, tpu.core_type = #tpu.core_type<tc>, window_params = [{transform_indices = @transform_0, window_bounds = array<i64: 1024, 256>}, {pipeline_mode = #tpu.pipeline_mode<synchronous>, transform_indices = @transform_1, window_bounds = array<i64: 256, 128>}, {pipeline_mode = #tpu.pipeline_mode<synchronous>, transform_indices = @transform_2, window_bounds = array<i64: 1, 128>}, {transform_indices = @transform_3, window_bounds = array<i64: 1024, 128>}]} {
    %c0 = arith.constant 0 : index
    %c0_0 = arith.constant 0 : index
    %0 = vector.load %arg1[%c0, %c0_0] : memref<1024x256xbf16, #tpu.memory_space<vmem>>, vector<1024x256xbf16>
    %c0_1 = arith.constant 0 : index
    %c0_2 = arith.constant 0 : index
    %1 = vector.load %arg2[%c0_1, %c0_2] : memref<256x128xbf16, #tpu.memory_space<vmem>>, vector<256x128xbf16>
    %cst = arith.constant dense<0.000000e+00> : vector<1024x128xf32>
    %2 = tpu.matmul %0, %1, %cst {dimension_numbers = #tpu.dot_dimension_numbers<[1], [0], [0], [1], [0, 0, 1, 1], [], []>} : vector<1024x256xbf16>, vector<256x128xbf16>, vector<1024x128xf32> -> vector<1024x128xf32>
    %c0_3 = arith.constant 0 : index
    %c0_4 = arith.constant 0 : index
    %3 = vector.load %arg3[%c0_3, %c0_4] : memref<1x128xf32, #tpu.memory_space<vmem>>, vector<1x128xf32>
    %4 = vector.broadcast %3 : vector<1x128xf32> to vector<1024x128xf32>
    %5 = arith.addf %2, %4 : vector<1024x128xf32>
    %cst_5 = arith.constant 0.000000e+00 : f32
    %6 = vector.broadcast %cst_5 : f32 to vector<1024x128xf32>
    %7 = arith.maximumf %5, %6 : vector<1024x128xf32>
    %8 = arith.truncf %7 : vector<1024x128xf32> to vector<1024x128xbf16>
    %c0_6 = arith.constant 0 : index
    %c0_7 = arith.constant 0 : index
    %9 = vector.load %arg4[%c0_6, %c0_7] : memref<1024x128xbf16, #tpu.memory_space<vmem>>, vector<1024x128xbf16>
    tpu.vector_store %arg4[%c0_6, %c0_7], %8 {strides = array<i32>} : memref<1024x128xbf16, #tpu.memory_space<vmem>>, vector<1024x128xbf16>,
    return
  }
  func.func @transform_0(%arg0: i32) -> (i32, i32) {
    %c0_i32 = arith.constant 0 : i32
    %c0_i32_0 = arith.constant 0 : i32
    return %arg0, %c0_i32 : i32, i32
  }
  func.func @transform_1(%arg0: i32) -> (i32, i32) {
    %c0_i32 = arith.constant 0 : i32
    %c0_i32_0 = arith.constant 0 : i32
    %c0_i32_1 = arith.constant 0 : i32
    return %c0_i32, %c0_i32_0 : i32, i32
  }
  func.func @transform_2(%arg0: i32) -> (i32, i32) {
    %c0_i32 = arith.constant 0 : i32
    %c0_i32_0 = arith.constant 0 : i32
    %c0_i32_1 = arith.constant 0 : i32
    return %c0_i32, %c0_i32_0 : i32, i32
  }
  func.func @transform_3(%arg0: i32) -> (i32, i32) {
    %c0_i32 = arith.constant 0 : i32
    %c0_i32_0 = arith.constant 0 : i32
    return %arg0, %c0_i32 : i32, i32
  }
}

module attributes {stable_mosaic.version = 11 : i64} {
  func.func @_matmul_bias_act_kernel(%arg0: i32, %arg1: memref<4096x128xbf16, #tpu.memory_space<vmem>>, %arg2: memref<128x128xbf16, #tpu.memory_space<vmem>>, %arg3: memref<1x128xf32, #tpu.memory_space<vmem>>, %arg4: memref<4096x128xf32, #tpu.memory_space<vmem>>) attributes {dimension_semantics = [#tpu.dimension_semantics<parallel>], iteration_bounds = array<i64: 2>, scalar_prefetch = 0 : i64, scratch_operands = 0 : i64, tpu.core_type = #tpu.core_type<tc>, window_params = [{transform_indices = @transform_0, window_bounds = array<i64: 4096, 128>}, {pipeline_mode = #tpu.pipeline_mode<synchronous>, transform_indices = @transform_1, window_bounds = array<i64: 128, 128>}, {pipeline_mode = #tpu.pipeline_mode<synchronous>, transform_indices = @transform_2, window_bounds = array<i64: 1, 128>}, {transform_indices = @transform_3, window_bounds = array<i64: 4096, 128>}]} {
    %c0 = arith.constant 0 : index
    %c0_0 = arith.constant 0 : index
    %0 = vector.load %arg1[%c0, %c0_0] : memref<4096x128xbf16, #tpu.memory_space<vmem>>, vector<4096x128xbf16>
    %c0_1 = arith.constant 0 : index
    %c0_2 = arith.constant 0 : index
    %1 = vector.load %arg2[%c0_1, %c0_2] : memref<128x128xbf16, #tpu.memory_space<vmem>>, vector<128x128xbf16>
    %cst = arith.constant dense<0.000000e+00> : vector<4096x128xf32>
    %2 = tpu.matmul %0, %1, %cst {dimension_numbers = #tpu.dot_dimension_numbers<[1], [0], [0], [1], [0, 0, 1, 1], [], []>} : vector<4096x128xbf16>, vector<128x128xbf16>, vector<4096x128xf32> -> vector<4096x128xf32>
    %c0_3 = arith.constant 0 : index
    %c0_4 = arith.constant 0 : index
    %3 = vector.load %arg3[%c0_3, %c0_4] : memref<1x128xf32, #tpu.memory_space<vmem>>, vector<1x128xf32>
    %4 = vector.broadcast %3 : vector<1x128xf32> to vector<4096x128xf32>
    %5 = arith.addf %2, %4 : vector<4096x128xf32>
    %c0_5 = arith.constant 0 : index
    %c0_6 = arith.constant 0 : index
    %6 = vector.load %arg4[%c0_5, %c0_6] : memref<4096x128xf32, #tpu.memory_space<vmem>>, vector<4096x128xf32>
    tpu.vector_store %arg4[%c0_5, %c0_6], %5 {strides = array<i32>} : memref<4096x128xf32, #tpu.memory_space<vmem>>, vector<4096x128xf32>,
    return
  }
  func.func @transform_0(%arg0: i32) -> (i32, i32) {
    %c0_i32 = arith.constant 0 : i32
    %c0_i32_0 = arith.constant 0 : i32
    return %arg0, %c0_i32 : i32, i32
  }
  func.func @transform_1(%arg0: i32) -> (i32, i32) {
    %c0_i32 = arith.constant 0 : i32
    %c0_i32_0 = arith.constant 0 : i32
    %c0_i32_1 = arith.constant 0 : i32
    return %c0_i32, %c0_i32_0 : i32, i32
  }
  func.func @transform_2(%arg0: i32) -> (i32, i32) {
    %c0_i32 = arith.constant 0 : i32
    %c0_i32_0 = arith.constant 0 : i32
    %c0_i32_1 = arith.constant 0 : i32
    return %c0_i32, %c0_i32_0 : i32, i32
  }
  func.func @transform_3(%arg0: i32) -> (i32, i32) {
    %c0_i32 = arith.constant 0 : i32
    %c0_i32_0 = arith.constant 0 : i32
    return %arg0, %c0_i32 : i32, i32
  }
}

</mosaic_0001>

<bundles_post_ra>
// kernel: eitnet_forward.8
= control target key start
LH: loop header
LB: loop body
LE: loop exit
PB: predicated region body
PF: predicated region fallthrough
CT: control target
= control target key end

     0   :  { %8 = vsyncpa [#allocation3], 0  ;;  %s1941_s0 = inlined_call_operand.vmem [shape: bf16[512,128], index: 0, kind: input, shape index: {}]   ;;  %s1942_s1 = inlined_call_operand.hbm [shape: bf16[128,128], index: 1, kind: input, shape index: {}]   ;;  %s1943_s2 = inlined_call_operand.hbm [shape: f32[1,128], index: 2, kind: input, shape index: {}]   ;;  %s1944_s3 = inlined_call_operand.vmem [shape: bf16[512,128], index: 3, kind: output, shape index: {}]  }
   0x1   :  { %9 = vsyncpa [#allocation5], 0  ;;  %s1635_s12 = smov [#allocation2]   ;;  %s1587_s16 = scalar_lea.hbm %s1942_s1, 1024 }
   0x2   :  { %s17_s13 = sshll.u32 %s1635_s12, 4  ;;  %p1588_p0 = scmp.ne.s32.totalorder %s1942_s1, %s1587_s16  ;;  %s18_s13 = int_to_ptr.vmem [resolvable:$true] %s17_s13 }
   0x3   :  { %p1591_p1 = scmp.lt.u32.totalorder %s1587_s16, %s1942_s1 }
   0x5   :  { %p1593_p2 = pnand %p1591_p1, %p1588_p0 }
   0x7   :  { %1596 = shalt.err (!%p1593_p2)
}
   0x8   :  { %s1597_s21 = scalar_lea.vmem %s18_s13, 1024  ;;  %p1602_p4 = scmp.lt.s32.totalorder %s18_s13, %s18_s13 }
   0x9   :  { %p1598_p3 = scmp.ne.s32.totalorder %s18_s13, %s1597_s21  ;;  %p1603_p5 = scmp.lt.s32.totalorder %s1597_s21, %s1597_s21 }
   0xb   :  { %p1604_p6 = por %p1603_p5, %p1602_p4 }
   0xd   :  { %p1605_p7 = pnand %p1604_p6, %p1598_p3 }
   0xf   :  { %1608 = shalt.err (!%p1605_p7)
}
  0x10   :  { %s1636_s22 = smov 64   ;;  %s1637_s23 = smov 4  }
  0x11   :  { %23 = dma.hbm_to_vmem [thread:$0]  %s1942_s1, 1024, %s18_s13, [#allocation3], %s1636_s22, %s1636_s22, %s1637_s23  }
  0x12   :  { %s1638_s26 = smov [#allocation4]   ;;  %s1609_s30 = scalar_lea.hbm %s1943_s2, 16 }
  0x13   :  { %s30_s27 = sshll.u32 %s1638_s26, 4  ;;  %p1610_p8 = scmp.ne.s32.totalorder %s1943_s2, %s1609_s30  ;;  %s31_s27 = int_to_ptr.vmem [resolvable:$true] %s30_s27 }
  0x14   :  { %p1613_p9 = scmp.lt.u32.totalorder %s1609_s30, %s1943_s2 }
  0x16   :  { %p1615_p10 = pnand %p1613_p9, %p1610_p8 }
  0x18   :  { %1618 = shalt.err (!%p1615_p10)
}
  0x19   :  { %s1619_s8 = scalar_lea.vmem %s31_s27, 16  ;;  %s1623_s1 = scalar_lea.vmem %s31_s27, 32 }
  0x1a   :  { %p1620_p11 = scmp.ne.s32.totalorder %s31_s27, %s1619_s8  ;;  %p1624_p12 = scmp.lt.s32.totalorder %s31_s27, %s31_s27 }
  0x1b   :  { %p1625_p13 = scmp.lt.s32.totalorder %s1623_s1, %s1619_s8 }
  0x1d   :  { %p1626_p0 = por %p1625_p13, %p1624_p12 }
  0x1f   :  { %p1627_p1 = pnand %p1626_p0, %p1620_p11 }
  0x21   :  { %1630 = shalt.err (!%p1627_p1)
}
  0x22   :  { %33 = dma.hbm_to_vmem [thread:$0]  %s1943_s2, 16, %s31_s27, [#allocation5]  }
  0x23   :  { %1631 = dma.done.wait [#allocation3], 1024  }
  0x24   :  { %1632 = vsyncadd [#allocation3], 4294966272 }
  0x25   :  { %1633 = dma.done.wait [#allocation5], 16  }
  0x26   :  { %1634 = vsyncadd [#allocation5], 4294967280  ;;  %v1547_v0 = vld [vmem:[#allocation2] sm:$0xff]   ;;  %v1548_v1 = vld [vmem:[#allocation2 + $0x8] sm:$0xff]  }
  0x27   :  { %1447 = vmatprep.subr.bf16.mxu0 %v1547_v0  ;;  %1527 = vmatprep.subr.bf16.mxu1 %v1547_v0  ;;  %v1549_v2 = vld [vmem:[#allocation2 + $0x10] sm:$0xff]   ;;  %v1550_v3 = vld [vmem:[#allocation2 + $0x18] sm:$0xff]   ;;  %v1555_v4 = vld [vmem:[%s1941_s0] sm:$0xff]  }
  0x28   :  { %1448 = vmatpush3.bf16.msra.mxu0 %v1547_v0  ;;  %1535 = vmatpush3.bf16.msra.mxu1 %v1547_v0  ;;  %v1556_v5 = vld [vmem:[%s1941_s0 + $0x80] sm:$0xff]   ;;  %v1552_v7 = vld [vmem:[#allocation2 + $0x28] sm:$0xff]   ;;  %v1553_v8 = vld [vmem:[#allocation2 + $0x30] sm:$0xff]  }
  0x29   :  { %1449 = vmatprep.subr.bf16.mxu0 %v1548_v1  ;;  %1528 = vmatprep.subr.bf16.mxu1 %v1548_v1  ;;  %v1551_v6 = vld [vmem:[#allocation2 + $0x20] sm:$0xff]   ;;  %v1554_v9 = vld [vmem:[#allocation2 + $0x38] sm:$0xff]   ;;  %v1557_v10 = vld [vmem:[%s1941_s0 + $0x8] sm:$0xff]  }
  0x2a   :  { %1463 = vmatprep.mubr.bf16.mxu0 %v1555_v4  ;;  %1495 = vmatprep.mubr.bf16.mxu1 %v1556_v5  ;;  %v1558_v11 = vld [vmem:[%s1941_s0 + $0x88] sm:$0xff]   ;;  %v1559_v12 = vld [vmem:[%s1941_s0 + $0x10] sm:$0xff]   ;;  %v1561_v14 = vld [vmem:[%s1941_s0 + $0x18] sm:$0xff]  }
  0x2b   :  { %v1560_v13 = vld [vmem:[%s1941_s0 + $0x90] sm:$0xff]   ;;  %v1562_v15 = vld [vmem:[%s1941_s0 + $0x98] sm:$0xff]   ;;  %v1563_v16 = vld [vmem:[%s1941_s0 + $0x20] sm:$0xff]  }
  0x2c   :  { %1450 = vmatpush3.bf16.msra.mxu0 %v1548_v1  ;;  %1536 = vmatpush3.bf16.msra.mxu1 %v1548_v1  ;;  %v1564_v17 = vld [vmem:[%s1941_s0 + $0xa0] sm:$0xff]   ;;  %v1565_v18 = vld [vmem:[%s1941_s0 + $0x28] sm:$0xff]   ;;  %v1567_v20 = vld [vmem:[%s1941_s0 + $0x30] sm:$0xff]  }
  0x2d   :  { %1451 = vmatprep.subr.bf16.mxu0 %v1549_v2  ;;  %1529 = vmatprep.subr.bf16.mxu1 %v1549_v2  ;;  %v1566_v19 = vld [vmem:[%s1941_s0 + $0xa8] sm:$0xff]   ;;  %v1568_v21 = vld [vmem:[%s1941_s0 + $0xb0] sm:$0xff]   ;;  %v1569_v22 = vld [vmem:[%s1941_s0 + $0x38] sm:$0xff]  }
  0x2e   :  { %v1570_v23 = vld [vmem:[%s1941_s0 + $0xb8] sm:$0xff]   ;;  %v1571_v24 = vld [vmem:[%s1941_s0 + $0x40] sm:$0xff]   ;;  %v1573_v26 = vld [vmem:[%s1941_s0 + $0x48] sm:$0xff]  }
  0x2f   :  { %v1572_v25 = vld [vmem:[%s1941_s0 + $0xc0] sm:$0xff]   ;;  %v1574_v27 = vld [vmem:[%s1941_s0 + $0xc8] sm:$0xff]   ;;  %v1575_v28 = vld [vmem:[%s1941_s0 + $0x50] sm:$0xff]  }
  0x30   :  { %1452 = vmatpush3.bf16.msra.mxu0 %v1549_v2  ;;  %1537 = vmatpush3.bf16.msra.mxu1 %v1549_v2  ;;  %v1576_v29 = vld [vmem:[%s1941_s0 + $0xd0] sm:$0xff]   ;;  %v1577_v30 = vld [vmem:[%s1941_s0 + $0x58] sm:$0xff]   ;;  %v1579_v32 = vld [vmem:[%s1941_s0 + $0x60] sm:$0xff]  }
  0x31   :  { %1453 = vmatprep.subr.bf16.mxu0 %v1550_v3  ;;  %1530 = vmatprep.subr.bf16.mxu1 %v1550_v3  ;;  %v1578_v31 = vld [vmem:[%s1941_s0 + $0xd8] sm:$0xff]   ;;  %v1580_v33 = vld [vmem:[%s1941_s0 + $0xe0] sm:$0xff]   ;;  %v1581_v34 = vld [vmem:[%s1941_s0 + $0x68] sm:$0xff]  }
  0x32   :  { %v1582_v35 = vld [vmem:[%s1941_s0 + $0xe8] sm:$0xff]   ;;  %v1583_v36 = vld [vmem:[%s1941_s0 + $0x70] sm:$0xff]   ;;  %v1585_v38 = vld [vmem:[%s1941_s0 + $0x78] sm:$0xff]  }
  0x33   :  { %v1584_v37 = vld [vmem:[%s1941_s0 + $0xf0] sm:$0xff]   ;;  %v1586_v39 = vld [vmem:[%s1941_s0 + $0xf8] sm:$0xff]   ;;  %v1779_v40 = vld [vmem:[#allocation4] ss:$0 sm:$0xff] }
  0x34   :  { %1454 = vmatpush3.bf16.msra.mxu0 %v1550_v3  ;;  %1538 = vmatpush3.bf16.msra.mxu1 %v1550_v3 }
  0x35   :  { %1455 = vmatprep.subr.bf16.mxu0 %v1551_v6  ;;  %1531 = vmatprep.subr.bf16.mxu1 %v1551_v6 }
  0x38   :  { %1456 = vmatpush3.bf16.msra.mxu0 %v1551_v6  ;;  %1539 = vmatpush3.bf16.msra.mxu1 %v1551_v6 }
  0x39   :  { %1457 = vmatprep.subr.bf16.mxu0 %v1552_v7  ;;  %1532 = vmatprep.subr.bf16.mxu1 %v1552_v7 }
  0x3c   :  { %1458 = vmatpush3.bf16.msra.mxu0 %v1552_v7  ;;  %1540 = vmatpush3.bf16.msra.mxu1 %v1552_v7 }
  0x3d   :  { %1459 = vmatprep.subr.bf16.mxu0 %v1553_v8  ;;  %1533 = vmatprep.subr.bf16.mxu1 %v1553_v8 }
  0x40   :  { %1460 = vmatpush3.bf16.msra.mxu0 %v1553_v8  ;;  %1541 = vmatpush3.bf16.msra.mxu1 %v1553_v8 }
  0x41   :  { %1461 = vmatprep.subr.bf16.mxu0 %v1554_v9  ;;  %1534 = vmatprep.subr.bf16.mxu1 %v1554_v9 }
  0x44   :  { %1462 = vmatpush3.bf16.msra.mxu0 %v1554_v9  ;;  %1542 = vmatpush3.bf16.msra.mxu1 %v1554_v9 }
  0x47   :  { %1464 = vmatmul.mubr.bf16.vlgmr.msra.gmra.mrb[0].mxu0 %v1557_v10  ;;  %1496 = vmatmul.mubr.bf16.vlgmr.msra.gmra.mrb[0].mxu1 %v1558_v11 }
  0x48   :  { %1467 = vmatprep.mubr.bf16.mxu0 %v1559_v12  ;;  %1499 = vmatprep.mubr.bf16.mxu1 %v1560_v13 }
  0x4f   :  { %1468 = vmatmul.mubr.bf16.gmra.mrb[4].mxu0 %v1561_v14  ;;  %1500 = vmatmul.mubr.bf16.gmra.mrb[4].mxu1 %v1562_v15 }
  0x50   :  { %1471 = vmatprep.mubr.bf16.mxu0 %v1563_v16  ;;  %1503 = vmatprep.mubr.bf16.mxu1 %v1564_v17 }
  0x57   :  { %1472 = vmatmul.mubr.bf16.gmra.mrb[8].mxu0 %v1565_v18  ;;  %1504 = vmatmul.mubr.bf16.gmra.mrb[8].mxu1 %v1566_v19 }
  0x58   :  { %1475 = vmatprep.mubr.bf16.mxu0 %v1567_v20  ;;  %1507 = vmatprep.mubr.bf16.mxu1 %v1568_v21 }
  0x5f   :  { %1476 = vmatmul.mubr.bf16.gmra.mrb[12].mxu0 %v1569_v22  ;;  %1508 = vmatmul.mubr.bf16.gmra.mrb[12].mxu1 %v1570_v23 }
  0x60   :  { %1479 = vmatprep.mubr.bf16.mxu0 %v1571_v24  ;;  %1511 = vmatprep.mubr.bf16.mxu1 %v1572_v25 }
  0x67   :  { %1480 = vmatmul.mubr.bf16.gmra.mrb[16].mxu0 %v1573_v26  ;;  %1512 = vmatmul.mubr.bf16.gmra.mrb[16].mxu1 %v1574_v27 }
  0x68   :  { %1483 = vmatprep.mubr.bf16.mxu0 %v1575_v28  ;;  %1515 = vmatprep.mubr.bf16.mxu1 %v1576_v29 }
  0x6f   :  { %1484 = vmatmul.mubr.bf16.gmra.mrb[20].mxu0 %v1577_v30  ;;  %1516 = vmatmul.mubr.bf16.gmra.mrb[20].mxu1 %v1578_v31 }
  0x70   :  { %1487 = vmatprep.mubr.bf16.mxu0 %v1579_v32  ;;  %1519 = vmatprep.mubr.bf16.mxu1 %v1580_v33 }
  0x77   :  { %1488 = vmatmul.mubr.bf16.gmra.mrb[24].mxu0 %v1581_v34  ;;  %1520 = vmatmul.mubr.bf16.gmra.mrb[24].mxu1 %v1582_v35 }
  0x78   :  { %1491 = vmatprep.mubr.bf16.mxu0 %v1583_v36  ;;  %1523 = vmatprep.mubr.bf16.mxu1 %v1584_v37 }
  0x7f   :  { %1492 = vmatmul.mubr.bf16.gmra.mrb[28].mxu0 %v1585_v38  ;;  %1524 = vmatmul.mubr.bf16.gmra.mrb[28].mxu1 %v1586_v39 }
 0x11a   :  { %v1465_v41 = vpop.f32.mrb[0].mxu0  ;;  %v1497_v42 = vpop.f32.mrb[0].mxu1 }
 0x11b   :  { %v411_v43 = vadd.f32 %v1465_v41, %v1779_v40  ;;  %v539_v44 = vadd.f32 %v1497_v42, %v1779_v40  ;;  %v402_v45 = vpop.f32.mrb[1].mxu0  ;;  %v530_v46 = vpop.f32.mrb[1].mxu1 }
 0x11c   :  { %v403_v47 = vadd.f32 %v1779_v40, %v402_v45  ;;  %v531_v48 = vadd.f32 %v1779_v40, %v530_v46  ;;  %v1466_v49 = vpop.f32.mrb[2].mxu0  ;;  %v1498_v50 = vpop.f32.mrb[2].mxu1 }
 0x11d   :  { %v414_v51 = vadd.f32 %v1466_v49, %v1779_v40  ;;  %v542_v52 = vadd.f32 %v1498_v50, %v1779_v40  ;;  %v405_v53 = vpop.f32.mrb[3].mxu0  ;;  %v533_v54 = vpop.f32.mrb[3].mxu1  ;;  %v659_v57 = vmax.f32 %v411_v43, 0.0  ;;  %v691_v58 = vmax.f32 %v539_v44, 0.0 }
 0x11e   :  { %v406_v55 = vadd.f32 %v1779_v40, %v405_v53  ;;  %v534_v56 = vadd.f32 %v1779_v40, %v533_v54  ;;  %v657_v61 = vmax.f32 %v403_v47, 0.0  ;;  %v689_v62 = vmax.f32 %v531_v48, 0.0 }
 0x11f   :  { %v660_v59 = vmax.f32 %v414_v51, 0.0  ;;  %v692_v60 = vmax.f32 %v542_v52, 0.0 }
 0x120   :  { %v658_v63 = vmax.f32 %v406_v55, 0.0  ;;  %v690_v0 = vmax.f32 %v534_v56, 0.0 }
 0x121   :  { %v1224_v1 = vpack.c.bf16 %v660_v59, %v659_v57  ;;  %v1304_v2 = vpack.c.bf16 %v692_v60, %v691_v58 }
 0x122   :  { %v1219_v3 = vpack.c.bf16 %v658_v63, %v657_v61  ;;  %v1299_v4 = vpack.c.bf16 %v690_v0, %v689_v62  ;;  %v1469_v5 = vpop.f32.mrb[4].mxu0  ;;  %v1501_v6 = vpop.f32.mrb[4].mxu1 }
 0x123   :  { %1376 = vst [vmem:[%s1944_s3 + $0x8] sm:$0xff] %v1224_v1   ;;  %1392 = vst [vmem:[%s1944_s3 + $0x88] sm:$0xff] %v1304_v2   ;;  %v427_v7 = vadd.f32 %v1469_v5, %v1779_v40  ;;  %v555_v8 = vadd.f32 %v1501_v6, %v1779_v40  ;;  %v418_v9 = vpop.f32.mrb[5].mxu0  ;;  %v546_v10 = vpop.f32.mrb[5].mxu1 }
 0x124   :  { %1220 = vst [vmem:[%s1944_s3] sm:$0xff] %v1219_v3   ;;  %1391 = vst [vmem:[%s1944_s3 + $0x80] sm:$0xff] %v1299_v4   ;;  %v419_v11 = vadd.f32 %v1779_v40, %v418_v9  ;;  %v547_v12 = vadd.f32 %v1779_v40, %v546_v10  ;;  %v1470_v13 = vpop.f32.mrb[6].mxu0  ;;  %v1502_v14 = vpop.f32.mrb[6].mxu1 }
 0x125   :  { %v430_v15 = vadd.f32 %v1470_v13, %v1779_v40  ;;  %v558_v16 = vadd.f32 %v1502_v14, %v1779_v40  ;;  %v421_v17 = vpop.f32.mrb[7].mxu0  ;;  %v549_v18 = vpop.f32.mrb[7].mxu1  ;;  %v663_v21 = vmax.f32 %v427_v7, 0.0  ;;  %v695_v22 = vmax.f32 %v555_v8, 0.0 }
 0x126   :  { %v422_v19 = vadd.f32 %v1779_v40, %v421_v17  ;;  %v550_v20 = vadd.f32 %v1779_v40, %v549_v18  ;;  %v661_v25 = vmax.f32 %v419_v11, 0.0  ;;  %v693_v26 = vmax.f32 %v547_v12, 0.0 }
 0x127   :  { %v664_v23 = vmax.f32 %v430_v15, 0.0  ;;  %v696_v24 = vmax.f32 %v558_v16, 0.0 }
 0x128   :  { %v662_v27 = vmax.f32 %v422_v19, 0.0  ;;  %v694_v28 = vmax.f32 %v550_v20, 0.0 }
 0x129   :  { %v1234_v29 = vpack.c.bf16 %v664_v23, %v663_v21  ;;  %v1314_v30 = vpack.c.bf16 %v696_v24, %v695_v22 }
 0x12a   :  { %v1229_v31 = vpack.c.bf16 %v662_v27, %v661_v25  ;;  %v1309_v32 = vpack.c.bf16 %v694_v28, %v693_v26  ;;  %v1473_v33 = vpop.f32.mrb[8].mxu0  ;;  %v1505_v34 = vpop.f32.mrb[8].mxu1 }
 0x12b   :  { %1378 = vst [vmem:[%s1944_s3 + $0x18] sm:$0xff] %v1234_v29   ;;  %1394 = vst [vmem:[%s1944_s3 + $0x98] sm:$0xff] %v1314_v30   ;;  %v443_v35 = vadd.f32 %v1473_v33, %v1779_v40  ;;  %v571_v36 = vadd.f32 %v1505_v34, %v1779_v40  ;;  %v434_v37 = vpop.f32.mrb[9].mxu0  ;;  %v562_v38 = vpop.f32.mrb[9].mxu1 }
 0x12c   :  { %1377 = vst [vmem:[%s1944_s3 + $0x10] sm:$0xff] %v1229_v31   ;;  %1393 = vst [vmem:[%s1944_s3 + $0x90] sm:$0xff] %v1309_v32   ;;  %v435_v39 = vadd.f32 %v1779_v40, %v434_v37  ;;  %v563_v41 = vadd.f32 %v1779_v40, %v562_v38  ;;  %v1474_v42 = vpop.f32.mrb[10].mxu0  ;;  %v1506_v43 = vpop.f32.mrb[10].mxu1 }
 0x12d   :  { %v446_v44 = vadd.f32 %v1474_v42, %v1779_v40  ;;  %v574_v45 = vadd.f32 %v1506_v43, %v1779_v40  ;;  %v437_v46 = vpop.f32.mrb[11].mxu0  ;;  %v565_v47 = vpop.f32.mrb[11].mxu1  ;;  %v667_v50 = vmax.f32 %v443_v35, 0.0  ;;  %v699_v51 = vmax.f32 %v571_v36, 0.0 }
 0x12e   :  { %v438_v48 = vadd.f32 %v1779_v40, %v437_v46  ;;  %v566_v49 = vadd.f32 %v1779_v40, %v565_v47  ;;  %v665_v54 = vmax.f32 %v435_v39, 0.0  ;;  %v697_v55 = vmax.f32 %v563_v41, 0.0 }
 0x12f   :  { %v668_v52 = vmax.f32 %v446_v44, 0.0  ;;  %v700_v53 = vmax.f32 %v574_v45, 0.0 }
 0x130   :  { %v666_v56 = vmax.f32 %v438_v48, 0.0  ;;  %v698_v57 = vmax.f32 %v566_v49, 0.0 }
 0x131   :  { %v1244_v58 = vpack.c.bf16 %v668_v52, %v667_v50  ;;  %v1324_v59 = vpack.c.bf16 %v700_v53, %v699_v51 }
 0x132   :  { %v1239_v60 = vpack.c.bf16 %v666_v56, %v665_v54  ;;  %v1319_v61 = vpack.c.bf16 %v698_v57, %v697_v55  ;;  %v1477_v62 = vpop.f32.mrb[12].mxu0  ;;  %v1509_v63 = vpop.f32.mrb[12].mxu1 }
 0x133   :  { %1380 = vst [vmem:[%s1944_s3 + $0x28] sm:$0xff] %v1244_v58   ;;  %1396 = vst [vmem:[%s1944_s3 + $0xa8] sm:$0xff] %v1324_v59   ;;  %v459_v0 = vadd.f32 %v1477_v62, %v1779_v40  ;;  %v587_v1 = vadd.f32 %v1509_v63, %v1779_v40  ;;  %v450_v2 = vpop.f32.mrb[13].mxu0  ;;  %v578_v3 = vpop.f32.mrb[13].mxu1 }
 0x134   :  { %1379 = vst [vmem:[%s1944_s3 + $0x20] sm:$0xff] %v1239_v60   ;;  %1395 = vst [vmem:[%s1944_s3 + $0xa0] sm:$0xff] %v1319_v61   ;;  %v451_v4 = vadd.f32 %v1779_v40, %v450_v2  ;;  %v579_v5 = vadd.f32 %v1779_v40, %v578_v3  ;;  %v1478_v6 = vpop.f32.mrb[14].mxu0  ;;  %v1510_v7 = vpop.f32.mrb[14].mxu1 }
 0x135   :  { %v462_v8 = vadd.f32 %v1478_v6, %v1779_v40  ;;  %v590_v9 = vadd.f32 %v1510_v7, %v1779_v40  ;;  %v453_v10 = vpop.f32.mrb[15].mxu0  ;;  %v581_v11 = vpop.f32.mrb[15].mxu1  ;;  %v671_v14 = vmax.f32 %v459_v0, 0.0  ;;  %v703_v15 = vmax.f32 %v587_v1, 0.0 }
 0x136   :  { %v454_v12 = vadd.f32 %v1779_v40, %v453_v10  ;;  %v582_v13 = vadd.f32 %v1779_v40, %v581_v11  ;;  %v669_v18 = vmax.f32 %v451_v4, 0.0  ;;  %v701_v19 = vmax.f32 %v579_v5, 0.0 }
 0x137   :  { %v672_v16 = vmax.f32 %v462_v8, 0.0  ;;  %v704_v17 = vmax.f32 %v590_v9, 0.0 }
 0x138   :  { %v670_v20 = vmax.f32 %v454_v12, 0.0  ;;  %v702_v21 = vmax.f32 %v582_v13, 0.0 }
 0x139   :  { %v1254_v22 = vpack.c.bf16 %v672_v16, %v671_v14  ;;  %v1334_v23 = vpack.c.bf16 %v704_v17, %v703_v15 }
 0x13a   :  { %v1249_v24 = vpack.c.bf16 %v670_v20, %v669_v18  ;;  %v1329_v25 = vpack.c.bf16 %v702_v21, %v701_v19  ;;  %v1481_v26 = vpop.f32.mrb[16].mxu0  ;;  %v1513_v27 = vpop.f32.mrb[16].mxu1 }
 0x13b   :  { %1382 = vst [vmem:[%s1944_s3 + $0x38] sm:$0xff] %v1254_v22   ;;  %1398 = vst [vmem:[%s1944_s3 + $0xb8] sm:$0xff] %v1334_v23   ;;  %v475_v28 = vadd.f32 %v1481_v26, %v1779_v40  ;;  %v603_v29 = vadd.f32 %v1513_v27, %v1779_v40  ;;  %v466_v30 = vpop.f32.mrb[17].mxu0  ;;  %v594_v31 = vpop.f32.mrb[17].mxu1 }
 0x13c   :  { %1381 = vst [vmem:[%s1944_s3 + $0x30] sm:$0xff] %v1249_v24   ;;  %1397 = vst [vmem:[%s1944_s3 + $0xb0] sm:$0xff] %v1329_v25   ;;  %v467_v32 = vadd.f32 %v1779_v40, %v466_v30  ;;  %v595_v33 = vadd.f32 %v1779_v40, %v594_v31  ;;  %v1482_v34 = vpop.f32.mrb[18].mxu0  ;;  %v1514_v35 = vpop.f32.mrb[18].mxu1 }
 0x13d   :  { %v478_v36 = vadd.f32 %v1482_v34, %v1779_v40  ;;  %v606_v37 = vadd.f32 %v1514_v35, %v1779_v40  ;;  %v469_v38 = vpop.f32.mrb[19].mxu0  ;;  %v597_v39 = vpop.f32.mrb[19].mxu1  ;;  %v675_v43 = vmax.f32 %v475_v28, 0.0  ;;  %v707_v44 = vmax.f32 %v603_v29, 0.0 }
 0x13e   :  { %v470_v41 = vadd.f32 %v1779_v40, %v469_v38  ;;  %v598_v42 = vadd.f32 %v1779_v40, %v597_v39  ;;  %v673_v47 = vmax.f32 %v467_v32, 0.0  ;;  %v705_v48 = vmax.f32 %v595_v33, 0.0 }
 0x13f   :  { %v676_v45 = vmax.f32 %v478_v36, 0.0  ;;  %v708_v46 = vmax.f32 %v606_v37, 0.0 }
 0x140   :  { %v674_v49 = vmax.f32 %v470_v41, 0.0  ;;  %v706_v50 = vmax.f32 %v598_v42, 0.0 }
 0x141   :  { %v1264_v51 = vpack.c.bf16 %v676_v45, %v675_v43  ;;  %v1344_v52 = vpack.c.bf16 %v708_v46, %v707_v44 }
 0x142   :  { %v1259_v53 = vpack.c.bf16 %v674_v49, %v673_v47  ;;  %v1339_v54 = vpack.c.bf16 %v706_v50, %v705_v48  ;;  %v1485_v55 = vpop.f32.mrb[20].mxu0  ;;  %v1517_v56 = vpop.f32.mrb[20].mxu1 }
 0x143   :  { %1384 = vst [vmem:[%s1944_s3 + $0x48] sm:$0xff] %v1264_v51   ;;  %1400 = vst [vmem:[%s1944_s3 + $0xc8] sm:$0xff] %v1344_v52   ;;  %v491_v57 = vadd.f32 %v1485_v55, %v1779_v40  ;;  %v619_v58 = vadd.f32 %v1517_v56, %v1779_v40  ;;  %v482_v59 = vpop.f32.mrb[21].mxu0  ;;  %v610_v60 = vpop.f32.mrb[21].mxu1 }
 0x144   :  { %1383 = vst [vmem:[%s1944_s3 + $0x40] sm:$0xff] %v1259_v53   ;;  %1399 = vst [vmem:[%s1944_s3 + $0xc0] sm:$0xff] %v1339_v54   ;;  %v483_v61 = vadd.f32 %v1779_v40, %v482_v59  ;;  %v611_v62 = vadd.f32 %v1779_v40, %v610_v60  ;;  %v1486_v63 = vpop.f32.mrb[22].mxu0  ;;  %v1518_v0 = vpop.f32.mrb[22].mxu1 }
 0x145   :  { %v494_v1 = vadd.f32 %v1486_v63, %v1779_v40  ;;  %v622_v2 = vadd.f32 %v1518_v0, %v1779_v40  ;;  %v485_v3 = vpop.f32.mrb[23].mxu0  ;;  %v613_v4 = vpop.f32.mrb[23].mxu1  ;;  %v679_v7 = vmax.f32 %v491_v57, 0.0  ;;  %v711_v8 = vmax.f32 %v619_v58, 0.0 }
 0x146   :  { %v486_v5 = vadd.f32 %v1779_v40, %v485_v3  ;;  %v614_v6 = vadd.f32 %v1779_v40, %v613_v4  ;;  %v677_v11 = vmax.f32 %v483_v61, 0.0  ;;  %v709_v12 = vmax.f32 %v611_v62, 0.0 }
 0x147   :  { %v680_v9 = vmax.f32 %v494_v1, 0.0  ;;  %v712_v10 = vmax.f32 %v622_v2, 0.0 }
 0x148   :  { %v678_v13 = vmax.f32 %v486_v5, 0.0  ;;  %v710_v14 = vmax.f32 %v614_v6, 0.0 }
 0x149   :  { %v1274_v15 = vpack.c.bf16 %v680_v9, %v679_v7  ;;  %v1354_v16 = vpack.c.bf16 %v712_v10, %v711_v8 }
 0x14a   :  { %v1269_v17 = vpack.c.bf16 %v678_v13, %v677_v11  ;;  %v1349_v18 = vpack.c.bf16 %v710_v14, %v709_v12  ;;  %v1489_v19 = vpop.f32.mrb[24].mxu0  ;;  %v1521_v20 = vpop.f32.mrb[24].mxu1 }
 0x14b   :  { %1386 = vst [vmem:[%s1944_s3 + $0x58] sm:$0xff] %v1274_v15   ;;  %1402 = vst [vmem:[%s1944_s3 + $0xd8] sm:$0xff] %v1354_v16   ;;  %v507_v21 = vadd.f32 %v1489_v19, %v1779_v40  ;;  %v635_v22 = vadd.f32 %v1521_v20, %v1779_v40  ;;  %v498_v23 = vpop.f32.mrb[25].mxu0  ;;  %v626_v24 = vpop.f32.mrb[25].mxu1 }
 0x14c   :  { %1385 = vst [vmem:[%s1944_s3 + $0x50] sm:$0xff] %v1269_v17   ;;  %1401 = vst [vmem:[%s1944_s3 + $0xd0] sm:$0xff] %v1349_v18   ;;  %v499_v25 = vadd.f32 %v1779_v40, %v498_v23  ;;  %v627_v26 = vadd.f32 %v1779_v40, %v626_v24  ;;  %v1490_v27 = vpop.f32.mrb[26].mxu0  ;;  %v1522_v28 = vpop.f32.mrb[26].mxu1 }
 0x14d   :  { %v510_v29 = vadd.f32 %v1490_v27, %v1779_v40  ;;  %v638_v30 = vadd.f32 %v1522_v28, %v1779_v40  ;;  %v501_v31 = vpop.f32.mrb[27].mxu0  ;;  %v629_v32 = vpop.f32.mrb[27].mxu1  ;;  %v683_v35 = vmax.f32 %v507_v21, 0.0  ;;  %v715_v36 = vmax.f32 %v635_v22, 0.0 }
 0x14e   :  { %v502_v33 = vadd.f32 %v1779_v40, %v501_v31  ;;  %v630_v34 = vadd.f32 %v1779_v40, %v629_v32  ;;  %v681_v39 = vmax.f32 %v499_v25, 0.0  ;;  %v713_v41 = vmax.f32 %v627_v26, 0.0 }
 0x14f   :  { %v684_v37 = vmax.f32 %v510_v29, 0.0  ;;  %v716_v38 = vmax.f32 %v638_v30, 0.0 }
 0x150   :  { %v682_v42 = vmax.f32 %v502_v33, 0.0  ;;  %v714_v43 = vmax.f32 %v630_v34, 0.0 }
 0x151   :  { %v1284_v44 = vpack.c.bf16 %v684_v37, %v683_v35  ;;  %v1364_v45 = vpack.c.bf16 %v716_v38, %v715_v36 }
 0x152   :  { %v1279_v46 = vpack.c.bf16 %v682_v42, %v681_v39  ;;  %v1359_v47 = vpack.c.bf16 %v714_v43, %v713_v41  ;;  %v1493_v48 = vpop.f32.mrb[28].mxu0  ;;  %v1525_v49 = vpop.f32.mrb[28].mxu1 }
 0x153   :  { %1388 = vst [vmem:[%s1944_s3 + $0x68] sm:$0xff] %v1284_v44   ;;  %1404 = vst [vmem:[%s1944_s3 + $0xe8] sm:$0xff] %v1364_v45   ;;  %v523_v50 = vadd.f32 %v1493_v48, %v1779_v40  ;;  %v651_v51 = vadd.f32 %v1525_v49, %v1779_v40  ;;  %v514_v52 = vpop.f32.mrb[29].mxu0  ;;  %v642_v53 = vpop.f32.mrb[29].mxu1 }
 0x154   :  { %1387 = vst [vmem:[%s1944_s3 + $0x60] sm:$0xff] %v1279_v46   ;;  %1403 = vst [vmem:[%s1944_s3 + $0xe0] sm:$0xff] %v1359_v47   ;;  %v515_v54 = vadd.f32 %v1779_v40, %v514_v52  ;;  %v643_v55 = vadd.f32 %v1779_v40, %v642_v53  ;;  %v1494_v56 = vpop.f32.mrb[30].mxu0  ;;  %v1526_v57 = vpop.f32.mrb[30].mxu1 }
 0x155   :  { %v526_v58 = vadd.f32 %v1494_v56, %v1779_v40  ;;  %v654_v59 = vadd.f32 %v1526_v57, %v1779_v40  ;;  %v517_v60 = vpop.f32.mrb[31].mxu0  ;;  %v645_v61 = vpop.f32.mrb[31].mxu1  ;;  %v687_v0 = vmax.f32 %v523_v50, 0.0  ;;  %v719_v1 = vmax.f32 %v651_v51, 0.0 }
 0x156   :  { %v518_v62 = vadd.f32 %v1779_v40, %v517_v60  ;;  %v646_v63 = vadd.f32 %v1779_v40, %v645_v61  ;;  %v685_v4 = vmax.f32 %v515_v54, 0.0  ;;  %v717_v5 = vmax.f32 %v643_v55, 0.0 }
 0x157   :  { %v688_v2 = vmax.f32 %v526_v58, 0.0  ;;  %v720_v3 = vmax.f32 %v654_v59, 0.0 }
 0x158   :  { %v686_v6 = vmax.f32 %v518_v62, 0.0  ;;  %v718_v7 = vmax.f32 %v646_v63, 0.0 }
 0x159   :  { %v1294_v8 = vpack.c.bf16 %v688_v2, %v687_v0  ;;  %v1374_v9 = vpack.c.bf16 %v720_v3, %v719_v1 }
 0x15a   :  { %v1289_v10 = vpack.c.bf16 %v686_v6, %v685_v4  ;;  %v1369_v11 = vpack.c.bf16 %v718_v7, %v717_v5 }
 0x15b   :  { %1390 = vst [vmem:[%s1944_s3 + $0x78] sm:$0xff] %v1294_v8   ;;  %1406 = vst [vmem:[%s1944_s3 + $0xf8] sm:$0xff] %v1374_v9  }
 0x15c   :  { %1389 = vst [vmem:[%s1944_s3 + $0x70] sm:$0xff] %v1289_v10   ;;  %1405 = vst [vmem:[%s1944_s3 + $0xf0] sm:$0xff] %v1369_v11  }
 0x15d   :  { %1045 = vsyncpa [#allocation3], 1 }
 0x15e   :  { %1046 = vsyncpa [#allocation5], 1 }

// kernel: eitnet_forward.9
= control target key start
LH: loop header
LB: loop body
LE: loop exit
PB: predicated region body
PF: predicated region fallthrough
CT: control target
= control target key end

     0   :  { %s1176_s1 = inlined_call_operand.vmem [shape: bf16[384,128], index: 1, kind: input, shape index: {}]   ;;  %s1177_s0 = inlined_call_operand.vmem [shape: bf16[128,384], index: 0, kind: input, shape index: {}]   ;;  %s1178_s2 = inlined_call_operand.vmem [shape: f32[1,128], index: 2, kind: input, shape index: {}]   ;;  %s1179_s3 = inlined_call_operand.vmem [shape: bf16[128,128], index: 3, kind: output, shape index: {}]  }
   0x1   :  { %v908_v0 = vld [vmem:[%s1176_s1 + $0x40] sm:$0xff]   ;;  %v910_v2 = vld [vmem:[%s1176_s1 + $0x48] sm:$0xff]   ;;  %v913_v5 = vld [vmem:[%s1176_s1 + $0x50] sm:$0xff]  }
   0x2   :  { %v909_v1 = vld [vmem:[%s1176_s1] sm:$0xff]   ;;  %796 = vmatprep.subr.bf16.mxu0 %v908_v0  ;;  %v912_v4 = vld [vmem:[%s1176_s1 + $0x8] sm:$0xff]   ;;  %v915_v7 = vld [vmem:[%s1176_s1 + $0x10] sm:$0xff]  }
   0x3   :  { %797 = vmatpush3.bf16.msra.mxu0 %v909_v1  ;;  %v911_v3 = vld [vmem:[%s1176_s1 + $0x80] sm:$0xff]   ;;  %v914_v6 = vld [vmem:[%s1176_s1 + $0x88] sm:$0xff]   ;;  %v916_v8 = vld [vmem:[%s1176_s1 + $0x58] sm:$0xff]  }
   0x4   :  { %798 = vmatprep.subr.bf16.mxu0 %v910_v2  ;;  %876 = vmatprep.subr.bf16.mxu1 %v911_v3  ;;  %v917_v9 = vld [vmem:[%s1176_s1 + $0x90] sm:$0xff]   ;;  %v918_v10 = vld [vmem:[%s1176_s1 + $0x18] sm:$0xff]   ;;  %v919_v11 = vld [vmem:[%s1176_s1 + $0x60] sm:$0xff]  }
   0x5   :  { %877 = vmatpush3.bf16.msra.mxu1 %v911_v3  ;;  %v920_v12 = vld [vmem:[%s1176_s1 + $0x98] sm:$0xff]   ;;  %v921_v13 = vld [vmem:[%s1176_s1 + $0x20] sm:$0xff]   ;;  %v922_v15 = vld [vmem:[%s1176_s1 + $0x68] sm:$0xff]  }
   0x6   :  { %878 = vmatprep.subr.bf16.mxu1 %v914_v6  ;;  %v923_v14 = vld [vmem:[%s1176_s1 + $0xa0] sm:$0xff]   ;;  %v924_v16 = vld [vmem:[%s1176_s1 + $0x28] sm:$0xff]   ;;  %v925_v18 = vld [vmem:[%s1176_s1 + $0x70] sm:$0xff]  }
   0x7   :  { %799 = vmatpush3.bf16.msra.mxu0 %v912_v4  ;;  %v926_v17 = vld [vmem:[%s1176_s1 + $0xa8] sm:$0xff]   ;;  %v927_v19 = vld [vmem:[%s1176_s1 + $0x30] sm:$0xff]   ;;  %v928_v20 = vld [vmem:[%s1176_s1 + $0x78] sm:$0xff]  }
   0x8   :  { %800 = vmatprep.subr.bf16.mxu0 %v913_v5  ;;  %v929_v21 = vld [vmem:[%s1176_s1 + $0xb0] sm:$0xff]   ;;  %v930_v23 = vld [vmem:[%s1176_s1 + $0x38] sm:$0xff]   ;;  %v931_v26 = vld [vmem:[%s1177_s0] ss:$12 sps:$4 sm:$0xff]  }
   0x9   :  { %879 = vmatpush3.bf16.msra.mxu1 %v914_v6  ;;  %v933_v22 = vld [vmem:[%s1177_s0 + $0x4] ss:$12 sps:$4 sm:$0xff]   ;;  %v935_v24 = vld [vmem:[%s1177_s0 + $0x8] ss:$12 sps:$4 sm:$0xff]   ;;  %v934_v25 = vld [vmem:[%s1176_s1 + $0xb8] sm:$0xff]  }
   0xa   :  { %880 = vmatprep.subr.bf16.mxu1 %v917_v9  ;;  %406 = vmatprep.mubr.bf16.mxu0 %v933_v22  ;;  %v937_v27 = vld [vmem:[%s1177_s0 + $0x1c] ss:$12 sps:$4 sm:$0xff]   ;;  %v936_v28 = vld [vmem:[%s1177_s0 + $0x20] ss:$12 sps:$4 sm:$0xff]   ;;  %v943_v29 = vld [vmem:[%s1177_s0 + $0x38] ss:$12 sps:$4 sm:$0xff]  }
   0xb   :  { %801 = vmatpush3.bf16.msra.mxu0 %v915_v7  ;;  %892 = vmatprep.mubr.bf16.mxu1 %v935_v24  ;;  %v939_v30 = vld [vmem:[%s1177_s0 + $0x18] ss:$12 sps:$4 sm:$0xff]   ;;  %v940_v31 = vld [vmem:[%s1177_s0 + $0x34] ss:$12 sps:$4 sm:$0xff]   ;;  %v944_v32 = vld [vmem:[%s1177_s0 + $0x50] ss:$12 sps:$4 sm:$0xff]  }
   0xc   :  { %802 = vmatprep.subr.bf16.mxu0 %v916_v8  ;;  %v951_v33 = vld [vmem:[%s1177_s0 + $0x68] ss:$12 sps:$4 sm:$0xff]   ;;  %v942_v34 = vld [vmem:[%s1177_s0 + $0x30] ss:$12 sps:$4 sm:$0xff]   ;;  %v945_v35 = vld [vmem:[%s1177_s0 + $0x4c] ss:$12 sps:$4 sm:$0xff]  }
   0xd   :  { %881 = vmatpush3.bf16.msra.mxu1 %v917_v9  ;;  %v952_v36 = vld [vmem:[%s1177_s0 + $0x80] ss:$12 sps:$4 sm:$0xff]   ;;  %v959_v37 = vld [vmem:[%s1177_s0 + $0x98] ss:$12 sps:$4 sm:$0xff]   ;;  %v947_v38 = vld [vmem:[%s1177_s0 + $0x48] ss:$12 sps:$4 sm:$0xff]  }
   0xe   :  { %882 = vmatprep.subr.bf16.mxu1 %v920_v12  ;;  %v948_v39 = vld [vmem:[%s1177_s0 + $0x64] ss:$12 sps:$4 sm:$0xff]   ;;  %v950_v41 = vld [vmem:[%s1177_s0 + $0x60] ss:$12 sps:$4 sm:$0xff]   ;;  %v953_v42 = vld [vmem:[%s1177_s0 + $0x7c] ss:$12 sps:$4 sm:$0xff]  }
   0xf   :  { %803 = vmatpush3.bf16.msra.mxu0 %v918_v10  ;;  %v960_v40 = vld [vmem:[%s1177_s0 + $0xb0] ss:$12 sps:$4 sm:$0xff]   ;;  %v955_v43 = vld [vmem:[%s1177_s0 + $0x78] ss:$12 sps:$4 sm:$0xff]   ;;  %v956_v44 = vld [vmem:[%s1177_s0 + $0x94] ss:$12 sps:$4 sm:$0xff]  }
  0x10   :  { %804 = vmatprep.subr.bf16.mxu0 %v919_v11  ;;  %v958_v45 = vld [vmem:[%s1177_s0 + $0x90] ss:$12 sps:$4 sm:$0xff]   ;;  %v961_v46 = vld [vmem:[%s1177_s0 + $0xac] ss:$12 sps:$4 sm:$0xff]   ;;  %v963_v47 = vld [vmem:[%s1177_s0 + $0xa8] ss:$12 sps:$4 sm:$0xff]  }
  0x11   :  { %883 = vmatpush3.bf16.msra.mxu1 %v920_v12  ;;  %v1131_v50 = vld [vmem:[%s1178_s2] ss:$0 sm:$0xff] }
  0x12   :  { %884 = vmatprep.subr.bf16.mxu1 %v923_v14 }
  0x13   :  { %805 = vmatpush3.bf16.msra.mxu0 %v921_v13 }
  0x14   :  { %806 = vmatprep.subr.bf16.mxu0 %v922_v15 }
  0x15   :  { %885 = vmatpush3.bf16.msra.mxu1 %v923_v14 }
  0x16   :  { %886 = vmatprep.subr.bf16.mxu1 %v926_v17 }
  0x17   :  { %807 = vmatpush3.bf16.msra.mxu0 %v924_v16 }
  0x18   :  { %808 = vmatprep.subr.bf16.mxu0 %v925_v18 }
  0x19   :  { %887 = vmatpush3.bf16.msra.mxu1 %v926_v17 }
  0x1a   :  { %888 = vmatprep.subr.bf16.mxu1 %v929_v21 }
  0x1b   :  { %809 = vmatpush3.bf16.msra.mxu0 %v927_v19 }
  0x1c   :  { %810 = vmatprep.subr.bf16.mxu0 %v928_v20 }
  0x1d   :  { %889 = vmatpush3.bf16.msra.mxu1 %v929_v21 }
  0x1e   :  { %890 = vmatprep.subr.bf16.mxu1 %v934_v25 }
  0x1f   :  { %811 = vmatpush3.bf16.msra.mxu0 %v930_v23 }
  0x21   :  { %891 = vmatpush3.bf16.msra.mxu1 %v934_v25 }
  0x22   :  { %407 = vmatmul.mubr.bf16.vlgmr.msra.gmra.mrb[0].mxu0 %v931_v26 }
  0x23   :  { %414 = vmatprep.mubr.bf16.mxu0 %v937_v27 }
  0x24   :  { %893 = vmatmul.mubr.bf16.vlgmr.msra.gmra.mrb[0].mxu1 %v936_v28 }
  0x25   :  { %896 = vmatprep.mubr.bf16.mxu1 %v943_v29 }
  0x2a   :  { %415 = vmatmul.mubr.bf16.gmra.mrb[4].mxu0 %v939_v30 }
  0x2b   :  { %422 = vmatprep.mubr.bf16.mxu0 %v940_v31 }
  0x2c   :  { %897 = vmatmul.mubr.bf16.gmra.mrb[4].mxu1 %v944_v32 }
  0x2d   :  { %900 = vmatprep.mubr.bf16.mxu1 %v951_v33 }
  0x32   :  { %423 = vmatmul.mubr.bf16.gmra.mrb[8].mxu0 %v942_v34 }
  0x33   :  { %430 = vmatprep.mubr.bf16.mxu0 %v945_v35 }
  0x34   :  { %901 = vmatmul.mubr.bf16.gmra.mrb[8].mxu1 %v952_v36 }
  0x35   :  { %904 = vmatprep.mubr.bf16.mxu1 %v959_v37 }
  0x3a   :  { %431 = vmatmul.mubr.bf16.gmra.mrb[12].mxu0 %v947_v38 }
  0x3b   :  { %438 = vmatprep.mubr.bf16.mxu0 %v948_v39 }
  0x3c   :  { %905 = vmatmul.mubr.bf16.gmra.mrb[12].mxu1 %v960_v40 }
  0x42   :  { %439 = vmatmul.mubr.bf16.gmra.mrb[16].mxu0 %v950_v41 }
  0x43   :  { %446 = vmatprep.mubr.bf16.mxu0 %v953_v42 }
  0x4a   :  { %447 = vmatmul.mubr.bf16.gmra.mrb[20].mxu0 %v955_v43 }
  0x4b   :  { %454 = vmatprep.mubr.bf16.mxu0 %v956_v44 }
  0x52   :  { %455 = vmatmul.mubr.bf16.gmra.mrb[24].mxu0 %v958_v45 }
  0x53   :  { %462 = vmatprep.mubr.bf16.mxu0 %v961_v46 }
  0x5a   :  { %463 = vmatmul.mubr.bf16.gmra.mrb[28].mxu0 %v963_v47 }
  0xf5   :  { %v812_v48 = vpop.f32.mrb[0].mxu0 }
  0xf6   :  { %v813_v49 = vpop.f32.mrb[1].mxu0 }
  0xf7   :  { %v814_v51 = vadd.f32 %v813_v49, %v812_v48  ;;  %v815_v52 = vpop.f32.mrb[2].mxu0  ;;  %v894_v54 = vpop.f32.mrb[0].mxu1 }
  0xf8   :  { %v816_v53 = vpop.f32.mrb[3].mxu0  ;;  %v505_v57 = vpop.f32.mrb[1].mxu1 }
  0xf9   :  { %v817_v55 = vadd.f32 %v816_v53, %v815_v52  ;;  %v409_v56 = vadd.f32 %v814_v51, %v1131_v50  ;;  %v895_v58 = vpop.f32.mrb[2].mxu1 }
  0xfa   :  { %v508_v61 = vpop.f32.mrb[3].mxu1 }
  0xfb   :  { %v506_v59 = vadd.f32 %v505_v57, %v409_v56  ;;  %v412_v60 = vadd.f32 %v817_v55, %v1131_v50 }
  0xfd   :  { %v509_v62 = vadd.f32 %v508_v61, %v412_v60  ;;  %v818_v63 = vpop.f32.mrb[4].mxu0  ;;  %v568_v1 = vmax.f32 %v506_v59, 0.0 }
  0xfe   :  { %v819_v0 = vpop.f32.mrb[5].mxu0 }
  0xff   :  { %v569_v2 = vmax.f32 %v509_v62, 0.0  ;;  %v820_v3 = vadd.f32 %v819_v0, %v818_v63  ;;  %v821_v4 = vpop.f32.mrb[6].mxu0  ;;  %v898_v6 = vpop.f32.mrb[4].mxu1 }
 0x100   :  { %v822_v5 = vpop.f32.mrb[7].mxu0  ;;  %v521_v10 = vpop.f32.mrb[5].mxu1 }
 0x101   :  { %v752_v7 = vpack.c.bf16 %v569_v2, %v568_v1  ;;  %v417_v8 = vadd.f32 %v820_v3, %v1131_v50  ;;  %v823_v9 = vadd.f32 %v822_v5, %v821_v4  ;;  %v899_v11 = vpop.f32.mrb[6].mxu1 }
 0x102   :  { %v524_v14 = vpop.f32.mrb[7].mxu1 }
 0x103   :  { %753 = vst [vmem:[%s1179_s3] sm:$0xff] %v752_v7   ;;  %v514_v12 = vadd.f32 %v894_v54, %v417_v8  ;;  %v420_v13 = vadd.f32 %v823_v9, %v1131_v50 }
 0x105   :  { %v517_v15 = vadd.f32 %v895_v58, %v420_v13  ;;  %v824_v16 = vpop.f32.mrb[8].mxu0  ;;  %v570_v18 = vmax.f32 %v514_v12, 0.0 }
 0x106   :  { %v825_v17 = vpop.f32.mrb[9].mxu0 }
 0x107   :  { %v571_v19 = vmax.f32 %v517_v15, 0.0  ;;  %v826_v20 = vadd.f32 %v825_v17, %v824_v16  ;;  %v827_v21 = vpop.f32.mrb[10].mxu0  ;;  %v902_v23 = vpop.f32.mrb[8].mxu1 }
 0x108   :  { %v828_v22 = vpop.f32.mrb[11].mxu0  ;;  %v537_v27 = vpop.f32.mrb[9].mxu1 }
 0x109   :  { %v757_v24 = vpack.c.bf16 %v571_v19, %v570_v18  ;;  %v829_v25 = vadd.f32 %v828_v22, %v827_v21  ;;  %v425_v26 = vadd.f32 %v826_v20, %v1131_v50  ;;  %v903_v28 = vpop.f32.mrb[10].mxu1 }
 0x10a   :  { %v540_v31 = vpop.f32.mrb[11].mxu1 }
 0x10b   :  { %789 = vst [vmem:[%s1179_s3 + $0x8] sm:$0xff] %v757_v24   ;;  %v522_v29 = vadd.f32 %v521_v10, %v425_v26  ;;  %v428_v30 = vadd.f32 %v829_v25, %v1131_v50 }
 0x10d   :  { %v525_v32 = vadd.f32 %v524_v14, %v428_v30  ;;  %v830_v33 = vpop.f32.mrb[12].mxu0  ;;  %v572_v35 = vmax.f32 %v522_v29, 0.0 }
 0x10e   :  { %v831_v34 = vpop.f32.mrb[13].mxu0 }
 0x10f   :  { %v573_v36 = vmax.f32 %v525_v32, 0.0  ;;  %v832_v37 = vadd.f32 %v831_v34, %v830_v33  ;;  %v833_v38 = vpop.f32.mrb[14].mxu0  ;;  %v1145_v40 = vpop.f32.mrb[12].mxu1 }
 0x110   :  { %v834_v39 = vpop.f32.mrb[15].mxu0  ;;  %v553_v44 = vpop.f32.mrb[13].mxu1 }
 0x111   :  { %v762_v41 = vpack.c.bf16 %v573_v36, %v572_v35  ;;  %v433_v42 = vadd.f32 %v832_v37, %v1131_v50  ;;  %v835_v43 = vadd.f32 %v834_v39, %v833_v38  ;;  %v907_v45 = vpop.f32.mrb[14].mxu1 }
 0x112   :  { %v556_v48 = vpop.f32.mrb[15].mxu1 }
 0x113   :  { %790 = vst [vmem:[%s1179_s3 + $0x10] sm:$0xff] %v762_v41   ;;  %v530_v46 = vadd.f32 %v898_v6, %v433_v42  ;;  %v436_v47 = vadd.f32 %v835_v43, %v1131_v50 }
 0x115   :  { %v533_v49 = vadd.f32 %v899_v11, %v436_v47  ;;  %v836_v51 = vpop.f32.mrb[16].mxu0  ;;  %v574_v53 = vmax.f32 %v530_v46, 0.0 }
 0x116   :  { %v837_v52 = vpop.f32.mrb[17].mxu0 }
 0x117   :  { %v575_v54 = vmax.f32 %v533_v49, 0.0  ;;  %v838_v55 = vadd.f32 %v837_v52, %v836_v51  ;;  %v839_v56 = vpop.f32.mrb[18].mxu0 }
 0x118   :  { %v840_v57 = vpop.f32.mrb[19].mxu0 }
 0x119   :  { %v767_v58 = vpack.c.bf16 %v575_v54, %v574_v53  ;;  %v841_v59 = vadd.f32 %v840_v57, %v839_v56  ;;  %v441_v60 = vadd.f32 %v838_v55, %v1131_v50 }
 0x11b   :  { %791 = vst [vmem:[%s1179_s3 + $0x18] sm:$0xff] %v767_v58   ;;  %v538_v61 = vadd.f32 %v537_v27, %v441_v60  ;;  %v444_v62 = vadd.f32 %v841_v59, %v1131_v50 }
 0x11d   :  { %v541_v63 = vadd.f32 %v540_v31, %v444_v62  ;;  %v842_v0 = vpop.f32.mrb[20].mxu0  ;;  %v576_v2 = vmax.f32 %v538_v61, 0.0 }
 0x11e   :  { %v843_v1 = vpop.f32.mrb[21].mxu0 }
 0x11f   :  { %v577_v3 = vmax.f32 %v541_v63, 0.0  ;;  %v844_v4 = vadd.f32 %v843_v1, %v842_v0  ;;  %v845_v5 = vpop.f32.mrb[22].mxu0 }
 0x120   :  { %v846_v6 = vpop.f32.mrb[23].mxu0 }
 0x121   :  { %v772_v7 = vpack.c.bf16 %v577_v3, %v576_v2  ;;  %v449_v8 = vadd.f32 %v844_v4, %v1131_v50  ;;  %v847_v9 = vadd.f32 %v846_v6, %v845_v5 }
 0x123   :  { %792 = vst [vmem:[%s1179_s3 + $0x20] sm:$0xff] %v772_v7   ;;  %v546_v10 = vadd.f32 %v902_v23, %v449_v8  ;;  %v452_v11 = vadd.f32 %v847_v9, %v1131_v50 }
 0x125   :  { %v549_v12 = vadd.f32 %v903_v28, %v452_v11  ;;  %v848_v13 = vpop.f32.mrb[24].mxu0  ;;  %v578_v15 = vmax.f32 %v546_v10, 0.0 }
 0x126   :  { %v849_v14 = vpop.f32.mrb[25].mxu0 }
 0x127   :  { %v579_v16 = vmax.f32 %v549_v12, 0.0  ;;  %v850_v17 = vadd.f32 %v849_v14, %v848_v13  ;;  %v851_v18 = vpop.f32.mrb[26].mxu0 }
 0x128   :  { %v852_v19 = vpop.f32.mrb[27].mxu0 }
 0x129   :  { %v777_v20 = vpack.c.bf16 %v579_v16, %v578_v15  ;;  %v853_v21 = vadd.f32 %v852_v19, %v851_v18  ;;  %v457_v22 = vadd.f32 %v850_v17, %v1131_v50 }
 0x12b   :  { %793 = vst [vmem:[%s1179_s3 + $0x28] sm:$0xff] %v777_v20   ;;  %v554_v24 = vadd.f32 %v553_v44, %v457_v22  ;;  %v460_v23 = vadd.f32 %v853_v21, %v1131_v50 }
 0x12d   :  { %v557_v25 = vadd.f32 %v556_v48, %v460_v23  ;;  %v854_v26 = vpop.f32.mrb[28].mxu0  ;;  %v580_v28 = vmax.f32 %v554_v24, 0.0 }
 0x12e   :  { %v855_v27 = vpop.f32.mrb[29].mxu0 }
 0x12f   :  { %v581_v29 = vmax.f32 %v557_v25, 0.0  ;;  %v856_v30 = vadd.f32 %v855_v27, %v854_v26  ;;  %v857_v31 = vpop.f32.mrb[30].mxu0 }
 0x130   :  { %v858_v32 = vpop.f32.mrb[31].mxu0 }
 0x131   :  { %v782_v33 = vpack.c.bf16 %v581_v29, %v580_v28  ;;  %v465_v34 = vadd.f32 %v856_v30, %v1131_v50  ;;  %v859_v35 = vadd.f32 %v858_v32, %v857_v31 }
 0x133   :  { %794 = vst [vmem:[%s1179_s3 + $0x30] sm:$0xff] %v782_v33   ;;  %v562_v36 = vadd.f32 %v1145_v40, %v465_v34  ;;  %v468_v37 = vadd.f32 %v859_v35, %v1131_v50 }
 0x135   :  { %v565_v38 = vadd.f32 %v907_v45, %v468_v37  ;;  %v582_v39 = vmax.f32 %v562_v36, 0.0 }
 0x137   :  { %v583_v41 = vmax.f32 %v565_v38, 0.0 }
 0x139   :  { %v787_v42 = vpack.c.bf16 %v583_v41, %v582_v39 }
 0x13b   :  { %795 = vst [vmem:[%s1179_s3 + $0x38] sm:$0xff] %v787_v42  }

// kernel: eitnet_forward.10
= control target key start
LH: loop header
LB: loop body
LE: loop exit
PB: predicated region body
PF: predicated region fallthrough
CT: control target
= control target key end

     0   :  { %s970_s1 = inlined_call_operand.vmem [shape: bf16[640,128], index: 1, kind: input, shape index: {}]   ;;  %s971_s0 = inlined_call_operand.vmem [shape: bf16[32,640], index: 0, kind: input, shape index: {}]   ;;  %s972_s2 = inlined_call_operand.vmem [shape: f32[1,128], index: 2, kind: input, shape index: {}]   ;;  %s973_s3 = inlined_call_operand.vmem [shape: bf16[32,128], index: 3, kind: output, shape index: {}]  }
   0x1   :  { %v737_v0 = vld [vmem:[%s970_s1 + $0x40] sm:$0xff]   ;;  %v741_v4 = vld [vmem:[%s970_s1 + $0x48] sm:$0xff]   ;;  %v745_v8 = vld [vmem:[%s970_s1 + $0x50] sm:$0xff]  }
   0x2   :  { %v738_v1 = vld [vmem:[%s970_s1] sm:$0xff]   ;;  %651 = vmatprep.subr.bf16.mxu0 %v737_v0  ;;  %v742_v5 = vld [vmem:[%s970_s1 + $0x8] sm:$0xff]   ;;  %v746_v9 = vld [vmem:[%s970_s1 + $0x10] sm:$0xff]  }
   0x3   :  { %v739_v2 = vld [vmem:[%s970_s1 + $0xc0] sm:$0xff]   ;;  %652 = vmatpush3.bf16.msra.mxu0 %v738_v1  ;;  %v743_v6 = vld [vmem:[%s970_s1 + $0xc8] sm:$0xff]   ;;  %v747_v10 = vld [vmem:[%s970_s1 + $0xd0] sm:$0xff]  }
   0x4   :  { %v740_v3 = vld [vmem:[%s970_s1 + $0x80] sm:$0xff]   ;;  %679 = vmatprep.subr.bf16.mxu1 %v739_v2  ;;  %653 = vmatprep.subr.bf16.mxu0 %v741_v4  ;;  %v744_v7 = vld [vmem:[%s970_s1 + $0x88] sm:$0xff]   ;;  %v748_v11 = vld [vmem:[%s970_s1 + $0x90] sm:$0xff]  }
   0x5   :  { %680 = vmatpush3.bf16.msra.mxu1 %v740_v3  ;;  %v749_v12 = vld [vmem:[%s970_s1 + $0x58] sm:$0xff]   ;;  %v753_v16 = vld [vmem:[%s970_s1 + $0x60] sm:$0xff]   ;;  %v757_v20 = vld [vmem:[%s970_s1 + $0x68] sm:$0xff]  }
   0x6   :  { %681 = vmatprep.subr.bf16.mxu1 %v743_v6  ;;  %v750_v13 = vld [vmem:[%s970_s1 + $0x18] sm:$0xff]   ;;  %v754_v17 = vld [vmem:[%s970_s1 + $0x20] sm:$0xff]   ;;  %v758_v21 = vld [vmem:[%s970_s1 + $0x28] sm:$0xff]  }
   0x7   :  { %654 = vmatpush3.bf16.msra.mxu0 %v742_v5  ;;  %v751_v14 = vld [vmem:[%s970_s1 + $0xd8] sm:$0xff]   ;;  %v755_v18 = vld [vmem:[%s970_s1 + $0xe0] sm:$0xff]   ;;  %v759_v22 = vld [vmem:[%s970_s1 + $0xe8] sm:$0xff]  }
   0x8   :  { %655 = vmatprep.subr.bf16.mxu0 %v745_v8  ;;  %v752_v15 = vld [vmem:[%s970_s1 + $0x98] sm:$0xff]   ;;  %v756_v19 = vld [vmem:[%s970_s1 + $0xa0] sm:$0xff]   ;;  %v760_v23 = vld [vmem:[%s970_s1 + $0xa8] sm:$0xff]  }
   0x9   :  { %682 = vmatpush3.bf16.msra.mxu1 %v744_v7  ;;  %v761_v24 = vld [vmem:[%s970_s1 + $0x70] sm:$0xff]   ;;  %v765_v28 = vld [vmem:[%s970_s1 + $0x78] sm:$0xff]   ;;  %v772_v34 = vld [vmem:[%s970_s1 + $0x100] sm:$0xff]  }
   0xa   :  { %683 = vmatprep.subr.bf16.mxu1 %v747_v10  ;;  %v762_v25 = vld [vmem:[%s970_s1 + $0x30] sm:$0xff]   ;;  %v766_v29 = vld [vmem:[%s970_s1 + $0x38] sm:$0xff]   ;;  %v775_v36 = vld [vmem:[%s971_s0 + $0xc] ss:$20 sps:$4 sm:$0xff]  }
   0xb   :  { %656 = vmatpush3.bf16.msra.mxu0 %v746_v9  ;;  %v763_v26 = vld [vmem:[%s970_s1 + $0xf0] sm:$0xff]   ;;  %v767_v30 = vld [vmem:[%s970_s1 + $0xf8] sm:$0xff]   ;;  %v776_v37 = vld [vmem:[%s970_s1 + $0x108] sm:$0xff]   ;;  %487 = vmatprep.mubr.bf16.mxu1 %v775_v36 }
   0xc   :  { %657 = vmatprep.subr.bf16.mxu0 %v749_v12  ;;  %v764_v27 = vld [vmem:[%s970_s1 + $0xb0] sm:$0xff]   ;;  %v770_v32 = vld [vmem:[%s971_s0 + $0x4] ss:$20 sps:$4 sm:$0xff]   ;;  %v773_v35 = vld [vmem:[%s971_s0 + $0x8] ss:$20 sps:$4 sm:$0xff]  }
   0xd   :  { %684 = vmatpush3.bf16.msra.mxu1 %v748_v11  ;;  %v768_v31 = vld [vmem:[%s971_s0] ss:$20 sps:$4 sm:$0xff]   ;;  %v771_v33 = vld [vmem:[%s970_s1 + $0xb8] sm:$0xff]   ;;  %438 = vmatprep.mubr.bf16.mxu0 %v770_v32  ;;  %v786_v43 = vld [vmem:[%s971_s0 + $0x30] ss:$20 sps:$4 sm:$0xff]  }
   0xe   :  { %685 = vmatprep.subr.bf16.mxu1 %v751_v14  ;;  %v777_v38 = vld [vmem:[%s970_s1 + $0x110] sm:$0xff]   ;;  %v780_v39 = vld [vmem:[%s971_s0 + $0x2c] ss:$20 sps:$4 sm:$0xff]   ;;  %v778_v40 = vld [vmem:[%s970_s1 + $0x118] sm:$0xff]  }
   0xf   :  { %658 = vmatpush3.bf16.msra.mxu0 %v750_v13  ;;  %v783_v41 = vld [vmem:[%s971_s0 + $0x28] ss:$20 sps:$4 sm:$0xff]   ;;  %v779_v44 = vld [vmem:[%s970_s1 + $0x120] sm:$0xff]   ;;  %v787_v47 = vld [vmem:[%s970_s1 + $0x130] sm:$0xff]  }
  0x10   :  { %659 = vmatprep.subr.bf16.mxu0 %v753_v16  ;;  %v784_v42 = vld [vmem:[%s971_s0 + $0x34] ss:$20 sps:$4 sm:$0xff]   ;;  %v789_v45 = vld [vmem:[%s971_s0 + $0x10] ss:$20 sps:$4 sm:$0xff]   ;;  %v788_v48 = vld [vmem:[%s970_s1 + $0x138] sm:$0xff]  }
  0x11   :  { %686 = vmatpush3.bf16.msra.mxu1 %v752_v15  ;;  %v782_v46 = vld [vmem:[%s970_s1 + $0x128] sm:$0xff]   ;;  %v581_v51 = vld [vmem:[%s972_s2] ss:$0 sm:$0xff] }
  0x12   :  { %687 = vmatprep.subr.bf16.mxu1 %v755_v18  ;;  %v790_v49 = vld [vmem:[%s971_s0 + $0x38] ss:$20 sps:$4 sm:$0xff]  }
  0x13   :  { %660 = vmatpush3.bf16.msra.mxu0 %v754_v17 }
  0x14   :  { %661 = vmatprep.subr.bf16.mxu0 %v757_v20 }
  0x15   :  { %688 = vmatpush3.bf16.msra.mxu1 %v756_v19 }
  0x16   :  { %689 = vmatprep.subr.bf16.mxu1 %v759_v22 }
  0x17   :  { %662 = vmatpush3.bf16.msra.mxu0 %v758_v21 }
  0x18   :  { %663 = vmatprep.subr.bf16.mxu0 %v761_v24 }
  0x19   :  { %690 = vmatpush3.bf16.msra.mxu1 %v760_v23 }
  0x1a   :  { %691 = vmatprep.subr.bf16.mxu1 %v763_v26 }
  0x1b   :  { %664 = vmatpush3.bf16.msra.mxu0 %v762_v25 }
  0x1c   :  { %665 = vmatprep.subr.bf16.mxu0 %v765_v28 }
  0x1d   :  { %692 = vmatpush3.bf16.msra.mxu1 %v764_v27 }
  0x1e   :  { %693 = vmatprep.subr.bf16.mxu1 %v767_v30 }
  0x1f   :  { %666 = vmatpush3.bf16.msra.mxu0 %v766_v29 }
  0x20   :  { %717 = vmatprep.subr.bf16.mxu0 %v772_v34 }
  0x21   :  { %694 = vmatpush3.bf16.msra.mxu1 %v771_v33 }
  0x22   :  { %439 = vmatmul.mubr.bf16.vlgmr.msra.gmra.mrb[0].mxu0 %v768_v31 }
  0x23   :  { %718 = vmatpush3.bf16.msra.mxu0 %v772_v34  ;;  %446 = vmatprep.mubr.bf16.mxu0 %v780_v39 }
  0x24   :  { %488 = vmatmul.mubr.bf16.vlgmr.msra.gmra.mrb[0].mxu1 %v773_v35  ;;  %719 = vmatprep.subr.bf16.mxu0 %v776_v37 }
  0x25   :  { %495 = vmatprep.mubr.bf16.mxu1 %v784_v42 }
  0x27   :  { %720 = vmatpush3.bf16.msra.mxu0 %v776_v37 }
  0x28   :  { %721 = vmatprep.subr.bf16.mxu0 %v777_v38 }
  0x2a   :  { %447 = vmatmul.mubr.bf16.gmra.mrb[4].mxu0 %v783_v41 }
  0x2b   :  { %722 = vmatpush3.bf16.msra.mxu0 %v777_v38  ;;  %733 = vmatprep.mubr.bf16.mxu0 %v789_v45 }
  0x2c   :  { %723 = vmatprep.subr.bf16.mxu0 %v778_v40  ;;  %496 = vmatmul.mubr.bf16.gmra.mrb[4].mxu1 %v786_v43 }
  0x2f   :  { %724 = vmatpush3.bf16.msra.mxu0 %v778_v40 }
  0x30   :  { %725 = vmatprep.subr.bf16.mxu0 %v779_v44 }
  0x33   :  { %726 = vmatpush3.bf16.msra.mxu0 %v779_v44 }
  0x34   :  { %727 = vmatprep.subr.bf16.mxu0 %v782_v46 }
  0x37   :  { %728 = vmatpush3.bf16.msra.mxu0 %v782_v46 }
  0x38   :  { %729 = vmatprep.subr.bf16.mxu0 %v787_v47 }
  0x3b   :  { %730 = vmatpush3.bf16.msra.mxu0 %v787_v47 }
  0x3c   :  { %731 = vmatprep.subr.bf16.mxu0 %v788_v48 }
  0x3f   :  { %732 = vmatpush3.bf16.msra.mxu0 %v788_v48 }
  0x42   :  { %734 = vmatmul.mubr.bf16.vlgmr.msra.gmra.mrb[8].mxu0 %v790_v49 }
  0xf5   :  { %v667_v50 = vpop.f32.mrb[0].mxu0 }
  0xf6   :  { %v668_v52 = vpop.f32.mrb[1].mxu0 }
  0xf7   :  { %v669_v53 = vadd.f32 %v668_v52, %v667_v50  ;;  %v670_v54 = vpop.f32.mrb[2].mxu0  ;;  %v695_v55 = vpop.f32.mrb[0].mxu1 }
  0xf8   :  { %v671_v56 = vpop.f32.mrb[3].mxu0  ;;  %v696_v59 = vpop.f32.mrb[1].mxu1 }
  0xf9   :  { %v441_v57 = vadd.f32 %v669_v53, %v581_v51  ;;  %v672_v58 = vadd.f32 %v671_v56, %v670_v54  ;;  %v697_v60 = vadd.f32 %v696_v59, %v695_v55  ;;  %v698_v61 = vpop.f32.mrb[2].mxu1 }
  0xfa   :  { %v699_v63 = vpop.f32.mrb[3].mxu1 }
  0xfb   :  { %v444_v62 = vadd.f32 %v672_v58, %v581_v51  ;;  %v700_v0 = vadd.f32 %v699_v63, %v698_v61  ;;  %v490_v1 = vadd.f32 %v697_v60, %v441_v57 }
  0xfd   :  { %v673_v2 = vpop.f32.mrb[4].mxu0  ;;  %v493_v4 = vadd.f32 %v700_v0, %v444_v62 }
  0xfe   :  { %v674_v3 = vpop.f32.mrb[5].mxu0 }
  0xff   :  { %v675_v5 = vadd.f32 %v674_v3, %v673_v2  ;;  %v676_v6 = vpop.f32.mrb[6].mxu0  ;;  %v701_v7 = vpop.f32.mrb[4].mxu1 }
 0x100   :  { %v677_v8 = vpop.f32.mrb[7].mxu0  ;;  %v702_v11 = vpop.f32.mrb[5].mxu1 }
 0x101   :  { %v449_v9 = vadd.f32 %v675_v5, %v581_v51  ;;  %v678_v10 = vadd.f32 %v677_v8, %v676_v6  ;;  %v703_v12 = vadd.f32 %v702_v11, %v701_v7  ;;  %v704_v13 = vpop.f32.mrb[6].mxu1 }
 0x102   :  { %v705_v15 = vpop.f32.mrb[7].mxu1 }
 0x103   :  { %v452_v14 = vadd.f32 %v678_v10, %v581_v51  ;;  %v706_v16 = vadd.f32 %v705_v15, %v704_v13  ;;  %v498_v17 = vadd.f32 %v703_v12, %v449_v9 }
 0x105   :  { %v501_v18 = vadd.f32 %v706_v16, %v452_v14 }
 0x115   :  { %v735_v19 = vpop.f32.mrb[8].mxu0 }
 0x116   :  { %v547_v20 = vadd.f32 %v735_v19, %v498_v17  ;;  %v538_v21 = vpop.f32.mrb[9].mxu0 }
 0x117   :  { %v539_v22 = vadd.f32 %v538_v21, %v490_v1  ;;  %v736_v23 = vpop.f32.mrb[10].mxu0 }
 0x118   :  { %v550_v24 = vadd.f32 %v736_v23, %v501_v18  ;;  %v541_v25 = vpop.f32.mrb[11].mxu0  ;;  %v555_v27 = vmax.f32 %v547_v20, 0.0 }
 0x119   :  { %v542_v26 = vadd.f32 %v541_v25, %v493_v4  ;;  %v553_v29 = vmax.f32 %v539_v22, 0.0 }
 0x11a   :  { %v556_v28 = vmax.f32 %v550_v24, 0.0 }
 0x11b   :  { %v554_v30 = vmax.f32 %v542_v26, 0.0 }
 0x11c   :  { %v648_v31 = vpack.c.bf16 %v556_v28, %v555_v27 }
 0x11d   :  { %v643_v32 = vpack.c.bf16 %v554_v30, %v553_v29 }
 0x11e   :  { %650 = vst [vmem:[%s973_s3 + $0x8] sm:$0xff] %v648_v31  }
 0x11f   :  { %644 = vst [vmem:[%s973_s3] sm:$0xff] %v643_v32  }

// kernel: eitnet_forward.11
= control target key start
LH: loop header
LB: loop body
LE: loop exit
PB: predicated region body
PF: predicated region fallthrough
CT: control target
= control target key end

     0   :  { %s2299_s1 = inlined_call_operand.vmem [shape: bf16[1152,256], index: 1, kind: input, shape index: {}]   ;;  %s2300_s0 = inlined_call_operand.vmem [shape: bf16[32,1152], index: 0, kind: input, shape index: {}]   ;;  %s2301_s2 = inlined_call_operand.vmem [shape: f32[1,256], index: 2, kind: input, shape index: {}]   ;;  %s2302_s3 = inlined_call_operand.vmem [shape: bf16[32,256], index: 3, kind: output, shape index: {}]  }
   0x1   :  { %v1535_v0 = vld [vmem:[%s2299_s1 + $0x4] ss:$8 sps:$4 sm:$0xff]   ;;  %v1539_v2 = vld [vmem:[%s2299_s1] ss:$8 sps:$4 sm:$0xff]   ;;  %v1541_v4 = vld [vmem:[%s2299_s1 + $0x14] ss:$8 sps:$4 sm:$0xff]  }
   0x2   :  { %v1537_v1 = vld [vmem:[%s2299_s1 + $0x204] ss:$8 sps:$4 sm:$0xff]   ;;  %1003 = vmatprep.subr.bf16.mxu1 %v1535_v0  ;;  %v1540_v3 = vld [vmem:[%s2299_s1 + $0x200] ss:$8 sps:$4 sm:$0xff]   ;;  %v1543_v5 = vld [vmem:[%s2299_s1 + $0x214] ss:$8 sps:$4 sm:$0xff]  }
   0x3   :  { %1109 = vmatprep.subr.bf16.mxu0 %v1537_v1  ;;  %1004 = vmatpush1.bf16.msra.mxu1 %v1539_v2  ;;  %v1545_v6 = vld [vmem:[%s2299_s1 + $0x10] ss:$8 sps:$4 sm:$0xff]   ;;  %v1547_v8 = vld [vmem:[%s2299_s1 + $0x24] ss:$8 sps:$4 sm:$0xff]   ;;  %v1551_v10 = vld [vmem:[%s2299_s1 + $0x20] ss:$8 sps:$4 sm:$0xff]  }
   0x4   :  { %1110 = vmatpush1.bf16.msra.mxu0 %v1540_v3  ;;  %1005 = vmatprep.subr.bf16.mxu1 %v1541_v4  ;;  %v1546_v7 = vld [vmem:[%s2299_s1 + $0x210] ss:$8 sps:$4 sm:$0xff]   ;;  %v1549_v9 = vld [vmem:[%s2299_s1 + $0x224] ss:$8 sps:$4 sm:$0xff]   ;;  %v1552_v11 = vld [vmem:[%s2299_s1 + $0x220] ss:$8 sps:$4 sm:$0xff]  }
   0x5   :  { %1111 = vmatprep.subr.bf16.mxu0 %v1543_v5  ;;  %v1553_v12 = vld [vmem:[%s2299_s1 + $0x34] ss:$8 sps:$4 sm:$0xff]   ;;  %v1557_v14 = vld [vmem:[%s2299_s1 + $0x30] ss:$8 sps:$4 sm:$0xff]   ;;  %v1559_v16 = vld [vmem:[%s2299_s1 + $0x44] ss:$8 sps:$4 sm:$0xff]  }
   0x6   :  { %v1555_v13 = vld [vmem:[%s2299_s1 + $0x234] ss:$8 sps:$4 sm:$0xff]   ;;  %v1558_v15 = vld [vmem:[%s2299_s1 + $0x230] ss:$8 sps:$4 sm:$0xff]   ;;  %v1561_v17 = vld [vmem:[%s2299_s1 + $0x244] ss:$8 sps:$4 sm:$0xff]  }
   0x7   :  { %1006 = vmatpush1.bf16.msra.mxu1 %v1545_v6  ;;  %v1563_v18 = vld [vmem:[%s2299_s1 + $0x40] ss:$8 sps:$4 sm:$0xff]   ;;  %v1565_v20 = vld [vmem:[%s2299_s1 + $0x54] ss:$8 sps:$4 sm:$0xff]   ;;  %v1569_v22 = vld [vmem:[%s2299_s1 + $0x50] ss:$8 sps:$4 sm:$0xff]  }
   0x8   :  { %1112 = vmatpush1.bf16.msra.mxu0 %v1546_v7  ;;  %1007 = vmatprep.subr.bf16.mxu1 %v1547_v8  ;;  %v1564_v19 = vld [vmem:[%s2299_s1 + $0x240] ss:$8 sps:$4 sm:$0xff]   ;;  %v1567_v21 = vld [vmem:[%s2299_s1 + $0x254] ss:$8 sps:$4 sm:$0xff]   ;;  %v1570_v23 = vld [vmem:[%s2299_s1 + $0x250] ss:$8 sps:$4 sm:$0xff]  }
   0x9   :  { %1113 = vmatprep.subr.bf16.mxu0 %v1549_v9  ;;  %v1571_v24 = vld [vmem:[%s2299_s1 + $0x64] ss:$8 sps:$4 sm:$0xff]   ;;  %v1575_v26 = vld [vmem:[%s2299_s1 + $0x60] ss:$8 sps:$4 sm:$0xff]   ;;  %v1577_v28 = vld [vmem:[%s2299_s1 + $0x74] ss:$8 sps:$4 sm:$0xff]  }
   0xa   :  { %v1573_v25 = vld [vmem:[%s2299_s1 + $0x264] ss:$8 sps:$4 sm:$0xff]   ;;  %v1576_v27 = vld [vmem:[%s2299_s1 + $0x260] ss:$8 sps:$4 sm:$0xff]   ;;  %v1579_v29 = vld [vmem:[%s2299_s1 + $0x274] ss:$8 sps:$4 sm:$0xff]  }
   0xb   :  { %1008 = vmatpush1.bf16.msra.mxu1 %v1551_v10  ;;  %v1581_v30 = vld [vmem:[%s2299_s1 + $0x70] ss:$8 sps:$4 sm:$0xff]   ;;  %v1583_v32 = vld [vmem:[%s2299_s1 + $0x84] ss:$8 sps:$4 sm:$0xff]   ;;  %v1587_v34 = vld [vmem:[%s2299_s1 + $0x80] ss:$8 sps:$4 sm:$0xff]  }
   0xc   :  { %1114 = vmatpush1.bf16.msra.mxu0 %v1552_v11  ;;  %1009 = vmatprep.subr.bf16.mxu1 %v1553_v12  ;;  %v1582_v31 = vld [vmem:[%s2299_s1 + $0x270] ss:$8 sps:$4 sm:$0xff]   ;;  %v1585_v33 = vld [vmem:[%s2299_s1 + $0x284] ss:$8 sps:$4 sm:$0xff]   ;;  %v1588_v35 = vld [vmem:[%s2299_s1 + $0x280] ss:$8 sps:$4 sm:$0xff]  }
   0xd   :  { %1115 = vmatprep.subr.bf16.mxu0 %v1555_v13  ;;  %v1589_v36 = vld [vmem:[%s2299_s1 + $0x94] ss:$8 sps:$4 sm:$0xff]   ;;  %v1593_v38 = vld [vmem:[%s2299_s1 + $0x90] ss:$8 sps:$4 sm:$0xff]   ;;  %v1595_v40 = vld [vmem:[%s2299_s1 + $0xa4] ss:$8 sps:$4 sm:$0xff]  }
   0xe   :  { %v1591_v37 = vld [vmem:[%s2299_s1 + $0x294] ss:$8 sps:$4 sm:$0xff]   ;;  %v1594_v39 = vld [vmem:[%s2299_s1 + $0x290] ss:$8 sps:$4 sm:$0xff]   ;;  %v1597_v41 = vld [vmem:[%s2299_s1 + $0x2a4] ss:$8 sps:$4 sm:$0xff]  }
   0xf   :  { %1010 = vmatpush1.bf16.msra.mxu1 %v1557_v14  ;;  %v1599_v42 = vld [vmem:[%s2299_s1 + $0xa0] ss:$8 sps:$4 sm:$0xff]   ;;  %v1601_v44 = vld [vmem:[%s2299_s1 + $0xb4] ss:$8 sps:$4 sm:$0xff]   ;;  %v1605_v46 = vld [vmem:[%s2299_s1 + $0xb0] ss:$8 sps:$4 sm:$0xff]  }
  0x10   :  { %1116 = vmatpush1.bf16.msra.mxu0 %v1558_v15  ;;  %1011 = vmatprep.subr.bf16.mxu1 %v1559_v16  ;;  %v1600_v43 = vld [vmem:[%s2299_s1 + $0x2a0] ss:$8 sps:$4 sm:$0xff]   ;;  %v1603_v45 = vld [vmem:[%s2299_s1 + $0x2b4] ss:$8 sps:$4 sm:$0xff]   ;;  %v1606_v47 = vld [vmem:[%s2299_s1 + $0x2b0] ss:$8 sps:$4 sm:$0xff]  }
  0x11   :  { %1117 = vmatprep.subr.bf16.mxu0 %v1561_v17  ;;  %v1633_v48 = vld [vmem:[%s2300_s0 + $0x4] ss:$36 sps:$4 sm:$0xff]   ;;  %v1639_v51 = vld [vmem:[%s2300_s0 + $0x14] ss:$36 sps:$4 sm:$0xff]  }
  0x12   :  { %v1607_v49 = vld [vmem:[%s2299_s1 + $0xc4] ss:$8 sps:$4 sm:$0xff]   ;;  %1035 = vmatprep.mubr.bf16.mxu1 %v1633_v48  ;;  %v1611_v52 = vld [vmem:[%s2299_s1 + $0xc0] ss:$8 sps:$4 sm:$0xff]   ;;  %v1613_v54 = vld [vmem:[%s2299_s1 + $0xd4] ss:$8 sps:$4 sm:$0xff]   ;;  %1141 = vmatprep.mubr.bf16.mxu0 %v1639_v51 }
  0x13   :  { %1012 = vmatpush1.bf16.msra.mxu1 %v1563_v18  ;;  %v1609_v50 = vld [vmem:[%s2299_s1 + $0x2c4] ss:$8 sps:$4 sm:$0xff]   ;;  %v1612_v53 = vld [vmem:[%s2299_s1 + $0x2c0] ss:$8 sps:$4 sm:$0xff]   ;;  %v1615_v55 = vld [vmem:[%s2299_s1 + $0x2d4] ss:$8 sps:$4 sm:$0xff]  }
  0x14   :  { %1118 = vmatpush1.bf16.msra.mxu0 %v1564_v19  ;;  %1013 = vmatprep.subr.bf16.mxu1 %v1565_v20  ;;  %v1617_v56 = vld [vmem:[%s2299_s1 + $0xd0] ss:$8 sps:$4 sm:$0xff]   ;;  %v1619_v58 = vld [vmem:[%s2299_s1 + $0xe4] ss:$8 sps:$4 sm:$0xff]   ;;  %v1623_v60 = vld [vmem:[%s2299_s1 + $0xe0] ss:$8 sps:$4 sm:$0xff]  }
  0x15   :  { %1119 = vmatprep.subr.bf16.mxu0 %v1567_v21  ;;  %v1618_v57 = vld [vmem:[%s2299_s1 + $0x2d0] ss:$8 sps:$4 sm:$0xff]   ;;  %v1621_v59 = vld [vmem:[%s2299_s1 + $0x2e4] ss:$8 sps:$4 sm:$0xff]   ;;  %v1624_v61 = vld [vmem:[%s2299_s1 + $0x2e0] ss:$8 sps:$4 sm:$0xff]  }
  0x16   :  { %v1625_v62 = vld [vmem:[%s2299_s1 + $0xf4] ss:$8 sps:$4 sm:$0xff]   ;;  %v1629_v0 = vld [vmem:[%s2299_s1 + $0xf0] ss:$8 sps:$4 sm:$0xff]   ;;  %v1636_v2 = vld [vmem:[%s2299_s1 + $0x104] ss:$8 sps:$4 sm:$0xff]  }
  0x17   :  { %1014 = vmatpush1.bf16.msra.mxu1 %v1569_v22  ;;  %v1627_v63 = vld [vmem:[%s2299_s1 + $0x2f4] ss:$8 sps:$4 sm:$0xff]   ;;  %v1630_v1 = vld [vmem:[%s2299_s1 + $0x2f0] ss:$8 sps:$4 sm:$0xff]   ;;  %v1642_v3 = vld [vmem:[%s2299_s1 + $0x304] ss:$8 sps:$4 sm:$0xff]  }
  0x18   :  { %1120 = vmatpush1.bf16.msra.mxu0 %v1570_v23  ;;  %1015 = vmatprep.subr.bf16.mxu1 %v1571_v24  ;;  %v1631_v4 = vld [vmem:[%s2300_s0] ss:$36 sps:$4 sm:$0xff]   ;;  %v1637_v6 = vld [vmem:[%s2300_s0 + $0x10] ss:$36 sps:$4 sm:$0xff]  }
  0x19   :  { %1121 = vmatprep.subr.bf16.mxu0 %v1573_v25  ;;  %v1634_v5 = vld [vmem:[%s2299_s1 + $0x100] ss:$8 sps:$4 sm:$0xff]   ;;  %v1645_v8 = vld [vmem:[%s2299_s1 + $0x114] ss:$8 sps:$4 sm:$0xff]   ;;  %v1643_v10 = vld [vmem:[%s2299_s1 + $0x110] ss:$8 sps:$4 sm:$0xff]  }
  0x1a   :  { %v1640_v7 = vld [vmem:[%s2299_s1 + $0x300] ss:$8 sps:$4 sm:$0xff]   ;;  %v1648_v9 = vld [vmem:[%s2299_s1 + $0x314] ss:$8 sps:$4 sm:$0xff]   ;;  %v1646_v11 = vld [vmem:[%s2299_s1 + $0x310] ss:$8 sps:$4 sm:$0xff]  }
  0x1b   :  { %1016 = vmatpush1.bf16.msra.mxu1 %v1575_v26  ;;  %v1651_v12 = vld [vmem:[%s2299_s1 + $0x124] ss:$8 sps:$4 sm:$0xff]   ;;  %v1649_v14 = vld [vmem:[%s2299_s1 + $0x120] ss:$8 sps:$4 sm:$0xff]   ;;  %v1657_v16 = vld [vmem:[%s2299_s1 + $0x134] ss:$8 sps:$4 sm:$0xff]  }
  0x1c   :  { %1122 = vmatpush1.bf16.msra.mxu0 %v1576_v27  ;;  %1017 = vmatprep.subr.bf16.mxu1 %v1577_v28  ;;  %v1654_v13 = vld [vmem:[%s2299_s1 + $0x324] ss:$8 sps:$4 sm:$0xff]   ;;  %v1652_v15 = vld [vmem:[%s2299_s1 + $0x320] ss:$8 sps:$4 sm:$0xff]   ;;  %v1660_v17 = vld [vmem:[%s2299_s1 + $0x334] ss:$8 sps:$4 sm:$0xff]  }
  0x1d   :  { %1123 = vmatprep.subr.bf16.mxu0 %v1579_v29  ;;  %v1655_v18 = vld [vmem:[%s2299_s1 + $0x130] ss:$8 sps:$4 sm:$0xff]   ;;  %v1663_v20 = vld [vmem:[%s2299_s1 + $0x144] ss:$8 sps:$4 sm:$0xff]   ;;  %v1661_v22 = vld [vmem:[%s2299_s1 + $0x140] ss:$8 sps:$4 sm:$0xff]  }
  0x1e   :  { %v1658_v19 = vld [vmem:[%s2299_s1 + $0x330] ss:$8 sps:$4 sm:$0xff]   ;;  %v1666_v21 = vld [vmem:[%s2299_s1 + $0x344] ss:$8 sps:$4 sm:$0xff]   ;;  %v1664_v23 = vld [vmem:[%s2299_s1 + $0x340] ss:$8 sps:$4 sm:$0xff]  }
  0x1f   :  { %1018 = vmatpush1.bf16.msra.mxu1 %v1581_v30  ;;  %v1669_v24 = vld [vmem:[%s2299_s1 + $0x154] ss:$8 sps:$4 sm:$0xff]   ;;  %v1667_v26 = vld [vmem:[%s2299_s1 + $0x150] ss:$8 sps:$4 sm:$0xff]   ;;  %v1675_v28 = vld [vmem:[%s2299_s1 + $0x164] ss:$8 sps:$4 sm:$0xff]  }
  0x20   :  { %1124 = vmatpush1.bf16.msra.mxu0 %v1582_v31  ;;  %1019 = vmatprep.subr.bf16.mxu1 %v1583_v32  ;;  %v1672_v25 = vld [vmem:[%s2299_s1 + $0x354] ss:$8 sps:$4 sm:$0xff]   ;;  %v1670_v27 = vld [vmem:[%s2299_s1 + $0x350] ss:$8 sps:$4 sm:$0xff]   ;;  %v1725_v31 = vld [vmem:[%s2300_s0 + $0x48] ss:$36 sps:$4 sm:$0xff]  }
  0x21   :  { %1125 = vmatprep.subr.bf16.mxu0 %v1585_v33  ;;  %v1721_v29 = vld [vmem:[%s2300_s0 + $0x4c] ss:$36 sps:$4 sm:$0xff]   ;;  %v1723_v30 = vld [vmem:[%s2300_s0 + $0x5c] ss:$36 sps:$4 sm:$0xff]  }
  0x22   :  { %v1678_v32 = vld [vmem:[%s2299_s1 + $0x364] ss:$8 sps:$4 sm:$0xff]   ;;  %v1729_v33 = vld [vmem:[%s2300_s0 + $0x58] ss:$36 sps:$4 sm:$0xff]  }
  0x23   :  { %1020 = vmatpush1.bf16.msra.mxu1 %v1587_v34  ;;  %v1673_v34 = vld [vmem:[%s2299_s1 + $0x160] ss:$8 sps:$4 sm:$0xff]   ;;  %v1691_v48 = vld [vmem:[%s2299_s1 + $0x190] ss:$8 sps:$4 sm:$0xff]   ;;  %v1702_v51 = vld [vmem:[%s2299_s1 + $0x3a4] ss:$8 sps:$4 sm:$0xff]  }
  0x24   :  { %1126 = vmatpush1.bf16.msra.mxu0 %v1588_v35  ;;  %1021 = vmatprep.subr.bf16.mxu1 %v1589_v36  ;;  %v1676_v35 = vld [vmem:[%s2299_s1 + $0x360] ss:$8 sps:$4 sm:$0xff]   ;;  %v1681_v36 = vld [vmem:[%s2299_s1 + $0x174] ss:$8 sps:$4 sm:$0xff]  }
  0x25   :  { %1127 = vmatprep.subr.bf16.mxu0 %v1591_v37  ;;  %v1684_v37 = vld [vmem:[%s2299_s1 + $0x374] ss:$8 sps:$4 sm:$0xff]  }
  0x27   :  { %1022 = vmatpush1.bf16.msra.mxu1 %v1593_v38  ;;  %v1679_v38 = vld [vmem:[%s2299_s1 + $0x170] ss:$8 sps:$4 sm:$0xff]  }
  0x28   :  { %1128 = vmatpush1.bf16.msra.mxu0 %v1594_v39  ;;  %1023 = vmatprep.subr.bf16.mxu1 %v1595_v40  ;;  %v1682_v39 = vld [vmem:[%s2299_s1 + $0x370] ss:$8 sps:$4 sm:$0xff]   ;;  %v1687_v40 = vld [vmem:[%s2299_s1 + $0x184] ss:$8 sps:$4 sm:$0xff]  }
  0x29   :  { %1129 = vmatprep.subr.bf16.mxu0 %v1597_v41  ;;  %v1741_v41 = vld [vmem:[%s2300_s0 + $0xc] ss:$36 sps:$4 sm:$0xff]  }
  0x2b   :  { %1024 = vmatpush1.bf16.msra.mxu1 %v1599_v42  ;;  %v1690_v42 = vld [vmem:[%s2299_s1 + $0x384] ss:$8 sps:$4 sm:$0xff]  }
  0x2c   :  { %1130 = vmatpush1.bf16.msra.mxu0 %v1600_v43  ;;  %1025 = vmatprep.subr.bf16.mxu1 %v1601_v44  ;;  %v1744_v43 = vld [vmem:[%s2300_s0 + $0x1c] ss:$36 sps:$4 sm:$0xff]  }
  0x2d   :  { %1131 = vmatprep.subr.bf16.mxu0 %v1603_v45  ;;  %v1685_v44 = vld [vmem:[%s2299_s1 + $0x180] ss:$8 sps:$4 sm:$0xff]  }
  0x2e   :  { %v1688_v45 = vld [vmem:[%s2299_s1 + $0x380] ss:$8 sps:$4 sm:$0xff]  }
  0x2f   :  { %1026 = vmatpush1.bf16.msra.mxu1 %v1605_v46  ;;  %v1693_v46 = vld [vmem:[%s2299_s1 + $0x194] ss:$8 sps:$4 sm:$0xff]  }
  0x30   :  { %1132 = vmatpush1.bf16.msra.mxu0 %v1606_v47  ;;  %1027 = vmatprep.subr.bf16.mxu1 %v1607_v49  ;;  %v1696_v47 = vld [vmem:[%s2299_s1 + $0x394] ss:$8 sps:$4 sm:$0xff]   ;;  %v1694_v49 = vld [vmem:[%s2299_s1 + $0x390] ss:$8 sps:$4 sm:$0xff]  }
  0x31   :  { %1133 = vmatprep.subr.bf16.mxu0 %v1609_v50  ;;  %v1699_v50 = vld [vmem:[%s2299_s1 + $0x1a4] ss:$8 sps:$4 sm:$0xff]  }
  0x33   :  { %1028 = vmatpush1.bf16.msra.mxu1 %v1611_v52  ;;  %v1697_v52 = vld [vmem:[%s2299_s1 + $0x1a0] ss:$8 sps:$4 sm:$0xff]  }
  0x34   :  { %1134 = vmatpush1.bf16.msra.mxu0 %v1612_v53  ;;  %1029 = vmatprep.subr.bf16.mxu1 %v1613_v54  ;;  %v1700_v53 = vld [vmem:[%s2299_s1 + $0x3a0] ss:$8 sps:$4 sm:$0xff]   ;;  %v1705_v54 = vld [vmem:[%s2299_s1 + $0x1b4] ss:$8 sps:$4 sm:$0xff]  }
  0x35   :  { %1135 = vmatprep.subr.bf16.mxu0 %v1615_v55  ;;  %v1708_v55 = vld [vmem:[%s2299_s1 + $0x3b4] ss:$8 sps:$4 sm:$0xff]  }
  0x37   :  { %1030 = vmatpush1.bf16.msra.mxu1 %v1617_v56  ;;  %v1703_v56 = vld [vmem:[%s2299_s1 + $0x1b0] ss:$8 sps:$4 sm:$0xff]  }
  0x38   :  { %1136 = vmatpush1.bf16.msra.mxu0 %v1618_v57  ;;  %1031 = vmatprep.subr.bf16.mxu1 %v1619_v58  ;;  %v1706_v57 = vld [vmem:[%s2299_s1 + $0x3b0] ss:$8 sps:$4 sm:$0xff]   ;;  %v1711_v58 = vld [vmem:[%s2299_s1 + $0x1c4] ss:$8 sps:$4 sm:$0xff]  }
  0x39   :  { %1137 = vmatprep.subr.bf16.mxu0 %v1621_v59  ;;  %v1714_v59 = vld [vmem:[%s2299_s1 + $0x3c4] ss:$8 sps:$4 sm:$0xff]  }
  0x3b   :  { %1032 = vmatpush1.bf16.msra.mxu1 %v1623_v60  ;;  %v1709_v60 = vld [vmem:[%s2299_s1 + $0x1c0] ss:$8 sps:$4 sm:$0xff]  }
  0x3c   :  { %1138 = vmatpush1.bf16.msra.mxu0 %v1624_v61  ;;  %1033 = vmatprep.subr.bf16.mxu1 %v1625_v62  ;;  %v1712_v61 = vld [vmem:[%s2299_s1 + $0x3c0] ss:$8 sps:$4 sm:$0xff]   ;;  %v1717_v62 = vld [vmem:[%s2299_s1 + $0x1d4] ss:$8 sps:$4 sm:$0xff]  }
  0x3d   :  { %1139 = vmatprep.subr.bf16.mxu0 %v1627_v63  ;;  %v1720_v63 = vld [vmem:[%s2299_s1 + $0x3d4] ss:$8 sps:$4 sm:$0xff]  }
  0x3f   :  { %1034 = vmatpush1.bf16.msra.mxu1 %v1629_v0  ;;  %v1715_v0 = vld [vmem:[%s2299_s1 + $0x1d0] ss:$8 sps:$4 sm:$0xff]  }
  0x40   :  { %1140 = vmatpush1.bf16.msra.mxu0 %v1630_v1  ;;  %1056 = vmatprep.subr.bf16.mxu1 %v1636_v2  ;;  %v1718_v1 = vld [vmem:[%s2299_s1 + $0x3d0] ss:$8 sps:$4 sm:$0xff]   ;;  %v1728_v2 = vld [vmem:[%s2299_s1 + $0x1e4] ss:$8 sps:$4 sm:$0xff]  }
  0x41   :  { %1162 = vmatprep.subr.bf16.mxu0 %v1642_v3  ;;  %v1732_v3 = vld [vmem:[%s2299_s1 + $0x3e4] ss:$8 sps:$4 sm:$0xff]  }
  0x42   :  { %1036 = vmatmul.mubr.bf16.vlgmr.msra.gmra.mrb[0].mxu1 %v1631_v4  ;;  %v1726_v4 = vld [vmem:[%s2299_s1 + $0x1e0] ss:$8 sps:$4 sm:$0xff]  }
  0x43   :  { %1142 = vmatmul.mubr.bf16.vlgmr.msra.gmra.mrb[0].mxu0 %v1637_v6  ;;  %1057 = vmatpush1.bf16.msra.mxu1 %v1634_v5  ;;  %v1730_v5 = vld [vmem:[%s2299_s1 + $0x3e0] ss:$8 sps:$4 sm:$0xff]   ;;  %v1735_v6 = vld [vmem:[%s2299_s1 + $0x1f4] ss:$8 sps:$4 sm:$0xff]  }
  0x44   :  { %1163 = vmatpush1.bf16.msra.mxu0 %v1640_v7  ;;  %1058 = vmatprep.subr.bf16.mxu1 %v1645_v8  ;;  %v1738_v7 = vld [vmem:[%s2299_s1 + $0x3f4] ss:$8 sps:$4 sm:$0xff]   ;;  %v1733_v8 = vld [vmem:[%s2299_s1 + $0x1f0] ss:$8 sps:$4 sm:$0xff]  }
  0x45   :  { %1164 = vmatprep.subr.bf16.mxu0 %v1648_v9  ;;  %1045 = vmatprep.mubr.bf16.mxu1 %v1721_v29  ;;  %v1736_v9 = vld [vmem:[%s2299_s1 + $0x3f0] ss:$8 sps:$4 sm:$0xff]   ;;  %v1771_v29 = vld [vmem:[%s2299_s1 + $0x464] ss:$8 sps:$4 sm:$0xff]  }
  0x46   :  { %1151 = vmatprep.mubr.bf16.mxu0 %v1723_v30  ;;  %v1769_v30 = vld [vmem:[%s2299_s1 + $0x460] ss:$8 sps:$4 sm:$0xff]  }
  0x47   :  { %1059 = vmatpush1.bf16.msra.mxu1 %v1643_v10  ;;  %v1747_v10 = vld [vmem:[%s2299_s1 + $0x404] ss:$8 sps:$4 sm:$0xff]  }
  0x48   :  { %1165 = vmatpush1.bf16.msra.mxu0 %v1646_v11  ;;  %1060 = vmatprep.subr.bf16.mxu1 %v1651_v12  ;;  %v1739_v11 = vld [vmem:[%s2300_s0 + $0x8] ss:$36 sps:$4 sm:$0xff]   ;;  %v1742_v12 = vld [vmem:[%s2300_s0 + $0x18] ss:$36 sps:$4 sm:$0xff]  }
  0x49   :  { %1166 = vmatprep.subr.bf16.mxu0 %v1654_v13  ;;  %v1745_v13 = vld [vmem:[%s2299_s1 + $0x400] ss:$8 sps:$4 sm:$0xff]  }
  0x4a   :  { %1046 = vmatmul.mubr.bf16.gmra.mrb[4].mxu1 %v1725_v31  ;;  %v1774_v31 = vld [vmem:[%s2299_s1 + $0x474] ss:$8 sps:$4 sm:$0xff]  }
  0x4b   :  { %1061 = vmatpush1.bf16.msra.mxu1 %v1649_v14  ;;  %1152 = vmatmul.mubr.bf16.gmra.mrb[4].mxu0 %v1729_v33  ;;  %v1750_v14 = vld [vmem:[%s2299_s1 + $0x414] ss:$8 sps:$4 sm:$0xff]   ;;  %v1775_v33 = vld [vmem:[%s2300_s0 + $0x20] ss:$36 sps:$4 sm:$0xff]  }
  0x4c   :  { %1167 = vmatpush1.bf16.msra.mxu0 %v1652_v15  ;;  %1062 = vmatprep.subr.bf16.mxu1 %v1657_v16  ;;  %v1751_v15 = vld [vmem:[%s2300_s0 + $0x54] ss:$36 sps:$4 sm:$0xff]   ;;  %v1753_v16 = vld [vmem:[%s2300_s0 + $0x64] ss:$36 sps:$4 sm:$0xff]  }
  0x4d   :  { %1168 = vmatprep.subr.bf16.mxu0 %v1660_v17  ;;  %1088 = vmatprep.mubr.bf16.mxu1 %v1741_v41  ;;  %v1748_v17 = vld [vmem:[%s2299_s1 + $0x410] ss:$8 sps:$4 sm:$0xff]  }
  0x4e   :  { %1194 = vmatprep.mubr.bf16.mxu0 %v1744_v43 }
  0x4f   :  { %1063 = vmatpush1.bf16.msra.mxu1 %v1655_v18  ;;  %v1759_v18 = vld [vmem:[%s2299_s1 + $0x424] ss:$8 sps:$4 sm:$0xff]  }
  0x50   :  { %1169 = vmatpush1.bf16.msra.mxu0 %v1658_v19  ;;  %1064 = vmatprep.subr.bf16.mxu1 %v1663_v20  ;;  %v1755_v19 = vld [vmem:[%s2300_s0 + $0x50] ss:$36 sps:$4 sm:$0xff]   ;;  %v1756_v20 = vld [vmem:[%s2300_s0 + $0x60] ss:$36 sps:$4 sm:$0xff]  }
  0x51   :  { %1170 = vmatprep.subr.bf16.mxu0 %v1666_v21  ;;  %v1757_v21 = vld [vmem:[%s2299_s1 + $0x420] ss:$8 sps:$4 sm:$0xff]  }
  0x53   :  { %1065 = vmatpush1.bf16.msra.mxu1 %v1661_v22  ;;  %v1762_v22 = vld [vmem:[%s2299_s1 + $0x434] ss:$8 sps:$4 sm:$0xff]  }
  0x54   :  { %1171 = vmatpush1.bf16.msra.mxu0 %v1664_v23  ;;  %1066 = vmatprep.subr.bf16.mxu1 %v1669_v24  ;;  %v1760_v23 = vld [vmem:[%s2299_s1 + $0x430] ss:$8 sps:$4 sm:$0xff]   ;;  %v1765_v24 = vld [vmem:[%s2299_s1 + $0x444] ss:$8 sps:$4 sm:$0xff]  }
  0x55   :  { %1172 = vmatprep.subr.bf16.mxu0 %v1672_v25  ;;  %v1777_v25 = vmov 0  }
  0x57   :  { %1067 = vmatpush1.bf16.msra.mxu1 %v1667_v26  ;;  %v1763_v26 = vld [vmem:[%s2299_s1 + $0x440] ss:$8 sps:$4 sm:$0xff]  }
  0x58   :  { %1173 = vmatpush1.bf16.msra.mxu0 %v1670_v27  ;;  %1068 = vmatprep.subr.bf16.mxu1 %v1675_v28  ;;  %v1768_v27 = vld [vmem:[%s2299_s1 + $0x454] ss:$8 sps:$4 sm:$0xff]   ;;  %v1766_v28 = vld [vmem:[%s2299_s1 + $0x450] ss:$8 sps:$4 sm:$0xff]  }
  0x59   :  { %1174 = vmatprep.subr.bf16.mxu0 %v1678_v32  ;;  %v1772_v32 = vld [vmem:[%s2299_s1 + $0x470] ss:$8 sps:$4 sm:$0xff]  }
  0x5b   :  { %1069 = vmatpush1.bf16.msra.mxu1 %v1673_v34  ;;  %v1776_v34 = vld [vmem:[%s2300_s0 + $0x68] ss:$36 sps:$4 sm:$0xff]  }
  0x5c   :  { %1175 = vmatpush1.bf16.msra.mxu0 %v1676_v35  ;;  %1070 = vmatprep.subr.bf16.mxu1 %v1681_v36  ;;  %v181_v35 = vlaneseq }
  0x5d   :  { %1176 = vmatprep.subr.bf16.mxu0 %v1684_v37 }
  0x5e   :  { %v182_v36 = vshrl.u32 %v181_v35, 7 }
  0x5f   :  { %1071 = vmatpush1.bf16.msra.mxu1 %v1679_v38 }
  0x60   :  { %1177 = vmatpush1.bf16.msra.mxu0 %v1682_v39  ;;  %1072 = vmatprep.subr.bf16.mxu1 %v1687_v40  ;;  %v183_v40 = vsub.s32 0, %v182_v36  ;;  %v187_v43 = vsub.s32 1, %v182_v36 }
  0x61   :  { %1178 = vmatprep.subr.bf16.mxu0 %v1690_v42  ;;  %v179_v42 = vld [vmem:[%s2301_s2] sm:$0x3] }
  0x63   :  { %1073 = vmatpush1.bf16.msra.mxu1 %v1685_v44  ;;  %v184_v44 = vrot.slane %v179_v42, %v183_v40 }
  0x64   :  { %1179 = vmatpush1.bf16.msra.mxu0 %v1688_v45  ;;  %1074 = vmatprep.subr.bf16.mxu1 %v1693_v46  ;;  %v188_v45 = vrot.slane %v179_v42, %v187_v43 }
  0x65   :  { %1180 = vmatprep.subr.bf16.mxu0 %v1696_v47 }
  0x67   :  { %1075 = vmatpush1.bf16.msra.mxu1 %v1691_v48 }
  0x68   :  { %1181 = vmatpush1.bf16.msra.mxu0 %v1694_v49  ;;  %1076 = vmatprep.subr.bf16.mxu1 %v1699_v50 }
  0x69   :  { %1182 = vmatprep.subr.bf16.mxu0 %v1702_v51 }
  0x6b   :  { %1077 = vmatpush1.bf16.msra.mxu1 %v1697_v52 }
  0x6c   :  { %1183 = vmatpush1.bf16.msra.mxu0 %v1700_v53  ;;  %1078 = vmatprep.subr.bf16.mxu1 %v1705_v54 }
  0x6d   :  { %1184 = vmatprep.subr.bf16.mxu0 %v1708_v55 }
  0x6f   :  { %1079 = vmatpush1.bf16.msra.mxu1 %v1703_v56 }
  0x70   :  { %1185 = vmatpush1.bf16.msra.mxu0 %v1706_v57  ;;  %1080 = vmatprep.subr.bf16.mxu1 %v1711_v58 }
  0x71   :  { %1186 = vmatprep.subr.bf16.mxu0 %v1714_v59 }
  0x73   :  { %1081 = vmatpush1.bf16.msra.mxu1 %v1709_v60 }
  0x74   :  { %1187 = vmatpush1.bf16.msra.mxu0 %v1712_v61  ;;  %1082 = vmatprep.subr.bf16.mxu1 %v1717_v62 }
  0x75   :  { %1188 = vmatprep.subr.bf16.mxu0 %v1720_v63 }
  0x77   :  { %1083 = vmatpush1.bf16.msra.mxu1 %v1715_v0 }
  0x78   :  { %1189 = vmatpush1.bf16.msra.mxu0 %v1718_v1  ;;  %1084 = vmatprep.subr.bf16.mxu1 %v1728_v2 }
  0x79   :  { %1190 = vmatprep.subr.bf16.mxu0 %v1732_v3 }
  0x7b   :  { %1085 = vmatpush1.bf16.msra.mxu1 %v1726_v4 }
  0x7c   :  { %1191 = vmatpush1.bf16.msra.mxu0 %v1730_v5  ;;  %1086 = vmatprep.subr.bf16.mxu1 %v1735_v6 }
  0x7d   :  { %1192 = vmatprep.subr.bf16.mxu0 %v1738_v7 }
  0x7f   :  { %1087 = vmatpush1.bf16.msra.mxu1 %v1733_v8 }
  0x80   :  { %1193 = vmatpush1.bf16.msra.mxu0 %v1736_v9  ;;  %1478 = vmatprep.subr.bf16.mxu1 %v1747_v10 }
  0x81   :  { %1215 = vmatprep.subr.bf16.mxu0 %v1747_v10 }
  0x82   :  { %1089 = vmatmul.mubr.bf16.vlgmr.msra.gmra.mrb[0].mxu1 %v1739_v11 }
  0x83   :  { %1195 = vmatmul.mubr.bf16.vlgmr.msra.gmra.mrb[0].mxu0 %v1742_v12  ;;  %1486 = vmatpush1.bf16.msra.mxu1 %v1745_v13 }
  0x84   :  { %1216 = vmatpush1.bf16.msra.mxu0 %v1745_v13  ;;  %1479 = vmatprep.subr.bf16.mxu1 %v1750_v14 }
  0x85   :  { %1217 = vmatprep.subr.bf16.mxu0 %v1750_v14  ;;  %1098 = vmatprep.mubr.bf16.mxu1 %v1751_v15 }
  0x86   :  { %1204 = vmatprep.mubr.bf16.mxu0 %v1753_v16 }
  0x87   :  { %1487 = vmatpush1.bf16.msra.mxu1 %v1748_v17 }
  0x88   :  { %1218 = vmatpush1.bf16.msra.mxu0 %v1748_v17  ;;  %1480 = vmatprep.subr.bf16.mxu1 %v1759_v18 }
  0x89   :  { %1219 = vmatprep.subr.bf16.mxu0 %v1759_v18 }
  0x8a   :  { %1099 = vmatmul.mubr.bf16.gmra.mrb[4].mxu1 %v1755_v19 }
  0x8b   :  { %1205 = vmatmul.mubr.bf16.gmra.mrb[4].mxu0 %v1756_v20  ;;  %1488 = vmatpush1.bf16.msra.mxu1 %v1757_v21 }
  0x8c   :  { %1220 = vmatpush1.bf16.msra.mxu0 %v1757_v21  ;;  %1481 = vmatprep.subr.bf16.mxu1 %v1762_v22 }
  0x8d   :  { %1221 = vmatprep.subr.bf16.mxu0 %v1762_v22  ;;  %1247 = vmatprep.mubr.bf16.mxu0 %v1777_v25 }
  0x8e   :  { %1257 = vmatprep.mubr.bf16.mxu1 %v1777_v25 }
  0x8f   :  { %1489 = vmatpush1.bf16.msra.mxu1 %v1760_v23 }
  0x90   :  { %1222 = vmatpush1.bf16.msra.mxu0 %v1760_v23  ;;  %1482 = vmatprep.subr.bf16.mxu1 %v1765_v24 }
  0x91   :  { %1223 = vmatprep.subr.bf16.mxu0 %v1765_v24 }
  0x93   :  { %1490 = vmatpush1.bf16.msra.mxu1 %v1763_v26 }
  0x94   :  { %1224 = vmatpush1.bf16.msra.mxu0 %v1763_v26  ;;  %1483 = vmatprep.subr.bf16.mxu1 %v1768_v27 }
  0x95   :  { %1225 = vmatprep.subr.bf16.mxu0 %v1768_v27 }
  0x97   :  { %1491 = vmatpush1.bf16.msra.mxu1 %v1766_v28 }
  0x98   :  { %1226 = vmatpush1.bf16.msra.mxu0 %v1766_v28  ;;  %1484 = vmatprep.subr.bf16.mxu1 %v1771_v29 }
  0x99   :  { %1227 = vmatprep.subr.bf16.mxu0 %v1771_v29 }
  0x9b   :  { %1492 = vmatpush1.bf16.msra.mxu1 %v1769_v30 }
  0x9c   :  { %1228 = vmatpush1.bf16.msra.mxu0 %v1769_v30  ;;  %1485 = vmatprep.subr.bf16.mxu1 %v1774_v31 }
  0x9d   :  { %1229 = vmatprep.subr.bf16.mxu0 %v1774_v31 }
  0x9f   :  { %1493 = vmatpush1.bf16.msra.mxu1 %v1772_v32 }
  0xa0   :  { %1230 = vmatpush1.bf16.msra.mxu0 %v1772_v32 }
  0xa2   :  { %1258 = vmatmul.mubr.bf16.vlgmr.msra.gmra.mrb[8].mxu1 %v1776_v34 }
  0xa3   :  { %1248 = vmatmul.mubr.bf16.vlgmr.msra.gmra.mrb[0].mxu0 %v1775_v33 }
 0x155   :  { %v1090_v37 = vpop.f32.mrb[0].mxu1 }
 0x156   :  { %v1092_v38 = vpop.f32.mrb[1].mxu1  ;;  %v1494_v62 = vadd.f32 %v1090_v37, %v184_v44 }
 0x157   :  { %v1094_v39 = vpop.f32.mrb[2].mxu1  ;;  %v1496_v63 = vadd.f32 %v1092_v38, %v188_v45 }
 0x158   :  { %v1096_v41 = vpop.f32.mrb[3].mxu1  ;;  %v1498_v2 = vadd.f32 %v1094_v39, %v184_v44 }
 0x159   :  { %v1500_v7 = vadd.f32 %v1096_v41, %v188_v45 }
 0x15d   :  { %v1100_v46 = vpop.f32.mrb[4].mxu1 }
 0x15e   :  { %v1206_v47 = vpop.f32.mrb[4].mxu0  ;;  %v1502_v48 = vadd.f32 %v1100_v46, %v184_v44  ;;  %v1102_v49 = vpop.f32.mrb[5].mxu1 }
 0x15f   :  { %v1208_v50 = vpop.f32.mrb[5].mxu0  ;;  %v1505_v51 = vadd.f32 %v1102_v49, %v188_v45  ;;  %v1104_v52 = vpop.f32.mrb[6].mxu1 }
 0x160   :  { %v1210_v53 = vpop.f32.mrb[6].mxu0  ;;  %v1503_v54 = vadd.f32 %v1502_v48, %v1206_v47  ;;  %v1508_v55 = vadd.f32 %v1104_v52, %v184_v44  ;;  %v1106_v56 = vpop.f32.mrb[7].mxu1 }
 0x161   :  { %v1212_v57 = vpop.f32.mrb[7].mxu0  ;;  %v1506_v58 = vadd.f32 %v1505_v51, %v1208_v50  ;;  %v1511_v59 = vadd.f32 %v1106_v56, %v188_v45 }
 0x162   :  { %v1509_v60 = vadd.f32 %v1508_v55, %v1210_v53 }
 0x163   :  { %v1512_v61 = vadd.f32 %v1511_v59, %v1212_v57 }
 0x175   :  { %v1259_v1 = vpop.f32.mrb[8].mxu1 }
 0x176   :  { %v1249_v0 = vpop.f32.mrb[0].mxu0  ;;  %v1504_v4 = vadd.f32 %v1503_v54, %v1259_v1  ;;  %v1261_v6 = vpop.f32.mrb[9].mxu1 }
 0x177   :  { %v1495_v3 = vadd.f32 %v1494_v62, %v1249_v0  ;;  %v1251_v5 = vpop.f32.mrb[1].mxu0  ;;  %v1507_v9 = vadd.f32 %v1506_v58, %v1261_v6  ;;  %v1263_v11 = vpop.f32.mrb[10].mxu1 }
 0x178   :  { %v1497_v8 = vadd.f32 %v1496_v63, %v1251_v5  ;;  %v1253_v10 = vpop.f32.mrb[2].mxu0  ;;  %v1272_v13 = vmax.f32 %v1504_v4, 0.0  ;;  %v1510_v15 = vadd.f32 %v1509_v60, %v1263_v11  ;;  %v1265_v17 = vpop.f32.mrb[11].mxu1 }
 0x179   :  { %v1268_v12 = vmax.f32 %v1495_v3, 0.0  ;;  %v1499_v14 = vadd.f32 %v1498_v2, %v1253_v10  ;;  %v1255_v16 = vpop.f32.mrb[3].mxu0  ;;  %v1273_v19 = vmax.f32 %v1507_v9, 0.0  ;;  %v1513_v21 = vadd.f32 %v1512_v61, %v1265_v17 }
 0x17a   :  { %v1269_v18 = vmax.f32 %v1497_v8, 0.0  ;;  %v1501_v20 = vadd.f32 %v1500_v7, %v1255_v16  ;;  %v1274_v23 = vmax.f32 %v1510_v15, 0.0 }
 0x17b   :  { %v1270_v22 = vmax.f32 %v1499_v14, 0.0  ;;  %v1476_v25 = vpack.c.bf16 %v1273_v19, %v1272_v13  ;;  %v1275_v27 = vmax.f32 %v1513_v21, 0.0 }
 0x17c   :  { %v1474_v24 = vpack.c.bf16 %v1269_v18, %v1268_v12  ;;  %v1271_v26 = vmax.f32 %v1501_v20, 0.0 }
 0x17d   :  { %1302 = vst [vmem:[%s2302_s3 + $0x10] sm:$0xff] %v1476_v25  ;;  %v1477_v29 = vpack.c.bf16 %v1275_v27, %v1274_v23 }
 0x17e   :  { %1300 = vst [vmem:[%s2302_s3] sm:$0xff] %v1474_v24  ;;  %v1475_v28 = vpack.c.bf16 %v1271_v26, %v1270_v22 }
 0x17f   :  { %1303 = vst [vmem:[%s2302_s3 + $0x18] sm:$0xff] %v1477_v29 }
 0x180   :  { %1301 = vst [vmem:[%s2302_s3 + $0x8] sm:$0xff] %v1475_v28 }

// kernel: eitnet_forward.12
= control target key start
LH: loop header
LB: loop body
LE: loop exit
PB: predicated region body
PF: predicated region fallthrough
CT: control target
= control target key end

     0   :  { %s1772_s1 = inlined_call_operand.vmem [shape: bf16[640,128], index: 1, kind: input, shape index: {}]   ;;  %s1773_s0 = inlined_call_operand.vmem [shape: bf16[128,640], index: 0, kind: input, shape index: {}]   ;;  %s1774_s2 = inlined_call_operand.vmem [shape: f32[1,128], index: 2, kind: input, shape index: {}]   ;;  %s1775_s3 = inlined_call_operand.vmem [shape: bf16[128,128], index: 3, kind: output, shape index: {}]  }
   0x1   :  { %v1341_v0 = vld [vmem:[%s1772_s1 + $0x40] sm:$0xff]   ;;  %v1345_v4 = vld [vmem:[%s1772_s1 + $0x48] sm:$0xff]   ;;  %v1349_v8 = vld [vmem:[%s1772_s1 + $0x50] sm:$0xff]  }
   0x2   :  { %v1342_v1 = vld [vmem:[%s1772_s1 + $0xc0] sm:$0xff]   ;;  %1149 = vmatprep.subr.bf16.mxu0 %v1341_v0  ;;  %v1346_v5 = vld [vmem:[%s1772_s1 + $0xc8] sm:$0xff]   ;;  %v1350_v9 = vld [vmem:[%s1772_s1 + $0xd0] sm:$0xff]  }
   0x3   :  { %v1343_v2 = vld [vmem:[%s1772_s1] sm:$0xff]   ;;  %1213 = vmatprep.subr.bf16.mxu1 %v1342_v1  ;;  %v1347_v6 = vld [vmem:[%s1772_s1 + $0x8] sm:$0xff]   ;;  %v1351_v10 = vld [vmem:[%s1772_s1 + $0x10] sm:$0xff]  }
   0x4   :  { %v1344_v3 = vld [vmem:[%s1772_s1 + $0x80] sm:$0xff]   ;;  %1150 = vmatpush3.bf16.msra.mxu0 %v1343_v2  ;;  %v1348_v7 = vld [vmem:[%s1772_s1 + $0x88] sm:$0xff]   ;;  %v1352_v11 = vld [vmem:[%s1772_s1 + $0x90] sm:$0xff]  }
   0x5   :  { %1214 = vmatpush3.bf16.msra.mxu1 %v1344_v3  ;;  %1151 = vmatprep.subr.bf16.mxu0 %v1345_v4  ;;  %v1353_v12 = vld [vmem:[%s1772_s1 + $0x58] sm:$0xff]   ;;  %v1357_v16 = vld [vmem:[%s1772_s1 + $0x60] sm:$0xff]   ;;  %v1361_v20 = vld [vmem:[%s1772_s1 + $0x68] sm:$0xff]  }
   0x6   :  { %1215 = vmatprep.subr.bf16.mxu1 %v1346_v5  ;;  %v1354_v13 = vld [vmem:[%s1772_s1 + $0xd8] sm:$0xff]   ;;  %v1358_v17 = vld [vmem:[%s1772_s1 + $0xe0] sm:$0xff]   ;;  %v1362_v21 = vld [vmem:[%s1772_s1 + $0xe8] sm:$0xff]  }
   0x7   :  { %v1355_v14 = vld [vmem:[%s1772_s1 + $0x18] sm:$0xff]   ;;  %v1359_v18 = vld [vmem:[%s1772_s1 + $0x20] sm:$0xff]   ;;  %v1363_v22 = vld [vmem:[%s1772_s1 + $0x28] sm:$0xff]  }
   0x8   :  { %1152 = vmatpush3.bf16.msra.mxu0 %v1347_v6  ;;  %v1356_v15 = vld [vmem:[%s1772_s1 + $0x98] sm:$0xff]   ;;  %v1360_v19 = vld [vmem:[%s1772_s1 + $0xa0] sm:$0xff]   ;;  %v1364_v23 = vld [vmem:[%s1772_s1 + $0xa8] sm:$0xff]  }
   0x9   :  { %1216 = vmatpush3.bf16.msra.mxu1 %v1348_v7  ;;  %1153 = vmatprep.subr.bf16.mxu0 %v1349_v8  ;;  %v1365_v24 = vld [vmem:[%s1772_s1 + $0x70] sm:$0xff]   ;;  %v1369_v28 = vld [vmem:[%s1772_s1 + $0x78] sm:$0xff]   ;;  %v1378_v35 = vld [vmem:[%s1773_s0 + $0xc] ss:$20 sps:$4 sm:$0xff]  }
   0xa   :  { %1217 = vmatprep.subr.bf16.mxu1 %v1350_v9  ;;  %v1366_v25 = vld [vmem:[%s1772_s1 + $0xf0] sm:$0xff]   ;;  %v1370_v29 = vld [vmem:[%s1772_s1 + $0xf8] sm:$0xff]   ;;  %v1379_v36 = vld [vmem:[%s1772_s1 + $0x100] sm:$0xff]   ;;  %727 = vmatprep.mubr.bf16.mxu1 %v1378_v35 }
   0xb   :  { %v1367_v26 = vld [vmem:[%s1772_s1 + $0x30] sm:$0xff]   ;;  %v1371_v30 = vld [vmem:[%s1772_s1 + $0x38] sm:$0xff]   ;;  %v1380_v37 = vld [vmem:[%s1773_s0 + $0x2c] ss:$20 sps:$4 sm:$0xff]  }
   0xc   :  { %1154 = vmatpush3.bf16.msra.mxu0 %v1351_v10  ;;  %v1368_v27 = vld [vmem:[%s1772_s1 + $0xb0] sm:$0xff]   ;;  %v1372_v31 = vld [vmem:[%s1772_s1 + $0xb8] sm:$0xff]   ;;  %v1386_v39 = vld [vmem:[%s1772_s1 + $0x108] sm:$0xff]  }
   0xd   :  { %1218 = vmatpush3.bf16.msra.mxu1 %v1352_v11  ;;  %1155 = vmatprep.subr.bf16.mxu0 %v1353_v12  ;;  %v1373_v32 = vld [vmem:[%s1773_s0] ss:$20 sps:$4 sm:$0xff]   ;;  %v1375_v33 = vld [vmem:[%s1773_s0 + $0x4] ss:$20 sps:$4 sm:$0xff]   ;;  %v1376_v34 = vld [vmem:[%s1773_s0 + $0x8] ss:$20 sps:$4 sm:$0xff]  }
   0xe   :  { %1219 = vmatprep.subr.bf16.mxu1 %v1354_v13  ;;  %630 = vmatprep.mubr.bf16.mxu0 %v1375_v33  ;;  %v1382_v38 = vld [vmem:[%s1773_s0 + $0x34] ss:$20 sps:$4 sm:$0xff]   ;;  %v1385_v41 = vld [vmem:[%s1773_s0 + $0x30] ss:$20 sps:$4 sm:$0xff]   ;;  %v1400_v45 = vld [vmem:[%s1772_s1 + $0x118] sm:$0xff]  }
   0xf   :  { %v1384_v40 = vld [vmem:[%s1773_s0 + $0x28] ss:$20 sps:$4 sm:$0xff]   ;;  %v1393_v44 = vld [vmem:[%s1772_s1 + $0x110] sm:$0xff]   ;;  %v1392_v47 = vld [vmem:[%s1773_s0 + $0x58] ss:$20 sps:$4 sm:$0xff]  }
  0x10   :  { %1156 = vmatpush3.bf16.msra.mxu0 %v1355_v14  ;;  %v1387_v42 = vld [vmem:[%s1773_s0 + $0x54] ss:$20 sps:$4 sm:$0xff]   ;;  %v1389_v43 = vld [vmem:[%s1773_s0 + $0x5c] ss:$20 sps:$4 sm:$0xff]   ;;  %v1396_v49 = vld [vmem:[%s1773_s0 + $0x84] ss:$20 sps:$4 sm:$0xff]  }
  0x11   :  { %1220 = vmatpush3.bf16.msra.mxu1 %v1356_v15  ;;  %1157 = vmatprep.subr.bf16.mxu0 %v1357_v16  ;;  %v1391_v46 = vld [vmem:[%s1773_s0 + $0x50] ss:$20 sps:$4 sm:$0xff]   ;;  %v1414_v51 = vld [vmem:[%s1772_s1 + $0x128] sm:$0xff]   ;;  %v1399_v53 = vld [vmem:[%s1773_s0 + $0x80] ss:$20 sps:$4 sm:$0xff]  }
  0x12   :  { %1221 = vmatprep.subr.bf16.mxu1 %v1358_v17  ;;  %v1394_v48 = vld [vmem:[%s1773_s0 + $0x7c] ss:$20 sps:$4 sm:$0xff]   ;;  %v1407_v50 = vld [vmem:[%s1772_s1 + $0x120] sm:$0xff]   ;;  %v1398_v52 = vld [vmem:[%s1773_s0 + $0x78] ss:$20 sps:$4 sm:$0xff]  }
  0x13   :  { %v1401_v54 = vld [vmem:[%s1773_s0 + $0xa4] ss:$20 sps:$4 sm:$0xff]   ;;  %v1421_v55 = vld [vmem:[%s1772_s1 + $0x130] sm:$0xff]   ;;  %v1403_v56 = vld [vmem:[%s1773_s0 + $0xac] ss:$20 sps:$4 sm:$0xff]  }
  0x14   :  { %1158 = vmatpush3.bf16.msra.mxu0 %v1359_v18  ;;  %v1428_v57 = vld [vmem:[%s1772_s1 + $0x138] sm:$0xff]   ;;  %v1405_v58 = vld [vmem:[%s1773_s0 + $0xa0] ss:$20 sps:$4 sm:$0xff]   ;;  %v1413_v63 = vld [vmem:[%s1773_s0 + $0xd0] ss:$20 sps:$4 sm:$0xff]  }
  0x15   :  { %1222 = vmatpush3.bf16.msra.mxu1 %v1360_v19  ;;  %1159 = vmatprep.subr.bf16.mxu0 %v1361_v20  ;;  %v1406_v59 = vld [vmem:[%s1773_s0 + $0xa8] ss:$20 sps:$4 sm:$0xff]   ;;  %v1408_v60 = vld [vmem:[%s1773_s0 + $0xcc] ss:$20 sps:$4 sm:$0xff]   ;;  %v1419_v2 = vld [vmem:[%s1773_s0 + $0xf0] ss:$20 sps:$4 sm:$0xff]  }
  0x16   :  { %1223 = vmatprep.subr.bf16.mxu1 %v1362_v21  ;;  %v1410_v61 = vld [vmem:[%s1773_s0 + $0xd4] ss:$20 sps:$4 sm:$0xff]   ;;  %v1417_v1 = vld [vmem:[%s1773_s0 + $0xfc] ss:$20 sps:$4 sm:$0xff]   ;;  %v1420_v3 = vld [vmem:[%s1773_s0 + $0xf8] ss:$20 sps:$4 sm:$0xff]  }
  0x17   :  { %v1412_v62 = vld [vmem:[%s1773_s0 + $0xc8] ss:$20 sps:$4 sm:$0xff]   ;;  %v1424_v5 = vld [vmem:[%s1773_s0 + $0x124] ss:$20 sps:$4 sm:$0xff]   ;;  %v1427_v7 = vld [vmem:[%s1773_s0 + $0x120] ss:$20 sps:$4 sm:$0xff]  }
  0x18   :  { %1160 = vmatpush3.bf16.msra.mxu0 %v1363_v22  ;;  %v1415_v0 = vld [vmem:[%s1773_s0 + $0xf4] ss:$20 sps:$4 sm:$0xff]   ;;  %v1422_v4 = vld [vmem:[%s1773_s0 + $0x11c] ss:$20 sps:$4 sm:$0xff]   ;;  %v1426_v6 = vld [vmem:[%s1773_s0 + $0x118] ss:$20 sps:$4 sm:$0xff]  }
  0x19   :  { %1224 = vmatpush3.bf16.msra.mxu1 %v1364_v23  ;;  %1161 = vmatprep.subr.bf16.mxu0 %v1365_v24  ;;  %v1429_v8 = vld [vmem:[%s1773_s0 + $0x10] ss:$20 sps:$4 sm:$0xff]   ;;  %v1431_v10 = vld [vmem:[%s1773_s0 + $0x38] ss:$20 sps:$4 sm:$0xff]   ;;  %v1433_v12 = vld [vmem:[%s1773_s0 + $0x60] ss:$20 sps:$4 sm:$0xff]  }
  0x1a   :  { %1225 = vmatprep.subr.bf16.mxu1 %v1366_v25  ;;  %v1430_v9 = vld [vmem:[%s1773_s0 + $0xb0] ss:$20 sps:$4 sm:$0xff]   ;;  %v1432_v11 = vld [vmem:[%s1773_s0 + $0xd8] ss:$20 sps:$4 sm:$0xff]   ;;  %v1434_v13 = vld [vmem:[%s1773_s0 + $0x100] ss:$20 sps:$4 sm:$0xff]  }
  0x1b   :  { %v1435_v14 = vld [vmem:[%s1773_s0 + $0x88] ss:$20 sps:$4 sm:$0xff]   ;;  %v1700_v18 = vld [vmem:[%s1774_s2] ss:$0 sm:$0xff] }
  0x1c   :  { %1162 = vmatpush3.bf16.msra.mxu0 %v1367_v26  ;;  %v1436_v15 = vld [vmem:[%s1773_s0 + $0x128] ss:$20 sps:$4 sm:$0xff]  }
  0x1d   :  { %1226 = vmatpush3.bf16.msra.mxu1 %v1368_v27  ;;  %1163 = vmatprep.subr.bf16.mxu0 %v1369_v28 }
  0x1e   :  { %1227 = vmatprep.subr.bf16.mxu1 %v1370_v29 }
  0x20   :  { %1164 = vmatpush3.bf16.msra.mxu0 %v1371_v30 }
  0x21   :  { %1228 = vmatpush3.bf16.msra.mxu1 %v1372_v31  ;;  %1293 = vmatprep.subr.bf16.mxu0 %v1379_v36 }
  0x22   :  { %1325 = vmatprep.subr.bf16.mxu1 %v1379_v36 }
  0x23   :  { %631 = vmatmul.mubr.bf16.vlgmr.msra.gmra.mrb[0].mxu0 %v1373_v32 }
  0x24   :  { %728 = vmatmul.mubr.bf16.vlgmr.msra.gmra.mrb[0].mxu1 %v1376_v34  ;;  %1294 = vmatpush3.bf16.msra.mxu0 %v1379_v36 }
  0x25   :  { %1333 = vmatpush3.bf16.msra.mxu1 %v1379_v36  ;;  %638 = vmatprep.mubr.bf16.mxu0 %v1380_v37 }
  0x26   :  { %735 = vmatprep.mubr.bf16.mxu1 %v1382_v38  ;;  %1295 = vmatprep.subr.bf16.mxu0 %v1386_v39 }
  0x27   :  { %1326 = vmatprep.subr.bf16.mxu1 %v1386_v39 }
  0x28   :  { %1296 = vmatpush3.bf16.msra.mxu0 %v1386_v39 }
  0x29   :  { %1334 = vmatpush3.bf16.msra.mxu1 %v1386_v39  ;;  %1297 = vmatprep.subr.bf16.mxu0 %v1393_v44 }
  0x2a   :  { %1327 = vmatprep.subr.bf16.mxu1 %v1393_v44 }
  0x2b   :  { %639 = vmatmul.mubr.bf16.gmra.mrb[4].mxu0 %v1384_v40 }
  0x2c   :  { %736 = vmatmul.mubr.bf16.gmra.mrb[4].mxu1 %v1385_v41  ;;  %646 = vmatprep.mubr.bf16.mxu0 %v1387_v42 }
  0x2d   :  { %743 = vmatprep.mubr.bf16.mxu1 %v1389_v43  ;;  %1298 = vmatpush3.bf16.msra.mxu0 %v1393_v44 }
  0x2e   :  { %1335 = vmatpush3.bf16.msra.mxu1 %v1393_v44  ;;  %1299 = vmatprep.subr.bf16.mxu0 %v1400_v45 }
  0x2f   :  { %1328 = vmatprep.subr.bf16.mxu1 %v1400_v45 }
  0x31   :  { %1300 = vmatpush3.bf16.msra.mxu0 %v1400_v45 }
  0x32   :  { %1336 = vmatpush3.bf16.msra.mxu1 %v1400_v45  ;;  %1301 = vmatprep.subr.bf16.mxu0 %v1407_v50 }
  0x33   :  { %647 = vmatmul.mubr.bf16.gmra.mrb[8].mxu0 %v1391_v46  ;;  %1329 = vmatprep.subr.bf16.mxu1 %v1407_v50 }
  0x34   :  { %744 = vmatmul.mubr.bf16.gmra.mrb[8].mxu1 %v1392_v47  ;;  %654 = vmatprep.mubr.bf16.mxu0 %v1394_v48 }
  0x35   :  { %751 = vmatprep.mubr.bf16.mxu1 %v1396_v49  ;;  %1302 = vmatpush3.bf16.msra.mxu0 %v1407_v50 }
  0x36   :  { %1337 = vmatpush3.bf16.msra.mxu1 %v1407_v50  ;;  %1303 = vmatprep.subr.bf16.mxu0 %v1414_v51 }
  0x37   :  { %1330 = vmatprep.subr.bf16.mxu1 %v1414_v51 }
  0x39   :  { %1304 = vmatpush3.bf16.msra.mxu0 %v1414_v51 }
  0x3a   :  { %1338 = vmatpush3.bf16.msra.mxu1 %v1414_v51  ;;  %1305 = vmatprep.subr.bf16.mxu0 %v1421_v55 }
  0x3b   :  { %655 = vmatmul.mubr.bf16.gmra.mrb[12].mxu0 %v1398_v52  ;;  %1331 = vmatprep.subr.bf16.mxu1 %v1421_v55 }
  0x3c   :  { %752 = vmatmul.mubr.bf16.gmra.mrb[12].mxu1 %v1399_v53  ;;  %662 = vmatprep.mubr.bf16.mxu0 %v1401_v54 }
  0x3d   :  { %759 = vmatprep.mubr.bf16.mxu1 %v1403_v56  ;;  %1306 = vmatpush3.bf16.msra.mxu0 %v1421_v55 }
  0x3e   :  { %1339 = vmatpush3.bf16.msra.mxu1 %v1421_v55  ;;  %1307 = vmatprep.subr.bf16.mxu0 %v1428_v57 }
  0x3f   :  { %1332 = vmatprep.subr.bf16.mxu1 %v1428_v57 }
  0x41   :  { %1308 = vmatpush3.bf16.msra.mxu0 %v1428_v57 }
  0x42   :  { %1340 = vmatpush3.bf16.msra.mxu1 %v1428_v57 }
  0x43   :  { %663 = vmatmul.mubr.bf16.gmra.mrb[16].mxu0 %v1405_v58 }
  0x44   :  { %760 = vmatmul.mubr.bf16.gmra.mrb[16].mxu1 %v1406_v59  ;;  %670 = vmatprep.mubr.bf16.mxu0 %v1408_v60 }
  0x45   :  { %767 = vmatprep.mubr.bf16.mxu1 %v1410_v61 }
  0x4b   :  { %671 = vmatmul.mubr.bf16.gmra.mrb[20].mxu0 %v1412_v62 }
  0x4c   :  { %768 = vmatmul.mubr.bf16.gmra.mrb[20].mxu1 %v1413_v63  ;;  %678 = vmatprep.mubr.bf16.mxu0 %v1415_v0 }
  0x4d   :  { %775 = vmatprep.mubr.bf16.mxu1 %v1417_v1 }
  0x53   :  { %679 = vmatmul.mubr.bf16.gmra.mrb[24].mxu0 %v1419_v2 }
  0x54   :  { %776 = vmatmul.mubr.bf16.gmra.mrb[24].mxu1 %v1420_v3  ;;  %686 = vmatprep.mubr.bf16.mxu0 %v1422_v4 }
  0x55   :  { %783 = vmatprep.mubr.bf16.mxu1 %v1424_v5 }
  0x5b   :  { %687 = vmatmul.mubr.bf16.gmra.mrb[28].mxu0 %v1426_v6 }
  0x5c   :  { %784 = vmatmul.mubr.bf16.gmra.mrb[28].mxu1 %v1427_v7  ;;  %1309 = vmatprep.mubr.bf16.mxu0 %v1429_v8 }
  0x5d   :  { %1317 = vmatprep.mubr.bf16.mxu1 %v1430_v9 }
  0x63   :  { %1310 = vmatmul.mubr.bf16.vlgmr.msra.gmra.mrb[32].mxu0 %v1431_v10 }
  0x64   :  { %1318 = vmatmul.mubr.bf16.vlgmr.msra.gmra.mrb[32].mxu1 %v1432_v11  ;;  %1313 = vmatprep.mubr.bf16.mxu0 %v1433_v12 }
  0x65   :  { %1321 = vmatprep.mubr.bf16.mxu1 %v1434_v13 }
  0x6b   :  { %1314 = vmatmul.mubr.bf16.gmra.mrb[36].mxu0 %v1435_v14 }
  0x6c   :  { %1322 = vmatmul.mubr.bf16.gmra.mrb[36].mxu1 %v1436_v15 }
  0xf6   :  { %v1165_v16 = vpop.f32.mrb[0].mxu0 }
  0xf7   :  { %v1229_v17 = vpop.f32.mrb[0].mxu1  ;;  %v1166_v19 = vpop.f32.mrb[1].mxu0 }
  0xf8   :  { %v1167_v20 = vadd.f32 %v1166_v19, %v1165_v16  ;;  %v1230_v21 = vpop.f32.mrb[1].mxu1  ;;  %v1168_v22 = vpop.f32.mrb[2].mxu0 }
  0xf9   :  { %v1231_v23 = vadd.f32 %v1230_v21, %v1229_v17  ;;  %v1232_v24 = vpop.f32.mrb[2].mxu1  ;;  %v1169_v25 = vpop.f32.mrb[3].mxu0 }
  0xfa   :  { %v633_v26 = vadd.f32 %v1167_v20, %v1700_v18  ;;  %v1170_v27 = vadd.f32 %v1169_v25, %v1168_v22  ;;  %v1233_v28 = vpop.f32.mrb[3].mxu1 }
  0xfb   :  { %v1234_v29 = vadd.f32 %v1233_v28, %v1232_v24 }
  0xfc   :  { %v636_v30 = vadd.f32 %v1170_v27, %v1700_v18  ;;  %v1704_v31 = vadd.f32 %v1231_v23, %v633_v26 }
  0xfe   :  { %v1171_v32 = vpop.f32.mrb[4].mxu0  ;;  %v1706_v33 = vadd.f32 %v1234_v29, %v636_v30 }
  0xff   :  { %v1235_v34 = vpop.f32.mrb[4].mxu1  ;;  %v1172_v35 = vpop.f32.mrb[5].mxu0 }
 0x100   :  { %v1173_v36 = vadd.f32 %v1172_v35, %v1171_v32  ;;  %v1236_v37 = vpop.f32.mrb[5].mxu1  ;;  %v1174_v38 = vpop.f32.mrb[6].mxu0 }
 0x101   :  { %v1237_v39 = vadd.f32 %v1236_v37, %v1235_v34  ;;  %v1238_v40 = vpop.f32.mrb[6].mxu1  ;;  %v1175_v41 = vpop.f32.mrb[7].mxu0 }
 0x102   :  { %v641_v42 = vadd.f32 %v1173_v36, %v1700_v18  ;;  %v1176_v43 = vadd.f32 %v1175_v41, %v1174_v38  ;;  %v1239_v44 = vpop.f32.mrb[7].mxu1 }
 0x103   :  { %v1240_v45 = vadd.f32 %v1239_v44, %v1238_v40 }
 0x104   :  { %v644_v46 = vadd.f32 %v1176_v43, %v1700_v18  ;;  %v1710_v47 = vadd.f32 %v1237_v39, %v641_v42 }
 0x106   :  { %v1177_v48 = vpop.f32.mrb[8].mxu0  ;;  %v1712_v49 = vadd.f32 %v1240_v45, %v644_v46 }
 0x107   :  { %v1241_v50 = vpop.f32.mrb[8].mxu1  ;;  %v1178_v51 = vpop.f32.mrb[9].mxu0 }
 0x108   :  { %v1179_v52 = vadd.f32 %v1178_v51, %v1177_v48  ;;  %v1242_v53 = vpop.f32.mrb[9].mxu1  ;;  %v1180_v54 = vpop.f32.mrb[10].mxu0 }
 0x109   :  { %v1243_v55 = vadd.f32 %v1242_v53, %v1241_v50  ;;  %v1244_v56 = vpop.f32.mrb[10].mxu1  ;;  %v1181_v57 = vpop.f32.mrb[11].mxu0 }
 0x10a   :  { %v649_v58 = vadd.f32 %v1179_v52, %v1700_v18  ;;  %v1182_v59 = vadd.f32 %v1181_v57, %v1180_v54  ;;  %v1245_v60 = vpop.f32.mrb[11].mxu1 }
 0x10b   :  { %v1246_v61 = vadd.f32 %v1245_v60, %v1244_v56 }
 0x10c   :  { %v652_v62 = vadd.f32 %v1182_v59, %v1700_v18  ;;  %v1716_v63 = vadd.f32 %v1243_v55, %v649_v58 }
 0x10e   :  { %v1183_v0 = vpop.f32.mrb[12].mxu0  ;;  %v1718_v1 = vadd.f32 %v1246_v61, %v652_v62 }
 0x10f   :  { %v1247_v2 = vpop.f32.mrb[12].mxu1  ;;  %v1184_v3 = vpop.f32.mrb[13].mxu0 }
 0x110   :  { %v1185_v4 = vadd.f32 %v1184_v3, %v1183_v0  ;;  %v1248_v5 = vpop.f32.mrb[13].mxu1  ;;  %v1186_v6 = vpop.f32.mrb[14].mxu0 }
 0x111   :  { %v1249_v7 = vadd.f32 %v1248_v5, %v1247_v2  ;;  %v1250_v8 = vpop.f32.mrb[14].mxu1  ;;  %v1187_v9 = vpop.f32.mrb[15].mxu0 }
 0x112   :  { %v657_v10 = vadd.f32 %v1185_v4, %v1700_v18  ;;  %v1188_v11 = vadd.f32 %v1187_v9, %v1186_v6  ;;  %v1251_v12 = vpop.f32.mrb[15].mxu1 }
 0x113   :  { %v1252_v13 = vadd.f32 %v1251_v12, %v1250_v8 }
 0x114   :  { %v660_v14 = vadd.f32 %v1188_v11, %v1700_v18  ;;  %v1722_v15 = vadd.f32 %v1249_v7, %v657_v10 }
 0x116   :  { %v1189_v16 = vpop.f32.mrb[16].mxu0  ;;  %v1724_v17 = vadd.f32 %v1252_v13, %v660_v14 }
 0x117   :  { %v1253_v19 = vpop.f32.mrb[16].mxu1  ;;  %v1190_v20 = vpop.f32.mrb[17].mxu0 }
 0x118   :  { %v1191_v21 = vadd.f32 %v1190_v20, %v1189_v16  ;;  %v1254_v22 = vpop.f32.mrb[17].mxu1  ;;  %v1192_v23 = vpop.f32.mrb[18].mxu0 }
 0x119   :  { %v1255_v24 = vadd.f32 %v1254_v22, %v1253_v19  ;;  %v1256_v25 = vpop.f32.mrb[18].mxu1  ;;  %v1193_v26 = vpop.f32.mrb[19].mxu0 }
 0x11a   :  { %v665_v27 = vadd.f32 %v1191_v21, %v1700_v18  ;;  %v1194_v28 = vadd.f32 %v1193_v26, %v1192_v23  ;;  %v1257_v29 = vpop.f32.mrb[19].mxu1 }
 0x11b   :  { %v1258_v30 = vadd.f32 %v1257_v29, %v1256_v25 }
 0x11c   :  { %v668_v32 = vadd.f32 %v1194_v28, %v1700_v18  ;;  %v762_v34 = vadd.f32 %v1255_v24, %v665_v27 }
 0x11e   :  { %v1195_v35 = vpop.f32.mrb[20].mxu0  ;;  %v1728_v36 = vadd.f32 %v1258_v30, %v668_v32 }
 0x11f   :  { %v1259_v37 = vpop.f32.mrb[20].mxu1  ;;  %v1196_v38 = vpop.f32.mrb[21].mxu0 }
 0x120   :  { %v1197_v39 = vadd.f32 %v1196_v38, %v1195_v35  ;;  %v1260_v40 = vpop.f32.mrb[21].mxu1  ;;  %v1198_v41 = vpop.f32.mrb[22].mxu0 }
 0x121   :  { %v1261_v42 = vadd.f32 %v1260_v40, %v1259_v37  ;;  %v1262_v43 = vpop.f32.mrb[22].mxu1  ;;  %v1199_v44 = vpop.f32.mrb[23].mxu0 }
 0x122   :  { %v673_v45 = vadd.f32 %v1197_v39, %v1700_v18  ;;  %v1200_v46 = vadd.f32 %v1199_v44, %v1198_v41  ;;  %v1263_v48 = vpop.f32.mrb[23].mxu1 }
 0x123   :  { %v1264_v50 = vadd.f32 %v1263_v48, %v1262_v43 }
 0x124   :  { %v676_v51 = vadd.f32 %v1200_v46, %v1700_v18  ;;  %v770_v52 = vadd.f32 %v1261_v42, %v673_v45 }
 0x126   :  { %v1201_v53 = vpop.f32.mrb[24].mxu0  ;;  %v773_v54 = vadd.f32 %v1264_v50, %v676_v51 }
 0x127   :  { %v1265_v55 = vpop.f32.mrb[24].mxu1  ;;  %v1202_v56 = vpop.f32.mrb[25].mxu0 }
 0x128   :  { %v1203_v57 = vadd.f32 %v1202_v56, %v1201_v53  ;;  %v1266_v58 = vpop.f32.mrb[25].mxu1  ;;  %v1204_v59 = vpop.f32.mrb[26].mxu0 }
 0x129   :  { %v1267_v60 = vadd.f32 %v1266_v58, %v1265_v55  ;;  %v1268_v61 = vpop.f32.mrb[26].mxu1  ;;  %v1205_v62 = vpop.f32.mrb[27].mxu0 }
 0x12a   :  { %v681_v0 = vadd.f32 %v1203_v57, %v1700_v18  ;;  %v1206_v2 = vadd.f32 %v1205_v62, %v1204_v59  ;;  %v1269_v3 = vpop.f32.mrb[27].mxu1 }
 0x12b   :  { %v1270_v4 = vadd.f32 %v1269_v3, %v1268_v61 }
 0x12c   :  { %v684_v5 = vadd.f32 %v1206_v2, %v1700_v18  ;;  %v778_v6 = vadd.f32 %v1267_v60, %v681_v0 }
 0x12e   :  { %v1207_v7 = vpop.f32.mrb[28].mxu0  ;;  %v1734_v8 = vadd.f32 %v1270_v4, %v684_v5 }
 0x12f   :  { %v1271_v9 = vpop.f32.mrb[28].mxu1  ;;  %v1208_v10 = vpop.f32.mrb[29].mxu0 }
 0x130   :  { %v1209_v11 = vadd.f32 %v1208_v10, %v1207_v7  ;;  %v1272_v12 = vpop.f32.mrb[29].mxu1  ;;  %v1210_v13 = vpop.f32.mrb[30].mxu0 }
 0x131   :  { %v1273_v14 = vadd.f32 %v1272_v12, %v1271_v9  ;;  %v1274_v16 = vpop.f32.mrb[30].mxu1  ;;  %v1211_v19 = vpop.f32.mrb[31].mxu0 }
 0x132   :  { %v689_v20 = vadd.f32 %v1209_v11, %v1700_v18  ;;  %v1212_v21 = vadd.f32 %v1211_v19, %v1210_v13  ;;  %v1275_v22 = vpop.f32.mrb[31].mxu1 }
 0x133   :  { %v1276_v23 = vadd.f32 %v1275_v22, %v1274_v16 }
 0x134   :  { %v692_v24 = vadd.f32 %v1212_v21, %v1700_v18  ;;  %v786_v25 = vadd.f32 %v1273_v14, %v689_v20 }
 0x136   :  { %v1311_v26 = vpop.f32.mrb[32].mxu0  ;;  %v789_v27 = vadd.f32 %v1276_v23, %v692_v24 }
 0x137   :  { %v835_v28 = vadd.f32 %v1311_v26, %v1710_v47  ;;  %v1319_v29 = vpop.f32.mrb[32].mxu1  ;;  %v826_v30 = vpop.f32.mrb[33].mxu0 }
 0x138   :  { %v867_v32 = vadd.f32 %v1319_v29, %v770_v52  ;;  %v827_v35 = vadd.f32 %v826_v30, %v1704_v31  ;;  %v858_v37 = vpop.f32.mrb[33].mxu1  ;;  %v1312_v38 = vpop.f32.mrb[34].mxu0 }
 0x139   :  { %v859_v39 = vadd.f32 %v858_v37, %v762_v34  ;;  %v838_v40 = vadd.f32 %v1312_v38, %v1712_v49  ;;  %v1320_v41 = vpop.f32.mrb[34].mxu1  ;;  %v829_v42 = vpop.f32.mrb[35].mxu0  ;;  %v891_v45 = vmax.f32 %v835_v28, 0.0 }
 0x13a   :  { %v870_v43 = vadd.f32 %v1320_v41, %v773_v54  ;;  %v830_v18 = vadd.f32 %v829_v42, %v1706_v33  ;;  %v861_v44 = vpop.f32.mrb[35].mxu1  ;;  %v899_v48 = vmax.f32 %v867_v32, 0.0  ;;  %v889_v50 = vmax.f32 %v827_v35, 0.0 }
 0x13b   :  { %v892_v46 = vmax.f32 %v838_v40, 0.0  ;;  %v862_v47 = vadd.f32 %v861_v44, %v1728_v36  ;;  %v897_v31 = vmax.f32 %v859_v39, 0.0 }
 0x13c   :  { %v900_v51 = vmax.f32 %v870_v43, 0.0  ;;  %v890_v52 = vmax.f32 %v830_v18, 0.0 }
 0x13d   :  { %v1110_v53 = vpack.c.bf16 %v892_v46, %v891_v45  ;;  %v898_v55 = vmax.f32 %v862_v47, 0.0 }
 0x13e   :  { %v1130_v34 = vpack.c.bf16 %v900_v51, %v899_v48  ;;  %v1105_v56 = vpack.c.bf16 %v890_v52, %v889_v50  ;;  %v1315_v49 = vpop.f32.mrb[36].mxu0 }
 0x13f   :  { %1142 = vst [vmem:[%s1775_s3 + $0x8] sm:$0xff] %v1110_v53   ;;  %v1125_v33 = vpack.c.bf16 %v898_v55, %v897_v31  ;;  %v851_v54 = vadd.f32 %v1315_v49, %v1722_v15  ;;  %v1323_v57 = vpop.f32.mrb[36].mxu1  ;;  %v842_v58 = vpop.f32.mrb[37].mxu0 }
 0x140   :  { %1146 = vst [vmem:[%s1775_s3 + $0x28] sm:$0xff] %v1130_v34   ;;  %1106 = vst [vmem:[%s1775_s3] sm:$0xff] %v1105_v56   ;;  %v883_v36 = vadd.f32 %v1323_v57, %v786_v25  ;;  %v843_v59 = vadd.f32 %v842_v58, %v1716_v63  ;;  %v874_v60 = vpop.f32.mrb[37].mxu1  ;;  %v1316_v61 = vpop.f32.mrb[38].mxu0 }
 0x141   :  { %1145 = vst [vmem:[%s1775_s3 + $0x20] sm:$0xff] %v1125_v33   ;;  %v875_v15 = vadd.f32 %v874_v60, %v778_v6  ;;  %v854_v62 = vadd.f32 %v1316_v61, %v1724_v17  ;;  %v1324_v0 = vpop.f32.mrb[38].mxu1  ;;  %v845_v2 = vpop.f32.mrb[39].mxu0  ;;  %v895_v7 = vmax.f32 %v851_v54, 0.0 }
 0x142   :  { %v886_v3 = vadd.f32 %v1324_v0, %v789_v27  ;;  %v846_v4 = vadd.f32 %v845_v2, %v1718_v1  ;;  %v877_v5 = vpop.f32.mrb[39].mxu1  ;;  %v903_v63 = vmax.f32 %v883_v36, 0.0  ;;  %v893_v11 = vmax.f32 %v843_v59, 0.0 }
 0x143   :  { %v896_v9 = vmax.f32 %v854_v62, 0.0  ;;  %v878_v10 = vadd.f32 %v877_v5, %v1734_v8  ;;  %v901_v14 = vmax.f32 %v875_v15, 0.0 }
 0x144   :  { %v904_v12 = vmax.f32 %v886_v3, 0.0  ;;  %v894_v13 = vmax.f32 %v846_v4, 0.0 }
 0x145   :  { %v1120_v16 = vpack.c.bf16 %v896_v9, %v895_v7  ;;  %v902_v19 = vmax.f32 %v878_v10, 0.0 }
 0x146   :  { %v1140_v6 = vpack.c.bf16 %v904_v12, %v903_v63  ;;  %v1115_v20 = vpack.c.bf16 %v894_v13, %v893_v11 }
 0x147   :  { %1144 = vst [vmem:[%s1775_s3 + $0x18] sm:$0xff] %v1120_v16   ;;  %v1135_v17 = vpack.c.bf16 %v902_v19, %v901_v14 }
 0x148   :  { %1148 = vst [vmem:[%s1775_s3 + $0x38] sm:$0xff] %v1140_v6   ;;  %1143 = vst [vmem:[%s1775_s3 + $0x10] sm:$0xff] %v1115_v20  }
 0x149   :  { %1147 = vst [vmem:[%s1775_s3 + $0x30] sm:$0xff] %v1135_v17  }

// kernel: eitnet_forward.13
= control target key start
LH: loop header
LB: loop body
LE: loop exit
PB: predicated region body
PF: predicated region fallthrough
CT: control target
= control target key end

     0   :  { %v2565_v0 = vmov 0   ;;  %s3269_s1 = inlined_call_operand.vmem [shape: bf16[384,128], index: 1, kind: input, shape index: {}]   ;;  %s3270_s0 = inlined_call_operand.vmem [shape: bf16[512,384], index: 0, kind: input, shape index: {}]   ;;  %s3271_s2 = inlined_call_operand.vmem [shape: f32[1,128], index: 2, kind: input, shape index: {}]   ;;  %s3272_s3 = inlined_call_operand.vmem [shape: bf16[512,128], index: 3, kind: output, shape index: {}]  }
   0x1   :  { %854 = vmatprep.subr.bf16.mxu0 %v2565_v0  ;;  %2380 = vmatprep.subr.bf16.mxu1 %v2565_v0  ;;  %v2413_v1 = vld [vmem:[%s3269_s1] sm:$0xff]   ;;  %v2414_v2 = vld [vmem:[%s3269_s1 + $0x8] sm:$0xff]   ;;  %v2415_v3 = vld [vmem:[%s3269_s1 + $0x10] sm:$0xff]  }
   0x2   :  { %855 = vmatpush1.bf16.msra.mxu0 %v2413_v1  ;;  %2396 = vmatpush1.bf16.msra.mxu1 %v2413_v1  ;;  %v2416_v4 = vld [vmem:[%s3269_s1 + $0x18] sm:$0xff]   ;;  %v2417_v5 = vld [vmem:[%s3269_s1 + $0x20] sm:$0xff]   ;;  %v2418_v7 = vld [vmem:[%s3269_s1 + $0x28] sm:$0xff]  }
   0x3   :  { %856 = vmatprep.subr.bf16.mxu0 %v2565_v0  ;;  %2381 = vmatprep.subr.bf16.mxu1 %v2565_v0  ;;  %v2431_v6 = vld [vmem:[%s3270_s0 + $0x4] ss:$12 sps:$4 sm:$0xff]   ;;  %v2420_v10 = vld [vmem:[%s3269_s1 + $0x38] sm:$0xff]   ;;  %v2422_v12 = vld [vmem:[%s3269_s1 + $0x48] sm:$0xff]  }
   0x4   :  { %v2434_v8 = vld [vmem:[%s3270_s0 + $0x244] ss:$12 sps:$4 sm:$0xff]   ;;  %886 = vmatprep.mubr.bf16.mxu0 %v2431_v6  ;;  %v2424_v14 = vld [vmem:[%s3269_s1 + $0x58] sm:$0xff]   ;;  %v2426_v16 = vld [vmem:[%s3269_s1 + $0x68] sm:$0xff]  }
   0x5   :  { %1078 = vmatprep.mubr.bf16.mxu1 %v2434_v8  ;;  %v2419_v9 = vld [vmem:[%s3269_s1 + $0x30] sm:$0xff]   ;;  %v2421_v11 = vld [vmem:[%s3269_s1 + $0x40] sm:$0xff]   ;;  %v2428_v18 = vld [vmem:[%s3269_s1 + $0x78] sm:$0xff]  }
   0x6   :  { %857 = vmatpush1.bf16.msra.mxu0 %v2414_v2  ;;  %2397 = vmatpush1.bf16.msra.mxu1 %v2414_v2  ;;  %v2423_v13 = vld [vmem:[%s3269_s1 + $0x50] sm:$0xff]   ;;  %v2425_v15 = vld [vmem:[%s3269_s1 + $0x60] sm:$0xff]   ;;  %v2436_v22 = vld [vmem:[%s3270_s0 + $0x1c] ss:$12 sps:$4 sm:$0xff]  }
   0x7   :  { %858 = vmatprep.subr.bf16.mxu0 %v2565_v0  ;;  %2382 = vmatprep.subr.bf16.mxu1 %v2565_v0  ;;  %v2427_v17 = vld [vmem:[%s3269_s1 + $0x70] sm:$0xff]   ;;  %v2435_v19 = vld [vmem:[%s3269_s1 + $0x80] sm:$0xff]   ;;  %v2438_v23 = vld [vmem:[%s3270_s0 + $0x25c] ss:$12 sps:$4 sm:$0xff]  }
   0x8   :  { %v2429_v20 = vld [vmem:[%s3270_s0] ss:$12 sps:$4 sm:$0xff]   ;;  %v2449_v25 = vld [vmem:[%s3269_s1 + $0x90] sm:$0xff]   ;;  %v2440_v26 = vld [vmem:[%s3270_s0 + $0x18] ss:$12 sps:$4 sm:$0xff]  }
   0x9   :  { %v2432_v21 = vld [vmem:[%s3270_s0 + $0x240] ss:$12 sps:$4 sm:$0xff]   ;;  %v2441_v27 = vld [vmem:[%s3270_s0 + $0x258] ss:$12 sps:$4 sm:$0xff]   ;;  %v2447_v31 = vld [vmem:[%s3270_s0 + $0x30] ss:$12 sps:$4 sm:$0xff]  }
   0xa   :  { %859 = vmatpush1.bf16.msra.mxu0 %v2415_v3  ;;  %2398 = vmatpush1.bf16.msra.mxu1 %v2415_v3  ;;  %v2442_v24 = vld [vmem:[%s3269_s1 + $0x88] sm:$0xff]   ;;  %v2443_v28 = vld [vmem:[%s3270_s0 + $0x34] ss:$12 sps:$4 sm:$0xff]   ;;  %v2456_v30 = vld [vmem:[%s3269_s1 + $0x98] sm:$0xff]  }
   0xb   :  { %860 = vmatprep.subr.bf16.mxu0 %v2565_v0  ;;  %2383 = vmatprep.subr.bf16.mxu1 %v2565_v0  ;;  %v2445_v29 = vld [vmem:[%s3270_s0 + $0x274] ss:$12 sps:$4 sm:$0xff]   ;;  %v2448_v33 = vld [vmem:[%s3270_s0 + $0x270] ss:$12 sps:$4 sm:$0xff]   ;;  %v2450_v34 = vld [vmem:[%s3270_s0 + $0x4c] ss:$12 sps:$4 sm:$0xff]  }
   0xc   :  { %v2463_v32 = vld [vmem:[%s3269_s1 + $0xa0] sm:$0xff]   ;;  %v2452_v35 = vld [vmem:[%s3270_s0 + $0x28c] ss:$12 sps:$4 sm:$0xff]   ;;  %v2454_v37 = vld [vmem:[%s3270_s0 + $0x48] ss:$12 sps:$4 sm:$0xff]  }
   0xd   :  { %v2470_v36 = vld [vmem:[%s3269_s1 + $0xa8] sm:$0xff]   ;;  %v2457_v39 = vld [vmem:[%s3270_s0 + $0x64] ss:$12 sps:$4 sm:$0xff]   ;;  %v2484_v42 = vld [vmem:[%s3269_s1 + $0xb8] sm:$0xff]  }
   0xe   :  { %861 = vmatpush1.bf16.msra.mxu0 %v2416_v4  ;;  %2399 = vmatpush1.bf16.msra.mxu1 %v2416_v4  ;;  %v2455_v38 = vld [vmem:[%s3270_s0 + $0x288] ss:$12 sps:$4 sm:$0xff]   ;;  %v2459_v40 = vld [vmem:[%s3270_s0 + $0x2a4] ss:$12 sps:$4 sm:$0xff]   ;;  %v2461_v43 = vld [vmem:[%s3270_s0 + $0x60] ss:$12 sps:$4 sm:$0xff]  }
   0xf   :  { %862 = vmatprep.subr.bf16.mxu0 %v2565_v0  ;;  %2384 = vmatprep.subr.bf16.mxu1 %v2565_v0  ;;  %v2477_v41 = vld [vmem:[%s3269_s1 + $0xb0] sm:$0xff]   ;;  %v2462_v44 = vld [vmem:[%s3270_s0 + $0x2a0] ss:$12 sps:$4 sm:$0xff]   ;;  %v2464_v45 = vld [vmem:[%s3270_s0 + $0x7c] ss:$12 sps:$4 sm:$0xff]  }
  0x10   :  { %v2466_v46 = vld [vmem:[%s3270_s0 + $0x2bc] ss:$12 sps:$4 sm:$0xff]   ;;  %v2468_v47 = vld [vmem:[%s3270_s0 + $0x78] ss:$12 sps:$4 sm:$0xff]   ;;  %v2471_v49 = vld [vmem:[%s3270_s0 + $0x94] ss:$12 sps:$4 sm:$0xff]  }
  0x11   :  { %v2469_v48 = vld [vmem:[%s3270_s0 + $0x2b8] ss:$12 sps:$4 sm:$0xff]   ;;  %v2473_v50 = vld [vmem:[%s3270_s0 + $0x2d4] ss:$12 sps:$4 sm:$0xff]   ;;  %v2475_v51 = vld [vmem:[%s3270_s0 + $0x90] ss:$12 sps:$4 sm:$0xff]  }
  0x12   :  { %863 = vmatpush1.bf16.msra.mxu0 %v2417_v5  ;;  %2400 = vmatpush1.bf16.msra.mxu1 %v2417_v5  ;;  %v2476_v52 = vld [vmem:[%s3270_s0 + $0x2d0] ss:$12 sps:$4 sm:$0xff]   ;;  %v2478_v53 = vld [vmem:[%s3270_s0 + $0xac] ss:$12 sps:$4 sm:$0xff]   ;;  %v2482_v55 = vld [vmem:[%s3270_s0 + $0xa8] ss:$12 sps:$4 sm:$0xff]  }
  0x13   :  { %864 = vmatprep.subr.bf16.mxu0 %v2565_v0  ;;  %2385 = vmatprep.subr.bf16.mxu1 %v2565_v0  ;;  %v2480_v54 = vld [vmem:[%s3270_s0 + $0x2ec] ss:$12 sps:$4 sm:$0xff]   ;;  %v2483_v56 = vld [vmem:[%s3270_s0 + $0x2e8] ss:$12 sps:$4 sm:$0xff]   ;;  %v2485_v57 = vld [vmem:[%s3270_s0 + $0xc4] ss:$12 sps:$4 sm:$0xff]  }
  0x14   :  { %v2487_v58 = vld [vmem:[%s3270_s0 + $0x8] ss:$12 sps:$4 sm:$0xff]   ;;  %v2488_v59 = vld [vmem:[%s3270_s0 + $0xc0] ss:$12 sps:$4 sm:$0xff]   ;;  %v2492_v62 = vld [vmem:[%s3270_s0 + $0x38] ss:$12 sps:$4 sm:$0xff]  }
  0x15   :  { %v2489_v60 = vld [vmem:[%s3270_s0 + $0x20] ss:$12 sps:$4 sm:$0xff]   ;;  %v2490_v61 = vld [vmem:[%s3270_s0 + $0xdc] ss:$12 sps:$4 sm:$0xff]   ;;  %v2493_v63 = vld [vmem:[%s3270_s0 + $0xd8] ss:$12 sps:$4 sm:$0xff]  }
  0x16   :  { %865 = vmatpush1.bf16.msra.mxu0 %v2418_v7  ;;  %2401 = vmatpush1.bf16.msra.mxu1 %v2418_v7  ;;  %v2495_v1 = vld [vmem:[%s3270_s0 + $0xf4] ss:$12 sps:$4 sm:$0xff]   ;;  %v2498_v3 = vld [vmem:[%s3270_s0 + $0xf0] ss:$12 sps:$4 sm:$0xff]   ;;  %v2500_v5 = vld [vmem:[%s3270_s0 + $0x10c] ss:$12 sps:$4 sm:$0xff]  }
  0x17   :  { %866 = vmatprep.subr.bf16.mxu0 %v2565_v0  ;;  %2386 = vmatprep.subr.bf16.mxu1 %v2565_v0  ;;  %v2497_v2 = vld [vmem:[%s3270_s0 + $0x68] ss:$12 sps:$4 sm:$0xff]   ;;  %v2499_v4 = vld [vmem:[%s3270_s0 + $0x80] ss:$12 sps:$4 sm:$0xff]   ;;  %v2502_v6 = vld [vmem:[%s3270_s0 + $0x98] ss:$12 sps:$4 sm:$0xff]  }
  0x18   :  { %v2503_v7 = vld [vmem:[%s3270_s0 + $0x108] ss:$12 sps:$4 sm:$0xff]   ;;  %v2504_v8 = vld [vmem:[%s3270_s0 + $0xb0] ss:$12 sps:$4 sm:$0xff]  }
  0x1a   :  { %867 = vmatpush1.bf16.msra.mxu0 %v2419_v9  ;;  %2402 = vmatpush1.bf16.msra.mxu1 %v2419_v9  ;;  %v2505_v9 = vld [vmem:[%s3270_s0 + $0x124] ss:$12 sps:$4 sm:$0xff]  }
  0x1b   :  { %868 = vmatprep.subr.bf16.mxu0 %v2565_v0  ;;  %2387 = vmatprep.subr.bf16.mxu1 %v2565_v0 }
  0x1e   :  { %869 = vmatpush1.bf16.msra.mxu0 %v2420_v10  ;;  %2403 = vmatpush1.bf16.msra.mxu1 %v2420_v10  ;;  %v2507_v10 = vld [vmem:[%s3270_s0 + $0xc8] ss:$12 sps:$4 sm:$0xff]  }
  0x1f   :  { %870 = vmatprep.subr.bf16.mxu0 %v2565_v0  ;;  %2388 = vmatprep.subr.bf16.mxu1 %v2565_v0 }
  0x22   :  { %871 = vmatpush1.bf16.msra.mxu0 %v2421_v11  ;;  %2404 = vmatpush1.bf16.msra.mxu1 %v2421_v11  ;;  %v2508_v11 = vld [vmem:[%s3270_s0 + $0x120] ss:$12 sps:$4 sm:$0xff]  }
  0x23   :  { %872 = vmatprep.subr.bf16.mxu0 %v2565_v0  ;;  %2389 = vmatprep.subr.bf16.mxu1 %v2565_v0 }
  0x26   :  { %873 = vmatpush1.bf16.msra.mxu0 %v2422_v12  ;;  %2405 = vmatpush1.bf16.msra.mxu1 %v2422_v12  ;;  %v2509_v12 = vld [vmem:[%s3270_s0 + $0xe0] ss:$12 sps:$4 sm:$0xff]  }
  0x27   :  { %874 = vmatprep.subr.bf16.mxu0 %v2565_v0  ;;  %2390 = vmatprep.subr.bf16.mxu1 %v2565_v0 }
  0x2a   :  { %875 = vmatpush1.bf16.msra.mxu0 %v2423_v13  ;;  %2406 = vmatpush1.bf16.msra.mxu1 %v2423_v13  ;;  %v2510_v13 = vld [vmem:[%s3270_s0 + $0x13c] ss:$12 sps:$4 sm:$0xff]  }
  0x2b   :  { %876 = vmatprep.subr.bf16.mxu0 %v2565_v0  ;;  %2391 = vmatprep.subr.bf16.mxu1 %v2565_v0 }
  0x2e   :  { %877 = vmatpush1.bf16.msra.mxu0 %v2424_v14  ;;  %2407 = vmatpush1.bf16.msra.mxu1 %v2424_v14  ;;  %v2512_v14 = vld [vmem:[%s3270_s0 + $0xf8] ss:$12 sps:$4 sm:$0xff]  }
  0x2f   :  { %878 = vmatprep.subr.bf16.mxu0 %v2565_v0  ;;  %2392 = vmatprep.subr.bf16.mxu1 %v2565_v0 }
  0x32   :  { %879 = vmatpush1.bf16.msra.mxu0 %v2425_v15  ;;  %2408 = vmatpush1.bf16.msra.mxu1 %v2425_v15  ;;  %v2513_v15 = vld [vmem:[%s3270_s0 + $0x138] ss:$12 sps:$4 sm:$0xff]  }
  0x33   :  { %880 = vmatprep.subr.bf16.mxu0 %v2565_v0  ;;  %2393 = vmatprep.subr.bf16.mxu1 %v2565_v0 }
  0x36   :  { %881 = vmatpush1.bf16.msra.mxu0 %v2426_v16  ;;  %2409 = vmatpush1.bf16.msra.mxu1 %v2426_v16  ;;  %v2514_v16 = vld [vmem:[%s3270_s0 + $0x110] ss:$12 sps:$4 sm:$0xff]  }
  0x37   :  { %882 = vmatprep.subr.bf16.mxu0 %v2565_v0  ;;  %2394 = vmatprep.subr.bf16.mxu1 %v2565_v0 }
  0x3a   :  { %883 = vmatpush1.bf16.msra.mxu0 %v2427_v17  ;;  %2410 = vmatpush1.bf16.msra.mxu1 %v2427_v17  ;;  %v2515_v17 = vld [vmem:[%s3270_s0 + $0x154] ss:$12 sps:$4 sm:$0xff]  }
  0x3b   :  { %884 = vmatprep.subr.bf16.mxu0 %v2565_v0  ;;  %2395 = vmatprep.subr.bf16.mxu1 %v2565_v0  ;;  %v2494_v0 = vld [vmem:[%s3270_s0 + $0x50] ss:$12 sps:$4 sm:$0xff]  }
  0x3e   :  { %885 = vmatpush1.bf16.msra.mxu0 %v2428_v18  ;;  %2411 = vmatpush1.bf16.msra.mxu1 %v2428_v18  ;;  %v2517_v18 = vld [vmem:[%s3270_s0 + $0x128] ss:$12 sps:$4 sm:$0xff]  }
  0x3f   :  { %2300 = vmatprep.subr.bf16.mxu1 %v2435_v19 }
  0x41   :  { %887 = vmatmul.mubr.bf16.vlgmr.msra.gmra.mrb[0].mxu0 %v2429_v20  ;;  %1079 = vmatmul.mubr.bf16.vlgmr.msra.gmra.mrb[0].mxu1 %v2432_v21  ;;  %v2519_v20 = vld [vmem:[%s3270_s0 + $0x140] ss:$12 sps:$4 sm:$0xff]  }
  0x42   :  { %2301 = vmatpush3.bf16.msra.mxu1 %v2435_v19  ;;  %894 = vmatprep.mubr.bf16.mxu0 %v2436_v22  ;;  %v2518_v19 = vld [vmem:[%s3270_s0 + $0x150] ss:$12 sps:$4 sm:$0xff]   ;;  %v2520_v21 = vld [vmem:[%s3270_s0 + $0x16c] ss:$12 sps:$4 sm:$0xff]  }
  0x43   :  { %1086 = vmatprep.mubr.bf16.mxu1 %v2438_v23  ;;  %2302 = vmatprep.subr.bf16.mxu1 %v2442_v24  ;;  %v2522_v22 = vld [vmem:[%s3270_s0 + $0x158] ss:$12 sps:$4 sm:$0xff]   ;;  %v2523_v23 = vld [vmem:[%s3270_s0 + $0x168] ss:$12 sps:$4 sm:$0xff]  }
  0x46   :  { %2303 = vmatpush3.bf16.msra.mxu1 %v2442_v24  ;;  %v2524_v24 = vld [vmem:[%s3270_s0 + $0x170] ss:$12 sps:$4 sm:$0xff]  }
  0x47   :  { %2304 = vmatprep.subr.bf16.mxu1 %v2449_v25 }
  0x49   :  { %895 = vmatmul.mubr.bf16.gmra.mrb[4].mxu0 %v2440_v26  ;;  %1087 = vmatmul.mubr.bf16.gmra.mrb[4].mxu1 %v2441_v27  ;;  %v2527_v26 = vld [vmem:[%s3270_s0 + $0x188] ss:$12 sps:$4 sm:$0xff]   ;;  %v2528_v27 = vld [vmem:[%s3270_s0 + $0x180] ss:$12 sps:$4 sm:$0xff]  }
  0x4a   :  { %902 = vmatprep.mubr.bf16.mxu0 %v2443_v28  ;;  %1094 = vmatprep.mubr.bf16.mxu1 %v2445_v29  ;;  %v2529_v28 = vld [vmem:[%s3270_s0 + $0x1a0] ss:$12 sps:$4 sm:$0xff]   ;;  %v2530_v29 = vld [vmem:[%s3270_s0 + $0x19c] ss:$12 sps:$4 sm:$0xff]  }
  0x4b   :  { %2305 = vmatpush3.bf16.msra.mxu1 %v2449_v25  ;;  %v2525_v25 = vld [vmem:[%s3270_s0 + $0x184] ss:$12 sps:$4 sm:$0xff]  }
  0x4c   :  { %2306 = vmatprep.subr.bf16.mxu1 %v2456_v30 }
  0x4f   :  { %2307 = vmatpush3.bf16.msra.mxu1 %v2456_v30  ;;  %v2532_v30 = vld [vmem:[%s3270_s0 + $0x1b8] ss:$12 sps:$4 sm:$0xff]  }
  0x50   :  { %2308 = vmatprep.subr.bf16.mxu1 %v2463_v32 }
  0x51   :  { %903 = vmatmul.mubr.bf16.gmra.mrb[8].mxu0 %v2447_v31  ;;  %1095 = vmatmul.mubr.bf16.gmra.mrb[8].mxu1 %v2448_v33  ;;  %v2533_v31 = vld [vmem:[%s3270_s0 + $0x198] ss:$12 sps:$4 sm:$0xff]   ;;  %v2535_v33 = vld [vmem:[%s3270_s0 + $0x1b4] ss:$12 sps:$4 sm:$0xff]  }
  0x52   :  { %910 = vmatprep.mubr.bf16.mxu0 %v2450_v34  ;;  %1102 = vmatprep.mubr.bf16.mxu1 %v2452_v35  ;;  %v2537_v34 = vld [vmem:[%s3270_s0 + $0x1e8] ss:$12 sps:$4 sm:$0xff]   ;;  %v2538_v35 = vld [vmem:[%s3270_s0 + $0x1b0] ss:$12 sps:$4 sm:$0xff]  }
  0x53   :  { %2309 = vmatpush3.bf16.msra.mxu1 %v2463_v32  ;;  %v2534_v32 = vld [vmem:[%s3270_s0 + $0x1d0] ss:$12 sps:$4 sm:$0xff]  }
  0x54   :  { %2310 = vmatprep.subr.bf16.mxu1 %v2470_v36 }
  0x57   :  { %2311 = vmatpush3.bf16.msra.mxu1 %v2470_v36  ;;  %v2539_v36 = vld [vmem:[%s3270_s0 + $0x200] ss:$12 sps:$4 sm:$0xff]  }
  0x58   :  { %2312 = vmatprep.subr.bf16.mxu1 %v2477_v41 }
  0x59   :  { %911 = vmatmul.mubr.bf16.gmra.mrb[12].mxu0 %v2454_v37  ;;  %1103 = vmatmul.mubr.bf16.gmra.mrb[12].mxu1 %v2455_v38  ;;  %v2540_v37 = vld [vmem:[%s3270_s0 + $0x1cc] ss:$12 sps:$4 sm:$0xff]  }
  0x5a   :  { %918 = vmatprep.mubr.bf16.mxu0 %v2457_v39  ;;  %1110 = vmatprep.mubr.bf16.mxu1 %v2459_v40  ;;  %v2542_v38 = vld [vmem:[%s3270_s0 + $0x218] ss:$12 sps:$4 sm:$0xff]   ;;  %v2543_v39 = vld [vmem:[%s3270_s0 + $0x1c8] ss:$12 sps:$4 sm:$0xff]   ;;  %v2544_v40 = vld [vmem:[%s3270_s0 + $0x230] ss:$12 sps:$4 sm:$0xff]  }
  0x5b   :  { %2313 = vmatpush3.bf16.msra.mxu1 %v2477_v41  ;;  %v2545_v41 = vld [vmem:[%s3270_s0 + $0x1e4] ss:$12 sps:$4 sm:$0xff]  }
  0x5c   :  { %2314 = vmatprep.subr.bf16.mxu1 %v2484_v42 }
  0x5f   :  { %2315 = vmatpush3.bf16.msra.mxu1 %v2484_v42  ;;  %v2547_v42 = vld [vmem:[%s3270_s0 + $0x248] ss:$12 sps:$4 sm:$0xff]  }
  0x61   :  { %919 = vmatmul.mubr.bf16.gmra.mrb[16].mxu0 %v2461_v43  ;;  %1111 = vmatmul.mubr.bf16.gmra.mrb[16].mxu1 %v2462_v44  ;;  %v2548_v43 = vld [vmem:[%s3270_s0 + $0x1e0] ss:$12 sps:$4 sm:$0xff]  }
  0x62   :  { %926 = vmatprep.mubr.bf16.mxu0 %v2464_v45  ;;  %1118 = vmatprep.mubr.bf16.mxu1 %v2466_v46  ;;  %v2549_v44 = vld [vmem:[%s3270_s0 + $0x260] ss:$12 sps:$4 sm:$0xff]   ;;  %v2550_v45 = vld [vmem:[%s3270_s0 + $0x1fc] ss:$12 sps:$4 sm:$0xff]   ;;  %v2552_v46 = vld [vmem:[%s3270_s0 + $0x278] ss:$12 sps:$4 sm:$0xff]  }
  0x69   :  { %927 = vmatmul.mubr.bf16.gmra.mrb[20].mxu0 %v2468_v47  ;;  %1119 = vmatmul.mubr.bf16.gmra.mrb[20].mxu1 %v2469_v48  ;;  %v2553_v47 = vld [vmem:[%s3270_s0 + $0x1f8] ss:$12 sps:$4 sm:$0xff]   ;;  %v2554_v48 = vld [vmem:[%s3270_s0 + $0x290] ss:$12 sps:$4 sm:$0xff]  }
  0x6a   :  { %934 = vmatprep.mubr.bf16.mxu0 %v2471_v49  ;;  %1126 = vmatprep.mubr.bf16.mxu1 %v2473_v50  ;;  %v2555_v49 = vld [vmem:[%s3270_s0 + $0x214] ss:$12 sps:$4 sm:$0xff]  }
  0x6b   :  { %v2557_v50 = vld [vmem:[%s3270_s0 + $0x2a8] ss:$12 sps:$4 sm:$0xff]  }
  0x71   :  { %935 = vmatmul.mubr.bf16.gmra.mrb[24].mxu0 %v2475_v51  ;;  %1127 = vmatmul.mubr.bf16.gmra.mrb[24].mxu1 %v2476_v52  ;;  %v2558_v51 = vld [vmem:[%s3270_s0 + $0x210] ss:$12 sps:$4 sm:$0xff]   ;;  %v2559_v52 = vld [vmem:[%s3270_s0 + $0x2c0] ss:$12 sps:$4 sm:$0xff]  }
  0x72   :  { %942 = vmatprep.mubr.bf16.mxu0 %v2478_v53  ;;  %1134 = vmatprep.mubr.bf16.mxu1 %v2480_v54  ;;  %v2560_v53 = vld [vmem:[%s3270_s0 + $0x22c] ss:$12 sps:$4 sm:$0xff]  }
  0x73   :  { %v2562_v54 = vld [vmem:[%s3270_s0 + $0x2d8] ss:$12 sps:$4 sm:$0xff]  }
  0x79   :  { %943 = vmatmul.mubr.bf16.gmra.mrb[28].mxu0 %v2482_v55  ;;  %1135 = vmatmul.mubr.bf16.gmra.mrb[28].mxu1 %v2483_v56  ;;  %v2563_v55 = vld [vmem:[%s3270_s0 + $0x228] ss:$12 sps:$4 sm:$0xff]   ;;  %v2564_v56 = vld [vmem:[%s3270_s0 + $0x2f0] ss:$12 sps:$4 sm:$0xff]  }
  0x7a   :  { %950 = vmatprep.mubr.bf16.mxu0 %v2485_v57  ;;  %2316 = vmatprep.mubr.bf16.mxu1 %v2487_v58 }
  0x81   :  { %951 = vmatmul.mubr.bf16.gmra.mrb[32].mxu0 %v2488_v59  ;;  %2317 = vmatmul.mubr.bf16.vlgmr.msra.gmra.mrb[32].mxu1 %v2489_v60 }
  0x82   :  { %958 = vmatprep.mubr.bf16.mxu0 %v2490_v61  ;;  %2320 = vmatprep.mubr.bf16.mxu1 %v2492_v62 }
  0x89   :  { %959 = vmatmul.mubr.bf16.gmra.mrb[36].mxu0 %v2493_v63  ;;  %2321 = vmatmul.mubr.bf16.gmra.mrb[36].mxu1 %v2494_v0 }
  0x8a   :  { %966 = vmatprep.mubr.bf16.mxu0 %v2495_v1  ;;  %2324 = vmatprep.mubr.bf16.mxu1 %v2497_v2 }
  0x91   :  { %967 = vmatmul.mubr.bf16.gmra.mrb[40].mxu0 %v2498_v3  ;;  %2325 = vmatmul.mubr.bf16.gmra.mrb[40].mxu1 %v2499_v4 }
  0x92   :  { %974 = vmatprep.mubr.bf16.mxu0 %v2500_v5  ;;  %2328 = vmatprep.mubr.bf16.mxu1 %v2502_v6 }
  0x99   :  { %975 = vmatmul.mubr.bf16.gmra.mrb[44].mxu0 %v2503_v7  ;;  %2329 = vmatmul.mubr.bf16.gmra.mrb[44].mxu1 %v2504_v8 }
  0x9a   :  { %982 = vmatprep.mubr.bf16.mxu0 %v2505_v9  ;;  %2332 = vmatprep.mubr.bf16.mxu1 %v2507_v10 }
  0xa1   :  { %983 = vmatmul.mubr.bf16.gmra.mrb[48].mxu0 %v2508_v11  ;;  %2333 = vmatmul.mubr.bf16.gmra.mrb[48].mxu1 %v2509_v12 }
  0xa2   :  { %990 = vmatprep.mubr.bf16.mxu0 %v2510_v13  ;;  %2336 = vmatprep.mubr.bf16.mxu1 %v2512_v14 }
  0xa9   :  { %991 = vmatmul.mubr.bf16.gmra.mrb[52].mxu0 %v2513_v15  ;;  %2337 = vmatmul.mubr.bf16.gmra.mrb[52].mxu1 %v2514_v16 }
  0xaa   :  { %998 = vmatprep.mubr.bf16.mxu0 %v2515_v17  ;;  %2340 = vmatprep.mubr.bf16.mxu1 %v2517_v18 }
  0xb1   :  { %999 = vmatmul.mubr.bf16.gmra.mrb[56].mxu0 %v2518_v19  ;;  %2341 = vmatmul.mubr.bf16.gmra.mrb[56].mxu1 %v2519_v20 }
  0xb2   :  { %1006 = vmatprep.mubr.bf16.mxu0 %v2520_v21  ;;  %2344 = vmatprep.mubr.bf16.mxu1 %v2522_v22 }
  0xb9   :  { %1007 = vmatmul.mubr.bf16.gmra.mrb[60].mxu0 %v2523_v23  ;;  %2345 = vmatmul.mubr.bf16.gmra.mrb[60].mxu1 %v2524_v24 }
  0xba   :  { %1014 = vmatprep.mubr.bf16.mxu0 %v2525_v25  ;;  %2348 = vmatprep.mubr.bf16.mxu1 %v2527_v26 }
  0xc1   :  { %1015 = vmatmul.mubr.bf16.gmra.mrb[64].mxu0 %v2528_v27  ;;  %2349 = vmatmul.mubr.bf16.gmra.mrb[64].mxu1 %v2529_v28 }
  0xc2   :  { %1022 = vmatprep.mubr.bf16.mxu0 %v2530_v29  ;;  %2352 = vmatprep.mubr.bf16.mxu1 %v2532_v30 }
  0xc9   :  { %1023 = vmatmul.mubr.bf16.gmra.mrb[68].mxu0 %v2533_v31  ;;  %2353 = vmatmul.mubr.bf16.gmra.mrb[68].mxu1 %v2534_v32 }
  0xca   :  { %1030 = vmatprep.mubr.bf16.mxu0 %v2535_v33  ;;  %2356 = vmatprep.mubr.bf16.mxu1 %v2537_v34 }
  0xd1   :  { %1031 = vmatmul.mubr.bf16.gmra.mrb[72].mxu0 %v2538_v35  ;;  %2357 = vmatmul.mubr.bf16.gmra.mrb[72].mxu1 %v2539_v36 }
  0xd2   :  { %1038 = vmatprep.mubr.bf16.mxu0 %v2540_v37  ;;  %2360 = vmatprep.mubr.bf16.mxu1 %v2542_v38 }
  0xd9   :  { %1039 = vmatmul.mubr.bf16.gmra.mrb[76].mxu0 %v2543_v39  ;;  %2361 = vmatmul.mubr.bf16.gmra.mrb[76].mxu1 %v2544_v40 }
  0xda   :  { %1046 = vmatprep.mubr.bf16.mxu0 %v2545_v41  ;;  %2364 = vmatprep.mubr.bf16.mxu1 %v2547_v42 }
  0xe1   :  { %1047 = vmatmul.mubr.bf16.gmra.mrb[80].mxu0 %v2548_v43  ;;  %2365 = vmatmul.mubr.bf16.gmra.mrb[80].mxu1 %v2549_v44 }
  0xe2   :  { %1054 = vmatprep.mubr.bf16.mxu0 %v2550_v45  ;;  %2368 = vmatprep.mubr.bf16.mxu1 %v2552_v46 }
  0xe9   :  { %1055 = vmatmul.mubr.bf16.gmra.mrb[84].mxu0 %v2553_v47  ;;  %2369 = vmatmul.mubr.bf16.gmra.mrb[84].mxu1 %v2554_v48 }
  0xea   :  { %1062 = vmatprep.mubr.bf16.mxu0 %v2555_v49  ;;  %2372 = vmatprep.mubr.bf16.mxu1 %v2557_v50 }
  0xf1   :  { %1063 = vmatmul.mubr.bf16.gmra.mrb[88].mxu0 %v2558_v51  ;;  %2373 = vmatmul.mubr.bf16.gmra.mrb[88].mxu1 %v2559_v52 }
  0xf2   :  { %1070 = vmatprep.mubr.bf16.mxu0 %v2560_v53  ;;  %2376 = vmatprep.mubr.bf16.mxu1 %v2562_v54 }
  0xf9   :  { %1071 = vmatmul.mubr.bf16.gmra.mrb[92].mxu0 %v2563_v55  ;;  %2377 = vmatmul.mubr.bf16.gmra.mrb[92].mxu1 %v2564_v56 }
 0x114   :  { %v2978_v57 = vpop.f32.mrb[0].mxu0  ;;  %v2980_v58 = vpop.f32.mrb[0].mxu1 }
 0x115   :  { %v890_v59 = vpop.f32.mrb[1].mxu0  ;;  %v1082_v60 = vpop.f32.mrb[1].mxu1 }
 0x116   :  { %v2982_v61 = vpop.f32.mrb[2].mxu0  ;;  %v2984_v62 = vpop.f32.mrb[2].mxu1  ;;  %v3041_v59 = vld [vmem:[%s3271_s2] ss:$0 sm:$0xff] }
 0x117   :  { %v893_v63 = vpop.f32.mrb[3].mxu0  ;;  %v1085_v0 = vpop.f32.mrb[3].mxu1 }
 0x118   :  { %v889_v63 = vadd.f32 %v3041_v59, %v2978_v57 }
 0x11c   :  { %v896_v1 = vpop.f32.mrb[4].mxu0  ;;  %v2986_v2 = vpop.f32.mrb[4].mxu1 }
 0x11d   :  { %v898_v3 = vpop.f32.mrb[5].mxu0  ;;  %v1090_v4 = vpop.f32.mrb[5].mxu1  ;;  %v897_v60 = vadd.f32 %v3041_v59, %v896_v1 }
 0x11e   :  { %v899_v5 = vpop.f32.mrb[6].mxu0  ;;  %v2988_v6 = vpop.f32.mrb[6].mxu1 }
 0x11f   :  { %v901_v7 = vpop.f32.mrb[7].mxu0  ;;  %v1093_v8 = vpop.f32.mrb[7].mxu1  ;;  %v900_v4 = vadd.f32 %v3041_v59, %v899_v5 }
 0x124   :  { %v2990_v9 = vpop.f32.mrb[8].mxu0  ;;  %v2992_v10 = vpop.f32.mrb[8].mxu1 }
 0x125   :  { %v906_v11 = vpop.f32.mrb[9].mxu0  ;;  %v1098_v12 = vpop.f32.mrb[9].mxu1 }
 0x126   :  { %v2994_v13 = vpop.f32.mrb[10].mxu0  ;;  %v2996_v14 = vpop.f32.mrb[10].mxu1  ;;  %v892_v12 = vadd.f32 %v3041_v59, %v2982_v61 }
 0x127   :  { %v909_v15 = vpop.f32.mrb[11].mxu0  ;;  %v1101_v16 = vpop.f32.mrb[11].mxu1 }
 0x12c   :  { %v2998_v17 = vpop.f32.mrb[12].mxu0  ;;  %v3000_v18 = vpop.f32.mrb[12].mxu1 }
 0x12d   :  { %v914_v19 = vpop.f32.mrb[13].mxu0  ;;  %v1106_v20 = vpop.f32.mrb[13].mxu1  ;;  %v913_v5 = vadd.f32 %v3041_v59, %v2998_v17  ;;  %v908_v17 = vadd.f32 %v3041_v59, %v2994_v13 }
 0x12e   :  { %v3002_v21 = vpop.f32.mrb[14].mxu0  ;;  %v3004_v22 = vpop.f32.mrb[14].mxu1 }
 0x12f   :  { %v917_v23 = vpop.f32.mrb[15].mxu0  ;;  %v1109_v24 = vpop.f32.mrb[15].mxu1 }
 0x134   :  { %v3006_v25 = vpop.f32.mrb[16].mxu0  ;;  %v3008_v26 = vpop.f32.mrb[16].mxu1 }
 0x135   :  { %v922_v27 = vpop.f32.mrb[17].mxu0  ;;  %v1114_v28 = vpop.f32.mrb[17].mxu1 }
 0x136   :  { %v3010_v29 = vpop.f32.mrb[18].mxu0  ;;  %v3012_v30 = vpop.f32.mrb[18].mxu1 }
 0x137   :  { %v925_v31 = vpop.f32.mrb[19].mxu0  ;;  %v1117_v32 = vpop.f32.mrb[19].mxu1 }
 0x13c   :  { %v3014_v33 = vpop.f32.mrb[20].mxu0  ;;  %v3016_v34 = vpop.f32.mrb[20].mxu1 }
 0x13d   :  { %v930_v35 = vpop.f32.mrb[21].mxu0  ;;  %v1122_v36 = vpop.f32.mrb[21].mxu1 }
 0x13e   :  { %v3018_v37 = vpop.f32.mrb[22].mxu0  ;;  %v3020_v38 = vpop.f32.mrb[22].mxu1  ;;  %v905_v35 = vadd.f32 %v3041_v59, %v2990_v9 }
 0x13f   :  { %v933_v39 = vpop.f32.mrb[23].mxu0  ;;  %v1125_v40 = vpop.f32.mrb[23].mxu1 }
 0x140   :  { %v916_v40 = vadd.f32 %v3041_v59, %v3002_v21 }
 0x144   :  { %v3022_v41 = vpop.f32.mrb[24].mxu0  ;;  %v3024_v42 = vpop.f32.mrb[24].mxu1 }
 0x145   :  { %v938_v43 = vpop.f32.mrb[25].mxu0  ;;  %v1130_v44 = vpop.f32.mrb[25].mxu1 }
 0x146   :  { %v3026_v45 = vpop.f32.mrb[26].mxu0  ;;  %v3028_v46 = vpop.f32.mrb[26].mxu1 }
 0x147   :  { %v941_v47 = vpop.f32.mrb[27].mxu0  ;;  %v1133_v48 = vpop.f32.mrb[27].mxu1 }
 0x14c   :  { %v3030_v49 = vpop.f32.mrb[28].mxu0  ;;  %v3032_v50 = vpop.f32.mrb[28].mxu1 }
 0x14d   :  { %v946_v51 = vpop.f32.mrb[29].mxu0  ;;  %v1138_v52 = vpop.f32.mrb[29].mxu1 }
 0x14e   :  { %v3034_v53 = vpop.f32.mrb[30].mxu0  ;;  %v3036_v54 = vpop.f32.mrb[30].mxu1 }
 0x14f   :  { %v949_v55 = vpop.f32.mrb[31].mxu0  ;;  %v1141_v56 = vpop.f32.mrb[31].mxu1 }
 0x154   :  { %v3046_v0 = vpop.f32.mrb[32].mxu0  ;;  %v2318_v3 = vpop.f32.mrb[32].mxu1 }
 0x155   :  { %v1186_v7 = vadd.f32 %v2318_v3, %v897_v60  ;;  %v954_v8 = vpop.f32.mrb[33].mxu0  ;;  %v1177_v11 = vpop.f32.mrb[33].mxu1 }
 0x156   :  { %v1178_v15 = vadd.f32 %v1177_v11, %v889_v63  ;;  %v3051_v16 = vpop.f32.mrb[34].mxu0  ;;  %v2319_v19 = vpop.f32.mrb[34].mxu1  ;;  %v921_v8 = vadd.f32 %v3041_v59, %v3006_v25 }
 0x157   :  { %v1189_v20 = vadd.f32 %v2319_v19, %v900_v4  ;;  %v957_v1 = vpop.f32.mrb[35].mxu0  ;;  %v1180_v23 = vpop.f32.mrb[35].mxu1  ;;  %v1434_v57 = vmax.f32 %v1186_v7, 0.0  ;;  %v929_v7 = vadd.f32 %v3041_v59, %v3014_v33  ;;  %v932_v19 = vadd.f32 %v3041_v59, %v3018_v37 }
 0x158   :  { %v1181_v24 = vadd.f32 %v1180_v23, %v892_v12  ;;  %v1432_v28 = vmax.f32 %v1178_v15, 0.0  ;;  %v924_v33 = vadd.f32 %v3041_v59, %v3010_v29 }
 0x159   :  { %v1435_v27 = vmax.f32 %v1189_v20, 0.0 }
 0x15a   :  { %v1433_v31 = vmax.f32 %v1181_v24, 0.0 }
 0x15b   :  { %v2077_v32 = vpack.c.bf16 %v1435_v27, %v1434_v57 }
 0x15c   :  { %v2072_v61 = vpack.c.bf16 %v1433_v31, %v1432_v28  ;;  %v3057_v36 = vpop.f32.mrb[36].mxu0  ;;  %v2322_v39 = vpop.f32.mrb[36].mxu1 }
 0x15d   :  { %2229 = vst [vmem:[%s3272_s3 + $0x8] sm:$0xff] %v2077_v32   ;;  %v1202_v43 = vadd.f32 %v2322_v39, %v913_v5  ;;  %v962_v44 = vpop.f32.mrb[37].mxu0  ;;  %v1193_v47 = vpop.f32.mrb[37].mxu1  ;;  %v945_v39 = vadd.f32 %v3041_v59, %v3030_v49  ;;  %v940_v49 = vadd.f32 %v3041_v59, %v3026_v45  ;;  %v953_v45 = vadd.f32 %v3041_v59, %v3046_v0 }
 0x15e   :  { %2073 = vst [vmem:[%s3272_s3] sm:$0xff] %v2072_v61   ;;  %v1194_v9 = vadd.f32 %v1193_v47, %v905_v35  ;;  %v3069_v48 = vpop.f32.mrb[38].mxu0  ;;  %v2323_v51 = vpop.f32.mrb[38].mxu1 }
 0x15f   :  { %v1205_v52 = vadd.f32 %v2323_v51, %v916_v40  ;;  %v965_v21 = vpop.f32.mrb[39].mxu0  ;;  %v1196_v55 = vpop.f32.mrb[39].mxu1  ;;  %v1438_v60 = vmax.f32 %v1202_v43, 0.0  ;;  %v937_v40 = vadd.f32 %v3041_v59, %v3022_v41 }
 0x160   :  { %v1197_v56 = vadd.f32 %v1196_v55, %v908_v17  ;;  %v1436_v3 = vmax.f32 %v1194_v9, 0.0  ;;  %v948_v17 = vadd.f32 %v3041_v59, %v3034_v53 }
 0x161   :  { %v1439_v63 = vmax.f32 %v1205_v52, 0.0 }
 0x162   :  { %v1437_v4 = vmax.f32 %v1197_v56, 0.0 }
 0x163   :  { %v2087_v13 = vpack.c.bf16 %v1439_v63, %v1438_v60 }
 0x164   :  { %v2082_v11 = vpack.c.bf16 %v1437_v4, %v1436_v3  ;;  %v3075_v12 = vpop.f32.mrb[40].mxu0  ;;  %v2326_v15 = vpop.f32.mrb[40].mxu1 }
 0x165   :  { %2231 = vst [vmem:[%s3272_s3 + $0x18] sm:$0xff] %v2087_v13   ;;  %v1218_v20 = vadd.f32 %v2326_v15, %v929_v7  ;;  %v970_v1 = vpop.f32.mrb[41].mxu0  ;;  %v1209_v23 = vpop.f32.mrb[41].mxu1 }
 0x166   :  { %2230 = vst [vmem:[%s3272_s3 + $0x10] sm:$0xff] %v2082_v11   ;;  %v1210_v25 = vadd.f32 %v1209_v23, %v921_v8  ;;  %v3087_v24 = vpop.f32.mrb[42].mxu0  ;;  %v2327_v57 = vpop.f32.mrb[42].mxu1  ;;  %v961_v8 = vadd.f32 %v3041_v59, %v3057_v36  ;;  %v964_v1 = vadd.f32 %v3041_v59, %v3069_v48  ;;  %v956_v36 = vadd.f32 %v3041_v59, %v3051_v16 }
 0x167   :  { %v1221_v27 = vadd.f32 %v2327_v57, %v932_v19  ;;  %v973_v37 = vpop.f32.mrb[43].mxu0  ;;  %v1212_v28 = vpop.f32.mrb[43].mxu1  ;;  %v1442_v5 = vmax.f32 %v1218_v20, 0.0  ;;  %v969_v16 = vadd.f32 %v3041_v59, %v3075_v12 }
 0x168   :  { %v1213_v31 = vadd.f32 %v1212_v28, %v924_v33  ;;  %v1440_v35 = vmax.f32 %v1210_v25, 0.0 }
 0x169   :  { %v1443_v32 = vmax.f32 %v1221_v27, 0.0 }
 0x16a   :  { %v1441_v61 = vmax.f32 %v1213_v31, 0.0 }
 0x16b   :  { %v2097_v29 = vpack.c.bf16 %v1443_v32, %v1442_v5 }
 0x16c   :  { %v2092_v43 = vpack.c.bf16 %v1441_v61, %v1440_v35  ;;  %v976_v44 = vpop.f32.mrb[44].mxu0  ;;  %v2330_v47 = vpop.f32.mrb[44].mxu1 }
 0x16d   :  { %2233 = vst [vmem:[%s3272_s3 + $0x28] sm:$0xff] %v2097_v29   ;;  %v1234_v9 = vadd.f32 %v2330_v47, %v945_v39  ;;  %v978_v51 = vpop.f32.mrb[45].mxu0  ;;  %v1225_v52 = vpop.f32.mrb[45].mxu1  ;;  %v977_v39 = vadd.f32 %v3041_v59, %v976_v44 }
 0x16e   :  { %2232 = vst [vmem:[%s3272_s3 + $0x20] sm:$0xff] %v2092_v43   ;;  %v1226_v41 = vadd.f32 %v1225_v52, %v937_v40  ;;  %v979_v21 = vpop.f32.mrb[46].mxu0  ;;  %v2331_v55 = vpop.f32.mrb[46].mxu1 }
 0x16f   :  { %v1237_v56 = vadd.f32 %v2331_v55, %v948_v17  ;;  %v981_v60 = vpop.f32.mrb[47].mxu0  ;;  %v1228_v53 = vpop.f32.mrb[47].mxu1  ;;  %v1446_v3 = vmax.f32 %v1234_v9, 0.0  ;;  %v980_v17 = vadd.f32 %v3041_v59, %v979_v21 }
 0x170   :  { %v1229_v63 = vadd.f32 %v1228_v53, %v940_v49  ;;  %v1444_v7 = vmax.f32 %v1226_v41, 0.0  ;;  %v972_v49 = vadd.f32 %v3041_v59, %v3087_v24 }
 0x171   :  { %v1447_v4 = vmax.f32 %v1237_v56, 0.0 }
 0x172   :  { %v1445_v13 = vmax.f32 %v1229_v63, 0.0 }
 0x173   :  { %v2107_v11 = vpack.c.bf16 %v1447_v4, %v1446_v3 }
 0x174   :  { %v2102_v15 = vpack.c.bf16 %v1445_v13, %v1444_v7  ;;  %v984_v19 = vpop.f32.mrb[48].mxu0  ;;  %v2334_v20 = vpop.f32.mrb[48].mxu1 }
 0x175   :  { %2235 = vst [vmem:[%s3272_s3 + $0x38] sm:$0xff] %v2107_v11   ;;  %v1250_v23 = vadd.f32 %v2334_v20, %v961_v8  ;;  %v986_v33 = vpop.f32.mrb[49].mxu0  ;;  %v1241_v25 = vpop.f32.mrb[49].mxu1  ;;  %v985_v24 = vadd.f32 %v3041_v59, %v984_v19 }
 0x176   :  { %2234 = vst [vmem:[%s3272_s3 + $0x30] sm:$0xff] %v2102_v15   ;;  %v1242_v0 = vadd.f32 %v1241_v25, %v953_v45  ;;  %v987_v57 = vpop.f32.mrb[50].mxu0  ;;  %v2335_v27 = vpop.f32.mrb[50].mxu1 }
 0x177   :  { %v1253_v37 = vadd.f32 %v2335_v27, %v964_v1  ;;  %v989_v28 = vpop.f32.mrb[51].mxu0  ;;  %v1244_v48 = vpop.f32.mrb[51].mxu1  ;;  %v1450_v5 = vmax.f32 %v1250_v23, 0.0  ;;  %v988_v33 = vadd.f32 %v3041_v59, %v987_v57 }
 0x178   :  { %v1245_v31 = vadd.f32 %v1244_v48, %v956_v36  ;;  %v1448_v35 = vmax.f32 %v1242_v0, 0.0 }
 0x179   :  { %v1451_v32 = vmax.f32 %v1253_v37, 0.0 }
 0x17a   :  { %v1449_v61 = vmax.f32 %v1245_v31, 0.0 }
 0x17b   :  { %v2117_v29 = vpack.c.bf16 %v1451_v32, %v1450_v5 }
 0x17c   :  { %v2112_v40 = vpack.c.bf16 %v1449_v61, %v1448_v35  ;;  %v992_v43 = vpop.f32.mrb[52].mxu0  ;;  %v2338_v47 = vpop.f32.mrb[52].mxu1 }
 0x17d   :  { %2237 = vst [vmem:[%s3272_s3 + $0x48] sm:$0xff] %v2117_v29   ;;  %v1266_v9 = vadd.f32 %v2338_v47, %v977_v39  ;;  %v994_v51 = vpop.f32.mrb[53].mxu0  ;;  %v1257_v52 = vpop.f32.mrb[53].mxu1  ;;  %v993_v7 = vadd.f32 %v3041_v59, %v992_v43 }
 0x17e   :  { %2236 = vst [vmem:[%s3272_s3 + $0x40] sm:$0xff] %v2112_v40   ;;  %v1258_v12 = vadd.f32 %v1257_v52, %v969_v16  ;;  %v995_v44 = vpop.f32.mrb[54].mxu0  ;;  %v2339_v41 = vpop.f32.mrb[54].mxu1 }
 0x17f   :  { %v1269_v55 = vadd.f32 %v2339_v41, %v980_v17  ;;  %v997_v56 = vpop.f32.mrb[55].mxu0  ;;  %v1260_v21 = vpop.f32.mrb[55].mxu1  ;;  %v1454_v53 = vmax.f32 %v1266_v9, 0.0  ;;  %v996_v15 = vadd.f32 %v3041_v59, %v995_v44 }
 0x180   :  { %v1261_v60 = vadd.f32 %v1260_v21, %v972_v49  ;;  %v1452_v3 = vmax.f32 %v1258_v12, 0.0 }
 0x181   :  { %v1455_v63 = vmax.f32 %v1269_v55, 0.0 }
 0x182   :  { %v1453_v4 = vmax.f32 %v1261_v60, 0.0 }
 0x183   :  { %v2127_v13 = vpack.c.bf16 %v1455_v63, %v1454_v53 }
 0x184   :  { %v2122_v8 = vpack.c.bf16 %v1453_v4, %v1452_v3  ;;  %v1000_v11 = vpop.f32.mrb[56].mxu0  ;;  %v2342_v45 = vpop.f32.mrb[56].mxu1 }
 0x185   :  { %2239 = vst [vmem:[%s3272_s3 + $0x58] sm:$0xff] %v2127_v13   ;;  %v1282_v20 = vadd.f32 %v2342_v45, %v993_v7  ;;  %v1002_v1 = vpop.f32.mrb[57].mxu0  ;;  %v1273_v23 = vpop.f32.mrb[57].mxu1  ;;  %v1001_v61 = vadd.f32 %v3041_v59, %v1000_v11 }
 0x186   :  { %2238 = vst [vmem:[%s3272_s3 + $0x50] sm:$0xff] %v2122_v8   ;;  %v1274_v25 = vadd.f32 %v1273_v23, %v985_v24  ;;  %v1003_v19 = vpop.f32.mrb[58].mxu0  ;;  %v2343_v36 = vpop.f32.mrb[58].mxu1 }
 0x187   :  { %v1285_v0 = vadd.f32 %v2343_v36, %v996_v15  ;;  %v1005_v27 = vpop.f32.mrb[59].mxu0  ;;  %v1276_v37 = vpop.f32.mrb[59].mxu1  ;;  %v1458_v48 = vmax.f32 %v1282_v20, 0.0  ;;  %v1004_v47 = vadd.f32 %v3041_v59, %v1003_v19 }
 0x188   :  { %v1277_v28 = vadd.f32 %v1276_v37, %v988_v33  ;;  %v1456_v5 = vmax.f32 %v1274_v25, 0.0 }
 0x189   :  { %v1459_v31 = vmax.f32 %v1285_v0, 0.0 }
 0x18a   :  { %v1457_v32 = vmax.f32 %v1277_v28, 0.0 }
 0x18b   :  { %v2137_v35 = vpack.c.bf16 %v1459_v31, %v1458_v48 }
 0x18c   :  { %v2132_v39 = vpack.c.bf16 %v1457_v32, %v1456_v5  ;;  %v1008_v57 = vpop.f32.mrb[60].mxu0  ;;  %v2346_v29 = vpop.f32.mrb[60].mxu1 }
 0x18d   :  { %2241 = vst [vmem:[%s3272_s3 + $0x68] sm:$0xff] %v2137_v35   ;;  %v1009_v16 = vadd.f32 %v3041_v59, %v1008_v57  ;;  %v1010_v40 = vpop.f32.mrb[61].mxu0  ;;  %v1289_v43 = vpop.f32.mrb[61].mxu1 }
 0x18e   :  { %2240 = vst [vmem:[%s3272_s3 + $0x60] sm:$0xff] %v2132_v39   ;;  %v1290_v17 = vadd.f32 %v1289_v43, %v1001_v61  ;;  %v1011_v9 = vpop.f32.mrb[62].mxu0  ;;  %v2347_v51 = vpop.f32.mrb[62].mxu1 }
 0x18f   :  { %v1298_v52 = vadd.f32 %v2346_v29, %v1009_v16  ;;  %v1012_v49 = vadd.f32 %v3041_v59, %v1011_v9  ;;  %v1013_v12 = vpop.f32.mrb[63].mxu0  ;;  %v1292_v44 = vpop.f32.mrb[63].mxu1 }
 0x190   :  { %v1293_v41 = vadd.f32 %v1292_v44, %v1004_v47  ;;  %v1460_v56 = vmax.f32 %v1290_v17, 0.0 }
 0x191   :  { %v1301_v55 = vadd.f32 %v2347_v51, %v1012_v49  ;;  %v1462_v60 = vmax.f32 %v1298_v52, 0.0 }
 0x192   :  { %v1461_v21 = vmax.f32 %v1293_v41, 0.0 }
 0x193   :  { %v1463_v53 = vmax.f32 %v1301_v55, 0.0 }
 0x194   :  { %v2142_v63 = vpack.c.bf16 %v1461_v21, %v1460_v56  ;;  %v1016_v3 = vpop.f32.mrb[64].mxu0  ;;  %v2350_v4 = vpop.f32.mrb[64].mxu1 }
 0x195   :  { %v2147_v7 = vpack.c.bf16 %v1463_v53, %v1462_v60  ;;  %v1017_v13 = vadd.f32 %v3041_v59, %v1016_v3  ;;  %v1018_v24 = vpop.f32.mrb[65].mxu0  ;;  %v1305_v8 = vpop.f32.mrb[65].mxu1 }
 0x196   :  { %2242 = vst [vmem:[%s3272_s3 + $0x70] sm:$0xff] %v2142_v63   ;;  %v1019_v11 = vpop.f32.mrb[66].mxu0  ;;  %v2351_v45 = vpop.f32.mrb[66].mxu1 }
 0x197   :  { %2243 = vst [vmem:[%s3272_s3 + $0x78] sm:$0xff] %v2147_v7   ;;  %v1306_v15 = vadd.f32 %v1305_v8, %v1017_v13  ;;  %v1020_v20 = vadd.f32 %v3041_v59, %v1019_v11  ;;  %v1021_v1 = vpop.f32.mrb[67].mxu0  ;;  %v1308_v23 = vpop.f32.mrb[67].mxu1 }
 0x199   :  { %v1309_v33 = vadd.f32 %v1308_v23, %v1020_v20  ;;  %v1464_v25 = vmax.f32 %v1306_v15, 0.0  ;;  %v1089_v23 = vadd.f32 %v3041_v59, %v2986_v2 }
 0x19b   :  { %v1465_v19 = vmax.f32 %v1309_v33, 0.0 }
 0x19c   :  { %v1024_v36 = vpop.f32.mrb[68].mxu0  ;;  %v2354_v0 = vpop.f32.mrb[68].mxu1 }
 0x19d   :  { %v2152_v27 = vpack.c.bf16 %v1465_v19, %v1464_v25  ;;  %v1025_v37 = vadd.f32 %v3041_v59, %v1024_v36  ;;  %v1026_v28 = vpop.f32.mrb[69].mxu0  ;;  %v1321_v48 = vpop.f32.mrb[69].mxu1  ;;  %v1081_v19 = vadd.f32 %v3041_v59, %v2980_v58 }
 0x19e   :  { %v1027_v31 = vpop.f32.mrb[70].mxu0  ;;  %v2355_v5 = vpop.f32.mrb[70].mxu1 }
 0x19f   :  { %2244 = vst [vmem:[%s3272_s3 + $0x80] sm:$0xff] %v2152_v27   ;;  %v1314_v32 = vadd.f32 %v2350_v4, %v1025_v37  ;;  %v1028_v35 = vadd.f32 %v3041_v59, %v1027_v31  ;;  %v1029_v61 = vpop.f32.mrb[71].mxu0  ;;  %v1324_v39 = vpop.f32.mrb[71].mxu1  ;;  %v1092_v37 = vadd.f32 %v3041_v59, %v2988_v6 }
 0x1a1   :  { %v1317_v57 = vadd.f32 %v2351_v45, %v1028_v35  ;;  %v1466_v29 = vmax.f32 %v1314_v32, 0.0 }
 0x1a3   :  { %v1467_v16 = vmax.f32 %v1317_v57, 0.0 }
 0x1a4   :  { %v1032_v40 = vpop.f32.mrb[72].mxu0  ;;  %v3162_v43 = vpop.f32.mrb[72].mxu1 }
 0x1a5   :  { %v2157_v47 = vpack.c.bf16 %v1467_v16, %v1466_v29  ;;  %v1033_v17 = vadd.f32 %v3041_v59, %v1032_v40  ;;  %v1034_v9 = vpop.f32.mrb[73].mxu0  ;;  %v1337_v51 = vpop.f32.mrb[73].mxu1 }
 0x1a6   :  { %v1035_v52 = vpop.f32.mrb[74].mxu0  ;;  %v3165_v49 = vpop.f32.mrb[74].mxu1 }
 0x1a7   :  { %2245 = vst [vmem:[%s3272_s3 + $0x88] sm:$0xff] %v2157_v47   ;;  %v1322_v12 = vadd.f32 %v1321_v48, %v1033_v17  ;;  %v1036_v44 = vadd.f32 %v3041_v59, %v1035_v52  ;;  %v1037_v41 = vpop.f32.mrb[75].mxu0  ;;  %v1340_v55 = vpop.f32.mrb[75].mxu1 }
 0x1a9   :  { %v1325_v56 = vadd.f32 %v1324_v39, %v1036_v44  ;;  %v1468_v21 = vmax.f32 %v1322_v12, 0.0 }
 0x1ab   :  { %v1469_v60 = vmax.f32 %v1325_v56, 0.0 }
 0x1ac   :  { %v1040_v53 = vpop.f32.mrb[76].mxu0  ;;  %v3171_v63 = vpop.f32.mrb[76].mxu1 }
 0x1ad   :  { %v2162_v3 = vpack.c.bf16 %v1469_v60, %v1468_v21  ;;  %v1041_v4 = vadd.f32 %v3041_v59, %v1040_v53  ;;  %v1042_v7 = vpop.f32.mrb[77].mxu0  ;;  %v3174_v13 = vpop.f32.mrb[77].mxu1  ;;  %v1108_v53 = vadd.f32 %v3041_v59, %v3004_v22 }
 0x1ae   :  { %v1043_v24 = vpop.f32.mrb[78].mxu0  ;;  %v3176_v8 = vpop.f32.mrb[78].mxu1 }
 0x1af   :  { %2246 = vst [vmem:[%s3272_s3 + $0x90] sm:$0xff] %v2162_v3   ;;  %v1330_v11 = vadd.f32 %v2354_v0, %v1041_v4  ;;  %v1044_v45 = vadd.f32 %v3041_v59, %v1043_v24  ;;  %v1045_v15 = vpop.f32.mrb[79].mxu0  ;;  %v3182_v20 = vpop.f32.mrb[79].mxu1  ;;  %v1100_v24 = vadd.f32 %v3041_v59, %v2996_v14 }
 0x1b1   :  { %v1333_v1 = vadd.f32 %v2355_v5, %v1044_v45  ;;  %v1470_v33 = vmax.f32 %v1330_v11, 0.0  ;;  %v1084_v5 = vadd.f32 %v3041_v59, %v2984_v62  ;;  %v1105_v62 = vadd.f32 %v3041_v59, %v3000_v18 }
 0x1b3   :  { %v1471_v25 = vmax.f32 %v1333_v1, 0.0 }
 0x1b4   :  { %v1048_v36 = vpop.f32.mrb[80].mxu0  ;;  %v2366_v27 = vpop.f32.mrb[80].mxu1 }
 0x1b5   :  { %v2167_v0 = vpack.c.bf16 %v1471_v25, %v1470_v33  ;;  %v1049_v28 = vadd.f32 %v3041_v59, %v1048_v36  ;;  %v1378_v48 = vadd.f32 %v2366_v27, %v1089_v23  ;;  %v1050_v31 = vpop.f32.mrb[81].mxu0  ;;  %v1369_v32 = vpop.f32.mrb[81].mxu1 }
 0x1b6   :  { %v1370_v2 = vadd.f32 %v1369_v32, %v1081_v19  ;;  %v1051_v35 = vpop.f32.mrb[82].mxu0  ;;  %v2367_v61 = vpop.f32.mrb[82].mxu1 }
 0x1b7   :  { %2247 = vst [vmem:[%s3272_s3 + $0x98] sm:$0xff] %v2167_v0   ;;  %v1338_v58 = vadd.f32 %v1337_v51, %v1049_v28  ;;  %v1052_v39 = vadd.f32 %v3041_v59, %v1051_v35  ;;  %v1381_v6 = vadd.f32 %v2367_v61, %v1092_v37  ;;  %v1053_v57 = vpop.f32.mrb[83].mxu0  ;;  %v1372_v29 = vpop.f32.mrb[83].mxu1  ;;  %v1482_v40 = vmax.f32 %v1378_v48, 0.0 }
 0x1b8   :  { %v1373_v16 = vadd.f32 %v1372_v29, %v1084_v5  ;;  %v1480_v9 = vmax.f32 %v1370_v2, 0.0  ;;  %v1097_v51 = vadd.f32 %v3041_v59, %v2992_v10  ;;  %v1121_v0 = vadd.f32 %v3041_v59, %v3016_v34 }
 0x1b9   :  { %v1341_v47 = vadd.f32 %v1340_v55, %v1052_v39  ;;  %v1483_v17 = vmax.f32 %v1381_v6, 0.0  ;;  %v1472_v12 = vmax.f32 %v1338_v58, 0.0  ;;  %v1124_v35 = vadd.f32 %v3041_v59, %v3020_v38 }
 0x1ba   :  { %v1481_v52 = vmax.f32 %v1373_v16, 0.0  ;;  %v1116_v6 = vadd.f32 %v3041_v59, %v3012_v30 }
 0x1bb   :  { %v1473_v44 = vmax.f32 %v1341_v47, 0.0  ;;  %v2197_v41 = vpack.c.bf16 %v1483_v17, %v1482_v40 }
 0x1bc   :  { %v2192_v56 = vpack.c.bf16 %v1481_v52, %v1480_v9  ;;  %v1056_v21 = vpop.f32.mrb[84].mxu0  ;;  %v2370_v60 = vpop.f32.mrb[84].mxu1 }
 0x1bd   :  { %v2172_v3 = vpack.c.bf16 %v1473_v44, %v1472_v12  ;;  %2253 = vst [vmem:[%s3272_s3 + $0xc8] sm:$0xff] %v2197_v41   ;;  %v1057_v55 = vadd.f32 %v3041_v59, %v1056_v21  ;;  %v1394_v18 = vadd.f32 %v2370_v60, %v1105_v62  ;;  %v1058_v4 = vpop.f32.mrb[85].mxu0  ;;  %v1385_v7 = vpop.f32.mrb[85].mxu1  ;;  %v1137_v41 = vadd.f32 %v3041_v59, %v3032_v50 }
 0x1be   :  { %2252 = vst [vmem:[%s3272_s3 + $0xc0] sm:$0xff] %v2192_v56   ;;  %v1386_v10 = vadd.f32 %v1385_v7, %v1097_v51  ;;  %v1059_v11 = vpop.f32.mrb[86].mxu0  ;;  %v2371_v22 = vpop.f32.mrb[86].mxu1 }
 0x1bf   :  { %2248 = vst [vmem:[%s3272_s3 + $0xa0] sm:$0xff] %v2172_v3   ;;  %v1346_v45 = vadd.f32 %v3162_v43, %v1057_v55  ;;  %v1060_v15 = vadd.f32 %v3041_v59, %v1059_v11  ;;  %v1397_v1 = vadd.f32 %v2371_v22, %v1108_v53  ;;  %v1061_v23 = vpop.f32.mrb[87].mxu0  ;;  %v1388_v33 = vpop.f32.mrb[87].mxu1  ;;  %v1486_v14 = vmax.f32 %v1394_v18, 0.0 }
 0x1c0   :  { %v1389_v25 = vadd.f32 %v1388_v33, %v1100_v24  ;;  %v1484_v27 = vmax.f32 %v1386_v10, 0.0  ;;  %v1113_v43 = vadd.f32 %v3041_v59, %v3008_v26  ;;  %v1140_v55 = vadd.f32 %v3041_v59, %v3036_v54 }
 0x1c1   :  { %v1349_v19 = vadd.f32 %v3165_v49, %v1060_v15  ;;  %v1487_v36 = vmax.f32 %v1397_v1, 0.0  ;;  %v1474_v28 = vmax.f32 %v1346_v45, 0.0  ;;  %v1132_v24 = vadd.f32 %v3041_v59, %v3028_v46 }
 0x1c2   :  { %v1485_v37 = vmax.f32 %v1389_v25, 0.0 }
 0x1c3   :  { %v1475_v48 = vmax.f32 %v1349_v19, 0.0  ;;  %v2207_v31 = vpack.c.bf16 %v1487_v36, %v1486_v14 }
 0x1c4   :  { %v2202_v32 = vpack.c.bf16 %v1485_v37, %v1484_v27  ;;  %v1064_v5 = vpop.f32.mrb[88].mxu0  ;;  %v2374_v2 = vpop.f32.mrb[88].mxu1 }
 0x1c5   :  { %v2177_v61 = vpack.c.bf16 %v1475_v48, %v1474_v28  ;;  %2255 = vst [vmem:[%s3272_s3 + $0xd8] sm:$0xff] %v2207_v31   ;;  %v1065_v49 = vadd.f32 %v3041_v59, %v1064_v5  ;;  %v1410_v34 = vadd.f32 %v2374_v2, %v1121_v0  ;;  %v1066_v58 = vpop.f32.mrb[89].mxu0  ;;  %v1401_v39 = vpop.f32.mrb[89].mxu1 }
 0x1c6   :  { %2254 = vst [vmem:[%s3272_s3 + $0xd0] sm:$0xff] %v2202_v32   ;;  %v1402_v26 = vadd.f32 %v1401_v39, %v1113_v43  ;;  %v1067_v57 = vpop.f32.mrb[90].mxu0  ;;  %v2375_v38 = vpop.f32.mrb[90].mxu1 }
 0x1c7   :  { %2249 = vst [vmem:[%s3272_s3 + $0xa8] sm:$0xff] %v2177_v61   ;;  %v1354_v29 = vadd.f32 %v3174_v13, %v1065_v49  ;;  %v1068_v16 = vadd.f32 %v3041_v59, %v1067_v57  ;;  %v1413_v40 = vadd.f32 %v2375_v38, %v1124_v35  ;;  %v1069_v47 = vpop.f32.mrb[91].mxu0  ;;  %v1404_v17 = vpop.f32.mrb[91].mxu1  ;;  %v1490_v30 = vmax.f32 %v1410_v34, 0.0 }
 0x1c8   :  { %v1405_v9 = vadd.f32 %v1404_v17, %v1116_v6  ;;  %v1488_v12 = vmax.f32 %v1402_v26, 0.0  ;;  %v1129_v13 = vadd.f32 %v3041_v59, %v3024_v42 }
 0x1c9   :  { %v1357_v52 = vadd.f32 %v3182_v20, %v1068_v16  ;;  %v1491_v62 = vmax.f32 %v1413_v40, 0.0  ;;  %v1476_v51 = vmax.f32 %v1354_v29, 0.0 }
 0x1ca   :  { %v1489_v44 = vmax.f32 %v1405_v9, 0.0 }
 0x1cb   :  { %v1477_v56 = vmax.f32 %v1357_v52, 0.0  ;;  %v2217_v21 = vpack.c.bf16 %v1491_v62, %v1490_v30 }
 0x1cc   :  { %v2212_v60 = vpack.c.bf16 %v1489_v44, %v1488_v12  ;;  %v1072_v53 = vpop.f32.mrb[92].mxu0  ;;  %v2378_v3 = vpop.f32.mrb[92].mxu1 }
 0x1cd   :  { %v2182_v18 = vpack.c.bf16 %v1477_v56, %v1476_v51  ;;  %2257 = vst [vmem:[%s3272_s3 + $0xe8] sm:$0xff] %v2217_v21   ;;  %v1073_v20 = vadd.f32 %v3041_v59, %v1072_v53  ;;  %v1426_v50 = vadd.f32 %v2378_v3, %v1137_v41  ;;  %v1074_v4 = vpop.f32.mrb[93].mxu0  ;;  %v1417_v7 = vpop.f32.mrb[93].mxu1 }
 0x1ce   :  { %2256 = vst [vmem:[%s3272_s3 + $0xe0] sm:$0xff] %v2212_v60   ;;  %v1418_v42 = vadd.f32 %v1417_v7, %v1129_v13  ;;  %v1075_v10 = vpop.f32.mrb[94].mxu0  ;;  %v2379_v54 = vpop.f32.mrb[94].mxu1 }
 0x1cf   :  { %2250 = vst [vmem:[%s3272_s3 + $0xb0] sm:$0xff] %v2182_v18   ;;  %v1362_v11 = vadd.f32 %v3171_v63, %v1073_v20  ;;  %v1076_v22 = vadd.f32 %v3041_v59, %v1075_v10  ;;  %v1429_v45 = vadd.f32 %v2379_v54, %v1140_v55  ;;  %v1077_v15 = vpop.f32.mrb[95].mxu0  ;;  %v1420_v1 = vpop.f32.mrb[95].mxu1  ;;  %v1494_v46 = vmax.f32 %v1426_v50, 0.0 }
 0x1d0   :  { %v1421_v23 = vadd.f32 %v1420_v1, %v1132_v24  ;;  %v1492_v14 = vmax.f32 %v1418_v42, 0.0 }
 0x1d1   :  { %v1365_v33 = vadd.f32 %v3176_v8, %v1076_v22  ;;  %v1495_v25 = vmax.f32 %v1429_v45, 0.0  ;;  %v1478_v36 = vmax.f32 %v1362_v11, 0.0 }
 0x1d2   :  { %v1493_v19 = vmax.f32 %v1421_v23, 0.0 }
 0x1d3   :  { %v1479_v27 = vmax.f32 %v1365_v33, 0.0  ;;  %v2227_v37 = vpack.c.bf16 %v1495_v25, %v1494_v46 }
 0x1d4   :  { %v2222_v0 = vpack.c.bf16 %v1493_v19, %v1492_v14 }
 0x1d5   :  { %v2187_v28 = vpack.c.bf16 %v1479_v27, %v1478_v36  ;;  %2259 = vst [vmem:[%s3272_s3 + $0xf8] sm:$0xff] %v2227_v37  }
 0x1d6   :  { %2258 = vst [vmem:[%s3272_s3 + $0xf0] sm:$0xff] %v2222_v0  }
 0x1d7   :  { %2251 = vst [vmem:[%s3272_s3 + $0xb8] sm:$0xff] %v2187_v28  }

// kernel: eitnet_forward.14
= control target key start
LH: loop header
LB: loop body
LE: loop exit
PB: predicated region body
PF: predicated region fallthrough
CT: control target
= control target key end

     0   :  { %s3526_s12 = smov 0   ;;  %s3961_s0 = inlined_call_operand.vmem [shape: bf16[2048,256], index: 0, kind: input, shape index: {}]   ;;  %s3962_s1 = inlined_call_operand.vmem [shape: bf16[256,128], index: 1, kind: input, shape index: {}]   ;;  %s3963_s2 = inlined_call_operand.vmem [shape: f32[1,128], index: 2, kind: input, shape index: {}]   ;;  %s3964_s3 = inlined_call_operand.vmem [shape: bf16[2048,128], index: 3, kind: output, shape index: {}]  }
   0x1 LB: > { %s2450_s13 = sadd.s32 4294967295, %s3503_s12   ;;  %p2454_p0 = scmp.ge.s32.totalorder %s3503_s12, 1  ;;  %s3503_s12 = sphi %s3526_s12, %s13_s12  }
   0x2   : > { %p139_p1 = scmp.lt.s32.totalorder %s3503_s12, 3 }
   0x4   : > { %p140_p2 = pnand %p2454_p0, %p139_p1 }
   0x5   : > { %v3288_v0 = vld [vmem:[%s3962_s1] sm:$0xff] (!%p140_p2)   ;;  %v3505_v1 = vmov (!%p140_p2), 0   ;;  %s2455_s16 = sshll.u32 (!%p140_p2), %s2450_s13, 7  ;;  %v3289_v2 = vld [vmem:[%s3962_s1 + $0x8] sm:$0xff] (!%p140_p2)   ;;  %v3290_v3 = vld [vmem:[%s3962_s1 + $0x10] sm:$0xff] (!%p140_p2)  }
   0x6   : > { %143 = sbr.rel (%p140_p2) target bundleno = 539 (0x21b), region = 32  ;;  %1081 = vmatprep.subr.bf16.mxu0 (!%p140_p2), %v3505_v1  ;;  %3247 = vmatprep.subr.bf16.mxu1 (!%p140_p2), %v3505_v1  ;;  %p165_p3 = scmp.lt.s32.totalorder (!%p140_p2), %s2455_s16, 255  ;;  %v3291_v4 = vld [vmem:[%s3962_s1 + $0x18] sm:$0xff] (!%p140_p2)   ;;  %v3292_v5 = vld [vmem:[%s3962_s1 + $0x20] sm:$0xff] (!%p140_p2)   ;;  %v3293_v7 = vld [vmem:[%s3962_s1 + $0x28] sm:$0xff] (!%p140_p2)  }
   0x7   : > { %1082 = vmatpush1.bf16.msra.mxu0 (!%p140_p2), %v3288_v0  ;;  %3263 = vmatpush1.bf16.msra.mxu1 (!%p140_p2), %v3288_v0  ;;  %v3294_v9 = vld [vmem:[%s3962_s1 + $0x30] sm:$0xff] (!%p140_p2)   ;;  %v3295_v10 = vld [vmem:[%s3962_s1 + $0x38] sm:$0xff] (!%p140_p2)   ;;  %v3296_v11 = vld [vmem:[%s3962_s1 + $0x40] sm:$0xff] (!%p140_p2)  }
   0x8   : > { %1083 = vmatprep.subr.bf16.mxu0 (!%p140_p2), %v3505_v1  ;;  %3248 = vmatprep.subr.bf16.mxu1 (!%p140_p2), %v3505_v1  ;;  %v3297_v12 = vld [vmem:[%s3962_s1 + $0x48] sm:$0xff] (!%p140_p2)   ;;  %v3298_v13 = vld [vmem:[%s3962_s1 + $0x50] sm:$0xff] (!%p140_p2)   ;;  %v3299_v14 = vld [vmem:[%s3962_s1 + $0x58] sm:$0xff] (!%p140_p2)  }
   0x9   : > { %v3300_v15 = vld [vmem:[%s3962_s1 + $0x60] sm:$0xff] (!%p140_p2)   ;;  %v3301_v16 = vld [vmem:[%s3962_s1 + $0x68] sm:$0xff] (!%p140_p2)   ;;  %v3302_v17 = vld [vmem:[%s3962_s1 + $0x70] sm:$0xff] (!%p140_p2)  }
   0xa   : > { %v3303_v18 = vld [vmem:[%s3962_s1 + $0x78] sm:$0xff] (!%p140_p2)  }
   0xb   : > { %1084 = vmatpush1.bf16.msra.mxu0 (!%p140_p2), %v3289_v2  ;;  %3264 = vmatpush1.bf16.msra.mxu1 (!%p140_p2), %v3289_v2 }
   0xc   : > { %1085 = vmatprep.subr.bf16.mxu0 (!%p140_p2), %v3505_v1  ;;  %3249 = vmatprep.subr.bf16.mxu1 (!%p140_p2), %v3505_v1 }
   0xd   : > { %s3966_s16 = smov (!%p165_p3, %s2455_s16), 255 }
   0xe   : > { %s2735_s23 = sshll.u32 %s3966_s16, 3  ;;  %s2459_s29 = sshll.u32 %s3966_s16, 2 }
   0xf   : > { %1086 = vmatpush1.bf16.msra.mxu0 %v3290_v3  ;;  %3265 = vmatpush1.bf16.msra.mxu1 %v3290_v3  ;;  %s3563_s28 = scalar_lea.vmem %s3961_s0, %s2735_s23  ;;  %s3749_s5 = scalar_lea.vmem %s3964_s3, %s2459_s29 }
  0x10   : > { %1087 = vmatprep.subr.bf16.mxu0 %v3505_v1  ;;  %3250 = vmatprep.subr.bf16.mxu1 %v3505_v1  ;;  %v3306_v6 = vld [vmem:[%s3563_s28 + $0x4] ss:$8 sps:$4 sm:$0xff]   ;;  %v3304_v19 = vld [vmem:[%s3563_s28] ss:$8 sps:$4 sm:$0xff]   ;;  %v3310_v21 = vld [vmem:[%s3563_s28 + $0x14] ss:$8 sps:$4 sm:$0xff]  }
  0x11   : > { %v3309_v8 = vld [vmem:[%s3563_s28 + $0x204] ss:$8 sps:$4 sm:$0xff]   ;;  %1113 = vmatprep.mubr.bf16.mxu0 %v3306_v6  ;;  %v3307_v20 = vld [vmem:[%s3563_s28 + $0x200] ss:$8 sps:$4 sm:$0xff]   ;;  %v3312_v22 = vld [vmem:[%s3563_s28 + $0x214] ss:$8 sps:$4 sm:$0xff]  }
  0x12   : > { %1369 = vmatprep.mubr.bf16.mxu1 %v3309_v8  ;;  %v3314_v23 = vld [vmem:[%s3563_s28 + $0x10] ss:$8 sps:$4 sm:$0xff]   ;;  %v3316_v25 = vld [vmem:[%s3563_s28 + $0x24] ss:$8 sps:$4 sm:$0xff]   ;;  %v3320_v27 = vld [vmem:[%s3563_s28 + $0x20] ss:$8 sps:$4 sm:$0xff]  }
  0x13   : > { %1088 = vmatpush1.bf16.msra.mxu0 %v3291_v4  ;;  %3266 = vmatpush1.bf16.msra.mxu1 %v3291_v4  ;;  %v3315_v24 = vld [vmem:[%s3563_s28 + $0x210] ss:$8 sps:$4 sm:$0xff]   ;;  %v3318_v26 = vld [vmem:[%s3563_s28 + $0x224] ss:$8 sps:$4 sm:$0xff]   ;;  %v3321_v28 = vld [vmem:[%s3563_s28 + $0x220] ss:$8 sps:$4 sm:$0xff]  }
  0x14   : > { %1089 = vmatprep.subr.bf16.mxu0 %v3505_v1  ;;  %3251 = vmatprep.subr.bf16.mxu1 %v3505_v1  ;;  %v3322_v29 = vld [vmem:[%s3563_s28 + $0x34] ss:$8 sps:$4 sm:$0xff]   ;;  %v3326_v31 = vld [vmem:[%s3563_s28 + $0x30] ss:$8 sps:$4 sm:$0xff]   ;;  %v3328_v33 = vld [vmem:[%s3563_s28 + $0x44] ss:$8 sps:$4 sm:$0xff]  }
  0x15   : > { %v3324_v30 = vld [vmem:[%s3563_s28 + $0x234] ss:$8 sps:$4 sm:$0xff]   ;;  %v3327_v32 = vld [vmem:[%s3563_s28 + $0x230] ss:$8 sps:$4 sm:$0xff]   ;;  %v3330_v34 = vld [vmem:[%s3563_s28 + $0x244] ss:$8 sps:$4 sm:$0xff]  }
  0x16   : > { %v3332_v35 = vld [vmem:[%s3563_s28 + $0x40] ss:$8 sps:$4 sm:$0xff]   ;;  %v3334_v37 = vld [vmem:[%s3563_s28 + $0x54] ss:$8 sps:$4 sm:$0xff]   ;;  %v3338_v39 = vld [vmem:[%s3563_s28 + $0x50] ss:$8 sps:$4 sm:$0xff]  }
  0x17   : > { %1090 = vmatpush1.bf16.msra.mxu0 %v3292_v5  ;;  %3267 = vmatpush1.bf16.msra.mxu1 %v3292_v5  ;;  %v3333_v36 = vld [vmem:[%s3563_s28 + $0x240] ss:$8 sps:$4 sm:$0xff]   ;;  %v3336_v38 = vld [vmem:[%s3563_s28 + $0x254] ss:$8 sps:$4 sm:$0xff]   ;;  %v3339_v40 = vld [vmem:[%s3563_s28 + $0x250] ss:$8 sps:$4 sm:$0xff]  }
  0x18   : > { %1091 = vmatprep.subr.bf16.mxu0 %v3505_v1  ;;  %3252 = vmatprep.subr.bf16.mxu1 %v3505_v1  ;;  %v3340_v41 = vld [vmem:[%s3563_s28 + $0x64] ss:$8 sps:$4 sm:$0xff]   ;;  %v3344_v43 = vld [vmem:[%s3563_s28 + $0x60] ss:$8 sps:$4 sm:$0xff]   ;;  %v3346_v45 = vld [vmem:[%s3563_s28 + $0x74] ss:$8 sps:$4 sm:$0xff]  }
  0x19   : > { %v3342_v42 = vld [vmem:[%s3563_s28 + $0x264] ss:$8 sps:$4 sm:$0xff]   ;;  %v3345_v44 = vld [vmem:[%s3563_s28 + $0x260] ss:$8 sps:$4 sm:$0xff]   ;;  %v3348_v46 = vld [vmem:[%s3563_s28 + $0x274] ss:$8 sps:$4 sm:$0xff]  }
  0x1a   : > { %v3350_v47 = vld [vmem:[%s3563_s28 + $0x70] ss:$8 sps:$4 sm:$0xff]   ;;  %v3352_v49 = vld [vmem:[%s3563_s28 + $0x84] ss:$8 sps:$4 sm:$0xff]   ;;  %v3356_v51 = vld [vmem:[%s3563_s28 + $0x80] ss:$8 sps:$4 sm:$0xff]  }
  0x1b   : > { %1092 = vmatpush1.bf16.msra.mxu0 %v3293_v7  ;;  %3268 = vmatpush1.bf16.msra.mxu1 %v3293_v7  ;;  %v3351_v48 = vld [vmem:[%s3563_s28 + $0x270] ss:$8 sps:$4 sm:$0xff]   ;;  %v3354_v50 = vld [vmem:[%s3563_s28 + $0x284] ss:$8 sps:$4 sm:$0xff]   ;;  %v3357_v52 = vld [vmem:[%s3563_s28 + $0x280] ss:$8 sps:$4 sm:$0xff]  }
  0x1c   : > { %1093 = vmatprep.subr.bf16.mxu0 %v3505_v1  ;;  %3253 = vmatprep.subr.bf16.mxu1 %v3505_v1  ;;  %v3358_v53 = vld [vmem:[%s3563_s28 + $0x94] ss:$8 sps:$4 sm:$0xff]   ;;  %v3362_v55 = vld [vmem:[%s3563_s28 + $0x90] ss:$8 sps:$4 sm:$0xff]   ;;  %v3364_v57 = vld [vmem:[%s3563_s28 + $0xa4] ss:$8 sps:$4 sm:$0xff]  }
  0x1d   : > { %v3360_v54 = vld [vmem:[%s3563_s28 + $0x294] ss:$8 sps:$4 sm:$0xff]   ;;  %v3363_v56 = vld [vmem:[%s3563_s28 + $0x290] ss:$8 sps:$4 sm:$0xff]   ;;  %v3366_v58 = vld [vmem:[%s3563_s28 + $0x2a4] ss:$8 sps:$4 sm:$0xff]  }
  0x1e   : > { %v3368_v59 = vld [vmem:[%s3563_s28 + $0xa0] ss:$8 sps:$4 sm:$0xff]   ;;  %v3370_v61 = vld [vmem:[%s3563_s28 + $0xb4] ss:$8 sps:$4 sm:$0xff]   ;;  %v3374_v63 = vld [vmem:[%s3563_s28 + $0xb0] ss:$8 sps:$4 sm:$0xff]  }
  0x1f   : > { %1094 = vmatpush1.bf16.msra.mxu0 %v3294_v9  ;;  %3269 = vmatpush1.bf16.msra.mxu1 %v3294_v9  ;;  %v3369_v60 = vld [vmem:[%s3563_s28 + $0x2a0] ss:$8 sps:$4 sm:$0xff]   ;;  %v3372_v62 = vld [vmem:[%s3563_s28 + $0x2b4] ss:$8 sps:$4 sm:$0xff]   ;;  %v3375_v0 = vld [vmem:[%s3563_s28 + $0x2b0] ss:$8 sps:$4 sm:$0xff]  }
  0x20   : > { %1095 = vmatprep.subr.bf16.mxu0 %v3505_v1  ;;  %3254 = vmatprep.subr.bf16.mxu1 %v3505_v1  ;;  %v3378_v2 = vld [vmem:[%s3563_s28 + $0x2c4] ss:$8 sps:$4 sm:$0xff]   ;;  %v3380_v3 = vld [vmem:[%s3563_s28 + $0xc0] ss:$8 sps:$4 sm:$0xff]   ;;  %v3382_v5 = vld [vmem:[%s3563_s28 + $0xd4] ss:$8 sps:$4 sm:$0xff]  }
  0x21   : > { %v3381_v4 = vld [vmem:[%s3563_s28 + $0x2c0] ss:$8 sps:$4 sm:$0xff]   ;;  %v3384_v6 = vld [vmem:[%s3563_s28 + $0x2d4] ss:$8 sps:$4 sm:$0xff]   ;;  %v3386_v7 = vld [vmem:[%s3563_s28 + $0xd0] ss:$8 sps:$4 sm:$0xff]  }
  0x22   : > { %v3387_v8 = vld [vmem:[%s3563_s28 + $0x2d0] ss:$8 sps:$4 sm:$0xff]   ;;  %v3388_v9 = vld [vmem:[%s3563_s28 + $0xe4] ss:$8 sps:$4 sm:$0xff]  }
  0x23   : > { %1096 = vmatpush1.bf16.msra.mxu0 %v3295_v10  ;;  %3270 = vmatpush1.bf16.msra.mxu1 %v3295_v10  ;;  %v3390_v10 = vld [vmem:[%s3563_s28 + $0x2e4] ss:$8 sps:$4 sm:$0xff]  }
  0x24   : > { %1097 = vmatprep.subr.bf16.mxu0 %v3505_v1  ;;  %3255 = vmatprep.subr.bf16.mxu1 %v3505_v1 }
  0x27   : > { %1098 = vmatpush1.bf16.msra.mxu0 %v3296_v11  ;;  %3271 = vmatpush1.bf16.msra.mxu1 %v3296_v11  ;;  %v3392_v11 = vld [vmem:[%s3563_s28 + $0xe0] ss:$8 sps:$4 sm:$0xff]  }
  0x28   : > { %1099 = vmatprep.subr.bf16.mxu0 %v3505_v1  ;;  %3256 = vmatprep.subr.bf16.mxu1 %v3505_v1 }
  0x2b   : > { %1100 = vmatpush1.bf16.msra.mxu0 %v3297_v12  ;;  %3272 = vmatpush1.bf16.msra.mxu1 %v3297_v12  ;;  %v3393_v12 = vld [vmem:[%s3563_s28 + $0x2e0] ss:$8 sps:$4 sm:$0xff]  }
  0x2c   : > { %1101 = vmatprep.subr.bf16.mxu0 %v3505_v1  ;;  %3257 = vmatprep.subr.bf16.mxu1 %v3505_v1 }
  0x2f   : > { %1102 = vmatpush1.bf16.msra.mxu0 %v3298_v13  ;;  %3273 = vmatpush1.bf16.msra.mxu1 %v3298_v13  ;;  %v3394_v13 = vld [vmem:[%s3563_s28 + $0xf4] ss:$8 sps:$4 sm:$0xff]  }
  0x30   : > { %1103 = vmatprep.subr.bf16.mxu0 %v3505_v1  ;;  %3258 = vmatprep.subr.bf16.mxu1 %v3505_v1 }
  0x33   : > { %1104 = vmatpush1.bf16.msra.mxu0 %v3299_v14  ;;  %3274 = vmatpush1.bf16.msra.mxu1 %v3299_v14  ;;  %v3396_v14 = vld [vmem:[%s3563_s28 + $0x2f4] ss:$8 sps:$4 sm:$0xff]  }
  0x34   : > { %1105 = vmatprep.subr.bf16.mxu0 %v3505_v1  ;;  %3259 = vmatprep.subr.bf16.mxu1 %v3505_v1 }
  0x37   : > { %1106 = vmatpush1.bf16.msra.mxu0 %v3300_v15  ;;  %3275 = vmatpush1.bf16.msra.mxu1 %v3300_v15  ;;  %v3398_v15 = vld [vmem:[%s3563_s28 + $0xf0] ss:$8 sps:$4 sm:$0xff]  }
  0x38   : > { %1107 = vmatprep.subr.bf16.mxu0 %v3505_v1  ;;  %3260 = vmatprep.subr.bf16.mxu1 %v3505_v1 }
  0x3b   : > { %1108 = vmatpush1.bf16.msra.mxu0 %v3301_v16  ;;  %3276 = vmatpush1.bf16.msra.mxu1 %v3301_v16  ;;  %v3399_v16 = vld [vmem:[%s3563_s28 + $0x2f0] ss:$8 sps:$4 sm:$0xff]  }
  0x3c   : > { %1109 = vmatprep.subr.bf16.mxu0 %v3505_v1  ;;  %3261 = vmatprep.subr.bf16.mxu1 %v3505_v1 }
  0x3f   : > { %1110 = vmatpush1.bf16.msra.mxu0 %v3302_v17  ;;  %3277 = vmatpush1.bf16.msra.mxu1 %v3302_v17  ;;  %v3400_v17 = vld [vmem:[%s3563_s28 + $0x104] ss:$8 sps:$4 sm:$0xff]  }
  0x40   : > { %1111 = vmatprep.subr.bf16.mxu0 %v3505_v1  ;;  %3262 = vmatprep.subr.bf16.mxu1 %v3505_v1  ;;  %v3376_v1 = vld [vmem:[%s3563_s28 + $0xc4] ss:$8 sps:$4 sm:$0xff]  }
  0x43   : > { %1112 = vmatpush1.bf16.msra.mxu0 %v3303_v18  ;;  %3278 = vmatpush1.bf16.msra.mxu1 %v3303_v18  ;;  %v3402_v18 = vld [vmem:[%s3563_s28 + $0x304] ss:$8 sps:$4 sm:$0xff]  }
  0x46   : > { %1114 = vmatmul.mubr.bf16.vlgmr.msra.gmra.mrb[0].mxu0 %v3304_v19  ;;  %1370 = vmatmul.mubr.bf16.vlgmr.msra.gmra.mrb[0].mxu1 %v3307_v20  ;;  %v3404_v19 = vld [vmem:[%s3563_s28 + $0x100] ss:$8 sps:$4 sm:$0xff]  }
  0x47   : > { %1121 = vmatprep.mubr.bf16.mxu0 %v3310_v21  ;;  %1377 = vmatprep.mubr.bf16.mxu1 %v3312_v22  ;;  %v3405_v20 = vld [vmem:[%s3563_s28 + $0x300] ss:$8 sps:$4 sm:$0xff]   ;;  %v3406_v21 = vld [vmem:[%s3563_s28 + $0x114] ss:$8 sps:$4 sm:$0xff]  }
  0x48   : > { %v3408_v22 = vld [vmem:[%s3563_s28 + $0x314] ss:$8 sps:$4 sm:$0xff]  }
  0x4e   : > { %1122 = vmatmul.mubr.bf16.gmra.mrb[4].mxu0 %v3314_v23  ;;  %1378 = vmatmul.mubr.bf16.gmra.mrb[4].mxu1 %v3315_v24  ;;  %v3410_v23 = vld [vmem:[%s3563_s28 + $0x110] ss:$8 sps:$4 sm:$0xff]  }
  0x4f   : > { %1129 = vmatprep.mubr.bf16.mxu0 %v3316_v25  ;;  %1385 = vmatprep.mubr.bf16.mxu1 %v3318_v26  ;;  %v3411_v24 = vld [vmem:[%s3563_s28 + $0x310] ss:$8 sps:$4 sm:$0xff]   ;;  %v3412_v25 = vld [vmem:[%s3563_s28 + $0x124] ss:$8 sps:$4 sm:$0xff]  }
  0x50   : > { %v3414_v26 = vld [vmem:[%s3563_s28 + $0x324] ss:$8 sps:$4 sm:$0xff]  }
  0x56   : > { %1130 = vmatmul.mubr.bf16.gmra.mrb[8].mxu0 %v3320_v27  ;;  %1386 = vmatmul.mubr.bf16.gmra.mrb[8].mxu1 %v3321_v28  ;;  %v3416_v27 = vld [vmem:[%s3563_s28 + $0x120] ss:$8 sps:$4 sm:$0xff]  }
  0x57   : > { %1137 = vmatprep.mubr.bf16.mxu0 %v3322_v29  ;;  %1393 = vmatprep.mubr.bf16.mxu1 %v3324_v30  ;;  %v3417_v28 = vld [vmem:[%s3563_s28 + $0x320] ss:$8 sps:$4 sm:$0xff]   ;;  %v3418_v29 = vld [vmem:[%s3563_s28 + $0x134] ss:$8 sps:$4 sm:$0xff]  }
  0x58   : > { %v3420_v30 = vld [vmem:[%s3563_s28 + $0x334] ss:$8 sps:$4 sm:$0xff]  }
  0x5e   : > { %1138 = vmatmul.mubr.bf16.gmra.mrb[12].mxu0 %v3326_v31  ;;  %1394 = vmatmul.mubr.bf16.gmra.mrb[12].mxu1 %v3327_v32  ;;  %v3422_v31 = vld [vmem:[%s3563_s28 + $0x130] ss:$8 sps:$4 sm:$0xff]  }
  0x5f   : > { %1145 = vmatprep.mubr.bf16.mxu0 %v3328_v33  ;;  %1401 = vmatprep.mubr.bf16.mxu1 %v3330_v34  ;;  %v3423_v32 = vld [vmem:[%s3563_s28 + $0x330] ss:$8 sps:$4 sm:$0xff]   ;;  %v3424_v33 = vld [vmem:[%s3563_s28 + $0x144] ss:$8 sps:$4 sm:$0xff]  }
  0x60   : > { %v3426_v34 = vld [vmem:[%s3563_s28 + $0x344] ss:$8 sps:$4 sm:$0xff]  }
  0x66   : > { %1146 = vmatmul.mubr.bf16.gmra.mrb[16].mxu0 %v3332_v35  ;;  %1402 = vmatmul.mubr.bf16.gmra.mrb[16].mxu1 %v3333_v36  ;;  %v3428_v35 = vld [vmem:[%s3563_s28 + $0x140] ss:$8 sps:$4 sm:$0xff]  }
  0x67   : > { %1153 = vmatprep.mubr.bf16.mxu0 %v3334_v37  ;;  %1409 = vmatprep.mubr.bf16.mxu1 %v3336_v38  ;;  %v3429_v36 = vld [vmem:[%s3563_s28 + $0x340] ss:$8 sps:$4 sm:$0xff]   ;;  %v3430_v37 = vld [vmem:[%s3563_s28 + $0x154] ss:$8 sps:$4 sm:$0xff]  }
  0x68   : > { %v3432_v38 = vld [vmem:[%s3563_s28 + $0x354] ss:$8 sps:$4 sm:$0xff]  }
  0x6e   : > { %1154 = vmatmul.mubr.bf16.gmra.mrb[20].mxu0 %v3338_v39  ;;  %1410 = vmatmul.mubr.bf16.gmra.mrb[20].mxu1 %v3339_v40  ;;  %v3434_v39 = vld [vmem:[%s3563_s28 + $0x150] ss:$8 sps:$4 sm:$0xff]  }
  0x6f   : > { %1161 = vmatprep.mubr.bf16.mxu0 %v3340_v41  ;;  %1417 = vmatprep.mubr.bf16.mxu1 %v3342_v42  ;;  %v3435_v40 = vld [vmem:[%s3563_s28 + $0x350] ss:$8 sps:$4 sm:$0xff]   ;;  %v3436_v41 = vld [vmem:[%s3563_s28 + $0x164] ss:$8 sps:$4 sm:$0xff]  }
  0x70   : > { %v3438_v42 = vld [vmem:[%s3563_s28 + $0x364] ss:$8 sps:$4 sm:$0xff]  }
  0x76   : > { %1162 = vmatmul.mubr.bf16.gmra.mrb[24].mxu0 %v3344_v43  ;;  %1418 = vmatmul.mubr.bf16.gmra.mrb[24].mxu1 %v3345_v44  ;;  %v3440_v43 = vld [vmem:[%s3563_s28 + $0x160] ss:$8 sps:$4 sm:$0xff]  }
  0x77   : > { %1169 = vmatprep.mubr.bf16.mxu0 %v3346_v45  ;;  %1425 = vmatprep.mubr.bf16.mxu1 %v3348_v46  ;;  %v3441_v44 = vld [vmem:[%s3563_s28 + $0x360] ss:$8 sps:$4 sm:$0xff]   ;;  %v3442_v45 = vld [vmem:[%s3563_s28 + $0x174] ss:$8 sps:$4 sm:$0xff]  }
  0x78   : > { %v3444_v46 = vld [vmem:[%s3563_s28 + $0x374] ss:$8 sps:$4 sm:$0xff]  }
  0x7e   : > { %1170 = vmatmul.mubr.bf16.gmra.mrb[28].mxu0 %v3350_v47  ;;  %1426 = vmatmul.mubr.bf16.gmra.mrb[28].mxu1 %v3351_v48  ;;  %v3446_v47 = vld [vmem:[%s3563_s28 + $0x170] ss:$8 sps:$4 sm:$0xff]  }
  0x7f   : > { %1177 = vmatprep.mubr.bf16.mxu0 %v3352_v49  ;;  %1433 = vmatprep.mubr.bf16.mxu1 %v3354_v50  ;;  %v3447_v48 = vld [vmem:[%s3563_s28 + $0x370] ss:$8 sps:$4 sm:$0xff]   ;;  %v3448_v49 = vld [vmem:[%s3563_s28 + $0x184] ss:$8 sps:$4 sm:$0xff]  }
  0x80   : > { %v3450_v50 = vld [vmem:[%s3563_s28 + $0x384] ss:$8 sps:$4 sm:$0xff]  }
  0x86   : > { %1178 = vmatmul.mubr.bf16.gmra.mrb[32].mxu0 %v3356_v51  ;;  %1434 = vmatmul.mubr.bf16.gmra.mrb[32].mxu1 %v3357_v52  ;;  %v3452_v51 = vld [vmem:[%s3563_s28 + $0x180] ss:$8 sps:$4 sm:$0xff]  }
  0x87   : > { %1185 = vmatprep.mubr.bf16.mxu0 %v3358_v53  ;;  %1441 = vmatprep.mubr.bf16.mxu1 %v3360_v54  ;;  %v3453_v52 = vld [vmem:[%s3563_s28 + $0x380] ss:$8 sps:$4 sm:$0xff]   ;;  %v3454_v53 = vld [vmem:[%s3563_s28 + $0x194] ss:$8 sps:$4 sm:$0xff]  }
  0x88   : > { %v3456_v54 = vld [vmem:[%s3563_s28 + $0x394] ss:$8 sps:$4 sm:$0xff]  }
  0x8e   : > { %1186 = vmatmul.mubr.bf16.gmra.mrb[36].mxu0 %v3362_v55  ;;  %1442 = vmatmul.mubr.bf16.gmra.mrb[36].mxu1 %v3363_v56  ;;  %v3458_v55 = vld [vmem:[%s3563_s28 + $0x190] ss:$8 sps:$4 sm:$0xff]  }
  0x8f   : > { %1193 = vmatprep.mubr.bf16.mxu0 %v3364_v57  ;;  %1449 = vmatprep.mubr.bf16.mxu1 %v3366_v58  ;;  %v3459_v56 = vld [vmem:[%s3563_s28 + $0x390] ss:$8 sps:$4 sm:$0xff]   ;;  %v3460_v57 = vld [vmem:[%s3563_s28 + $0x1a4] ss:$8 sps:$4 sm:$0xff]  }
  0x90   : > { %v3462_v58 = vld [vmem:[%s3563_s28 + $0x3a4] ss:$8 sps:$4 sm:$0xff]  }
  0x96   : > { %1194 = vmatmul.mubr.bf16.gmra.mrb[40].mxu0 %v3368_v59  ;;  %1450 = vmatmul.mubr.bf16.gmra.mrb[40].mxu1 %v3369_v60  ;;  %v3464_v59 = vld [vmem:[%s3563_s28 + $0x1a0] ss:$8 sps:$4 sm:$0xff]  }
  0x97   : > { %1201 = vmatprep.mubr.bf16.mxu0 %v3370_v61  ;;  %1457 = vmatprep.mubr.bf16.mxu1 %v3372_v62  ;;  %v3465_v60 = vld [vmem:[%s3563_s28 + $0x3a0] ss:$8 sps:$4 sm:$0xff]   ;;  %v3466_v61 = vld [vmem:[%s3563_s28 + $0x1b4] ss:$8 sps:$4 sm:$0xff]  }
  0x98   : > { %v3468_v62 = vld [vmem:[%s3563_s28 + $0x3b4] ss:$8 sps:$4 sm:$0xff]  }
  0x9e   : > { %1202 = vmatmul.mubr.bf16.gmra.mrb[44].mxu0 %v3374_v63  ;;  %1458 = vmatmul.mubr.bf16.gmra.mrb[44].mxu1 %v3375_v0  ;;  %v3735_v63 = vld [vmem:[%s3963_s2] ss:$0 sm:$0xff] }
  0x9f   : > { %1209 = vmatprep.mubr.bf16.mxu0 %v3376_v1  ;;  %1465 = vmatprep.mubr.bf16.mxu1 %v3378_v2 }
  0xa6   : > { %1210 = vmatmul.mubr.bf16.gmra.mrb[48].mxu0 %v3380_v3  ;;  %1466 = vmatmul.mubr.bf16.gmra.mrb[48].mxu1 %v3381_v4 }
  0xa7   : > { %1217 = vmatprep.mubr.bf16.mxu0 %v3382_v5  ;;  %1473 = vmatprep.mubr.bf16.mxu1 %v3384_v6  ;;  %v3470_v6 = vld [vmem:[%s3563_s28 + $0x1b0] ss:$8 sps:$4 sm:$0xff]  }
  0xae   : > { %1218 = vmatmul.mubr.bf16.gmra.mrb[52].mxu0 %v3386_v7  ;;  %1474 = vmatmul.mubr.bf16.gmra.mrb[52].mxu1 %v3387_v8  ;;  %v3471_v7 = vld [vmem:[%s3563_s28 + $0x3b0] ss:$8 sps:$4 sm:$0xff]  }
  0xaf   : > { %1225 = vmatprep.mubr.bf16.mxu0 %v3388_v9  ;;  %1481 = vmatprep.mubr.bf16.mxu1 %v3390_v10  ;;  %v3472_v10 = vld [vmem:[%s3563_s28 + $0x1c4] ss:$8 sps:$4 sm:$0xff]  }
  0xb6   : > { %1226 = vmatmul.mubr.bf16.gmra.mrb[56].mxu0 %v3392_v11  ;;  %1482 = vmatmul.mubr.bf16.gmra.mrb[56].mxu1 %v3393_v12  ;;  %v3474_v11 = vld [vmem:[%s3563_s28 + $0x3c4] ss:$8 sps:$4 sm:$0xff]  }
  0xb7   : > { %1233 = vmatprep.mubr.bf16.mxu0 %v3394_v13  ;;  %1489 = vmatprep.mubr.bf16.mxu1 %v3396_v14 }
  0xbe   : > { %1234 = vmatmul.mubr.bf16.gmra.mrb[60].mxu0 %v3398_v15  ;;  %1490 = vmatmul.mubr.bf16.gmra.mrb[60].mxu1 %v3399_v16 }
  0xbf   : > { %1241 = vmatprep.mubr.bf16.mxu0 %v3400_v17  ;;  %1497 = vmatprep.mubr.bf16.mxu1 %v3402_v18 }
  0xc6   : > { %1242 = vmatmul.mubr.bf16.gmra.mrb[64].mxu0 %v3404_v19  ;;  %1498 = vmatmul.mubr.bf16.gmra.mrb[64].mxu1 %v3405_v20 }
  0xc7   : > { %1249 = vmatprep.mubr.bf16.mxu0 %v3406_v21  ;;  %1505 = vmatprep.mubr.bf16.mxu1 %v3408_v22 }
  0xce   : > { %1250 = vmatmul.mubr.bf16.gmra.mrb[68].mxu0 %v3410_v23  ;;  %1506 = vmatmul.mubr.bf16.gmra.mrb[68].mxu1 %v3411_v24 }
  0xcf   : > { %1257 = vmatprep.mubr.bf16.mxu0 %v3412_v25  ;;  %1513 = vmatprep.mubr.bf16.mxu1 %v3414_v26 }
  0xd6   : > { %1258 = vmatmul.mubr.bf16.gmra.mrb[72].mxu0 %v3416_v27  ;;  %1514 = vmatmul.mubr.bf16.gmra.mrb[72].mxu1 %v3417_v28  ;;  %v3476_v28 = vld [vmem:[%s3563_s28 + $0x1c0] ss:$8 sps:$4 sm:$0xff]  }
  0xd7   : > { %1265 = vmatprep.mubr.bf16.mxu0 %v3418_v29  ;;  %1521 = vmatprep.mubr.bf16.mxu1 %v3420_v30  ;;  %v3477_v29 = vld [vmem:[%s3563_s28 + $0x3c0] ss:$8 sps:$4 sm:$0xff]  }
  0xde   : > { %1266 = vmatmul.mubr.bf16.gmra.mrb[76].mxu0 %v3422_v31  ;;  %1522 = vmatmul.mubr.bf16.gmra.mrb[76].mxu1 %v3423_v32  ;;  %v3478_v32 = vld [vmem:[%s3563_s28 + $0x1d4] ss:$8 sps:$4 sm:$0xff]  }
  0xdf   : > { %1273 = vmatprep.mubr.bf16.mxu0 %v3424_v33  ;;  %1529 = vmatprep.mubr.bf16.mxu1 %v3426_v34  ;;  %v3480_v33 = vld [vmem:[%s3563_s28 + $0x3d4] ss:$8 sps:$4 sm:$0xff]  }
  0xe6   : > { %1274 = vmatmul.mubr.bf16.gmra.mrb[80].mxu0 %v3428_v35  ;;  %1530 = vmatmul.mubr.bf16.gmra.mrb[80].mxu1 %v3429_v36 }
  0xe7   : > { %1281 = vmatprep.mubr.bf16.mxu0 %v3430_v37  ;;  %1537 = vmatprep.mubr.bf16.mxu1 %v3432_v38 }
  0xee   : > { %1282 = vmatmul.mubr.bf16.gmra.mrb[84].mxu0 %v3434_v39  ;;  %1538 = vmatmul.mubr.bf16.gmra.mrb[84].mxu1 %v3435_v40 }
  0xef   : > { %1289 = vmatprep.mubr.bf16.mxu0 %v3436_v41  ;;  %1545 = vmatprep.mubr.bf16.mxu1 %v3438_v42 }
  0xf6   : > { %1290 = vmatmul.mubr.bf16.gmra.mrb[88].mxu0 %v3440_v43  ;;  %1546 = vmatmul.mubr.bf16.gmra.mrb[88].mxu1 %v3441_v44 }
  0xf7   : > { %1297 = vmatprep.mubr.bf16.mxu0 %v3442_v45  ;;  %1553 = vmatprep.mubr.bf16.mxu1 %v3444_v46 }
  0xfe   : > { %1298 = vmatmul.mubr.bf16.gmra.mrb[92].mxu0 %v3446_v47  ;;  %1554 = vmatmul.mubr.bf16.gmra.mrb[92].mxu1 %v3447_v48 }
  0xff   : > { %1305 = vmatprep.mubr.bf16.mxu0 %v3448_v49  ;;  %1561 = vmatprep.mubr.bf16.mxu1 %v3450_v50  ;;  %v3482_v50 = vld [vmem:[%s3563_s28 + $0x1d0] ss:$8 sps:$4 sm:$0xff]  }
 0x106   : > { %1306 = vmatmul.mubr.bf16.gmra.mrb[96].mxu0 %v3452_v51  ;;  %1562 = vmatmul.mubr.bf16.gmra.mrb[96].mxu1 %v3453_v52  ;;  %v3483_v51 = vld [vmem:[%s3563_s28 + $0x3d0] ss:$8 sps:$4 sm:$0xff]  }
 0x107   : > { %1313 = vmatprep.mubr.bf16.mxu0 %v3454_v53  ;;  %1569 = vmatprep.mubr.bf16.mxu1 %v3456_v54  ;;  %v3484_v54 = vld [vmem:[%s3563_s28 + $0x1e4] ss:$8 sps:$4 sm:$0xff]  }
 0x10e   : > { %1314 = vmatmul.mubr.bf16.gmra.mrb[100].mxu0 %v3458_v55  ;;  %1570 = vmatmul.mubr.bf16.gmra.mrb[100].mxu1 %v3459_v56  ;;  %v3486_v55 = vld [vmem:[%s3563_s28 + $0x3e4] ss:$8 sps:$4 sm:$0xff]  }
 0x10f   : > { %1321 = vmatprep.mubr.bf16.mxu0 %v3460_v57  ;;  %1577 = vmatprep.mubr.bf16.mxu1 %v3462_v58 }
 0x116   : > { %1322 = vmatmul.mubr.bf16.gmra.mrb[104].mxu0 %v3464_v59  ;;  %1578 = vmatmul.mubr.bf16.gmra.mrb[104].mxu1 %v3465_v60 }
 0x117   : > { %1329 = vmatprep.mubr.bf16.mxu0 %v3466_v61  ;;  %1585 = vmatprep.mubr.bf16.mxu1 %v3468_v62 }
 0x119   : > { %v1115_v0 = vpop.f32.mrb[0].mxu0  ;;  %v1371_v1 = vpop.f32.mrb[0].mxu1 }
 0x11a   : > { %v1116_v2 = vadd.f32 %v3735_v63, %v1115_v0  ;;  %v1372_v3 = vadd.f32 %v3735_v63, %v1371_v1  ;;  %v1117_v4 = vpop.f32.mrb[1].mxu0  ;;  %v1373_v5 = vpop.f32.mrb[1].mxu1 }
 0x11b   : > { %v1118_v8 = vpop.f32.mrb[2].mxu0  ;;  %v1374_v9 = vpop.f32.mrb[2].mxu1 }
 0x11c   : > { %v1119_v12 = vadd.f32 %v3735_v63, %v1118_v8  ;;  %v1375_v13 = vadd.f32 %v3735_v63, %v1374_v9  ;;  %v1120_v14 = vpop.f32.mrb[3].mxu0  ;;  %v1376_v15 = vpop.f32.mrb[3].mxu1  ;;  %v1626_v16 = vmax.f32 %v1116_v2, 0.0  ;;  %v1690_v17 = vmax.f32 %v1372_v3, 0.0  ;;  %v3488_v9 = vld [vmem:[%s3563_s28 + $0x1e0] ss:$8 sps:$4 sm:$0xff]  }
 0x11d   : > { %v3492_v14 = vld [vmem:[%s3563_s28 + $0x3f4] ss:$8 sps:$4 sm:$0xff]  }
 0x11e   : > { %v1627_v18 = vmax.f32 %v1119_v12, 0.0  ;;  %v1691_v19 = vmax.f32 %v1375_v13, 0.0  ;;  %1330 = vmatmul.mubr.bf16.gmra.mrb[108].mxu0 %v3470_v6  ;;  %1586 = vmatmul.mubr.bf16.gmra.mrb[108].mxu1 %v3471_v7  ;;  %v3490_v13 = vld [vmem:[%s3563_s28 + $0x1f4] ss:$8 sps:$4 sm:$0xff]  }
 0x11f   : > { %1337 = vmatprep.mubr.bf16.mxu0 %v3472_v10  ;;  %1593 = vmatprep.mubr.bf16.mxu1 %v3474_v11  ;;  %v3489_v10 = vld [vmem:[%s3563_s28 + $0x3e0] ss:$8 sps:$4 sm:$0xff]  }
 0x120   : > { %v2867_v20 = vpack.c.bf16 %v1627_v18, %v1626_v16  ;;  %v3027_v21 = vpack.c.bf16 %v1691_v19, %v1690_v17 }
 0x121   : > { %v1123_v22 = vpop.f32.mrb[4].mxu0  ;;  %v1379_v23 = vpop.f32.mrb[4].mxu1 }
 0x122   : > { %2868 = vst [vmem:[%s3749_s5] sm:$0xff] %v2867_v20   ;;  %3215 = vst [vmem:[%s3749_s5 + $0x100] sm:$0xff] %v3027_v21   ;;  %v1124_v24 = vadd.f32 %v3735_v63, %v1123_v22  ;;  %v1380_v25 = vadd.f32 %v3735_v63, %v1379_v23  ;;  %v1125_v26 = vpop.f32.mrb[5].mxu0  ;;  %v1381_v27 = vpop.f32.mrb[5].mxu1 }
 0x123   : > { %v1126_v30 = vpop.f32.mrb[6].mxu0  ;;  %v1382_v31 = vpop.f32.mrb[6].mxu1 }
 0x124   : > { %v1127_v34 = vadd.f32 %v3735_v63, %v1126_v30  ;;  %v1383_v35 = vadd.f32 %v3735_v63, %v1382_v31  ;;  %v1128_v36 = vpop.f32.mrb[7].mxu0  ;;  %v1384_v37 = vpop.f32.mrb[7].mxu1  ;;  %v1628_v38 = vmax.f32 %v1124_v24, 0.0  ;;  %v1692_v39 = vmax.f32 %v1380_v25, 0.0  ;;  %v3494_v31 = vld [vmem:[%s3563_s28 + $0x1f0] ss:$8 sps:$4 sm:$0xff]  }
 0x126   : > { %v1629_v40 = vmax.f32 %v1127_v34, 0.0  ;;  %v1693_v41 = vmax.f32 %v1383_v35, 0.0  ;;  %1338 = vmatmul.mubr.bf16.gmra.mrb[112].mxu0 %v3476_v28  ;;  %1594 = vmatmul.mubr.bf16.gmra.mrb[112].mxu1 %v3477_v29 }
 0x127   : > { %1345 = vmatprep.mubr.bf16.mxu0 %v3478_v32  ;;  %1601 = vmatprep.mubr.bf16.mxu1 %v3480_v33  ;;  %v3495_v32 = vld [vmem:[%s3563_s28 + $0x3f0] ss:$8 sps:$4 sm:$0xff]  }
 0x128   : > { %v2872_v42 = vpack.c.bf16 %v1629_v40, %v1628_v38  ;;  %v3032_v43 = vpack.c.bf16 %v1693_v41, %v1692_v39 }
 0x129   : > { %v1131_v44 = vpop.f32.mrb[8].mxu0  ;;  %v1387_v45 = vpop.f32.mrb[8].mxu1 }
 0x12a   : > { %3184 = vst [vmem:[%s3749_s5 + $0x8] sm:$0xff] %v2872_v42   ;;  %3216 = vst [vmem:[%s3749_s5 + $0x108] sm:$0xff] %v3032_v43   ;;  %v1132_v46 = vadd.f32 %v3735_v63, %v1131_v44  ;;  %v1388_v47 = vadd.f32 %v3735_v63, %v1387_v45  ;;  %v1133_v48 = vpop.f32.mrb[9].mxu0  ;;  %v1389_v49 = vpop.f32.mrb[9].mxu1 }
 0x12b   : > { %v1134_v52 = vpop.f32.mrb[10].mxu0  ;;  %v1390_v53 = vpop.f32.mrb[10].mxu1 }
 0x12c   : > { %v1135_v56 = vadd.f32 %v3735_v63, %v1134_v52  ;;  %v1391_v57 = vadd.f32 %v3735_v63, %v1390_v53  ;;  %v1136_v58 = vpop.f32.mrb[11].mxu0  ;;  %v1392_v59 = vpop.f32.mrb[11].mxu1  ;;  %v1630_v60 = vmax.f32 %v1132_v46, 0.0  ;;  %v1694_v61 = vmax.f32 %v1388_v47, 0.0 }
 0x12e   : > { %v1631_v62 = vmax.f32 %v1135_v56, 0.0  ;;  %v1695_v0 = vmax.f32 %v1391_v57, 0.0  ;;  %1346 = vmatmul.mubr.bf16.gmra.mrb[116].mxu0 %v3482_v50  ;;  %1602 = vmatmul.mubr.bf16.gmra.mrb[116].mxu1 %v3483_v51 }
 0x12f   : > { %1353 = vmatprep.mubr.bf16.mxu0 %v3484_v54  ;;  %1609 = vmatprep.mubr.bf16.mxu1 %v3486_v55 }
 0x130   : > { %v2877_v1 = vpack.c.bf16 %v1631_v62, %v1630_v60  ;;  %v3037_v2 = vpack.c.bf16 %v1695_v0, %v1694_v61 }
 0x131   : > { %v1139_v3 = vpop.f32.mrb[12].mxu0  ;;  %v1395_v4 = vpop.f32.mrb[12].mxu1 }
 0x132   : > { %3185 = vst [vmem:[%s3749_s5 + $0x10] sm:$0xff] %v2877_v1   ;;  %3217 = vst [vmem:[%s3749_s5 + $0x110] sm:$0xff] %v3037_v2   ;;  %v1140_v5 = vadd.f32 %v3735_v63, %v1139_v3  ;;  %v1396_v6 = vadd.f32 %v3735_v63, %v1395_v4  ;;  %v1141_v7 = vpop.f32.mrb[13].mxu0  ;;  %v1397_v8 = vpop.f32.mrb[13].mxu1 }
 0x133   : > { %v1142_v11 = vpop.f32.mrb[14].mxu0  ;;  %v1398_v12 = vpop.f32.mrb[14].mxu1 }
 0x134   : > { %v1143_v15 = vadd.f32 %v3735_v63, %v1142_v11  ;;  %v1399_v16 = vadd.f32 %v3735_v63, %v1398_v12  ;;  %v1144_v17 = vpop.f32.mrb[15].mxu0  ;;  %v1400_v18 = vpop.f32.mrb[15].mxu1  ;;  %v1632_v19 = vmax.f32 %v1140_v5, 0.0  ;;  %v1696_v20 = vmax.f32 %v1396_v6, 0.0 }
 0x136   : > { %v1633_v21 = vmax.f32 %v1143_v15, 0.0  ;;  %v1697_v22 = vmax.f32 %v1399_v16, 0.0  ;;  %1354 = vmatmul.mubr.bf16.gmra.mrb[120].mxu0 %v3488_v9  ;;  %1610 = vmatmul.mubr.bf16.gmra.mrb[120].mxu1 %v3489_v10 }
 0x137   : > { %1361 = vmatprep.mubr.bf16.mxu0 %v3490_v13  ;;  %1617 = vmatprep.mubr.bf16.mxu1 %v3492_v14 }
 0x138   : > { %v2882_v23 = vpack.c.bf16 %v1633_v21, %v1632_v19  ;;  %v3042_v24 = vpack.c.bf16 %v1697_v22, %v1696_v20 }
 0x139   : > { %v1147_v25 = vpop.f32.mrb[16].mxu0  ;;  %v1403_v26 = vpop.f32.mrb[16].mxu1 }
 0x13a   : > { %3186 = vst [vmem:[%s3749_s5 + $0x18] sm:$0xff] %v2882_v23   ;;  %3218 = vst [vmem:[%s3749_s5 + $0x118] sm:$0xff] %v3042_v24   ;;  %v1148_v27 = vadd.f32 %v3735_v63, %v1147_v25  ;;  %v1404_v28 = vadd.f32 %v3735_v63, %v1403_v26  ;;  %v1149_v29 = vpop.f32.mrb[17].mxu0  ;;  %v1405_v30 = vpop.f32.mrb[17].mxu1 }
 0x13b   : > { %v1150_v33 = vpop.f32.mrb[18].mxu0  ;;  %v1406_v34 = vpop.f32.mrb[18].mxu1 }
 0x13c   : > { %v1151_v35 = vadd.f32 %v3735_v63, %v1150_v33  ;;  %v1407_v36 = vadd.f32 %v3735_v63, %v1406_v34  ;;  %v1152_v37 = vpop.f32.mrb[19].mxu0  ;;  %v1408_v38 = vpop.f32.mrb[19].mxu1  ;;  %v1634_v39 = vmax.f32 %v1148_v27, 0.0  ;;  %v1698_v40 = vmax.f32 %v1404_v28, 0.0 }
 0x13e   : > { %v1635_v41 = vmax.f32 %v1151_v35, 0.0  ;;  %v1699_v42 = vmax.f32 %v1407_v36, 0.0  ;;  %1362 = vmatmul.mubr.bf16.gmra.mrb[124].mxu0 %v3494_v31  ;;  %1618 = vmatmul.mubr.bf16.gmra.mrb[124].mxu1 %v3495_v32 }
 0x140   : > { %v2887_v43 = vpack.c.bf16 %v1635_v41, %v1634_v39  ;;  %v3047_v44 = vpack.c.bf16 %v1699_v42, %v1698_v40 }
 0x141   : > { %v1155_v45 = vpop.f32.mrb[20].mxu0  ;;  %v1411_v46 = vpop.f32.mrb[20].mxu1 }
 0x142   : > { %3187 = vst [vmem:[%s3749_s5 + $0x20] sm:$0xff] %v2887_v43   ;;  %3219 = vst [vmem:[%s3749_s5 + $0x120] sm:$0xff] %v3047_v44   ;;  %v1156_v47 = vadd.f32 %v3735_v63, %v1155_v45  ;;  %v1412_v48 = vadd.f32 %v3735_v63, %v1411_v46  ;;  %v1157_v49 = vpop.f32.mrb[21].mxu0  ;;  %v1413_v50 = vpop.f32.mrb[21].mxu1 }
 0x143   : > { %v1158_v51 = vpop.f32.mrb[22].mxu0  ;;  %v1414_v52 = vpop.f32.mrb[22].mxu1 }
 0x144   : > { %v1159_v53 = vadd.f32 %v3735_v63, %v1158_v51  ;;  %v1415_v54 = vadd.f32 %v3735_v63, %v1414_v52  ;;  %v1160_v55 = vpop.f32.mrb[23].mxu0  ;;  %v1416_v56 = vpop.f32.mrb[23].mxu1  ;;  %v1636_v57 = vmax.f32 %v1156_v47, 0.0  ;;  %v1700_v58 = vmax.f32 %v1412_v48, 0.0 }
 0x146   : > { %v1637_v59 = vmax.f32 %v1159_v53, 0.0  ;;  %v1701_v60 = vmax.f32 %v1415_v54, 0.0 }
 0x148   : > { %v2892_v61 = vpack.c.bf16 %v1637_v59, %v1636_v57  ;;  %v3052_v62 = vpack.c.bf16 %v1701_v60, %v1700_v58 }
 0x149   : > { %v1163_v0 = vpop.f32.mrb[24].mxu0  ;;  %v1419_v1 = vpop.f32.mrb[24].mxu1 }
 0x14a   : > { %3188 = vst [vmem:[%s3749_s5 + $0x28] sm:$0xff] %v2892_v61   ;;  %3220 = vst [vmem:[%s3749_s5 + $0x128] sm:$0xff] %v3052_v62   ;;  %v1164_v2 = vadd.f32 %v3735_v63, %v1163_v0  ;;  %v1420_v3 = vadd.f32 %v3735_v63, %v1419_v1  ;;  %v1165_v4 = vpop.f32.mrb[25].mxu0  ;;  %v1421_v5 = vpop.f32.mrb[25].mxu1 }
 0x14b   : > { %v1166_v6 = vpop.f32.mrb[26].mxu0  ;;  %v1422_v7 = vpop.f32.mrb[26].mxu1 }
 0x14c   : > { %v1167_v8 = vadd.f32 %v3735_v63, %v1166_v6  ;;  %v1423_v9 = vadd.f32 %v3735_v63, %v1422_v7  ;;  %v1168_v10 = vpop.f32.mrb[27].mxu0  ;;  %v1424_v11 = vpop.f32.mrb[27].mxu1  ;;  %v1638_v12 = vmax.f32 %v1164_v2, 0.0  ;;  %v1702_v13 = vmax.f32 %v1420_v3, 0.0 }
 0x14e   : > { %v1639_v14 = vmax.f32 %v1167_v8, 0.0  ;;  %v1703_v15 = vmax.f32 %v1423_v9, 0.0 }
 0x150   : > { %v2897_v16 = vpack.c.bf16 %v1639_v14, %v1638_v12  ;;  %v3057_v17 = vpack.c.bf16 %v1703_v15, %v1702_v13 }
 0x151   : > { %v1171_v18 = vpop.f32.mrb[28].mxu0  ;;  %v1427_v19 = vpop.f32.mrb[28].mxu1 }
 0x152   : > { %3189 = vst [vmem:[%s3749_s5 + $0x30] sm:$0xff] %v2897_v16   ;;  %3221 = vst [vmem:[%s3749_s5 + $0x130] sm:$0xff] %v3057_v17   ;;  %v1172_v20 = vadd.f32 %v3735_v63, %v1171_v18  ;;  %v1428_v21 = vadd.f32 %v3735_v63, %v1427_v19  ;;  %v1173_v22 = vpop.f32.mrb[29].mxu0  ;;  %v1429_v23 = vpop.f32.mrb[29].mxu1 }
 0x153   : > { %v1174_v24 = vpop.f32.mrb[30].mxu0  ;;  %v1430_v25 = vpop.f32.mrb[30].mxu1 }
 0x154   : > { %v1175_v26 = vadd.f32 %v3735_v63, %v1174_v24  ;;  %v1431_v27 = vadd.f32 %v3735_v63, %v1430_v25  ;;  %v1176_v28 = vpop.f32.mrb[31].mxu0  ;;  %v1432_v29 = vpop.f32.mrb[31].mxu1  ;;  %v1640_v30 = vmax.f32 %v1172_v20, 0.0  ;;  %v1704_v31 = vmax.f32 %v1428_v21, 0.0 }
 0x156   : > { %v1641_v32 = vmax.f32 %v1175_v26, 0.0  ;;  %v1705_v33 = vmax.f32 %v1431_v27, 0.0 }
 0x158   : > { %v2902_v34 = vpack.c.bf16 %v1641_v32, %v1640_v30  ;;  %v3062_v35 = vpack.c.bf16 %v1705_v33, %v1704_v31 }
 0x159   : > { %v1179_v36 = vpop.f32.mrb[32].mxu0  ;;  %v1435_v37 = vpop.f32.mrb[32].mxu1 }
 0x15a   : > { %3190 = vst [vmem:[%s3749_s5 + $0x38] sm:$0xff] %v2902_v34   ;;  %3222 = vst [vmem:[%s3749_s5 + $0x138] sm:$0xff] %v3062_v35   ;;  %v1180_v38 = vadd.f32 %v3735_v63, %v1179_v36  ;;  %v1436_v39 = vadd.f32 %v3735_v63, %v1435_v37  ;;  %v1181_v40 = vpop.f32.mrb[33].mxu0  ;;  %v1437_v41 = vpop.f32.mrb[33].mxu1 }
 0x15b   : > { %v1182_v42 = vpop.f32.mrb[34].mxu0  ;;  %v1438_v43 = vpop.f32.mrb[34].mxu1 }
 0x15c   : > { %v1183_v44 = vadd.f32 %v3735_v63, %v1182_v42  ;;  %v1439_v45 = vadd.f32 %v3735_v63, %v1438_v43  ;;  %v1184_v46 = vpop.f32.mrb[35].mxu0  ;;  %v1440_v47 = vpop.f32.mrb[35].mxu1  ;;  %v1642_v48 = vmax.f32 %v1180_v38, 0.0  ;;  %v1706_v49 = vmax.f32 %v1436_v39, 0.0 }
 0x15e   : > { %v1643_v50 = vmax.f32 %v1183_v44, 0.0  ;;  %v1707_v51 = vmax.f32 %v1439_v45, 0.0 }
 0x160   : > { %v2907_v52 = vpack.c.bf16 %v1643_v50, %v1642_v48  ;;  %v3067_v53 = vpack.c.bf16 %v1707_v51, %v1706_v49 }
 0x161   : > { %v1187_v54 = vpop.f32.mrb[36].mxu0  ;;  %v1443_v55 = vpop.f32.mrb[36].mxu1 }
 0x162   : > { %3191 = vst [vmem:[%s3749_s5 + $0x40] sm:$0xff] %v2907_v52   ;;  %3223 = vst [vmem:[%s3749_s5 + $0x140] sm:$0xff] %v3067_v53   ;;  %v1188_v56 = vadd.f32 %v3735_v63, %v1187_v54  ;;  %v1444_v57 = vadd.f32 %v3735_v63, %v1443_v55  ;;  %v1189_v58 = vpop.f32.mrb[37].mxu0  ;;  %v1445_v59 = vpop.f32.mrb[37].mxu1 }
 0x163   : > { %v1190_v60 = vpop.f32.mrb[38].mxu0  ;;  %v1446_v61 = vpop.f32.mrb[38].mxu1 }
 0x164   : > { %v1191_v62 = vadd.f32 %v3735_v63, %v1190_v60  ;;  %v1447_v0 = vadd.f32 %v3735_v63, %v1446_v61  ;;  %v1192_v1 = vpop.f32.mrb[39].mxu0  ;;  %v1448_v2 = vpop.f32.mrb[39].mxu1  ;;  %v1644_v3 = vmax.f32 %v1188_v56, 0.0  ;;  %v1708_v4 = vmax.f32 %v1444_v57, 0.0 }
 0x166   : > { %v1645_v5 = vmax.f32 %v1191_v62, 0.0  ;;  %v1709_v6 = vmax.f32 %v1447_v0, 0.0 }
 0x168   : > { %v2912_v7 = vpack.c.bf16 %v1645_v5, %v1644_v3  ;;  %v3072_v8 = vpack.c.bf16 %v1709_v6, %v1708_v4 }
 0x169   : > { %v1195_v9 = vpop.f32.mrb[40].mxu0  ;;  %v1451_v10 = vpop.f32.mrb[40].mxu1 }
 0x16a   : > { %3192 = vst [vmem:[%s3749_s5 + $0x48] sm:$0xff] %v2912_v7   ;;  %3224 = vst [vmem:[%s3749_s5 + $0x148] sm:$0xff] %v3072_v8   ;;  %v1196_v11 = vadd.f32 %v3735_v63, %v1195_v9  ;;  %v1452_v12 = vadd.f32 %v3735_v63, %v1451_v10  ;;  %v1197_v13 = vpop.f32.mrb[41].mxu0  ;;  %v1453_v14 = vpop.f32.mrb[41].mxu1 }
 0x16b   : > { %v1198_v15 = vpop.f32.mrb[42].mxu0  ;;  %v1454_v16 = vpop.f32.mrb[42].mxu1 }
 0x16c   : > { %v1199_v17 = vadd.f32 %v3735_v63, %v1198_v15  ;;  %v1455_v18 = vadd.f32 %v3735_v63, %v1454_v16  ;;  %v1200_v19 = vpop.f32.mrb[43].mxu0  ;;  %v1456_v20 = vpop.f32.mrb[43].mxu1  ;;  %v1646_v21 = vmax.f32 %v1196_v11, 0.0  ;;  %v1710_v22 = vmax.f32 %v1452_v12, 0.0 }
 0x16e   : > { %v1647_v23 = vmax.f32 %v1199_v17, 0.0  ;;  %v1711_v24 = vmax.f32 %v1455_v18, 0.0 }
 0x170   : > { %v2917_v25 = vpack.c.bf16 %v1647_v23, %v1646_v21  ;;  %v3077_v26 = vpack.c.bf16 %v1711_v24, %v1710_v22 }
 0x171   : > { %v1203_v27 = vpop.f32.mrb[44].mxu0  ;;  %v1459_v28 = vpop.f32.mrb[44].mxu1 }
 0x172   : > { %3193 = vst [vmem:[%s3749_s5 + $0x50] sm:$0xff] %v2917_v25   ;;  %3225 = vst [vmem:[%s3749_s5 + $0x150] sm:$0xff] %v3077_v26   ;;  %v1204_v29 = vadd.f32 %v3735_v63, %v1203_v27  ;;  %v1460_v30 = vadd.f32 %v3735_v63, %v1459_v28  ;;  %v1205_v31 = vpop.f32.mrb[45].mxu0  ;;  %v1461_v32 = vpop.f32.mrb[45].mxu1 }
 0x173   : > { %v1206_v33 = vpop.f32.mrb[46].mxu0  ;;  %v1462_v34 = vpop.f32.mrb[46].mxu1 }
 0x174   : > { %v1207_v35 = vadd.f32 %v3735_v63, %v1206_v33  ;;  %v1463_v36 = vadd.f32 %v3735_v63, %v1462_v34  ;;  %v1208_v37 = vpop.f32.mrb[47].mxu0  ;;  %v1464_v38 = vpop.f32.mrb[47].mxu1  ;;  %v1648_v39 = vmax.f32 %v1204_v29, 0.0  ;;  %v1712_v40 = vmax.f32 %v1460_v30, 0.0 }
 0x176   : > { %v1649_v41 = vmax.f32 %v1207_v35, 0.0  ;;  %v1713_v42 = vmax.f32 %v1463_v36, 0.0 }
 0x178   : > { %v2922_v43 = vpack.c.bf16 %v1649_v41, %v1648_v39  ;;  %v3082_v44 = vpack.c.bf16 %v1713_v42, %v1712_v40 }
 0x179   : > { %v1211_v45 = vpop.f32.mrb[48].mxu0  ;;  %v1467_v46 = vpop.f32.mrb[48].mxu1 }
 0x17a   : > { %3194 = vst [vmem:[%s3749_s5 + $0x58] sm:$0xff] %v2922_v43   ;;  %3226 = vst [vmem:[%s3749_s5 + $0x158] sm:$0xff] %v3082_v44   ;;  %v1212_v47 = vadd.f32 %v3735_v63, %v1211_v45  ;;  %v1468_v48 = vadd.f32 %v3735_v63, %v1467_v46  ;;  %v1213_v49 = vpop.f32.mrb[49].mxu0  ;;  %v1469_v50 = vpop.f32.mrb[49].mxu1 }
 0x17b   : > { %v1214_v51 = vpop.f32.mrb[50].mxu0  ;;  %v1470_v52 = vpop.f32.mrb[50].mxu1 }
 0x17c   : > { %v1215_v53 = vadd.f32 %v3735_v63, %v1214_v51  ;;  %v1471_v54 = vadd.f32 %v3735_v63, %v1470_v52  ;;  %v1216_v55 = vpop.f32.mrb[51].mxu0  ;;  %v1472_v56 = vpop.f32.mrb[51].mxu1  ;;  %v1650_v57 = vmax.f32 %v1212_v47, 0.0  ;;  %v1714_v58 = vmax.f32 %v1468_v48, 0.0 }
 0x17e   : > { %v1651_v59 = vmax.f32 %v1215_v53, 0.0  ;;  %v1715_v60 = vmax.f32 %v1471_v54, 0.0 }
 0x180   : > { %v2927_v61 = vpack.c.bf16 %v1651_v59, %v1650_v57  ;;  %v3087_v62 = vpack.c.bf16 %v1715_v60, %v1714_v58 }
 0x181   : > { %v1219_v0 = vpop.f32.mrb[52].mxu0  ;;  %v1475_v1 = vpop.f32.mrb[52].mxu1 }
 0x182   : > { %3195 = vst [vmem:[%s3749_s5 + $0x60] sm:$0xff] %v2927_v61   ;;  %3227 = vst [vmem:[%s3749_s5 + $0x160] sm:$0xff] %v3087_v62   ;;  %v1220_v2 = vadd.f32 %v3735_v63, %v1219_v0  ;;  %v1476_v3 = vadd.f32 %v3735_v63, %v1475_v1  ;;  %v1221_v4 = vpop.f32.mrb[53].mxu0  ;;  %v1477_v5 = vpop.f32.mrb[53].mxu1 }
 0x183   : > { %v1222_v6 = vpop.f32.mrb[54].mxu0  ;;  %v1478_v7 = vpop.f32.mrb[54].mxu1 }
 0x184   : > { %v1223_v8 = vadd.f32 %v3735_v63, %v1222_v6  ;;  %v1479_v9 = vadd.f32 %v3735_v63, %v1478_v7  ;;  %v1224_v10 = vpop.f32.mrb[55].mxu0  ;;  %v1480_v11 = vpop.f32.mrb[55].mxu1  ;;  %v1652_v12 = vmax.f32 %v1220_v2, 0.0  ;;  %v1716_v13 = vmax.f32 %v1476_v3, 0.0 }
 0x186   : > { %v1653_v14 = vmax.f32 %v1223_v8, 0.0  ;;  %v1717_v15 = vmax.f32 %v1479_v9, 0.0 }
 0x188   : > { %v2932_v16 = vpack.c.bf16 %v1653_v14, %v1652_v12  ;;  %v3092_v17 = vpack.c.bf16 %v1717_v15, %v1716_v13 }
 0x189   : > { %v1227_v18 = vpop.f32.mrb[56].mxu0  ;;  %v1483_v19 = vpop.f32.mrb[56].mxu1 }
 0x18a   : > { %3196 = vst [vmem:[%s3749_s5 + $0x68] sm:$0xff] %v2932_v16   ;;  %3228 = vst [vmem:[%s3749_s5 + $0x168] sm:$0xff] %v3092_v17   ;;  %v1228_v20 = vadd.f32 %v3735_v63, %v1227_v18  ;;  %v1484_v21 = vadd.f32 %v3735_v63, %v1483_v19  ;;  %v1229_v22 = vpop.f32.mrb[57].mxu0  ;;  %v1485_v23 = vpop.f32.mrb[57].mxu1 }
 0x18b   : > { %v1230_v24 = vpop.f32.mrb[58].mxu0  ;;  %v1486_v25 = vpop.f32.mrb[58].mxu1 }
 0x18c   : > { %v1231_v26 = vadd.f32 %v3735_v63, %v1230_v24  ;;  %v1487_v27 = vadd.f32 %v3735_v63, %v1486_v25  ;;  %v1232_v28 = vpop.f32.mrb[59].mxu0  ;;  %v1488_v29 = vpop.f32.mrb[59].mxu1  ;;  %v1654_v30 = vmax.f32 %v1228_v20, 0.0  ;;  %v1718_v31 = vmax.f32 %v1484_v21, 0.0 }
 0x18e   : > { %v1655_v32 = vmax.f32 %v1231_v26, 0.0  ;;  %v1719_v33 = vmax.f32 %v1487_v27, 0.0 }
 0x190   : > { %v2937_v34 = vpack.c.bf16 %v1655_v32, %v1654_v30  ;;  %v3097_v35 = vpack.c.bf16 %v1719_v33, %v1718_v31 }
 0x191   : > { %v1235_v36 = vpop.f32.mrb[60].mxu0  ;;  %v1491_v37 = vpop.f32.mrb[60].mxu1 }
 0x192   : > { %3197 = vst [vmem:[%s3749_s5 + $0x70] sm:$0xff] %v2937_v34   ;;  %3229 = vst [vmem:[%s3749_s5 + $0x170] sm:$0xff] %v3097_v35   ;;  %v1236_v38 = vadd.f32 %v3735_v63, %v1235_v36  ;;  %v1492_v39 = vadd.f32 %v3735_v63, %v1491_v37  ;;  %v1237_v40 = vpop.f32.mrb[61].mxu0  ;;  %v1493_v41 = vpop.f32.mrb[61].mxu1 }
 0x193   : > { %v1238_v42 = vpop.f32.mrb[62].mxu0  ;;  %v1494_v43 = vpop.f32.mrb[62].mxu1 }
 0x194   : > { %v1239_v44 = vadd.f32 %v3735_v63, %v1238_v42  ;;  %v1495_v45 = vadd.f32 %v3735_v63, %v1494_v43  ;;  %v1240_v46 = vpop.f32.mrb[63].mxu0  ;;  %v1496_v47 = vpop.f32.mrb[63].mxu1  ;;  %v1656_v48 = vmax.f32 %v1236_v38, 0.0  ;;  %v1720_v49 = vmax.f32 %v1492_v39, 0.0 }
 0x196   : > { %v1657_v50 = vmax.f32 %v1239_v44, 0.0  ;;  %v1721_v51 = vmax.f32 %v1495_v45, 0.0 }
 0x198   : > { %v2942_v52 = vpack.c.bf16 %v1657_v50, %v1656_v48  ;;  %v3102_v53 = vpack.c.bf16 %v1721_v51, %v1720_v49 }
 0x199   : > { %v1243_v54 = vpop.f32.mrb[64].mxu0  ;;  %v1499_v55 = vpop.f32.mrb[64].mxu1 }
 0x19a   : > { %3198 = vst [vmem:[%s3749_s5 + $0x78] sm:$0xff] %v2942_v52   ;;  %3230 = vst [vmem:[%s3749_s5 + $0x178] sm:$0xff] %v3102_v53   ;;  %v1244_v56 = vadd.f32 %v3735_v63, %v1243_v54  ;;  %v1500_v57 = vadd.f32 %v3735_v63, %v1499_v55  ;;  %v1245_v58 = vpop.f32.mrb[65].mxu0  ;;  %v1501_v59 = vpop.f32.mrb[65].mxu1 }
 0x19b   : > { %v1246_v60 = vpop.f32.mrb[66].mxu0  ;;  %v1502_v61 = vpop.f32.mrb[66].mxu1 }
 0x19c   : > { %v1247_v62 = vadd.f32 %v3735_v63, %v1246_v60  ;;  %v1503_v0 = vadd.f32 %v3735_v63, %v1502_v61  ;;  %v1248_v1 = vpop.f32.mrb[67].mxu0  ;;  %v1504_v2 = vpop.f32.mrb[67].mxu1  ;;  %v1658_v3 = vmax.f32 %v1244_v56, 0.0  ;;  %v1722_v4 = vmax.f32 %v1500_v57, 0.0 }
 0x19e   : > { %v1659_v5 = vmax.f32 %v1247_v62, 0.0  ;;  %v1723_v6 = vmax.f32 %v1503_v0, 0.0 }
 0x1a0   : > { %v2947_v7 = vpack.c.bf16 %v1659_v5, %v1658_v3  ;;  %v3107_v8 = vpack.c.bf16 %v1723_v6, %v1722_v4 }
 0x1a1   : > { %v1251_v9 = vpop.f32.mrb[68].mxu0  ;;  %v1507_v10 = vpop.f32.mrb[68].mxu1 }
 0x1a2   : > { %3199 = vst [vmem:[%s3749_s5 + $0x80] sm:$0xff] %v2947_v7   ;;  %3231 = vst [vmem:[%s3749_s5 + $0x180] sm:$0xff] %v3107_v8   ;;  %v1252_v11 = vadd.f32 %v3735_v63, %v1251_v9  ;;  %v1508_v12 = vadd.f32 %v3735_v63, %v1507_v10  ;;  %v1253_v13 = vpop.f32.mrb[69].mxu0  ;;  %v1509_v14 = vpop.f32.mrb[69].mxu1 }
 0x1a3   : > { %v1254_v15 = vpop.f32.mrb[70].mxu0  ;;  %v1510_v16 = vpop.f32.mrb[70].mxu1 }
 0x1a4   : > { %v1255_v17 = vadd.f32 %v3735_v63, %v1254_v15  ;;  %v1511_v18 = vadd.f32 %v3735_v63, %v1510_v16  ;;  %v1256_v19 = vpop.f32.mrb[71].mxu0  ;;  %v1512_v20 = vpop.f32.mrb[71].mxu1  ;;  %v1660_v21 = vmax.f32 %v1252_v11, 0.0  ;;  %v1724_v22 = vmax.f32 %v1508_v12, 0.0 }
 0x1a6   : > { %v1661_v23 = vmax.f32 %v1255_v17, 0.0  ;;  %v1725_v24 = vmax.f32 %v1511_v18, 0.0 }
 0x1a8   : > { %v2952_v25 = vpack.c.bf16 %v1661_v23, %v1660_v21  ;;  %v3112_v26 = vpack.c.bf16 %v1725_v24, %v1724_v22 }
 0x1a9   : > { %v1259_v27 = vpop.f32.mrb[72].mxu0  ;;  %v1515_v28 = vpop.f32.mrb[72].mxu1 }
 0x1aa   : > { %3200 = vst [vmem:[%s3749_s5 + $0x88] sm:$0xff] %v2952_v25   ;;  %3232 = vst [vmem:[%s3749_s5 + $0x188] sm:$0xff] %v3112_v26   ;;  %v1260_v29 = vadd.f32 %v3735_v63, %v1259_v27  ;;  %v1516_v30 = vadd.f32 %v3735_v63, %v1515_v28  ;;  %v1261_v31 = vpop.f32.mrb[73].mxu0  ;;  %v1517_v32 = vpop.f32.mrb[73].mxu1 }
 0x1ab   : > { %v1262_v33 = vpop.f32.mrb[74].mxu0  ;;  %v1518_v34 = vpop.f32.mrb[74].mxu1 }
 0x1ac   : > { %v1263_v35 = vadd.f32 %v3735_v63, %v1262_v33  ;;  %v1519_v36 = vadd.f32 %v3735_v63, %v1518_v34  ;;  %v1264_v37 = vpop.f32.mrb[75].mxu0  ;;  %v1520_v38 = vpop.f32.mrb[75].mxu1  ;;  %v1662_v39 = vmax.f32 %v1260_v29, 0.0  ;;  %v1726_v40 = vmax.f32 %v1516_v30, 0.0 }
 0x1ae   : > { %v1663_v41 = vmax.f32 %v1263_v35, 0.0  ;;  %v1727_v42 = vmax.f32 %v1519_v36, 0.0 }
 0x1b0   : > { %v2957_v43 = vpack.c.bf16 %v1663_v41, %v1662_v39  ;;  %v3117_v44 = vpack.c.bf16 %v1727_v42, %v1726_v40 }
 0x1b1   : > { %v1267_v45 = vpop.f32.mrb[76].mxu0  ;;  %v1523_v46 = vpop.f32.mrb[76].mxu1 }
 0x1b2   : > { %3201 = vst [vmem:[%s3749_s5 + $0x90] sm:$0xff] %v2957_v43   ;;  %3233 = vst [vmem:[%s3749_s5 + $0x190] sm:$0xff] %v3117_v44   ;;  %v1268_v47 = vadd.f32 %v3735_v63, %v1267_v45  ;;  %v1524_v48 = vadd.f32 %v3735_v63, %v1523_v46  ;;  %v1269_v49 = vpop.f32.mrb[77].mxu0  ;;  %v1525_v50 = vpop.f32.mrb[77].mxu1 }
 0x1b3   : > { %v1270_v51 = vpop.f32.mrb[78].mxu0  ;;  %v1526_v52 = vpop.f32.mrb[78].mxu1 }
 0x1b4   : > { %v1271_v53 = vadd.f32 %v3735_v63, %v1270_v51  ;;  %v1527_v54 = vadd.f32 %v3735_v63, %v1526_v52  ;;  %v1272_v55 = vpop.f32.mrb[79].mxu0  ;;  %v1528_v56 = vpop.f32.mrb[79].mxu1  ;;  %v1664_v57 = vmax.f32 %v1268_v47, 0.0  ;;  %v1728_v58 = vmax.f32 %v1524_v48, 0.0 }
 0x1b6   : > { %v1665_v59 = vmax.f32 %v1271_v53, 0.0  ;;  %v1729_v60 = vmax.f32 %v1527_v54, 0.0 }
 0x1b8   : > { %v2962_v61 = vpack.c.bf16 %v1665_v59, %v1664_v57  ;;  %v3122_v62 = vpack.c.bf16 %v1729_v60, %v1728_v58 }
 0x1b9   : > { %v1275_v0 = vpop.f32.mrb[80].mxu0  ;;  %v1531_v1 = vpop.f32.mrb[80].mxu1 }
 0x1ba   : > { %3202 = vst [vmem:[%s3749_s5 + $0x98] sm:$0xff] %v2962_v61   ;;  %3234 = vst [vmem:[%s3749_s5 + $0x198] sm:$0xff] %v3122_v62   ;;  %v1276_v2 = vadd.f32 %v3735_v63, %v1275_v0  ;;  %v1532_v3 = vadd.f32 %v3735_v63, %v1531_v1  ;;  %v1277_v4 = vpop.f32.mrb[81].mxu0  ;;  %v1533_v5 = vpop.f32.mrb[81].mxu1 }
 0x1bb   : > { %v1278_v6 = vpop.f32.mrb[82].mxu0  ;;  %v1534_v7 = vpop.f32.mrb[82].mxu1 }
 0x1bc   : > { %v1279_v8 = vadd.f32 %v3735_v63, %v1278_v6  ;;  %v1535_v9 = vadd.f32 %v3735_v63, %v1534_v7  ;;  %v1280_v10 = vpop.f32.mrb[83].mxu0  ;;  %v1536_v11 = vpop.f32.mrb[83].mxu1  ;;  %v1666_v12 = vmax.f32 %v1276_v2, 0.0  ;;  %v1730_v13 = vmax.f32 %v1532_v3, 0.0 }
 0x1bd   : > { %v3908_v11 = vld [vmem:[%s3963_s2] ss:$0 sm:$0xff] }
 0x1be   : > { %v1667_v14 = vmax.f32 %v1279_v8, 0.0  ;;  %v1731_v15 = vmax.f32 %v1535_v9, 0.0 }
 0x1c0   : > { %v2967_v16 = vpack.c.bf16 %v1667_v14, %v1666_v12  ;;  %v3127_v17 = vpack.c.bf16 %v1731_v15, %v1730_v13 }
 0x1c1   : > { %v1283_v18 = vpop.f32.mrb[84].mxu0  ;;  %v1539_v19 = vpop.f32.mrb[84].mxu1 }
 0x1c2   : > { %3203 = vst [vmem:[%s3749_s5 + $0xa0] sm:$0xff] %v2967_v16   ;;  %3235 = vst [vmem:[%s3749_s5 + $0x1a0] sm:$0xff] %v3127_v17   ;;  %v1284_v20 = vadd.f32 %v3735_v63, %v1283_v18  ;;  %v1540_v21 = vadd.f32 %v3735_v63, %v1539_v19  ;;  %v1285_v22 = vpop.f32.mrb[85].mxu0  ;;  %v1541_v23 = vpop.f32.mrb[85].mxu1 }
 0x1c3   : > { %v1286_v24 = vpop.f32.mrb[86].mxu0  ;;  %v1542_v25 = vpop.f32.mrb[86].mxu1 }
 0x1c4   : > { %v1287_v26 = vadd.f32 %v3735_v63, %v1286_v24  ;;  %v1543_v27 = vadd.f32 %v3735_v63, %v1542_v25  ;;  %v1288_v28 = vpop.f32.mrb[87].mxu0  ;;  %v1544_v29 = vpop.f32.mrb[87].mxu1  ;;  %v1668_v30 = vmax.f32 %v1284_v20, 0.0  ;;  %v1732_v31 = vmax.f32 %v1540_v21, 0.0 }
 0x1c6   : > { %v1669_v32 = vmax.f32 %v1287_v26, 0.0  ;;  %v1733_v33 = vmax.f32 %v1543_v27, 0.0 }
 0x1c8   : > { %v2972_v34 = vpack.c.bf16 %v1669_v32, %v1668_v30  ;;  %v3132_v35 = vpack.c.bf16 %v1733_v33, %v1732_v31 }
 0x1c9   : > { %v1291_v36 = vpop.f32.mrb[88].mxu0  ;;  %v1547_v37 = vpop.f32.mrb[88].mxu1 }
 0x1ca   : > { %3204 = vst [vmem:[%s3749_s5 + $0xa8] sm:$0xff] %v2972_v34   ;;  %3236 = vst [vmem:[%s3749_s5 + $0x1a8] sm:$0xff] %v3132_v35   ;;  %v1292_v38 = vadd.f32 %v3735_v63, %v1291_v36  ;;  %v1548_v39 = vadd.f32 %v3735_v63, %v1547_v37  ;;  %v1293_v40 = vpop.f32.mrb[89].mxu0  ;;  %v1549_v41 = vpop.f32.mrb[89].mxu1 }
 0x1cb   : > { %v1294_v42 = vpop.f32.mrb[90].mxu0  ;;  %v1550_v43 = vpop.f32.mrb[90].mxu1 }
 0x1cc   : > { %v1295_v44 = vadd.f32 %v3735_v63, %v1294_v42  ;;  %v1551_v45 = vadd.f32 %v3735_v63, %v1550_v43  ;;  %v1296_v46 = vpop.f32.mrb[91].mxu0  ;;  %v1552_v47 = vpop.f32.mrb[91].mxu1  ;;  %v1670_v48 = vmax.f32 %v1292_v38, 0.0  ;;  %v1734_v49 = vmax.f32 %v1548_v39, 0.0 }
 0x1ce   : > { %v1671_v50 = vmax.f32 %v1295_v44, 0.0  ;;  %v1735_v51 = vmax.f32 %v1551_v45, 0.0 }
 0x1d0   : > { %v2977_v52 = vpack.c.bf16 %v1671_v50, %v1670_v48  ;;  %v3137_v53 = vpack.c.bf16 %v1735_v51, %v1734_v49 }
 0x1d1   : > { %v1299_v54 = vpop.f32.mrb[92].mxu0  ;;  %v1555_v55 = vpop.f32.mrb[92].mxu1 }
 0x1d2   : > { %3205 = vst [vmem:[%s3749_s5 + $0xb0] sm:$0xff] %v2977_v52   ;;  %3237 = vst [vmem:[%s3749_s5 + $0x1b0] sm:$0xff] %v3137_v53   ;;  %v1300_v56 = vadd.f32 %v3735_v63, %v1299_v54  ;;  %v1556_v57 = vadd.f32 %v3735_v63, %v1555_v55  ;;  %v1301_v58 = vpop.f32.mrb[93].mxu0  ;;  %v1557_v59 = vpop.f32.mrb[93].mxu1 }
 0x1d3   : > { %v1302_v60 = vpop.f32.mrb[94].mxu0  ;;  %v1558_v61 = vpop.f32.mrb[94].mxu1 }
 0x1d4   : > { %v1303_v62 = vadd.f32 %v3735_v63, %v1302_v60  ;;  %v1559_v0 = vadd.f32 %v3735_v63, %v1558_v61  ;;  %v1304_v1 = vpop.f32.mrb[95].mxu0  ;;  %v1560_v2 = vpop.f32.mrb[95].mxu1  ;;  %v1672_v3 = vmax.f32 %v1300_v56, 0.0  ;;  %v1736_v4 = vmax.f32 %v1556_v57, 0.0 }
 0x1d6   : > { %v1673_v5 = vmax.f32 %v1303_v62, 0.0  ;;  %v1737_v6 = vmax.f32 %v1559_v0, 0.0 }
 0x1d8   : > { %v2982_v7 = vpack.c.bf16 %v1673_v5, %v1672_v3  ;;  %v3142_v8 = vpack.c.bf16 %v1737_v6, %v1736_v4 }
 0x1d9   : > { %v1307_v9 = vpop.f32.mrb[96].mxu0  ;;  %v1563_v10 = vpop.f32.mrb[96].mxu1 }
 0x1da   : > { %3206 = vst [vmem:[%s3749_s5 + $0xb8] sm:$0xff] %v2982_v7   ;;  %3238 = vst [vmem:[%s3749_s5 + $0x1b8] sm:$0xff] %v3142_v8   ;;  %v1308_v12 = vadd.f32 %v3908_v11, %v1307_v9  ;;  %v1564_v63 = vadd.f32 %v3908_v11, %v1563_v10  ;;  %v1309_v13 = vpop.f32.mrb[97].mxu0  ;;  %v1565_v14 = vpop.f32.mrb[97].mxu1 }
 0x1db   : > { %v1310_v15 = vpop.f32.mrb[98].mxu0  ;;  %v1566_v16 = vpop.f32.mrb[98].mxu1 }
 0x1dc   : > { %v1311_v17 = vadd.f32 %v3908_v11, %v1310_v15  ;;  %v1567_v18 = vadd.f32 %v3908_v11, %v1566_v16  ;;  %v1312_v19 = vpop.f32.mrb[99].mxu0  ;;  %v1568_v20 = vpop.f32.mrb[99].mxu1  ;;  %v1674_v21 = vmax.f32 %v1308_v12, 0.0  ;;  %v1738_v22 = vmax.f32 %v1564_v63, 0.0 }
 0x1de   : > { %v1675_v23 = vmax.f32 %v1311_v17, 0.0  ;;  %v1739_v24 = vmax.f32 %v1567_v18, 0.0 }
 0x1e0   : > { %v2987_v25 = vpack.c.bf16 %v1675_v23, %v1674_v21  ;;  %v3147_v26 = vpack.c.bf16 %v1739_v24, %v1738_v22 }
 0x1e1   : > { %v1315_v27 = vpop.f32.mrb[100].mxu0  ;;  %v1571_v28 = vpop.f32.mrb[100].mxu1 }
 0x1e2   : > { %3207 = vst [vmem:[%s3749_s5 + $0xc0] sm:$0xff] %v2987_v25   ;;  %3239 = vst [vmem:[%s3749_s5 + $0x1c0] sm:$0xff] %v3147_v26   ;;  %v1316_v29 = vadd.f32 %v3908_v11, %v1315_v27  ;;  %v1572_v30 = vadd.f32 %v3908_v11, %v1571_v28  ;;  %v1317_v31 = vpop.f32.mrb[101].mxu0  ;;  %v1573_v32 = vpop.f32.mrb[101].mxu1 }
 0x1e3   : > { %v1318_v33 = vpop.f32.mrb[102].mxu0  ;;  %v1574_v34 = vpop.f32.mrb[102].mxu1 }
 0x1e4   : > { %v1319_v35 = vadd.f32 %v3908_v11, %v1318_v33  ;;  %v1575_v36 = vadd.f32 %v3908_v11, %v1574_v34  ;;  %v1320_v37 = vpop.f32.mrb[103].mxu0  ;;  %v1576_v38 = vpop.f32.mrb[103].mxu1  ;;  %v1676_v39 = vmax.f32 %v1316_v29, 0.0  ;;  %v1740_v40 = vmax.f32 %v1572_v30, 0.0 }
 0x1e6   : > { %v1677_v41 = vmax.f32 %v1319_v35, 0.0  ;;  %v1741_v42 = vmax.f32 %v1575_v36, 0.0 }
 0x1e8   : > { %v2992_v43 = vpack.c.bf16 %v1677_v41, %v1676_v39  ;;  %v3152_v44 = vpack.c.bf16 %v1741_v42, %v1740_v40 }
 0x1e9   : > { %v1323_v45 = vpop.f32.mrb[104].mxu0  ;;  %v1579_v46 = vpop.f32.mrb[104].mxu1 }
 0x1ea   : > { %3208 = vst [vmem:[%s3749_s5 + $0xc8] sm:$0xff] %v2992_v43   ;;  %3240 = vst [vmem:[%s3749_s5 + $0x1c8] sm:$0xff] %v3152_v44   ;;  %v1324_v47 = vadd.f32 %v3908_v11, %v1323_v45  ;;  %v1580_v48 = vadd.f32 %v3908_v11, %v1579_v46  ;;  %v1325_v49 = vpop.f32.mrb[105].mxu0  ;;  %v1581_v50 = vpop.f32.mrb[105].mxu1 }
 0x1eb   : > { %v1326_v51 = vpop.f32.mrb[106].mxu0  ;;  %v1582_v52 = vpop.f32.mrb[106].mxu1 }
 0x1ec   : > { %v1327_v53 = vadd.f32 %v3908_v11, %v1326_v51  ;;  %v1583_v54 = vadd.f32 %v3908_v11, %v1582_v52  ;;  %v1328_v55 = vpop.f32.mrb[107].mxu0  ;;  %v1584_v56 = vpop.f32.mrb[107].mxu1  ;;  %v1678_v57 = vmax.f32 %v1324_v47, 0.0  ;;  %v1742_v58 = vmax.f32 %v1580_v48, 0.0 }
 0x1ee   : > { %v1679_v59 = vmax.f32 %v1327_v53, 0.0  ;;  %v1743_v60 = vmax.f32 %v1583_v54, 0.0 }
 0x1f0   : > { %v2997_v61 = vpack.c.bf16 %v1679_v59, %v1678_v57  ;;  %v3157_v62 = vpack.c.bf16 %v1743_v60, %v1742_v58 }
 0x1f1   : > { %v1331_v0 = vpop.f32.mrb[108].mxu0  ;;  %v1587_v1 = vpop.f32.mrb[108].mxu1 }
 0x1f2   : > { %3209 = vst [vmem:[%s3749_s5 + $0xd0] sm:$0xff] %v2997_v61   ;;  %3241 = vst [vmem:[%s3749_s5 + $0x1d0] sm:$0xff] %v3157_v62   ;;  %v1332_v2 = vadd.f32 %v3908_v11, %v1331_v0  ;;  %v1588_v3 = vadd.f32 %v3908_v11, %v1587_v1  ;;  %v1333_v4 = vpop.f32.mrb[109].mxu0  ;;  %v1589_v5 = vpop.f32.mrb[109].mxu1 }
 0x1f3   : > { %v1334_v6 = vpop.f32.mrb[110].mxu0  ;;  %v1590_v7 = vpop.f32.mrb[110].mxu1 }
 0x1f4   : > { %v1335_v8 = vadd.f32 %v3908_v11, %v1334_v6  ;;  %v1591_v9 = vadd.f32 %v3908_v11, %v1590_v7  ;;  %v1336_v10 = vpop.f32.mrb[111].mxu0  ;;  %v1592_v12 = vpop.f32.mrb[111].mxu1  ;;  %v1680_v63 = vmax.f32 %v1332_v2, 0.0  ;;  %v1744_v13 = vmax.f32 %v1588_v3, 0.0 }
 0x1f6   : > { %v1681_v14 = vmax.f32 %v1335_v8, 0.0  ;;  %v1745_v15 = vmax.f32 %v1591_v9, 0.0 }
 0x1f8   : > { %v3002_v16 = vpack.c.bf16 %v1681_v14, %v1680_v63  ;;  %v3162_v17 = vpack.c.bf16 %v1745_v15, %v1744_v13 }
 0x1f9   : > { %v1339_v18 = vpop.f32.mrb[112].mxu0  ;;  %v1595_v19 = vpop.f32.mrb[112].mxu1 }
 0x1fa   : > { %3210 = vst [vmem:[%s3749_s5 + $0xd8] sm:$0xff] %v3002_v16   ;;  %3242 = vst [vmem:[%s3749_s5 + $0x1d8] sm:$0xff] %v3162_v17   ;;  %v1340_v20 = vadd.f32 %v3908_v11, %v1339_v18  ;;  %v1596_v21 = vadd.f32 %v3908_v11, %v1595_v19  ;;  %v1341_v22 = vpop.f32.mrb[113].mxu0  ;;  %v1597_v23 = vpop.f32.mrb[113].mxu1 }
 0x1fb   : > { %v1342_v24 = vpop.f32.mrb[114].mxu0  ;;  %v1598_v25 = vpop.f32.mrb[114].mxu1 }
 0x1fc   : > { %v1343_v26 = vadd.f32 %v3908_v11, %v1342_v24  ;;  %v1599_v27 = vadd.f32 %v3908_v11, %v1598_v25  ;;  %v1344_v28 = vpop.f32.mrb[115].mxu0  ;;  %v1600_v29 = vpop.f32.mrb[115].mxu1  ;;  %v1682_v30 = vmax.f32 %v1340_v20, 0.0  ;;  %v1746_v31 = vmax.f32 %v1596_v21, 0.0 }
 0x1fe   : > { %v1683_v32 = vmax.f32 %v1343_v26, 0.0  ;;  %v1747_v33 = vmax.f32 %v1599_v27, 0.0 }
 0x200   : > { %v3007_v34 = vpack.c.bf16 %v1683_v32, %v1682_v30  ;;  %v3167_v35 = vpack.c.bf16 %v1747_v33, %v1746_v31 }
 0x201   : > { %v1347_v36 = vpop.f32.mrb[116].mxu0  ;;  %v1603_v37 = vpop.f32.mrb[116].mxu1 }
 0x202   : > { %3211 = vst [vmem:[%s3749_s5 + $0xe0] sm:$0xff] %v3007_v34   ;;  %3243 = vst [vmem:[%s3749_s5 + $0x1e0] sm:$0xff] %v3167_v35   ;;  %v1348_v38 = vadd.f32 %v3908_v11, %v1347_v36  ;;  %v1604_v39 = vadd.f32 %v3908_v11, %v1603_v37  ;;  %v1349_v40 = vpop.f32.mrb[117].mxu0  ;;  %v1605_v41 = vpop.f32.mrb[117].mxu1 }
 0x203   : > { %v1350_v42 = vpop.f32.mrb[118].mxu0  ;;  %v1606_v43 = vpop.f32.mrb[118].mxu1 }
 0x204   : > { %v1351_v44 = vadd.f32 %v3908_v11, %v1350_v42  ;;  %v1607_v45 = vadd.f32 %v3908_v11, %v1606_v43  ;;  %v1352_v46 = vpop.f32.mrb[119].mxu0  ;;  %v1608_v47 = vpop.f32.mrb[119].mxu1  ;;  %v1684_v48 = vmax.f32 %v1348_v38, 0.0  ;;  %v1748_v49 = vmax.f32 %v1604_v39, 0.0 }
 0x206   : > { %v1685_v50 = vmax.f32 %v1351_v44, 0.0  ;;  %v1749_v51 = vmax.f32 %v1607_v45, 0.0 }
 0x208   : > { %v3012_v52 = vpack.c.bf16 %v1685_v50, %v1684_v48  ;;  %v3172_v53 = vpack.c.bf16 %v1749_v51, %v1748_v49 }
 0x209   : > { %v1355_v54 = vpop.f32.mrb[120].mxu0  ;;  %v1611_v55 = vpop.f32.mrb[120].mxu1 }
 0x20a   : > { %3212 = vst [vmem:[%s3749_s5 + $0xe8] sm:$0xff] %v3012_v52   ;;  %3244 = vst [vmem:[%s3749_s5 + $0x1e8] sm:$0xff] %v3172_v53   ;;  %v1356_v56 = vadd.f32 %v3908_v11, %v1355_v54  ;;  %v1612_v57 = vadd.f32 %v3908_v11, %v1611_v55  ;;  %v1357_v58 = vpop.f32.mrb[121].mxu0  ;;  %v1613_v59 = vpop.f32.mrb[121].mxu1 }
 0x20b   : > { %v1358_v60 = vpop.f32.mrb[122].mxu0  ;;  %v1614_v61 = vpop.f32.mrb[122].mxu1 }
 0x20c   : > { %v1359_v62 = vadd.f32 %v3908_v11, %v1358_v60  ;;  %v1615_v0 = vadd.f32 %v3908_v11, %v1614_v61  ;;  %v1360_v1 = vpop.f32.mrb[123].mxu0  ;;  %v1616_v2 = vpop.f32.mrb[123].mxu1  ;;  %v1686_v3 = vmax.f32 %v1356_v56, 0.0  ;;  %v1750_v4 = vmax.f32 %v1612_v57, 0.0 }
 0x20e   : > { %v1687_v5 = vmax.f32 %v1359_v62, 0.0  ;;  %v1751_v6 = vmax.f32 %v1615_v0, 0.0 }
 0x210   : > { %v3017_v7 = vpack.c.bf16 %v1687_v5, %v1686_v3  ;;  %v3177_v8 = vpack.c.bf16 %v1751_v6, %v1750_v4 }
 0x211   : > { %v1363_v9 = vpop.f32.mrb[124].mxu0  ;;  %v1619_v10 = vpop.f32.mrb[124].mxu1 }
 0x212   : > { %3213 = vst [vmem:[%s3749_s5 + $0xf0] sm:$0xff] %v3017_v7   ;;  %3245 = vst [vmem:[%s3749_s5 + $0x1f0] sm:$0xff] %v3177_v8   ;;  %v1364_v12 = vadd.f32 %v3908_v11, %v1363_v9  ;;  %v1620_v63 = vadd.f32 %v3908_v11, %v1619_v10  ;;  %v1365_v13 = vpop.f32.mrb[125].mxu0  ;;  %v1621_v14 = vpop.f32.mrb[125].mxu1 }
 0x213   : > { %v1366_v15 = vpop.f32.mrb[126].mxu0  ;;  %v1622_v16 = vpop.f32.mrb[126].mxu1 }
 0x214   : > { %v1367_v17 = vadd.f32 %v3908_v11, %v1366_v15  ;;  %v1623_v18 = vadd.f32 %v3908_v11, %v1622_v16  ;;  %v1368_v19 = vpop.f32.mrb[127].mxu0  ;;  %v1624_v20 = vpop.f32.mrb[127].mxu1  ;;  %v1688_v21 = vmax.f32 %v1364_v12, 0.0  ;;  %v1752_v22 = vmax.f32 %v1620_v63, 0.0 }
 0x216   : > { %v1689_v23 = vmax.f32 %v1367_v17, 0.0  ;;  %v1753_v24 = vmax.f32 %v1623_v18, 0.0 }
 0x218   : > { %v3022_v25 = vpack.c.bf16 %v1689_v23, %v1688_v21  ;;  %v3182_v26 = vpack.c.bf16 %v1753_v24, %v1752_v22 }
 0x21a   : > { %3214 = vst [vmem:[%s3749_s5 + $0xf8] sm:$0xff] %v3022_v25   ;;  %3246 = vst [vmem:[%s3749_s5 + $0x1f8] sm:$0xff] %v3182_v26  }
 0x21b PF: > { %s13_s12 = sadd.s32 1, %s3503_s12  }
 0x21c   : > { %p10_p4 = scmp.ge.s32.totalorder %s13_s12, 4  }
 0x21e   :  { %12 = sbr.rel (!%p10_p4) target bundleno = 1 (0x1), region = 62 }

// kernel: eitnet_forward.15
= control target key start
LH: loop header
LB: loop body
LE: loop exit
PB: predicated region body
PF: predicated region fallthrough
CT: control target
= control target key end

     0   :  { %s6330_s12 = smov 0   ;;  %s7679_s0 = inlined_call_operand.vmem [shape: bf16[8192,128], index: 0, kind: input, shape index: {}]   ;;  %s7680_s1 = inlined_call_operand.vmem [shape: bf16[128,128], index: 1, kind: input, shape index: {}]   ;;  %s7681_s2 = inlined_call_operand.vmem [shape: f32[1,128], index: 2, kind: input, shape index: {}]   ;;  %s7682_s3 = inlined_call_operand.vmem [shape: f32[8192,128], index: 3, kind: output, shape index: {}]  }
   0x1 LB: > { %s4943_s13 = sadd.s32 4294967295, %s6308_s12   ;;  %p4947_p0 = scmp.ge.s32.totalorder %s6308_s12, 1  ;;  %s6308_s12 = sphi %s6330_s12, %s13_s12  }
   0x2   : > { %p138_p1 = scmp.lt.s32.totalorder %s6308_s12, 3 }
   0x4   : > { %p139_p2 = pnand %p4947_p0, %p138_p1 }
   0x5   : > { %v6035_v0 = vld [vmem:[%s7680_s1] sm:$0xff] (!%p139_p2)   ;;  %s4948_s16 = sshll.u32 (!%p139_p2), %s4943_s13, 9  ;;  %v6036_v1 = vld [vmem:[%s7680_s1 + $0x8] sm:$0xff] (!%p139_p2)   ;;  %v6037_v2 = vld [vmem:[%s7680_s1 + $0x10] sm:$0xff] (!%p139_p2)  }
   0x6   : > { %142 = sbr.rel (%p139_p2) target bundleno = 760 (0x2f8), region = 32  ;;  %p163_p3 = scmp.lt.s32.totalorder (!%p139_p2), %s4948_s16, 1023  ;;  %5483 = vmatprep.subr.bf16.mxu0 (!%p139_p2), %v6035_v0  ;;  %6011 = vmatprep.subr.bf16.mxu1 (!%p139_p2), %v6035_v0  ;;  %v6038_v3 = vld [vmem:[%s7680_s1 + $0x18] sm:$0xff] (!%p139_p2)   ;;  %v6039_v6 = vld [vmem:[%s7680_s1 + $0x20] sm:$0xff] (!%p139_p2)   ;;  %v6040_v7 = vld [vmem:[%s7680_s1 + $0x28] sm:$0xff] (!%p139_p2)  }
   0x7   : > { %5484 = vmatpush3.bf16.msra.mxu0 (!%p139_p2), %v6035_v0  ;;  %6019 = vmatpush3.bf16.msra.mxu1 (!%p139_p2), %v6035_v0  ;;  %v6041_v8 = vld [vmem:[%s7680_s1 + $0x30] sm:$0xff] (!%p139_p2)   ;;  %v6042_v9 = vld [vmem:[%s7680_s1 + $0x38] sm:$0xff] (!%p139_p2)  }
   0x8   : > { %5485 = vmatprep.subr.bf16.mxu0 (!%p139_p2), %v6036_v1  ;;  %6012 = vmatprep.subr.bf16.mxu1 (!%p139_p2), %v6036_v1 }
   0xb   : > { %5486 = vmatpush3.bf16.msra.mxu0 (!%p139_p2), %v6036_v1  ;;  %6020 = vmatpush3.bf16.msra.mxu1 (!%p139_p2), %v6036_v1 }
   0xc   : > { %5487 = vmatprep.subr.bf16.mxu0 (!%p139_p2), %v6037_v2  ;;  %6013 = vmatprep.subr.bf16.mxu1 (!%p139_p2), %v6037_v2 }
   0xd   : > { %s7684_s16 = smov (!%p163_p3, %s4948_s16), 1023 }
   0xe   : > { %s4949_s21 = sshll.u32 %s7684_s16, 2  ;;  %s4951_s8 = sshll.u32 %s7684_s16, 3 }
   0xf   : > { %s6353_s24 = scalar_lea.vmem %s7679_s0, %s4949_s21  ;;  %5488 = vmatpush3.bf16.msra.mxu0 %v6037_v2  ;;  %6021 = vmatpush3.bf16.msra.mxu1 %v6037_v2  ;;  %s6489_s14 = scalar_lea.vmem %s7682_s3, %s4951_s8 }
  0x10   : > { %v6043_v4 = vld [vmem:[%s6353_s24] sm:$0xff]   ;;  %5489 = vmatprep.subr.bf16.mxu0 %v6038_v3  ;;  %6014 = vmatprep.subr.bf16.mxu1 %v6038_v3  ;;  %v6045_v10 = vld [vmem:[%s6353_s24 + $0x8] sm:$0xff]   ;;  %v6047_v12 = vld [vmem:[%s6353_s24 + $0x10] sm:$0xff]  }
  0x11   : > { %v6044_v5 = vld [vmem:[%s6353_s24 + $0x400] sm:$0xff]   ;;  %5499 = vmatprep.mubr.bf16.mxu0 %v6043_v4  ;;  %v6046_v11 = vld [vmem:[%s6353_s24 + $0x408] sm:$0xff]   ;;  %v6048_v13 = vld [vmem:[%s6353_s24 + $0x410] sm:$0xff]  }
  0x12   : > { %5755 = vmatprep.mubr.bf16.mxu1 %v6044_v5  ;;  %v6049_v14 = vld [vmem:[%s6353_s24 + $0x18] sm:$0xff]   ;;  %v6051_v16 = vld [vmem:[%s6353_s24 + $0x20] sm:$0xff]   ;;  %v6053_v18 = vld [vmem:[%s6353_s24 + $0x28] sm:$0xff]  }
  0x13   : > { %5490 = vmatpush3.bf16.msra.mxu0 %v6038_v3  ;;  %6022 = vmatpush3.bf16.msra.mxu1 %v6038_v3  ;;  %v6050_v15 = vld [vmem:[%s6353_s24 + $0x418] sm:$0xff]   ;;  %v6052_v17 = vld [vmem:[%s6353_s24 + $0x420] sm:$0xff]   ;;  %v6054_v19 = vld [vmem:[%s6353_s24 + $0x428] sm:$0xff]  }
  0x14   : > { %5491 = vmatprep.subr.bf16.mxu0 %v6039_v6  ;;  %6015 = vmatprep.subr.bf16.mxu1 %v6039_v6  ;;  %v6055_v20 = vld [vmem:[%s6353_s24 + $0x30] sm:$0xff]   ;;  %v6057_v22 = vld [vmem:[%s6353_s24 + $0x38] sm:$0xff]   ;;  %v6059_v24 = vld [vmem:[%s6353_s24 + $0x40] sm:$0xff]  }
  0x15   : > { %v6056_v21 = vld [vmem:[%s6353_s24 + $0x430] sm:$0xff]   ;;  %v6058_v23 = vld [vmem:[%s6353_s24 + $0x438] sm:$0xff]   ;;  %v6060_v25 = vld [vmem:[%s6353_s24 + $0x440] sm:$0xff]  }
  0x16   : > { %v6061_v26 = vld [vmem:[%s6353_s24 + $0x48] sm:$0xff]   ;;  %v6063_v28 = vld [vmem:[%s6353_s24 + $0x50] sm:$0xff]   ;;  %v6065_v30 = vld [vmem:[%s6353_s24 + $0x58] sm:$0xff]  }
  0x17   : > { %5492 = vmatpush3.bf16.msra.mxu0 %v6039_v6  ;;  %6023 = vmatpush3.bf16.msra.mxu1 %v6039_v6  ;;  %v6062_v27 = vld [vmem:[%s6353_s24 + $0x448] sm:$0xff]   ;;  %v6064_v29 = vld [vmem:[%s6353_s24 + $0x450] sm:$0xff]   ;;  %v6066_v31 = vld [vmem:[%s6353_s24 + $0x458] sm:$0xff]  }
  0x18   : > { %5493 = vmatprep.subr.bf16.mxu0 %v6040_v7  ;;  %6016 = vmatprep.subr.bf16.mxu1 %v6040_v7  ;;  %v6067_v32 = vld [vmem:[%s6353_s24 + $0x60] sm:$0xff]   ;;  %v6069_v34 = vld [vmem:[%s6353_s24 + $0x68] sm:$0xff]   ;;  %v6071_v36 = vld [vmem:[%s6353_s24 + $0x70] sm:$0xff]  }
  0x19   : > { %v6068_v33 = vld [vmem:[%s6353_s24 + $0x460] sm:$0xff]   ;;  %v6070_v35 = vld [vmem:[%s6353_s24 + $0x468] sm:$0xff]   ;;  %v6072_v37 = vld [vmem:[%s6353_s24 + $0x470] sm:$0xff]  }
  0x1a   : > { %v6073_v38 = vld [vmem:[%s6353_s24 + $0x78] sm:$0xff]   ;;  %v6075_v40 = vld [vmem:[%s6353_s24 + $0x80] sm:$0xff]   ;;  %v6077_v42 = vld [vmem:[%s6353_s24 + $0x88] sm:$0xff]  }
  0x1b   : > { %5494 = vmatpush3.bf16.msra.mxu0 %v6040_v7  ;;  %6024 = vmatpush3.bf16.msra.mxu1 %v6040_v7  ;;  %v6074_v39 = vld [vmem:[%s6353_s24 + $0x478] sm:$0xff]   ;;  %v6076_v41 = vld [vmem:[%s6353_s24 + $0x480] sm:$0xff]   ;;  %v6078_v43 = vld [vmem:[%s6353_s24 + $0x488] sm:$0xff]  }
  0x1c   : > { %5495 = vmatprep.subr.bf16.mxu0 %v6041_v8  ;;  %6017 = vmatprep.subr.bf16.mxu1 %v6041_v8  ;;  %v6079_v44 = vld [vmem:[%s6353_s24 + $0x90] sm:$0xff]   ;;  %v6081_v46 = vld [vmem:[%s6353_s24 + $0x98] sm:$0xff]   ;;  %v6083_v48 = vld [vmem:[%s6353_s24 + $0xa0] sm:$0xff]  }
  0x1d   : > { %v6080_v45 = vld [vmem:[%s6353_s24 + $0x490] sm:$0xff]   ;;  %v6082_v47 = vld [vmem:[%s6353_s24 + $0x498] sm:$0xff]   ;;  %v6084_v49 = vld [vmem:[%s6353_s24 + $0x4a0] sm:$0xff]  }
  0x1e   : > { %v6085_v50 = vld [vmem:[%s6353_s24 + $0xa8] sm:$0xff]   ;;  %v6087_v52 = vld [vmem:[%s6353_s24 + $0xb0] sm:$0xff]   ;;  %v6089_v54 = vld [vmem:[%s6353_s24 + $0xb8] sm:$0xff]  }
  0x1f   : > { %5496 = vmatpush3.bf16.msra.mxu0 %v6041_v8  ;;  %6025 = vmatpush3.bf16.msra.mxu1 %v6041_v8  ;;  %v6086_v51 = vld [vmem:[%s6353_s24 + $0x4a8] sm:$0xff]   ;;  %v6088_v53 = vld [vmem:[%s6353_s24 + $0x4b0] sm:$0xff]   ;;  %v6090_v55 = vld [vmem:[%s6353_s24 + $0x4b8] sm:$0xff]  }
  0x20   : > { %5497 = vmatprep.subr.bf16.mxu0 %v6042_v9  ;;  %6018 = vmatprep.subr.bf16.mxu1 %v6042_v9  ;;  %v6091_v56 = vld [vmem:[%s6353_s24 + $0xc0] sm:$0xff]   ;;  %v6093_v58 = vld [vmem:[%s6353_s24 + $0xc8] sm:$0xff]   ;;  %v6095_v60 = vld [vmem:[%s6353_s24 + $0xd0] sm:$0xff]  }
  0x21   : > { %v6092_v57 = vld [vmem:[%s6353_s24 + $0x4c0] sm:$0xff]   ;;  %v6094_v59 = vld [vmem:[%s6353_s24 + $0x4c8] sm:$0xff]   ;;  %v6096_v61 = vld [vmem:[%s6353_s24 + $0x4d0] sm:$0xff]  }
  0x22   : > { %v6097_v62 = vld [vmem:[%s6353_s24 + $0xd8] sm:$0xff]   ;;  %v6099_v0 = vld [vmem:[%s6353_s24 + $0xe0] sm:$0xff]   ;;  %v6101_v2 = vld [vmem:[%s6353_s24 + $0xe8] sm:$0xff]  }
  0x23   : > { %5498 = vmatpush3.bf16.msra.mxu0 %v6042_v9  ;;  %6026 = vmatpush3.bf16.msra.mxu1 %v6042_v9  ;;  %v6098_v63 = vld [vmem:[%s6353_s24 + $0x4d8] sm:$0xff]   ;;  %v6100_v1 = vld [vmem:[%s6353_s24 + $0x4e0] sm:$0xff]   ;;  %v6102_v3 = vld [vmem:[%s6353_s24 + $0x4e8] sm:$0xff]  }
  0x24   : > { %v6103_v4 = vld [vmem:[%s6353_s24 + $0xf0] sm:$0xff]   ;;  %v6105_v6 = vld [vmem:[%s6353_s24 + $0xf8] sm:$0xff]   ;;  %v6107_v8 = vld [vmem:[%s6353_s24 + $0x100] sm:$0xff]  }
  0x25   : > { %v6104_v5 = vld [vmem:[%s6353_s24 + $0x4f0] sm:$0xff]   ;;  %v6106_v7 = vld [vmem:[%s6353_s24 + $0x4f8] sm:$0xff]   ;;  %v6108_v9 = vld [vmem:[%s6353_s24 + $0x500] sm:$0xff]  }
  0x26   : > { %5500 = vmatmul.mubr.bf16.vlgmr.msra.gmra.mrb[0].mxu0 %v6045_v10  ;;  %5756 = vmatmul.mubr.bf16.vlgmr.msra.gmra.mrb[0].mxu1 %v6046_v11  ;;  %v6109_v10 = vld [vmem:[%s6353_s24 + $0x108] sm:$0xff]  }
  0x27   : > { %5503 = vmatprep.mubr.bf16.mxu0 %v6047_v12  ;;  %5759 = vmatprep.mubr.bf16.mxu1 %v6048_v13  ;;  %v6110_v11 = vld [vmem:[%s6353_s24 + $0x508] sm:$0xff]   ;;  %v6111_v12 = vld [vmem:[%s6353_s24 + $0x110] sm:$0xff]  }
  0x28   : > { %v6112_v13 = vld [vmem:[%s6353_s24 + $0x510] sm:$0xff]  }
  0x2e   : > { %5504 = vmatmul.mubr.bf16.gmra.mrb[4].mxu0 %v6049_v14  ;;  %5760 = vmatmul.mubr.bf16.gmra.mrb[4].mxu1 %v6050_v15  ;;  %v6113_v14 = vld [vmem:[%s6353_s24 + $0x118] sm:$0xff]  }
  0x2f   : > { %5507 = vmatprep.mubr.bf16.mxu0 %v6051_v16  ;;  %5763 = vmatprep.mubr.bf16.mxu1 %v6052_v17  ;;  %v6114_v15 = vld [vmem:[%s6353_s24 + $0x518] sm:$0xff]   ;;  %v6115_v16 = vld [vmem:[%s6353_s24 + $0x120] sm:$0xff]  }
  0x30   : > { %v6116_v17 = vld [vmem:[%s6353_s24 + $0x520] sm:$0xff]  }
  0x36   : > { %5508 = vmatmul.mubr.bf16.gmra.mrb[8].mxu0 %v6053_v18  ;;  %5764 = vmatmul.mubr.bf16.gmra.mrb[8].mxu1 %v6054_v19  ;;  %v6117_v18 = vld [vmem:[%s6353_s24 + $0x128] sm:$0xff]  }
  0x37   : > { %5511 = vmatprep.mubr.bf16.mxu0 %v6055_v20  ;;  %5767 = vmatprep.mubr.bf16.mxu1 %v6056_v21  ;;  %v6118_v19 = vld [vmem:[%s6353_s24 + $0x528] sm:$0xff]   ;;  %v6119_v20 = vld [vmem:[%s6353_s24 + $0x130] sm:$0xff]  }
  0x38   : > { %v6120_v21 = vld [vmem:[%s6353_s24 + $0x530] sm:$0xff]  }
  0x3e   : > { %5512 = vmatmul.mubr.bf16.gmra.mrb[12].mxu0 %v6057_v22  ;;  %5768 = vmatmul.mubr.bf16.gmra.mrb[12].mxu1 %v6058_v23  ;;  %v6121_v22 = vld [vmem:[%s6353_s24 + $0x138] sm:$0xff]  }
  0x3f   : > { %5515 = vmatprep.mubr.bf16.mxu0 %v6059_v24  ;;  %5771 = vmatprep.mubr.bf16.mxu1 %v6060_v25  ;;  %v6122_v23 = vld [vmem:[%s6353_s24 + $0x538] sm:$0xff]   ;;  %v6123_v24 = vld [vmem:[%s6353_s24 + $0x140] sm:$0xff]  }
  0x40   : > { %v6124_v25 = vld [vmem:[%s6353_s24 + $0x540] sm:$0xff]  }
  0x46   : > { %5516 = vmatmul.mubr.bf16.gmra.mrb[16].mxu0 %v6061_v26  ;;  %5772 = vmatmul.mubr.bf16.gmra.mrb[16].mxu1 %v6062_v27  ;;  %v6125_v26 = vld [vmem:[%s6353_s24 + $0x148] sm:$0xff]  }
  0x47   : > { %5519 = vmatprep.mubr.bf16.mxu0 %v6063_v28  ;;  %5775 = vmatprep.mubr.bf16.mxu1 %v6064_v29  ;;  %v6126_v27 = vld [vmem:[%s6353_s24 + $0x548] sm:$0xff]   ;;  %v6127_v28 = vld [vmem:[%s6353_s24 + $0x150] sm:$0xff]  }
  0x48   : > { %v6128_v29 = vld [vmem:[%s6353_s24 + $0x550] sm:$0xff]  }
  0x4e   : > { %5520 = vmatmul.mubr.bf16.gmra.mrb[20].mxu0 %v6065_v30  ;;  %5776 = vmatmul.mubr.bf16.gmra.mrb[20].mxu1 %v6066_v31  ;;  %v6129_v30 = vld [vmem:[%s6353_s24 + $0x158] sm:$0xff]  }
  0x4f   : > { %5523 = vmatprep.mubr.bf16.mxu0 %v6067_v32  ;;  %5779 = vmatprep.mubr.bf16.mxu1 %v6068_v33  ;;  %v6130_v31 = vld [vmem:[%s6353_s24 + $0x558] sm:$0xff]   ;;  %v6131_v32 = vld [vmem:[%s6353_s24 + $0x160] sm:$0xff]  }
  0x50   : > { %v6132_v33 = vld [vmem:[%s6353_s24 + $0x560] sm:$0xff]  }
  0x56   : > { %5524 = vmatmul.mubr.bf16.gmra.mrb[24].mxu0 %v6069_v34  ;;  %5780 = vmatmul.mubr.bf16.gmra.mrb[24].mxu1 %v6070_v35  ;;  %v6133_v34 = vld [vmem:[%s6353_s24 + $0x168] sm:$0xff]  }
  0x57   : > { %5527 = vmatprep.mubr.bf16.mxu0 %v6071_v36  ;;  %5783 = vmatprep.mubr.bf16.mxu1 %v6072_v37  ;;  %v6134_v35 = vld [vmem:[%s6353_s24 + $0x568] sm:$0xff]   ;;  %v6135_v36 = vld [vmem:[%s6353_s24 + $0x170] sm:$0xff]  }
  0x58   : > { %v6136_v37 = vld [vmem:[%s6353_s24 + $0x570] sm:$0xff]  }
  0x5e   : > { %5528 = vmatmul.mubr.bf16.gmra.mrb[28].mxu0 %v6073_v38  ;;  %5784 = vmatmul.mubr.bf16.gmra.mrb[28].mxu1 %v6074_v39  ;;  %v6137_v38 = vld [vmem:[%s6353_s24 + $0x178] sm:$0xff]  }
  0x5f   : > { %5531 = vmatprep.mubr.bf16.mxu0 %v6075_v40  ;;  %5787 = vmatprep.mubr.bf16.mxu1 %v6076_v41  ;;  %v6138_v39 = vld [vmem:[%s6353_s24 + $0x578] sm:$0xff]   ;;  %v6139_v40 = vld [vmem:[%s6353_s24 + $0x180] sm:$0xff]  }
  0x60   : > { %v6140_v41 = vld [vmem:[%s6353_s24 + $0x580] sm:$0xff]  }
  0x66   : > { %5532 = vmatmul.mubr.bf16.gmra.mrb[32].mxu0 %v6077_v42  ;;  %5788 = vmatmul.mubr.bf16.gmra.mrb[32].mxu1 %v6078_v43  ;;  %v6141_v42 = vld [vmem:[%s6353_s24 + $0x188] sm:$0xff]  }
  0x67   : > { %5535 = vmatprep.mubr.bf16.mxu0 %v6079_v44  ;;  %5791 = vmatprep.mubr.bf16.mxu1 %v6080_v45  ;;  %v6142_v43 = vld [vmem:[%s6353_s24 + $0x588] sm:$0xff]   ;;  %v6143_v44 = vld [vmem:[%s6353_s24 + $0x190] sm:$0xff]  }
  0x68   : > { %v6144_v45 = vld [vmem:[%s6353_s24 + $0x590] sm:$0xff]  }
  0x6e   : > { %5536 = vmatmul.mubr.bf16.gmra.mrb[36].mxu0 %v6081_v46  ;;  %5792 = vmatmul.mubr.bf16.gmra.mrb[36].mxu1 %v6082_v47  ;;  %v6145_v46 = vld [vmem:[%s6353_s24 + $0x198] sm:$0xff]  }
  0x6f   : > { %5539 = vmatprep.mubr.bf16.mxu0 %v6083_v48  ;;  %5795 = vmatprep.mubr.bf16.mxu1 %v6084_v49  ;;  %v6146_v47 = vld [vmem:[%s6353_s24 + $0x598] sm:$0xff]   ;;  %v6147_v48 = vld [vmem:[%s6353_s24 + $0x1a0] sm:$0xff]  }
  0x70   : > { %v6148_v49 = vld [vmem:[%s6353_s24 + $0x5a0] sm:$0xff]  }
  0x76   : > { %5540 = vmatmul.mubr.bf16.gmra.mrb[40].mxu0 %v6085_v50  ;;  %5796 = vmatmul.mubr.bf16.gmra.mrb[40].mxu1 %v6086_v51  ;;  %v6149_v50 = vld [vmem:[%s6353_s24 + $0x1a8] sm:$0xff]  }
  0x77   : > { %5543 = vmatprep.mubr.bf16.mxu0 %v6087_v52  ;;  %5799 = vmatprep.mubr.bf16.mxu1 %v6088_v53  ;;  %v6150_v51 = vld [vmem:[%s6353_s24 + $0x5a8] sm:$0xff]   ;;  %v6151_v52 = vld [vmem:[%s6353_s24 + $0x1b0] sm:$0xff]  }
  0x78   : > { %v6152_v53 = vld [vmem:[%s6353_s24 + $0x5b0] sm:$0xff]  }
  0x7e   : > { %5544 = vmatmul.mubr.bf16.gmra.mrb[44].mxu0 %v6089_v54  ;;  %5800 = vmatmul.mubr.bf16.gmra.mrb[44].mxu1 %v6090_v55  ;;  %v6484_v54 = vld [vmem:[%s7681_s2] ss:$0 sm:$0xff] }
  0x7f   : > { %5547 = vmatprep.mubr.bf16.mxu0 %v6091_v56  ;;  %5803 = vmatprep.mubr.bf16.mxu1 %v6092_v57 }
  0x86   : > { %5548 = vmatmul.mubr.bf16.gmra.mrb[48].mxu0 %v6093_v58  ;;  %5804 = vmatmul.mubr.bf16.gmra.mrb[48].mxu1 %v6094_v59 }
  0x87   : > { %5551 = vmatprep.mubr.bf16.mxu0 %v6095_v60  ;;  %5807 = vmatprep.mubr.bf16.mxu1 %v6096_v61  ;;  %v6153_v61 = vld [vmem:[%s6353_s24 + $0x1b8] sm:$0xff]  }
  0x8e   : > { %5552 = vmatmul.mubr.bf16.gmra.mrb[52].mxu0 %v6097_v62  ;;  %5808 = vmatmul.mubr.bf16.gmra.mrb[52].mxu1 %v6098_v63  ;;  %v6154_v62 = vld [vmem:[%s6353_s24 + $0x5b8] sm:$0xff]  }
  0x8f   : > { %5555 = vmatprep.mubr.bf16.mxu0 %v6099_v0  ;;  %5811 = vmatprep.mubr.bf16.mxu1 %v6100_v1 }
  0x96   : > { %5556 = vmatmul.mubr.bf16.gmra.mrb[56].mxu0 %v6101_v2  ;;  %5812 = vmatmul.mubr.bf16.gmra.mrb[56].mxu1 %v6102_v3  ;;  %v6155_v3 = vld [vmem:[%s6353_s24 + $0x1c0] sm:$0xff]  }
  0x97   : > { %5559 = vmatprep.mubr.bf16.mxu0 %v6103_v4  ;;  %5815 = vmatprep.mubr.bf16.mxu1 %v6104_v5  ;;  %v6156_v4 = vld [vmem:[%s6353_s24 + $0x5c0] sm:$0xff]  }
  0x9e   : > { %5560 = vmatmul.mubr.bf16.gmra.mrb[60].mxu0 %v6105_v6  ;;  %5816 = vmatmul.mubr.bf16.gmra.mrb[60].mxu1 %v6106_v7 }
  0x9f   : > { %5563 = vmatprep.mubr.bf16.mxu0 %v6107_v8  ;;  %5819 = vmatprep.mubr.bf16.mxu1 %v6108_v9 }
  0xa6   : > { %5564 = vmatmul.mubr.bf16.gmra.mrb[64].mxu0 %v6109_v10  ;;  %5820 = vmatmul.mubr.bf16.gmra.mrb[64].mxu1 %v6110_v11 }
  0xa7   : > { %5567 = vmatprep.mubr.bf16.mxu0 %v6111_v12  ;;  %5823 = vmatprep.mubr.bf16.mxu1 %v6112_v13 }
  0xae   : > { %5568 = vmatmul.mubr.bf16.gmra.mrb[68].mxu0 %v6113_v14  ;;  %5824 = vmatmul.mubr.bf16.gmra.mrb[68].mxu1 %v6114_v15 }
  0xaf   : > { %5571 = vmatprep.mubr.bf16.mxu0 %v6115_v16  ;;  %5827 = vmatprep.mubr.bf16.mxu1 %v6116_v17  ;;  %v6157_v17 = vld [vmem:[%s6353_s24 + $0x1c8] sm:$0xff]  }
  0xb6   : > { %5572 = vmatmul.mubr.bf16.gmra.mrb[72].mxu0 %v6117_v18  ;;  %5828 = vmatmul.mubr.bf16.gmra.mrb[72].mxu1 %v6118_v19  ;;  %v6158_v18 = vld [vmem:[%s6353_s24 + $0x5c8] sm:$0xff]  }
  0xb7   : > { %5575 = vmatprep.mubr.bf16.mxu0 %v6119_v20  ;;  %5831 = vmatprep.mubr.bf16.mxu1 %v6120_v21 }
  0xbe   : > { %5576 = vmatmul.mubr.bf16.gmra.mrb[76].mxu0 %v6121_v22  ;;  %5832 = vmatmul.mubr.bf16.gmra.mrb[76].mxu1 %v6122_v23  ;;  %v6159_v23 = vld [vmem:[%s6353_s24 + $0x1d0] sm:$0xff]  }
  0xbf   : > { %5579 = vmatprep.mubr.bf16.mxu0 %v6123_v24  ;;  %5835 = vmatprep.mubr.bf16.mxu1 %v6124_v25  ;;  %v6160_v24 = vld [vmem:[%s6353_s24 + $0x5d0] sm:$0xff]  }
  0xc6   : > { %5580 = vmatmul.mubr.bf16.gmra.mrb[80].mxu0 %v6125_v26  ;;  %5836 = vmatmul.mubr.bf16.gmra.mrb[80].mxu1 %v6126_v27 }
  0xc7   : > { %5583 = vmatprep.mubr.bf16.mxu0 %v6127_v28  ;;  %5839 = vmatprep.mubr.bf16.mxu1 %v6128_v29 }
  0xce   : > { %5584 = vmatmul.mubr.bf16.gmra.mrb[84].mxu0 %v6129_v30  ;;  %5840 = vmatmul.mubr.bf16.gmra.mrb[84].mxu1 %v6130_v31 }
  0xcf   : > { %5587 = vmatprep.mubr.bf16.mxu0 %v6131_v32  ;;  %5843 = vmatprep.mubr.bf16.mxu1 %v6132_v33 }
  0xd6   : > { %5588 = vmatmul.mubr.bf16.gmra.mrb[88].mxu0 %v6133_v34  ;;  %5844 = vmatmul.mubr.bf16.gmra.mrb[88].mxu1 %v6134_v35 }
  0xd7   : > { %5591 = vmatprep.mubr.bf16.mxu0 %v6135_v36  ;;  %5847 = vmatprep.mubr.bf16.mxu1 %v6136_v37  ;;  %v6161_v37 = vld [vmem:[%s6353_s24 + $0x1d8] sm:$0xff]  }
  0xde   : > { %5592 = vmatmul.mubr.bf16.gmra.mrb[92].mxu0 %v6137_v38  ;;  %5848 = vmatmul.mubr.bf16.gmra.mrb[92].mxu1 %v6138_v39  ;;  %v6162_v38 = vld [vmem:[%s6353_s24 + $0x5d8] sm:$0xff]  }
  0xdf   : > { %5595 = vmatprep.mubr.bf16.mxu0 %v6139_v40  ;;  %5851 = vmatprep.mubr.bf16.mxu1 %v6140_v41 }
  0xe6   : > { %5596 = vmatmul.mubr.bf16.gmra.mrb[96].mxu0 %v6141_v42  ;;  %5852 = vmatmul.mubr.bf16.gmra.mrb[96].mxu1 %v6142_v43  ;;  %v6163_v43 = vld [vmem:[%s6353_s24 + $0x1e0] sm:$0xff]  }
  0xe7   : > { %5599 = vmatprep.mubr.bf16.mxu0 %v6143_v44  ;;  %5855 = vmatprep.mubr.bf16.mxu1 %v6144_v45  ;;  %v6164_v44 = vld [vmem:[%s6353_s24 + $0x5e0] sm:$0xff]  }
  0xee   : > { %5600 = vmatmul.mubr.bf16.gmra.mrb[100].mxu0 %v6145_v46  ;;  %5856 = vmatmul.mubr.bf16.gmra.mrb[100].mxu1 %v6146_v47 }
  0xef   : > { %5603 = vmatprep.mubr.bf16.mxu0 %v6147_v48  ;;  %5859 = vmatprep.mubr.bf16.mxu1 %v6148_v49 }
  0xf6   : > { %5604 = vmatmul.mubr.bf16.gmra.mrb[104].mxu0 %v6149_v50  ;;  %5860 = vmatmul.mubr.bf16.gmra.mrb[104].mxu1 %v6150_v51 }
  0xf7   : > { %5607 = vmatprep.mubr.bf16.mxu0 %v6151_v52  ;;  %5863 = vmatprep.mubr.bf16.mxu1 %v6152_v53 }
  0xf9   : > { %v5501_v55 = vpop.f32.mrb[0].mxu0  ;;  %v5757_v56 = vpop.f32.mrb[0].mxu1 }
  0xfa   : > { %v2337_v57 = vadd.f32 %v5501_v55, %v6484_v54  ;;  %v3361_v58 = vadd.f32 %v5757_v56, %v6484_v54  ;;  %v2328_v59 = vpop.f32.mrb[1].mxu0  ;;  %v3352_v60 = vpop.f32.mrb[1].mxu1 }
  0xfb   : > { %v2329_v63 = vadd.f32 %v6484_v54, %v2328_v59  ;;  %v3353_v0 = vadd.f32 %v6484_v54, %v3352_v60  ;;  %v5502_v1 = vpop.f32.mrb[2].mxu0  ;;  %v5758_v2 = vpop.f32.mrb[2].mxu1  ;;  %v6166_v59 = vld [vmem:[%s6353_s24 + $0x5e8] sm:$0xff]  }
  0xfc   : > { %4377 = vst [vmem:[%s6489_s14 + $0x10] sm:$0xff] %v2337_v57  ;;  %4633 = vst [vmem:[%s6489_s14 + $0x810] sm:$0xff] %v3361_v58  ;;  %v2340_v5 = vadd.f32 %v5502_v1, %v6484_v54  ;;  %v3364_v6 = vadd.f32 %v5758_v2, %v6484_v54  ;;  %v2331_v7 = vpop.f32.mrb[3].mxu0  ;;  %v3355_v8 = vpop.f32.mrb[3].mxu1  ;;  %v6165_v58 = vld [vmem:[%s6353_s24 + $0x1e8] sm:$0xff]   ;;  %v6168_v1 = vld [vmem:[%s6353_s24 + $0x5f0] sm:$0xff]  }
  0xfd   : > { %4375 = vst [vmem:[%s6489_s14] sm:$0xff] %v2329_v63  ;;  %4631 = vst [vmem:[%s6489_s14 + $0x800] sm:$0xff] %v3353_v0  ;;  %v2332_v9 = vadd.f32 %v6484_v54, %v2331_v7  ;;  %v3356_v10 = vadd.f32 %v6484_v54, %v3355_v8  ;;  %v6167_v0 = vld [vmem:[%s6353_s24 + $0x1f0] sm:$0xff]  }
  0xfe   : > { %4378 = vst [vmem:[%s6489_s14 + $0x18] sm:$0xff] %v2340_v5  ;;  %4634 = vst [vmem:[%s6489_s14 + $0x818] sm:$0xff] %v3364_v6  ;;  %5608 = vmatmul.mubr.bf16.gmra.mrb[108].mxu0 %v6153_v61  ;;  %5864 = vmatmul.mubr.bf16.gmra.mrb[108].mxu1 %v6154_v62 }
  0xff   : > { %4376 = vst [vmem:[%s6489_s14 + $0x8] sm:$0xff] %v2332_v9  ;;  %4632 = vst [vmem:[%s6489_s14 + $0x808] sm:$0xff] %v3356_v10  ;;  %5611 = vmatprep.mubr.bf16.mxu0 %v6155_v3  ;;  %5867 = vmatprep.mubr.bf16.mxu1 %v6156_v4 }
 0x101   : > { %v5505_v11 = vpop.f32.mrb[4].mxu0  ;;  %v5761_v12 = vpop.f32.mrb[4].mxu1 }
 0x102   : > { %v2353_v13 = vadd.f32 %v5505_v11, %v6484_v54  ;;  %v3377_v14 = vadd.f32 %v5761_v12, %v6484_v54  ;;  %v2344_v15 = vpop.f32.mrb[5].mxu0  ;;  %v3368_v16 = vpop.f32.mrb[5].mxu1 }
 0x103   : > { %v2345_v19 = vadd.f32 %v6484_v54, %v2344_v15  ;;  %v3369_v20 = vadd.f32 %v6484_v54, %v3368_v16  ;;  %v5506_v21 = vpop.f32.mrb[6].mxu0  ;;  %v5762_v22 = vpop.f32.mrb[6].mxu1  ;;  %v6170_v15 = vld [vmem:[%s6353_s24 + $0x5f8] sm:$0xff]  }
 0x104   : > { %4381 = vst [vmem:[%s6489_s14 + $0x30] sm:$0xff] %v2353_v13  ;;  %4637 = vst [vmem:[%s6489_s14 + $0x830] sm:$0xff] %v3377_v14  ;;  %v2356_v25 = vadd.f32 %v5506_v21, %v6484_v54  ;;  %v3380_v26 = vadd.f32 %v5762_v22, %v6484_v54  ;;  %v2347_v27 = vpop.f32.mrb[7].mxu0  ;;  %v3371_v28 = vpop.f32.mrb[7].mxu1  ;;  %v6169_v14 = vld [vmem:[%s6353_s24 + $0x1f8] sm:$0xff]   ;;  %v6172_v21 = vld [vmem:[%s6353_s24 + $0x600] sm:$0xff]  }
 0x105   : > { %4379 = vst [vmem:[%s6489_s14 + $0x20] sm:$0xff] %v2345_v19  ;;  %4635 = vst [vmem:[%s6489_s14 + $0x820] sm:$0xff] %v3369_v20  ;;  %v2348_v29 = vadd.f32 %v6484_v54, %v2347_v27  ;;  %v3372_v30 = vadd.f32 %v6484_v54, %v3371_v28  ;;  %v6171_v20 = vld [vmem:[%s6353_s24 + $0x200] sm:$0xff]  }
 0x106   : > { %4382 = vst [vmem:[%s6489_s14 + $0x38] sm:$0xff] %v2356_v25  ;;  %4638 = vst [vmem:[%s6489_s14 + $0x838] sm:$0xff] %v3380_v26  ;;  %5612 = vmatmul.mubr.bf16.gmra.mrb[112].mxu0 %v6157_v17  ;;  %5868 = vmatmul.mubr.bf16.gmra.mrb[112].mxu1 %v6158_v18 }
 0x107   : > { %4380 = vst [vmem:[%s6489_s14 + $0x28] sm:$0xff] %v2348_v29  ;;  %4636 = vst [vmem:[%s6489_s14 + $0x828] sm:$0xff] %v3372_v30  ;;  %5615 = vmatprep.mubr.bf16.mxu0 %v6159_v23  ;;  %5871 = vmatprep.mubr.bf16.mxu1 %v6160_v24 }
 0x109   : > { %v5509_v31 = vpop.f32.mrb[8].mxu0  ;;  %v5765_v32 = vpop.f32.mrb[8].mxu1 }
 0x10a   : > { %v2369_v33 = vadd.f32 %v5509_v31, %v6484_v54  ;;  %v3393_v34 = vadd.f32 %v5765_v32, %v6484_v54  ;;  %v2360_v35 = vpop.f32.mrb[9].mxu0  ;;  %v3384_v36 = vpop.f32.mrb[9].mxu1 }
 0x10b   : > { %v2361_v39 = vadd.f32 %v6484_v54, %v2360_v35  ;;  %v3385_v40 = vadd.f32 %v6484_v54, %v3384_v36  ;;  %v5510_v41 = vpop.f32.mrb[10].mxu0  ;;  %v5766_v42 = vpop.f32.mrb[10].mxu1  ;;  %v6174_v35 = vld [vmem:[%s6353_s24 + $0x608] sm:$0xff]  }
 0x10c   : > { %4385 = vst [vmem:[%s6489_s14 + $0x50] sm:$0xff] %v2369_v33  ;;  %4641 = vst [vmem:[%s6489_s14 + $0x850] sm:$0xff] %v3393_v34  ;;  %v2372_v45 = vadd.f32 %v5510_v41, %v6484_v54  ;;  %v3396_v46 = vadd.f32 %v5766_v42, %v6484_v54  ;;  %v2363_v47 = vpop.f32.mrb[11].mxu0  ;;  %v3387_v48 = vpop.f32.mrb[11].mxu1  ;;  %v6173_v34 = vld [vmem:[%s6353_s24 + $0x208] sm:$0xff]   ;;  %v6176_v41 = vld [vmem:[%s6353_s24 + $0x610] sm:$0xff]  }
 0x10d   : > { %4383 = vst [vmem:[%s6489_s14 + $0x40] sm:$0xff] %v2361_v39  ;;  %4639 = vst [vmem:[%s6489_s14 + $0x840] sm:$0xff] %v3385_v40  ;;  %v2364_v49 = vadd.f32 %v6484_v54, %v2363_v47  ;;  %v3388_v50 = vadd.f32 %v6484_v54, %v3387_v48  ;;  %v6175_v40 = vld [vmem:[%s6353_s24 + $0x210] sm:$0xff]  }
 0x10e   : > { %4386 = vst [vmem:[%s6489_s14 + $0x58] sm:$0xff] %v2372_v45  ;;  %4642 = vst [vmem:[%s6489_s14 + $0x858] sm:$0xff] %v3396_v46  ;;  %5616 = vmatmul.mubr.bf16.gmra.mrb[116].mxu0 %v6161_v37  ;;  %5872 = vmatmul.mubr.bf16.gmra.mrb[116].mxu1 %v6162_v38 }
 0x10f   : > { %4384 = vst [vmem:[%s6489_s14 + $0x48] sm:$0xff] %v2364_v49  ;;  %4640 = vst [vmem:[%s6489_s14 + $0x848] sm:$0xff] %v3388_v50  ;;  %5619 = vmatprep.mubr.bf16.mxu0 %v6163_v43  ;;  %5875 = vmatprep.mubr.bf16.mxu1 %v6164_v44 }
 0x111   : > { %v5513_v51 = vpop.f32.mrb[12].mxu0  ;;  %v5769_v52 = vpop.f32.mrb[12].mxu1 }
 0x112   : > { %v2385_v53 = vadd.f32 %v5513_v51, %v6484_v54  ;;  %v3409_v55 = vadd.f32 %v5769_v52, %v6484_v54  ;;  %v2376_v56 = vpop.f32.mrb[13].mxu0  ;;  %v3400_v57 = vpop.f32.mrb[13].mxu1 }
 0x113   : > { %v2377_v60 = vadd.f32 %v6484_v54, %v2376_v56  ;;  %v3401_v61 = vadd.f32 %v6484_v54, %v3400_v57  ;;  %v5514_v62 = vpop.f32.mrb[14].mxu0  ;;  %v5770_v63 = vpop.f32.mrb[14].mxu1  ;;  %v6178_v56 = vld [vmem:[%s6353_s24 + $0x618] sm:$0xff]  }
 0x114   : > { %4389 = vst [vmem:[%s6489_s14 + $0x70] sm:$0xff] %v2385_v53  ;;  %4645 = vst [vmem:[%s6489_s14 + $0x870] sm:$0xff] %v3409_v55  ;;  %v2388_v2 = vadd.f32 %v5514_v62, %v6484_v54  ;;  %v3412_v3 = vadd.f32 %v5770_v63, %v6484_v54  ;;  %v2379_v4 = vpop.f32.mrb[15].mxu0  ;;  %v3403_v5 = vpop.f32.mrb[15].mxu1  ;;  %v6177_v55 = vld [vmem:[%s6353_s24 + $0x218] sm:$0xff]   ;;  %v6180_v62 = vld [vmem:[%s6353_s24 + $0x620] sm:$0xff]  }
 0x115   : > { %4387 = vst [vmem:[%s6489_s14 + $0x60] sm:$0xff] %v2377_v60  ;;  %4643 = vst [vmem:[%s6489_s14 + $0x860] sm:$0xff] %v3401_v61  ;;  %v2380_v6 = vadd.f32 %v6484_v54, %v2379_v4  ;;  %v3404_v7 = vadd.f32 %v6484_v54, %v3403_v5  ;;  %v6179_v61 = vld [vmem:[%s6353_s24 + $0x220] sm:$0xff]  }
 0x116   : > { %4390 = vst [vmem:[%s6489_s14 + $0x78] sm:$0xff] %v2388_v2  ;;  %4646 = vst [vmem:[%s6489_s14 + $0x878] sm:$0xff] %v3412_v3  ;;  %5620 = vmatmul.mubr.bf16.gmra.mrb[120].mxu0 %v6165_v58  ;;  %5876 = vmatmul.mubr.bf16.gmra.mrb[120].mxu1 %v6166_v59 }
 0x117   : > { %4388 = vst [vmem:[%s6489_s14 + $0x68] sm:$0xff] %v2380_v6  ;;  %4644 = vst [vmem:[%s6489_s14 + $0x868] sm:$0xff] %v3404_v7  ;;  %5623 = vmatprep.mubr.bf16.mxu0 %v6167_v0  ;;  %5879 = vmatprep.mubr.bf16.mxu1 %v6168_v1 }
 0x119   : > { %v5517_v8 = vpop.f32.mrb[16].mxu0  ;;  %v5773_v9 = vpop.f32.mrb[16].mxu1 }
 0x11a   : > { %v2401_v10 = vadd.f32 %v5517_v8, %v6484_v54  ;;  %v3425_v11 = vadd.f32 %v5773_v9, %v6484_v54  ;;  %v2392_v12 = vpop.f32.mrb[17].mxu0  ;;  %v3416_v13 = vpop.f32.mrb[17].mxu1 }
 0x11b   : > { %v2393_v16 = vadd.f32 %v6484_v54, %v2392_v12  ;;  %v3417_v17 = vadd.f32 %v6484_v54, %v3416_v13  ;;  %v5518_v18 = vpop.f32.mrb[18].mxu0  ;;  %v5774_v19 = vpop.f32.mrb[18].mxu1  ;;  %v6182_v12 = vld [vmem:[%s6353_s24 + $0x628] sm:$0xff]  }
 0x11c   : > { %4393 = vst [vmem:[%s6489_s14 + $0x90] sm:$0xff] %v2401_v10  ;;  %4649 = vst [vmem:[%s6489_s14 + $0x890] sm:$0xff] %v3425_v11  ;;  %v2404_v22 = vadd.f32 %v5518_v18, %v6484_v54  ;;  %v3428_v23 = vadd.f32 %v5774_v19, %v6484_v54  ;;  %v2395_v24 = vpop.f32.mrb[19].mxu0  ;;  %v3419_v25 = vpop.f32.mrb[19].mxu1  ;;  %v6181_v11 = vld [vmem:[%s6353_s24 + $0x228] sm:$0xff]   ;;  %v6184_v18 = vld [vmem:[%s6353_s24 + $0x630] sm:$0xff]  }
 0x11d   : > { %4391 = vst [vmem:[%s6489_s14 + $0x80] sm:$0xff] %v2393_v16  ;;  %4647 = vst [vmem:[%s6489_s14 + $0x880] sm:$0xff] %v3417_v17  ;;  %v2396_v26 = vadd.f32 %v6484_v54, %v2395_v24  ;;  %v3420_v27 = vadd.f32 %v6484_v54, %v3419_v25  ;;  %v6183_v17 = vld [vmem:[%s6353_s24 + $0x230] sm:$0xff]  }
 0x11e   : > { %4394 = vst [vmem:[%s6489_s14 + $0x98] sm:$0xff] %v2404_v22  ;;  %4650 = vst [vmem:[%s6489_s14 + $0x898] sm:$0xff] %v3428_v23  ;;  %5624 = vmatmul.mubr.bf16.gmra.mrb[124].mxu0 %v6169_v14  ;;  %5880 = vmatmul.mubr.bf16.gmra.mrb[124].mxu1 %v6170_v15 }
 0x11f   : > { %4392 = vst [vmem:[%s6489_s14 + $0x88] sm:$0xff] %v2396_v26  ;;  %4648 = vst [vmem:[%s6489_s14 + $0x888] sm:$0xff] %v3420_v27  ;;  %5627 = vmatprep.mubr.bf16.mxu0 %v6171_v20  ;;  %5883 = vmatprep.mubr.bf16.mxu1 %v6172_v21 }
 0x121   : > { %v5521_v28 = vpop.f32.mrb[20].mxu0  ;;  %v5777_v29 = vpop.f32.mrb[20].mxu1 }
 0x122   : > { %v2417_v30 = vadd.f32 %v5521_v28, %v6484_v54  ;;  %v3441_v31 = vadd.f32 %v5777_v29, %v6484_v54  ;;  %v2408_v32 = vpop.f32.mrb[21].mxu0  ;;  %v3432_v33 = vpop.f32.mrb[21].mxu1 }
 0x123   : > { %v2409_v36 = vadd.f32 %v6484_v54, %v2408_v32  ;;  %v3433_v37 = vadd.f32 %v6484_v54, %v3432_v33  ;;  %v5522_v38 = vpop.f32.mrb[22].mxu0  ;;  %v5778_v39 = vpop.f32.mrb[22].mxu1  ;;  %v6186_v32 = vld [vmem:[%s6353_s24 + $0x638] sm:$0xff]  }
 0x124   : > { %4397 = vst [vmem:[%s6489_s14 + $0xb0] sm:$0xff] %v2417_v30  ;;  %4653 = vst [vmem:[%s6489_s14 + $0x8b0] sm:$0xff] %v3441_v31  ;;  %v2420_v42 = vadd.f32 %v5522_v38, %v6484_v54  ;;  %v3444_v43 = vadd.f32 %v5778_v39, %v6484_v54  ;;  %v2411_v44 = vpop.f32.mrb[23].mxu0  ;;  %v3435_v45 = vpop.f32.mrb[23].mxu1  ;;  %v6185_v31 = vld [vmem:[%s6353_s24 + $0x238] sm:$0xff]   ;;  %v6188_v38 = vld [vmem:[%s6353_s24 + $0x640] sm:$0xff]  }
 0x125   : > { %4395 = vst [vmem:[%s6489_s14 + $0xa0] sm:$0xff] %v2409_v36  ;;  %4651 = vst [vmem:[%s6489_s14 + $0x8a0] sm:$0xff] %v3433_v37  ;;  %v2412_v46 = vadd.f32 %v6484_v54, %v2411_v44  ;;  %v3436_v47 = vadd.f32 %v6484_v54, %v3435_v45  ;;  %v6187_v37 = vld [vmem:[%s6353_s24 + $0x240] sm:$0xff]  }
 0x126   : > { %4398 = vst [vmem:[%s6489_s14 + $0xb8] sm:$0xff] %v2420_v42  ;;  %4654 = vst [vmem:[%s6489_s14 + $0x8b8] sm:$0xff] %v3444_v43  ;;  %5628 = vmatmul.mubr.bf16.gmra.mrb[128].mxu0 %v6173_v34  ;;  %5884 = vmatmul.mubr.bf16.gmra.mrb[128].mxu1 %v6174_v35 }
 0x127   : > { %4396 = vst [vmem:[%s6489_s14 + $0xa8] sm:$0xff] %v2412_v46  ;;  %4652 = vst [vmem:[%s6489_s14 + $0x8a8] sm:$0xff] %v3436_v47  ;;  %5631 = vmatprep.mubr.bf16.mxu0 %v6175_v40  ;;  %5887 = vmatprep.mubr.bf16.mxu1 %v6176_v41 }
 0x129   : > { %v5525_v48 = vpop.f32.mrb[24].mxu0  ;;  %v5781_v49 = vpop.f32.mrb[24].mxu1 }
 0x12a   : > { %v2433_v50 = vadd.f32 %v5525_v48, %v6484_v54  ;;  %v3457_v51 = vadd.f32 %v5781_v49, %v6484_v54  ;;  %v2424_v52 = vpop.f32.mrb[25].mxu0  ;;  %v3448_v53 = vpop.f32.mrb[25].mxu1 }
 0x12b   : > { %v2425_v57 = vadd.f32 %v6484_v54, %v2424_v52  ;;  %v3449_v58 = vadd.f32 %v6484_v54, %v3448_v53  ;;  %v5526_v59 = vpop.f32.mrb[26].mxu0  ;;  %v5782_v60 = vpop.f32.mrb[26].mxu1  ;;  %v6190_v52 = vld [vmem:[%s6353_s24 + $0x648] sm:$0xff]  }
 0x12c   : > { %4401 = vst [vmem:[%s6489_s14 + $0xd0] sm:$0xff] %v2433_v50  ;;  %4657 = vst [vmem:[%s6489_s14 + $0x8d0] sm:$0xff] %v3457_v51  ;;  %v2436_v63 = vadd.f32 %v5526_v59, %v6484_v54  ;;  %v3460_v0 = vadd.f32 %v5782_v60, %v6484_v54  ;;  %v2427_v1 = vpop.f32.mrb[27].mxu0  ;;  %v3451_v2 = vpop.f32.mrb[27].mxu1  ;;  %v6189_v51 = vld [vmem:[%s6353_s24 + $0x248] sm:$0xff]   ;;  %v6192_v59 = vld [vmem:[%s6353_s24 + $0x650] sm:$0xff]  }
 0x12d   : > { %4399 = vst [vmem:[%s6489_s14 + $0xc0] sm:$0xff] %v2425_v57  ;;  %4655 = vst [vmem:[%s6489_s14 + $0x8c0] sm:$0xff] %v3449_v58  ;;  %v2428_v3 = vadd.f32 %v6484_v54, %v2427_v1  ;;  %v3452_v4 = vadd.f32 %v6484_v54, %v3451_v2  ;;  %v6191_v58 = vld [vmem:[%s6353_s24 + $0x250] sm:$0xff]  }
 0x12e   : > { %4402 = vst [vmem:[%s6489_s14 + $0xd8] sm:$0xff] %v2436_v63  ;;  %4658 = vst [vmem:[%s6489_s14 + $0x8d8] sm:$0xff] %v3460_v0  ;;  %5632 = vmatmul.mubr.bf16.gmra.mrb[132].mxu0 %v6177_v55  ;;  %5888 = vmatmul.mubr.bf16.gmra.mrb[132].mxu1 %v6178_v56 }
 0x12f   : > { %4400 = vst [vmem:[%s6489_s14 + $0xc8] sm:$0xff] %v2428_v3  ;;  %4656 = vst [vmem:[%s6489_s14 + $0x8c8] sm:$0xff] %v3452_v4  ;;  %5635 = vmatprep.mubr.bf16.mxu0 %v6179_v61  ;;  %5891 = vmatprep.mubr.bf16.mxu1 %v6180_v62 }
 0x131   : > { %v5529_v5 = vpop.f32.mrb[28].mxu0  ;;  %v5785_v6 = vpop.f32.mrb[28].mxu1 }
 0x132   : > { %v2449_v7 = vadd.f32 %v5529_v5, %v6484_v54  ;;  %v3473_v8 = vadd.f32 %v5785_v6, %v6484_v54  ;;  %v2440_v9 = vpop.f32.mrb[29].mxu0  ;;  %v3464_v10 = vpop.f32.mrb[29].mxu1 }
 0x133   : > { %v2441_v13 = vadd.f32 %v6484_v54, %v2440_v9  ;;  %v3465_v14 = vadd.f32 %v6484_v54, %v3464_v10  ;;  %v5530_v15 = vpop.f32.mrb[30].mxu0  ;;  %v5786_v16 = vpop.f32.mrb[30].mxu1  ;;  %v6194_v9 = vld [vmem:[%s6353_s24 + $0x658] sm:$0xff]  }
 0x134   : > { %4405 = vst [vmem:[%s6489_s14 + $0xf0] sm:$0xff] %v2449_v7  ;;  %4661 = vst [vmem:[%s6489_s14 + $0x8f0] sm:$0xff] %v3473_v8  ;;  %v2452_v19 = vadd.f32 %v5530_v15, %v6484_v54  ;;  %v3476_v20 = vadd.f32 %v5786_v16, %v6484_v54  ;;  %v2443_v21 = vpop.f32.mrb[31].mxu0  ;;  %v3467_v22 = vpop.f32.mrb[31].mxu1  ;;  %v6193_v8 = vld [vmem:[%s6353_s24 + $0x258] sm:$0xff]   ;;  %v6196_v15 = vld [vmem:[%s6353_s24 + $0x660] sm:$0xff]  }
 0x135   : > { %4403 = vst [vmem:[%s6489_s14 + $0xe0] sm:$0xff] %v2441_v13  ;;  %4659 = vst [vmem:[%s6489_s14 + $0x8e0] sm:$0xff] %v3465_v14  ;;  %v2444_v23 = vadd.f32 %v6484_v54, %v2443_v21  ;;  %v3468_v24 = vadd.f32 %v6484_v54, %v3467_v22  ;;  %v6195_v14 = vld [vmem:[%s6353_s24 + $0x260] sm:$0xff]  }
 0x136   : > { %4406 = vst [vmem:[%s6489_s14 + $0xf8] sm:$0xff] %v2452_v19  ;;  %4662 = vst [vmem:[%s6489_s14 + $0x8f8] sm:$0xff] %v3476_v20  ;;  %5636 = vmatmul.mubr.bf16.gmra.mrb[136].mxu0 %v6181_v11  ;;  %5892 = vmatmul.mubr.bf16.gmra.mrb[136].mxu1 %v6182_v12 }
 0x137   : > { %4404 = vst [vmem:[%s6489_s14 + $0xe8] sm:$0xff] %v2444_v23  ;;  %4660 = vst [vmem:[%s6489_s14 + $0x8e8] sm:$0xff] %v3468_v24  ;;  %5639 = vmatprep.mubr.bf16.mxu0 %v6183_v17  ;;  %5895 = vmatprep.mubr.bf16.mxu1 %v6184_v18 }
 0x139   : > { %v5533_v25 = vpop.f32.mrb[32].mxu0  ;;  %v5789_v26 = vpop.f32.mrb[32].mxu1 }
 0x13a   : > { %v2465_v27 = vadd.f32 %v5533_v25, %v6484_v54  ;;  %v3489_v28 = vadd.f32 %v5789_v26, %v6484_v54  ;;  %v2456_v29 = vpop.f32.mrb[33].mxu0  ;;  %v3480_v30 = vpop.f32.mrb[33].mxu1 }
 0x13b   : > { %v2457_v33 = vadd.f32 %v6484_v54, %v2456_v29  ;;  %v3481_v34 = vadd.f32 %v6484_v54, %v3480_v30  ;;  %v5534_v35 = vpop.f32.mrb[34].mxu0  ;;  %v5790_v36 = vpop.f32.mrb[34].mxu1  ;;  %v6198_v29 = vld [vmem:[%s6353_s24 + $0x668] sm:$0xff]  }
 0x13c   : > { %4409 = vst [vmem:[%s6489_s14 + $0x110] sm:$0xff] %v2465_v27  ;;  %4665 = vst [vmem:[%s6489_s14 + $0x910] sm:$0xff] %v3489_v28  ;;  %v2468_v39 = vadd.f32 %v5534_v35, %v6484_v54  ;;  %v3492_v40 = vadd.f32 %v5790_v36, %v6484_v54  ;;  %v2459_v41 = vpop.f32.mrb[35].mxu0  ;;  %v3483_v42 = vpop.f32.mrb[35].mxu1  ;;  %v6197_v28 = vld [vmem:[%s6353_s24 + $0x268] sm:$0xff]   ;;  %v6200_v35 = vld [vmem:[%s6353_s24 + $0x670] sm:$0xff]  }
 0x13d   : > { %4407 = vst [vmem:[%s6489_s14 + $0x100] sm:$0xff] %v2457_v33  ;;  %4663 = vst [vmem:[%s6489_s14 + $0x900] sm:$0xff] %v3481_v34  ;;  %v2460_v43 = vadd.f32 %v6484_v54, %v2459_v41  ;;  %v3484_v44 = vadd.f32 %v6484_v54, %v3483_v42  ;;  %v6199_v34 = vld [vmem:[%s6353_s24 + $0x270] sm:$0xff]  }
 0x13e   : > { %4410 = vst [vmem:[%s6489_s14 + $0x118] sm:$0xff] %v2468_v39  ;;  %4666 = vst [vmem:[%s6489_s14 + $0x918] sm:$0xff] %v3492_v40  ;;  %5640 = vmatmul.mubr.bf16.gmra.mrb[140].mxu0 %v6185_v31  ;;  %5896 = vmatmul.mubr.bf16.gmra.mrb[140].mxu1 %v6186_v32 }
 0x13f   : > { %4408 = vst [vmem:[%s6489_s14 + $0x108] sm:$0xff] %v2460_v43  ;;  %4664 = vst [vmem:[%s6489_s14 + $0x908] sm:$0xff] %v3484_v44  ;;  %5643 = vmatprep.mubr.bf16.mxu0 %v6187_v37  ;;  %5899 = vmatprep.mubr.bf16.mxu1 %v6188_v38 }
 0x141   : > { %v5537_v45 = vpop.f32.mrb[36].mxu0  ;;  %v5793_v46 = vpop.f32.mrb[36].mxu1 }
 0x142   : > { %v2481_v47 = vadd.f32 %v5537_v45, %v6484_v54  ;;  %v3505_v48 = vadd.f32 %v5793_v46, %v6484_v54  ;;  %v2472_v49 = vpop.f32.mrb[37].mxu0  ;;  %v3496_v50 = vpop.f32.mrb[37].mxu1 }
 0x143   : > { %v2473_v53 = vadd.f32 %v6484_v54, %v2472_v49  ;;  %v3497_v55 = vadd.f32 %v6484_v54, %v3496_v50  ;;  %v5538_v56 = vpop.f32.mrb[38].mxu0  ;;  %v5794_v57 = vpop.f32.mrb[38].mxu1  ;;  %v6202_v49 = vld [vmem:[%s6353_s24 + $0x678] sm:$0xff]  }
 0x144   : > { %4413 = vst [vmem:[%s6489_s14 + $0x130] sm:$0xff] %v2481_v47  ;;  %4669 = vst [vmem:[%s6489_s14 + $0x930] sm:$0xff] %v3505_v48  ;;  %v2484_v60 = vadd.f32 %v5538_v56, %v6484_v54  ;;  %v3508_v61 = vadd.f32 %v5794_v57, %v6484_v54  ;;  %v2475_v62 = vpop.f32.mrb[39].mxu0  ;;  %v3499_v63 = vpop.f32.mrb[39].mxu1  ;;  %v6201_v48 = vld [vmem:[%s6353_s24 + $0x278] sm:$0xff]   ;;  %v6204_v56 = vld [vmem:[%s6353_s24 + $0x680] sm:$0xff]  }
 0x145   : > { %4411 = vst [vmem:[%s6489_s14 + $0x120] sm:$0xff] %v2473_v53  ;;  %4667 = vst [vmem:[%s6489_s14 + $0x920] sm:$0xff] %v3497_v55  ;;  %v2476_v0 = vadd.f32 %v6484_v54, %v2475_v62  ;;  %v3500_v1 = vadd.f32 %v6484_v54, %v3499_v63  ;;  %v6203_v55 = vld [vmem:[%s6353_s24 + $0x280] sm:$0xff]  }
 0x146   : > { %4414 = vst [vmem:[%s6489_s14 + $0x138] sm:$0xff] %v2484_v60  ;;  %4670 = vst [vmem:[%s6489_s14 + $0x938] sm:$0xff] %v3508_v61  ;;  %5644 = vmatmul.mubr.bf16.gmra.mrb[144].mxu0 %v6189_v51  ;;  %5900 = vmatmul.mubr.bf16.gmra.mrb[144].mxu1 %v6190_v52 }
 0x147   : > { %4412 = vst [vmem:[%s6489_s14 + $0x128] sm:$0xff] %v2476_v0  ;;  %4668 = vst [vmem:[%s6489_s14 + $0x928] sm:$0xff] %v3500_v1  ;;  %5647 = vmatprep.mubr.bf16.mxu0 %v6191_v58  ;;  %5903 = vmatprep.mubr.bf16.mxu1 %v6192_v59 }
 0x149   : > { %v5541_v2 = vpop.f32.mrb[40].mxu0  ;;  %v5797_v3 = vpop.f32.mrb[40].mxu1 }
 0x14a   : > { %v2497_v4 = vadd.f32 %v5541_v2, %v6484_v54  ;;  %v3521_v5 = vadd.f32 %v5797_v3, %v6484_v54  ;;  %v2488_v6 = vpop.f32.mrb[41].mxu0  ;;  %v3512_v7 = vpop.f32.mrb[41].mxu1 }
 0x14b   : > { %v2489_v10 = vadd.f32 %v6484_v54, %v2488_v6  ;;  %v3513_v11 = vadd.f32 %v6484_v54, %v3512_v7  ;;  %v5542_v12 = vpop.f32.mrb[42].mxu0  ;;  %v5798_v13 = vpop.f32.mrb[42].mxu1  ;;  %v6206_v6 = vld [vmem:[%s6353_s24 + $0x688] sm:$0xff]  }
 0x14c   : > { %4417 = vst [vmem:[%s6489_s14 + $0x150] sm:$0xff] %v2497_v4  ;;  %4673 = vst [vmem:[%s6489_s14 + $0x950] sm:$0xff] %v3521_v5  ;;  %v2500_v16 = vadd.f32 %v5542_v12, %v6484_v54  ;;  %v3524_v17 = vadd.f32 %v5798_v13, %v6484_v54  ;;  %v2491_v18 = vpop.f32.mrb[43].mxu0  ;;  %v3515_v19 = vpop.f32.mrb[43].mxu1  ;;  %v6205_v5 = vld [vmem:[%s6353_s24 + $0x288] sm:$0xff]   ;;  %v6208_v12 = vld [vmem:[%s6353_s24 + $0x690] sm:$0xff]  }
 0x14d   : > { %4415 = vst [vmem:[%s6489_s14 + $0x140] sm:$0xff] %v2489_v10  ;;  %4671 = vst [vmem:[%s6489_s14 + $0x940] sm:$0xff] %v3513_v11  ;;  %v2492_v20 = vadd.f32 %v6484_v54, %v2491_v18  ;;  %v3516_v21 = vadd.f32 %v6484_v54, %v3515_v19  ;;  %v6207_v11 = vld [vmem:[%s6353_s24 + $0x290] sm:$0xff]  }
 0x14e   : > { %4418 = vst [vmem:[%s6489_s14 + $0x158] sm:$0xff] %v2500_v16  ;;  %4674 = vst [vmem:[%s6489_s14 + $0x958] sm:$0xff] %v3524_v17  ;;  %5648 = vmatmul.mubr.bf16.gmra.mrb[148].mxu0 %v6193_v8  ;;  %5904 = vmatmul.mubr.bf16.gmra.mrb[148].mxu1 %v6194_v9 }
 0x14f   : > { %4416 = vst [vmem:[%s6489_s14 + $0x148] sm:$0xff] %v2492_v20  ;;  %4672 = vst [vmem:[%s6489_s14 + $0x948] sm:$0xff] %v3516_v21  ;;  %5651 = vmatprep.mubr.bf16.mxu0 %v6195_v14  ;;  %5907 = vmatprep.mubr.bf16.mxu1 %v6196_v15 }
 0x151   : > { %v5545_v22 = vpop.f32.mrb[44].mxu0  ;;  %v5801_v23 = vpop.f32.mrb[44].mxu1 }
 0x152   : > { %v2513_v24 = vadd.f32 %v5545_v22, %v6484_v54  ;;  %v3537_v25 = vadd.f32 %v5801_v23, %v6484_v54  ;;  %v2504_v26 = vpop.f32.mrb[45].mxu0  ;;  %v3528_v27 = vpop.f32.mrb[45].mxu1 }
 0x153   : > { %v2505_v30 = vadd.f32 %v6484_v54, %v2504_v26  ;;  %v3529_v31 = vadd.f32 %v6484_v54, %v3528_v27  ;;  %v5546_v32 = vpop.f32.mrb[46].mxu0  ;;  %v5802_v33 = vpop.f32.mrb[46].mxu1  ;;  %v6210_v26 = vld [vmem:[%s6353_s24 + $0x698] sm:$0xff]  }
 0x154   : > { %4421 = vst [vmem:[%s6489_s14 + $0x170] sm:$0xff] %v2513_v24  ;;  %4677 = vst [vmem:[%s6489_s14 + $0x970] sm:$0xff] %v3537_v25  ;;  %v2516_v36 = vadd.f32 %v5546_v32, %v6484_v54  ;;  %v3540_v37 = vadd.f32 %v5802_v33, %v6484_v54  ;;  %v2507_v38 = vpop.f32.mrb[47].mxu0  ;;  %v3531_v39 = vpop.f32.mrb[47].mxu1  ;;  %v6209_v25 = vld [vmem:[%s6353_s24 + $0x298] sm:$0xff]   ;;  %v6212_v32 = vld [vmem:[%s6353_s24 + $0x6a0] sm:$0xff]  }
 0x155   : > { %4419 = vst [vmem:[%s6489_s14 + $0x160] sm:$0xff] %v2505_v30  ;;  %4675 = vst [vmem:[%s6489_s14 + $0x960] sm:$0xff] %v3529_v31  ;;  %v2508_v40 = vadd.f32 %v6484_v54, %v2507_v38  ;;  %v3532_v41 = vadd.f32 %v6484_v54, %v3531_v39  ;;  %v6211_v31 = vld [vmem:[%s6353_s24 + $0x2a0] sm:$0xff]  }
 0x156   : > { %4422 = vst [vmem:[%s6489_s14 + $0x178] sm:$0xff] %v2516_v36  ;;  %4678 = vst [vmem:[%s6489_s14 + $0x978] sm:$0xff] %v3540_v37  ;;  %5652 = vmatmul.mubr.bf16.gmra.mrb[152].mxu0 %v6197_v28  ;;  %5908 = vmatmul.mubr.bf16.gmra.mrb[152].mxu1 %v6198_v29 }
 0x157   : > { %4420 = vst [vmem:[%s6489_s14 + $0x168] sm:$0xff] %v2508_v40  ;;  %4676 = vst [vmem:[%s6489_s14 + $0x968] sm:$0xff] %v3532_v41  ;;  %5655 = vmatprep.mubr.bf16.mxu0 %v6199_v34  ;;  %5911 = vmatprep.mubr.bf16.mxu1 %v6200_v35 }
 0x159   : > { %v5549_v42 = vpop.f32.mrb[48].mxu0  ;;  %v5805_v43 = vpop.f32.mrb[48].mxu1 }
 0x15a   : > { %v2529_v44 = vadd.f32 %v5549_v42, %v6484_v54  ;;  %v3553_v45 = vadd.f32 %v5805_v43, %v6484_v54  ;;  %v2520_v46 = vpop.f32.mrb[49].mxu0  ;;  %v3544_v47 = vpop.f32.mrb[49].mxu1 }
 0x15b   : > { %v2521_v50 = vadd.f32 %v6484_v54, %v2520_v46  ;;  %v3545_v51 = vadd.f32 %v6484_v54, %v3544_v47  ;;  %v5550_v52 = vpop.f32.mrb[50].mxu0  ;;  %v5806_v53 = vpop.f32.mrb[50].mxu1  ;;  %v6214_v46 = vld [vmem:[%s6353_s24 + $0x6a8] sm:$0xff]  }
 0x15c   : > { %4425 = vst [vmem:[%s6489_s14 + $0x190] sm:$0xff] %v2529_v44  ;;  %4681 = vst [vmem:[%s6489_s14 + $0x990] sm:$0xff] %v3553_v45  ;;  %v2532_v57 = vadd.f32 %v5550_v52, %v6484_v54  ;;  %v3556_v58 = vadd.f32 %v5806_v53, %v6484_v54  ;;  %v2523_v59 = vpop.f32.mrb[51].mxu0  ;;  %v3547_v60 = vpop.f32.mrb[51].mxu1  ;;  %v6213_v45 = vld [vmem:[%s6353_s24 + $0x2a8] sm:$0xff]   ;;  %v6216_v52 = vld [vmem:[%s6353_s24 + $0x6b0] sm:$0xff]  }
 0x15d   : > { %4423 = vst [vmem:[%s6489_s14 + $0x180] sm:$0xff] %v2521_v50  ;;  %4679 = vst [vmem:[%s6489_s14 + $0x980] sm:$0xff] %v3545_v51  ;;  %v2524_v61 = vadd.f32 %v6484_v54, %v2523_v59  ;;  %v3548_v62 = vadd.f32 %v6484_v54, %v3547_v60  ;;  %v6215_v51 = vld [vmem:[%s6353_s24 + $0x2b0] sm:$0xff]  }
 0x15e   : > { %4426 = vst [vmem:[%s6489_s14 + $0x198] sm:$0xff] %v2532_v57  ;;  %4682 = vst [vmem:[%s6489_s14 + $0x998] sm:$0xff] %v3556_v58  ;;  %5656 = vmatmul.mubr.bf16.gmra.mrb[156].mxu0 %v6201_v48  ;;  %5912 = vmatmul.mubr.bf16.gmra.mrb[156].mxu1 %v6202_v49 }
 0x15f   : > { %4424 = vst [vmem:[%s6489_s14 + $0x188] sm:$0xff] %v2524_v61  ;;  %4680 = vst [vmem:[%s6489_s14 + $0x988] sm:$0xff] %v3548_v62  ;;  %5659 = vmatprep.mubr.bf16.mxu0 %v6203_v55  ;;  %5915 = vmatprep.mubr.bf16.mxu1 %v6204_v56 }
 0x161   : > { %v5553_v63 = vpop.f32.mrb[52].mxu0  ;;  %v5809_v0 = vpop.f32.mrb[52].mxu1 }
 0x162   : > { %v2545_v1 = vadd.f32 %v5553_v63, %v6484_v54  ;;  %v3569_v2 = vadd.f32 %v5809_v0, %v6484_v54  ;;  %v2536_v3 = vpop.f32.mrb[53].mxu0  ;;  %v3560_v4 = vpop.f32.mrb[53].mxu1 }
 0x163   : > { %v2537_v7 = vadd.f32 %v6484_v54, %v2536_v3  ;;  %v3561_v8 = vadd.f32 %v6484_v54, %v3560_v4  ;;  %v5554_v9 = vpop.f32.mrb[54].mxu0  ;;  %v5810_v10 = vpop.f32.mrb[54].mxu1  ;;  %v6218_v3 = vld [vmem:[%s6353_s24 + $0x6b8] sm:$0xff]  }
 0x164   : > { %4429 = vst [vmem:[%s6489_s14 + $0x1b0] sm:$0xff] %v2545_v1  ;;  %4685 = vst [vmem:[%s6489_s14 + $0x9b0] sm:$0xff] %v3569_v2  ;;  %v2548_v13 = vadd.f32 %v5554_v9, %v6484_v54  ;;  %v3572_v14 = vadd.f32 %v5810_v10, %v6484_v54  ;;  %v2539_v15 = vpop.f32.mrb[55].mxu0  ;;  %v3563_v16 = vpop.f32.mrb[55].mxu1  ;;  %v6217_v2 = vld [vmem:[%s6353_s24 + $0x2b8] sm:$0xff]   ;;  %v6220_v9 = vld [vmem:[%s6353_s24 + $0x6c0] sm:$0xff]  }
 0x165   : > { %4427 = vst [vmem:[%s6489_s14 + $0x1a0] sm:$0xff] %v2537_v7  ;;  %4683 = vst [vmem:[%s6489_s14 + $0x9a0] sm:$0xff] %v3561_v8  ;;  %v2540_v17 = vadd.f32 %v6484_v54, %v2539_v15  ;;  %v3564_v18 = vadd.f32 %v6484_v54, %v3563_v16  ;;  %v6219_v8 = vld [vmem:[%s6353_s24 + $0x2c0] sm:$0xff]  }
 0x166   : > { %4430 = vst [vmem:[%s6489_s14 + $0x1b8] sm:$0xff] %v2548_v13  ;;  %4686 = vst [vmem:[%s6489_s14 + $0x9b8] sm:$0xff] %v3572_v14  ;;  %5660 = vmatmul.mubr.bf16.gmra.mrb[160].mxu0 %v6205_v5  ;;  %5916 = vmatmul.mubr.bf16.gmra.mrb[160].mxu1 %v6206_v6 }
 0x167   : > { %4428 = vst [vmem:[%s6489_s14 + $0x1a8] sm:$0xff] %v2540_v17  ;;  %4684 = vst [vmem:[%s6489_s14 + $0x9a8] sm:$0xff] %v3564_v18  ;;  %5663 = vmatprep.mubr.bf16.mxu0 %v6207_v11  ;;  %5919 = vmatprep.mubr.bf16.mxu1 %v6208_v12 }
 0x169   : > { %v5557_v19 = vpop.f32.mrb[56].mxu0  ;;  %v5813_v20 = vpop.f32.mrb[56].mxu1 }
 0x16a   : > { %v2561_v21 = vadd.f32 %v5557_v19, %v6484_v54  ;;  %v3585_v22 = vadd.f32 %v5813_v20, %v6484_v54  ;;  %v2552_v23 = vpop.f32.mrb[57].mxu0  ;;  %v3576_v24 = vpop.f32.mrb[57].mxu1 }
 0x16b   : > { %v2553_v27 = vadd.f32 %v6484_v54, %v2552_v23  ;;  %v3577_v28 = vadd.f32 %v6484_v54, %v3576_v24  ;;  %v5558_v29 = vpop.f32.mrb[58].mxu0  ;;  %v5814_v30 = vpop.f32.mrb[58].mxu1  ;;  %v6222_v23 = vld [vmem:[%s6353_s24 + $0x6c8] sm:$0xff]  }
 0x16c   : > { %4433 = vst [vmem:[%s6489_s14 + $0x1d0] sm:$0xff] %v2561_v21  ;;  %4689 = vst [vmem:[%s6489_s14 + $0x9d0] sm:$0xff] %v3585_v22  ;;  %v2564_v33 = vadd.f32 %v5558_v29, %v6484_v54  ;;  %v3588_v34 = vadd.f32 %v5814_v30, %v6484_v54  ;;  %v2555_v35 = vpop.f32.mrb[59].mxu0  ;;  %v3579_v36 = vpop.f32.mrb[59].mxu1  ;;  %v6221_v22 = vld [vmem:[%s6353_s24 + $0x2c8] sm:$0xff]   ;;  %v6224_v29 = vld [vmem:[%s6353_s24 + $0x6d0] sm:$0xff]  }
 0x16d   : > { %4431 = vst [vmem:[%s6489_s14 + $0x1c0] sm:$0xff] %v2553_v27  ;;  %4687 = vst [vmem:[%s6489_s14 + $0x9c0] sm:$0xff] %v3577_v28  ;;  %v2556_v37 = vadd.f32 %v6484_v54, %v2555_v35  ;;  %v3580_v38 = vadd.f32 %v6484_v54, %v3579_v36  ;;  %v6223_v28 = vld [vmem:[%s6353_s24 + $0x2d0] sm:$0xff]  }
 0x16e   : > { %4434 = vst [vmem:[%s6489_s14 + $0x1d8] sm:$0xff] %v2564_v33  ;;  %4690 = vst [vmem:[%s6489_s14 + $0x9d8] sm:$0xff] %v3588_v34  ;;  %5664 = vmatmul.mubr.bf16.gmra.mrb[164].mxu0 %v6209_v25  ;;  %5920 = vmatmul.mubr.bf16.gmra.mrb[164].mxu1 %v6210_v26 }
 0x16f   : > { %4432 = vst [vmem:[%s6489_s14 + $0x1c8] sm:$0xff] %v2556_v37  ;;  %4688 = vst [vmem:[%s6489_s14 + $0x9c8] sm:$0xff] %v3580_v38  ;;  %5667 = vmatprep.mubr.bf16.mxu0 %v6211_v31  ;;  %5923 = vmatprep.mubr.bf16.mxu1 %v6212_v32 }
 0x171   : > { %v5561_v39 = vpop.f32.mrb[60].mxu0  ;;  %v5817_v40 = vpop.f32.mrb[60].mxu1 }
 0x172   : > { %v2577_v41 = vadd.f32 %v5561_v39, %v6484_v54  ;;  %v3601_v42 = vadd.f32 %v5817_v40, %v6484_v54  ;;  %v2568_v43 = vpop.f32.mrb[61].mxu0  ;;  %v3592_v44 = vpop.f32.mrb[61].mxu1 }
 0x173   : > { %v2569_v47 = vadd.f32 %v6484_v54, %v2568_v43  ;;  %v3593_v48 = vadd.f32 %v6484_v54, %v3592_v44  ;;  %v5562_v49 = vpop.f32.mrb[62].mxu0  ;;  %v5818_v50 = vpop.f32.mrb[62].mxu1  ;;  %v6226_v43 = vld [vmem:[%s6353_s24 + $0x6d8] sm:$0xff]  }
 0x174   : > { %4437 = vst [vmem:[%s6489_s14 + $0x1f0] sm:$0xff] %v2577_v41  ;;  %4693 = vst [vmem:[%s6489_s14 + $0x9f0] sm:$0xff] %v3601_v42  ;;  %v2580_v53 = vadd.f32 %v5562_v49, %v6484_v54  ;;  %v3604_v55 = vadd.f32 %v5818_v50, %v6484_v54  ;;  %v2571_v56 = vpop.f32.mrb[63].mxu0  ;;  %v3595_v57 = vpop.f32.mrb[63].mxu1  ;;  %v6225_v42 = vld [vmem:[%s6353_s24 + $0x2d8] sm:$0xff]   ;;  %v6228_v49 = vld [vmem:[%s6353_s24 + $0x6e0] sm:$0xff]  }
 0x175   : > { %4435 = vst [vmem:[%s6489_s14 + $0x1e0] sm:$0xff] %v2569_v47  ;;  %4691 = vst [vmem:[%s6489_s14 + $0x9e0] sm:$0xff] %v3593_v48  ;;  %v2572_v58 = vadd.f32 %v6484_v54, %v2571_v56  ;;  %v3596_v59 = vadd.f32 %v6484_v54, %v3595_v57  ;;  %v6814_v54 = vld [vmem:[%s7681_s2] ss:$0 sm:$0xff] }
 0x176   : > { %4438 = vst [vmem:[%s6489_s14 + $0x1f8] sm:$0xff] %v2580_v53  ;;  %4694 = vst [vmem:[%s6489_s14 + $0x9f8] sm:$0xff] %v3604_v55  ;;  %5668 = vmatmul.mubr.bf16.gmra.mrb[168].mxu0 %v6213_v45  ;;  %5924 = vmatmul.mubr.bf16.gmra.mrb[168].mxu1 %v6214_v46  ;;  %v6227_v48 = vld [vmem:[%s6353_s24 + $0x2e0] sm:$0xff]  }
 0x177   : > { %4436 = vst [vmem:[%s6489_s14 + $0x1e8] sm:$0xff] %v2572_v58  ;;  %4692 = vst [vmem:[%s6489_s14 + $0x9e8] sm:$0xff] %v3596_v59  ;;  %5671 = vmatprep.mubr.bf16.mxu0 %v6215_v51  ;;  %5927 = vmatprep.mubr.bf16.mxu1 %v6216_v52 }
 0x179   : > { %v5565_v60 = vpop.f32.mrb[64].mxu0  ;;  %v5821_v61 = vpop.f32.mrb[64].mxu1 }
 0x17a   : > { %v2593_v62 = vadd.f32 %v6814_v54, %v5565_v60  ;;  %v3617_v63 = vadd.f32 %v6814_v54, %v5821_v61  ;;  %v2584_v0 = vpop.f32.mrb[65].mxu0  ;;  %v3608_v1 = vpop.f32.mrb[65].mxu1 }
 0x17b   : > { %v2585_v4 = vadd.f32 %v6814_v54, %v2584_v0  ;;  %v3609_v5 = vadd.f32 %v6814_v54, %v3608_v1  ;;  %v5566_v6 = vpop.f32.mrb[66].mxu0  ;;  %v5822_v7 = vpop.f32.mrb[66].mxu1  ;;  %v6230_v0 = vld [vmem:[%s6353_s24 + $0x6e8] sm:$0xff]  }
 0x17c   : > { %4441 = vst [vmem:[%s6489_s14 + $0x210] sm:$0xff] %v2593_v62  ;;  %4697 = vst [vmem:[%s6489_s14 + $0xa10] sm:$0xff] %v3617_v63  ;;  %v2596_v10 = vadd.f32 %v6814_v54, %v5566_v6  ;;  %v3620_v11 = vadd.f32 %v6814_v54, %v5822_v7  ;;  %v2587_v12 = vpop.f32.mrb[67].mxu0  ;;  %v3611_v13 = vpop.f32.mrb[67].mxu1  ;;  %v6229_v63 = vld [vmem:[%s6353_s24 + $0x2e8] sm:$0xff]   ;;  %v6232_v6 = vld [vmem:[%s6353_s24 + $0x6f0] sm:$0xff]  }
 0x17d   : > { %4439 = vst [vmem:[%s6489_s14 + $0x200] sm:$0xff] %v2585_v4  ;;  %4695 = vst [vmem:[%s6489_s14 + $0xa00] sm:$0xff] %v3609_v5  ;;  %v2588_v14 = vadd.f32 %v6814_v54, %v2587_v12  ;;  %v3612_v15 = vadd.f32 %v6814_v54, %v3611_v13  ;;  %v6231_v5 = vld [vmem:[%s6353_s24 + $0x2f0] sm:$0xff]  }
 0x17e   : > { %4442 = vst [vmem:[%s6489_s14 + $0x218] sm:$0xff] %v2596_v10  ;;  %4698 = vst [vmem:[%s6489_s14 + $0xa18] sm:$0xff] %v3620_v11  ;;  %5672 = vmatmul.mubr.bf16.gmra.mrb[172].mxu0 %v6217_v2  ;;  %5928 = vmatmul.mubr.bf16.gmra.mrb[172].mxu1 %v6218_v3 }
 0x17f   : > { %4440 = vst [vmem:[%s6489_s14 + $0x208] sm:$0xff] %v2588_v14  ;;  %4696 = vst [vmem:[%s6489_s14 + $0xa08] sm:$0xff] %v3612_v15  ;;  %5675 = vmatprep.mubr.bf16.mxu0 %v6219_v8  ;;  %5931 = vmatprep.mubr.bf16.mxu1 %v6220_v9 }
 0x181   : > { %v5569_v16 = vpop.f32.mrb[68].mxu0  ;;  %v5825_v17 = vpop.f32.mrb[68].mxu1 }
 0x182   : > { %v2609_v18 = vadd.f32 %v6814_v54, %v5569_v16  ;;  %v3633_v19 = vadd.f32 %v6814_v54, %v5825_v17  ;;  %v2600_v20 = vpop.f32.mrb[69].mxu0  ;;  %v3624_v21 = vpop.f32.mrb[69].mxu1 }
 0x183   : > { %v2601_v24 = vadd.f32 %v6814_v54, %v2600_v20  ;;  %v3625_v25 = vadd.f32 %v6814_v54, %v3624_v21  ;;  %v5570_v26 = vpop.f32.mrb[70].mxu0  ;;  %v5826_v27 = vpop.f32.mrb[70].mxu1  ;;  %v6234_v20 = vld [vmem:[%s6353_s24 + $0x6f8] sm:$0xff]  }
 0x184   : > { %4445 = vst [vmem:[%s6489_s14 + $0x230] sm:$0xff] %v2609_v18  ;;  %4701 = vst [vmem:[%s6489_s14 + $0xa30] sm:$0xff] %v3633_v19  ;;  %v2612_v30 = vadd.f32 %v6814_v54, %v5570_v26  ;;  %v3636_v31 = vadd.f32 %v6814_v54, %v5826_v27  ;;  %v2603_v32 = vpop.f32.mrb[71].mxu0  ;;  %v3627_v33 = vpop.f32.mrb[71].mxu1  ;;  %v6233_v19 = vld [vmem:[%s6353_s24 + $0x2f8] sm:$0xff]   ;;  %v6236_v26 = vld [vmem:[%s6353_s24 + $0x700] sm:$0xff]  }
 0x185   : > { %4443 = vst [vmem:[%s6489_s14 + $0x220] sm:$0xff] %v2601_v24  ;;  %4699 = vst [vmem:[%s6489_s14 + $0xa20] sm:$0xff] %v3625_v25  ;;  %v2604_v34 = vadd.f32 %v6814_v54, %v2603_v32  ;;  %v3628_v35 = vadd.f32 %v6814_v54, %v3627_v33  ;;  %v6235_v25 = vld [vmem:[%s6353_s24 + $0x300] sm:$0xff]  }
 0x186   : > { %4446 = vst [vmem:[%s6489_s14 + $0x238] sm:$0xff] %v2612_v30  ;;  %4702 = vst [vmem:[%s6489_s14 + $0xa38] sm:$0xff] %v3636_v31  ;;  %5676 = vmatmul.mubr.bf16.gmra.mrb[176].mxu0 %v6221_v22  ;;  %5932 = vmatmul.mubr.bf16.gmra.mrb[176].mxu1 %v6222_v23 }
 0x187   : > { %4444 = vst [vmem:[%s6489_s14 + $0x228] sm:$0xff] %v2604_v34  ;;  %4700 = vst [vmem:[%s6489_s14 + $0xa28] sm:$0xff] %v3628_v35  ;;  %5679 = vmatprep.mubr.bf16.mxu0 %v6223_v28  ;;  %5935 = vmatprep.mubr.bf16.mxu1 %v6224_v29 }
 0x189   : > { %v5573_v36 = vpop.f32.mrb[72].mxu0  ;;  %v5829_v37 = vpop.f32.mrb[72].mxu1 }
 0x18a   : > { %v2625_v38 = vadd.f32 %v6814_v54, %v5573_v36  ;;  %v3649_v39 = vadd.f32 %v6814_v54, %v5829_v37  ;;  %v2616_v40 = vpop.f32.mrb[73].mxu0  ;;  %v3640_v41 = vpop.f32.mrb[73].mxu1 }
 0x18b   : > { %v2617_v44 = vadd.f32 %v6814_v54, %v2616_v40  ;;  %v3641_v45 = vadd.f32 %v6814_v54, %v3640_v41  ;;  %v5574_v46 = vpop.f32.mrb[74].mxu0  ;;  %v5830_v47 = vpop.f32.mrb[74].mxu1  ;;  %v6238_v40 = vld [vmem:[%s6353_s24 + $0x708] sm:$0xff]  }
 0x18c   : > { %4449 = vst [vmem:[%s6489_s14 + $0x250] sm:$0xff] %v2625_v38  ;;  %4705 = vst [vmem:[%s6489_s14 + $0xa50] sm:$0xff] %v3649_v39  ;;  %v2628_v50 = vadd.f32 %v6814_v54, %v5574_v46  ;;  %v3652_v51 = vadd.f32 %v6814_v54, %v5830_v47  ;;  %v2619_v52 = vpop.f32.mrb[75].mxu0  ;;  %v3643_v53 = vpop.f32.mrb[75].mxu1  ;;  %v6237_v39 = vld [vmem:[%s6353_s24 + $0x308] sm:$0xff]   ;;  %v6240_v46 = vld [vmem:[%s6353_s24 + $0x710] sm:$0xff]  }
 0x18d   : > { %4447 = vst [vmem:[%s6489_s14 + $0x240] sm:$0xff] %v2617_v44  ;;  %4703 = vst [vmem:[%s6489_s14 + $0xa40] sm:$0xff] %v3641_v45  ;;  %v2620_v55 = vadd.f32 %v6814_v54, %v2619_v52  ;;  %v3644_v56 = vadd.f32 %v6814_v54, %v3643_v53  ;;  %v6239_v45 = vld [vmem:[%s6353_s24 + $0x310] sm:$0xff]  }
 0x18e   : > { %4450 = vst [vmem:[%s6489_s14 + $0x258] sm:$0xff] %v2628_v50  ;;  %4706 = vst [vmem:[%s6489_s14 + $0xa58] sm:$0xff] %v3652_v51  ;;  %5680 = vmatmul.mubr.bf16.gmra.mrb[180].mxu0 %v6225_v42  ;;  %5936 = vmatmul.mubr.bf16.gmra.mrb[180].mxu1 %v6226_v43 }
 0x18f   : > { %4448 = vst [vmem:[%s6489_s14 + $0x248] sm:$0xff] %v2620_v55  ;;  %4704 = vst [vmem:[%s6489_s14 + $0xa48] sm:$0xff] %v3644_v56  ;;  %5683 = vmatprep.mubr.bf16.mxu0 %v6227_v48  ;;  %5939 = vmatprep.mubr.bf16.mxu1 %v6228_v49 }
 0x191   : > { %v5577_v57 = vpop.f32.mrb[76].mxu0  ;;  %v5833_v58 = vpop.f32.mrb[76].mxu1 }
 0x192   : > { %v2641_v59 = vadd.f32 %v6814_v54, %v5577_v57  ;;  %v3665_v60 = vadd.f32 %v6814_v54, %v5833_v58  ;;  %v2632_v61 = vpop.f32.mrb[77].mxu0  ;;  %v3656_v62 = vpop.f32.mrb[77].mxu1 }
 0x193   : > { %v2633_v1 = vadd.f32 %v6814_v54, %v2632_v61  ;;  %v3657_v2 = vadd.f32 %v6814_v54, %v3656_v62  ;;  %v5578_v3 = vpop.f32.mrb[78].mxu0  ;;  %v5834_v4 = vpop.f32.mrb[78].mxu1  ;;  %v6242_v61 = vld [vmem:[%s6353_s24 + $0x718] sm:$0xff]  }
 0x194   : > { %4453 = vst [vmem:[%s6489_s14 + $0x270] sm:$0xff] %v2641_v59  ;;  %4709 = vst [vmem:[%s6489_s14 + $0xa70] sm:$0xff] %v3665_v60  ;;  %v2644_v7 = vadd.f32 %v6814_v54, %v5578_v3  ;;  %v3668_v8 = vadd.f32 %v6814_v54, %v5834_v4  ;;  %v2635_v9 = vpop.f32.mrb[79].mxu0  ;;  %v3659_v10 = vpop.f32.mrb[79].mxu1  ;;  %v6241_v60 = vld [vmem:[%s6353_s24 + $0x318] sm:$0xff]   ;;  %v6244_v3 = vld [vmem:[%s6353_s24 + $0x720] sm:$0xff]  }
 0x195   : > { %4451 = vst [vmem:[%s6489_s14 + $0x260] sm:$0xff] %v2633_v1  ;;  %4707 = vst [vmem:[%s6489_s14 + $0xa60] sm:$0xff] %v3657_v2  ;;  %v2636_v11 = vadd.f32 %v6814_v54, %v2635_v9  ;;  %v3660_v12 = vadd.f32 %v6814_v54, %v3659_v10  ;;  %v6243_v2 = vld [vmem:[%s6353_s24 + $0x320] sm:$0xff]  }
 0x196   : > { %4454 = vst [vmem:[%s6489_s14 + $0x278] sm:$0xff] %v2644_v7  ;;  %4710 = vst [vmem:[%s6489_s14 + $0xa78] sm:$0xff] %v3668_v8  ;;  %5684 = vmatmul.mubr.bf16.gmra.mrb[184].mxu0 %v6229_v63  ;;  %5940 = vmatmul.mubr.bf16.gmra.mrb[184].mxu1 %v6230_v0 }
 0x197   : > { %4452 = vst [vmem:[%s6489_s14 + $0x268] sm:$0xff] %v2636_v11  ;;  %4708 = vst [vmem:[%s6489_s14 + $0xa68] sm:$0xff] %v3660_v12  ;;  %5687 = vmatprep.mubr.bf16.mxu0 %v6231_v5  ;;  %5943 = vmatprep.mubr.bf16.mxu1 %v6232_v6 }
 0x199   : > { %v5581_v13 = vpop.f32.mrb[80].mxu0  ;;  %v5837_v14 = vpop.f32.mrb[80].mxu1 }
 0x19a   : > { %v2657_v15 = vadd.f32 %v6814_v54, %v5581_v13  ;;  %v3681_v16 = vadd.f32 %v6814_v54, %v5837_v14  ;;  %v2648_v17 = vpop.f32.mrb[81].mxu0  ;;  %v3672_v18 = vpop.f32.mrb[81].mxu1 }
 0x19b   : > { %v2649_v21 = vadd.f32 %v6814_v54, %v2648_v17  ;;  %v3673_v22 = vadd.f32 %v6814_v54, %v3672_v18  ;;  %v5582_v23 = vpop.f32.mrb[82].mxu0  ;;  %v5838_v24 = vpop.f32.mrb[82].mxu1  ;;  %v6246_v17 = vld [vmem:[%s6353_s24 + $0x728] sm:$0xff]  }
 0x19c   : > { %4457 = vst [vmem:[%s6489_s14 + $0x290] sm:$0xff] %v2657_v15  ;;  %4713 = vst [vmem:[%s6489_s14 + $0xa90] sm:$0xff] %v3681_v16  ;;  %v2660_v27 = vadd.f32 %v6814_v54, %v5582_v23  ;;  %v3684_v28 = vadd.f32 %v6814_v54, %v5838_v24  ;;  %v2651_v29 = vpop.f32.mrb[83].mxu0  ;;  %v3675_v30 = vpop.f32.mrb[83].mxu1  ;;  %v6245_v16 = vld [vmem:[%s6353_s24 + $0x328] sm:$0xff]   ;;  %v6248_v23 = vld [vmem:[%s6353_s24 + $0x730] sm:$0xff]  }
 0x19d   : > { %4455 = vst [vmem:[%s6489_s14 + $0x280] sm:$0xff] %v2649_v21  ;;  %4711 = vst [vmem:[%s6489_s14 + $0xa80] sm:$0xff] %v3673_v22  ;;  %v2652_v31 = vadd.f32 %v6814_v54, %v2651_v29  ;;  %v3676_v32 = vadd.f32 %v6814_v54, %v3675_v30  ;;  %v6247_v22 = vld [vmem:[%s6353_s24 + $0x330] sm:$0xff]  }
 0x19e   : > { %4458 = vst [vmem:[%s6489_s14 + $0x298] sm:$0xff] %v2660_v27  ;;  %4714 = vst [vmem:[%s6489_s14 + $0xa98] sm:$0xff] %v3684_v28  ;;  %5688 = vmatmul.mubr.bf16.gmra.mrb[188].mxu0 %v6233_v19  ;;  %5944 = vmatmul.mubr.bf16.gmra.mrb[188].mxu1 %v6234_v20 }
 0x19f   : > { %4456 = vst [vmem:[%s6489_s14 + $0x288] sm:$0xff] %v2652_v31  ;;  %4712 = vst [vmem:[%s6489_s14 + $0xa88] sm:$0xff] %v3676_v32  ;;  %5691 = vmatprep.mubr.bf16.mxu0 %v6235_v25  ;;  %5947 = vmatprep.mubr.bf16.mxu1 %v6236_v26 }
 0x1a1   : > { %v5585_v33 = vpop.f32.mrb[84].mxu0  ;;  %v5841_v34 = vpop.f32.mrb[84].mxu1 }
 0x1a2   : > { %v2673_v35 = vadd.f32 %v6814_v54, %v5585_v33  ;;  %v3697_v36 = vadd.f32 %v6814_v54, %v5841_v34  ;;  %v2664_v37 = vpop.f32.mrb[85].mxu0  ;;  %v3688_v38 = vpop.f32.mrb[85].mxu1 }
 0x1a3   : > { %v2665_v41 = vadd.f32 %v6814_v54, %v2664_v37  ;;  %v3689_v42 = vadd.f32 %v6814_v54, %v3688_v38  ;;  %v5586_v43 = vpop.f32.mrb[86].mxu0  ;;  %v5842_v44 = vpop.f32.mrb[86].mxu1  ;;  %v6250_v37 = vld [vmem:[%s6353_s24 + $0x738] sm:$0xff]  }
 0x1a4   : > { %4461 = vst [vmem:[%s6489_s14 + $0x2b0] sm:$0xff] %v2673_v35  ;;  %4717 = vst [vmem:[%s6489_s14 + $0xab0] sm:$0xff] %v3697_v36  ;;  %v2676_v47 = vadd.f32 %v6814_v54, %v5586_v43  ;;  %v3700_v48 = vadd.f32 %v6814_v54, %v5842_v44  ;;  %v2667_v49 = vpop.f32.mrb[87].mxu0  ;;  %v3691_v50 = vpop.f32.mrb[87].mxu1  ;;  %v6249_v36 = vld [vmem:[%s6353_s24 + $0x338] sm:$0xff]   ;;  %v6252_v43 = vld [vmem:[%s6353_s24 + $0x740] sm:$0xff]  }
 0x1a5   : > { %4459 = vst [vmem:[%s6489_s14 + $0x2a0] sm:$0xff] %v2665_v41  ;;  %4715 = vst [vmem:[%s6489_s14 + $0xaa0] sm:$0xff] %v3689_v42  ;;  %v2668_v51 = vadd.f32 %v6814_v54, %v2667_v49  ;;  %v3692_v52 = vadd.f32 %v6814_v54, %v3691_v50  ;;  %v6251_v42 = vld [vmem:[%s6353_s24 + $0x340] sm:$0xff]  }
 0x1a6   : > { %4462 = vst [vmem:[%s6489_s14 + $0x2b8] sm:$0xff] %v2676_v47  ;;  %4718 = vst [vmem:[%s6489_s14 + $0xab8] sm:$0xff] %v3700_v48  ;;  %5692 = vmatmul.mubr.bf16.gmra.mrb[192].mxu0 %v6237_v39  ;;  %5948 = vmatmul.mubr.bf16.gmra.mrb[192].mxu1 %v6238_v40 }
 0x1a7   : > { %4460 = vst [vmem:[%s6489_s14 + $0x2a8] sm:$0xff] %v2668_v51  ;;  %4716 = vst [vmem:[%s6489_s14 + $0xaa8] sm:$0xff] %v3692_v52  ;;  %5695 = vmatprep.mubr.bf16.mxu0 %v6239_v45  ;;  %5951 = vmatprep.mubr.bf16.mxu1 %v6240_v46 }
 0x1a9   : > { %v5589_v53 = vpop.f32.mrb[88].mxu0  ;;  %v5845_v55 = vpop.f32.mrb[88].mxu1 }
 0x1aa   : > { %v2689_v56 = vadd.f32 %v6814_v54, %v5589_v53  ;;  %v3713_v57 = vadd.f32 %v6814_v54, %v5845_v55  ;;  %v2680_v58 = vpop.f32.mrb[89].mxu0  ;;  %v3704_v59 = vpop.f32.mrb[89].mxu1 }
 0x1ab   : > { %v2681_v62 = vadd.f32 %v6814_v54, %v2680_v58  ;;  %v3705_v63 = vadd.f32 %v6814_v54, %v3704_v59  ;;  %v5590_v0 = vpop.f32.mrb[90].mxu0  ;;  %v5846_v1 = vpop.f32.mrb[90].mxu1  ;;  %v6254_v58 = vld [vmem:[%s6353_s24 + $0x748] sm:$0xff]  }
 0x1ac   : > { %4465 = vst [vmem:[%s6489_s14 + $0x2d0] sm:$0xff] %v2689_v56  ;;  %4721 = vst [vmem:[%s6489_s14 + $0xad0] sm:$0xff] %v3713_v57  ;;  %v2692_v4 = vadd.f32 %v6814_v54, %v5590_v0  ;;  %v3716_v5 = vadd.f32 %v6814_v54, %v5846_v1  ;;  %v2683_v6 = vpop.f32.mrb[91].mxu0  ;;  %v3707_v7 = vpop.f32.mrb[91].mxu1  ;;  %v6253_v57 = vld [vmem:[%s6353_s24 + $0x348] sm:$0xff]   ;;  %v6256_v0 = vld [vmem:[%s6353_s24 + $0x750] sm:$0xff]  }
 0x1ad   : > { %4463 = vst [vmem:[%s6489_s14 + $0x2c0] sm:$0xff] %v2681_v62  ;;  %4719 = vst [vmem:[%s6489_s14 + $0xac0] sm:$0xff] %v3705_v63  ;;  %v2684_v8 = vadd.f32 %v6814_v54, %v2683_v6  ;;  %v3708_v9 = vadd.f32 %v6814_v54, %v3707_v7  ;;  %v6255_v63 = vld [vmem:[%s6353_s24 + $0x350] sm:$0xff]  }
 0x1ae   : > { %4466 = vst [vmem:[%s6489_s14 + $0x2d8] sm:$0xff] %v2692_v4  ;;  %4722 = vst [vmem:[%s6489_s14 + $0xad8] sm:$0xff] %v3716_v5  ;;  %5696 = vmatmul.mubr.bf16.gmra.mrb[196].mxu0 %v6241_v60  ;;  %5952 = vmatmul.mubr.bf16.gmra.mrb[196].mxu1 %v6242_v61 }
 0x1af   : > { %4464 = vst [vmem:[%s6489_s14 + $0x2c8] sm:$0xff] %v2684_v8  ;;  %4720 = vst [vmem:[%s6489_s14 + $0xac8] sm:$0xff] %v3708_v9  ;;  %5699 = vmatprep.mubr.bf16.mxu0 %v6243_v2  ;;  %5955 = vmatprep.mubr.bf16.mxu1 %v6244_v3 }
 0x1b1   : > { %v5593_v10 = vpop.f32.mrb[92].mxu0  ;;  %v5849_v11 = vpop.f32.mrb[92].mxu1 }
 0x1b2   : > { %v2705_v12 = vadd.f32 %v6814_v54, %v5593_v10  ;;  %v3729_v13 = vadd.f32 %v6814_v54, %v5849_v11  ;;  %v2696_v14 = vpop.f32.mrb[93].mxu0  ;;  %v3720_v15 = vpop.f32.mrb[93].mxu1 }
 0x1b3   : > { %v2697_v18 = vadd.f32 %v6814_v54, %v2696_v14  ;;  %v3721_v19 = vadd.f32 %v6814_v54, %v3720_v15  ;;  %v5594_v20 = vpop.f32.mrb[94].mxu0  ;;  %v5850_v21 = vpop.f32.mrb[94].mxu1  ;;  %v6258_v14 = vld [vmem:[%s6353_s24 + $0x758] sm:$0xff]  }
 0x1b4   : > { %4469 = vst [vmem:[%s6489_s14 + $0x2f0] sm:$0xff] %v2705_v12  ;;  %4725 = vst [vmem:[%s6489_s14 + $0xaf0] sm:$0xff] %v3729_v13  ;;  %v2708_v24 = vadd.f32 %v6814_v54, %v5594_v20  ;;  %v3732_v25 = vadd.f32 %v6814_v54, %v5850_v21  ;;  %v2699_v26 = vpop.f32.mrb[95].mxu0  ;;  %v3723_v27 = vpop.f32.mrb[95].mxu1  ;;  %v6257_v13 = vld [vmem:[%s6353_s24 + $0x358] sm:$0xff]   ;;  %v6260_v20 = vld [vmem:[%s6353_s24 + $0x760] sm:$0xff]  }
 0x1b5   : > { %4467 = vst [vmem:[%s6489_s14 + $0x2e0] sm:$0xff] %v2697_v18  ;;  %4723 = vst [vmem:[%s6489_s14 + $0xae0] sm:$0xff] %v3721_v19  ;;  %v2700_v28 = vadd.f32 %v6814_v54, %v2699_v26  ;;  %v3724_v29 = vadd.f32 %v6814_v54, %v3723_v27  ;;  %v6259_v19 = vld [vmem:[%s6353_s24 + $0x360] sm:$0xff]  }
 0x1b6   : > { %4470 = vst [vmem:[%s6489_s14 + $0x2f8] sm:$0xff] %v2708_v24  ;;  %4726 = vst [vmem:[%s6489_s14 + $0xaf8] sm:$0xff] %v3732_v25  ;;  %5700 = vmatmul.mubr.bf16.gmra.mrb[200].mxu0 %v6245_v16  ;;  %5956 = vmatmul.mubr.bf16.gmra.mrb[200].mxu1 %v6246_v17 }
 0x1b7   : > { %4468 = vst [vmem:[%s6489_s14 + $0x2e8] sm:$0xff] %v2700_v28  ;;  %4724 = vst [vmem:[%s6489_s14 + $0xae8] sm:$0xff] %v3724_v29  ;;  %5703 = vmatprep.mubr.bf16.mxu0 %v6247_v22  ;;  %5959 = vmatprep.mubr.bf16.mxu1 %v6248_v23 }
 0x1b9   : > { %v5597_v30 = vpop.f32.mrb[96].mxu0  ;;  %v5853_v31 = vpop.f32.mrb[96].mxu1 }
 0x1ba   : > { %v2721_v32 = vadd.f32 %v6814_v54, %v5597_v30  ;;  %v3745_v33 = vadd.f32 %v6814_v54, %v5853_v31  ;;  %v2712_v34 = vpop.f32.mrb[97].mxu0  ;;  %v3736_v35 = vpop.f32.mrb[97].mxu1 }
 0x1bb   : > { %v2713_v38 = vadd.f32 %v6814_v54, %v2712_v34  ;;  %v3737_v39 = vadd.f32 %v6814_v54, %v3736_v35  ;;  %v5598_v40 = vpop.f32.mrb[98].mxu0  ;;  %v5854_v41 = vpop.f32.mrb[98].mxu1  ;;  %v6262_v34 = vld [vmem:[%s6353_s24 + $0x768] sm:$0xff]  }
 0x1bc   : > { %4473 = vst [vmem:[%s6489_s14 + $0x310] sm:$0xff] %v2721_v32  ;;  %4729 = vst [vmem:[%s6489_s14 + $0xb10] sm:$0xff] %v3745_v33  ;;  %v2724_v44 = vadd.f32 %v6814_v54, %v5598_v40  ;;  %v3748_v45 = vadd.f32 %v6814_v54, %v5854_v41  ;;  %v2715_v46 = vpop.f32.mrb[99].mxu0  ;;  %v3739_v47 = vpop.f32.mrb[99].mxu1  ;;  %v6261_v33 = vld [vmem:[%s6353_s24 + $0x368] sm:$0xff]   ;;  %v6264_v40 = vld [vmem:[%s6353_s24 + $0x770] sm:$0xff]  }
 0x1bd   : > { %4471 = vst [vmem:[%s6489_s14 + $0x300] sm:$0xff] %v2713_v38  ;;  %4727 = vst [vmem:[%s6489_s14 + $0xb00] sm:$0xff] %v3737_v39  ;;  %v2716_v48 = vadd.f32 %v6814_v54, %v2715_v46  ;;  %v3740_v49 = vadd.f32 %v6814_v54, %v3739_v47  ;;  %v6263_v39 = vld [vmem:[%s6353_s24 + $0x370] sm:$0xff]  }
 0x1be   : > { %4474 = vst [vmem:[%s6489_s14 + $0x318] sm:$0xff] %v2724_v44  ;;  %4730 = vst [vmem:[%s6489_s14 + $0xb18] sm:$0xff] %v3748_v45  ;;  %5704 = vmatmul.mubr.bf16.gmra.mrb[204].mxu0 %v6249_v36  ;;  %5960 = vmatmul.mubr.bf16.gmra.mrb[204].mxu1 %v6250_v37 }
 0x1bf   : > { %4472 = vst [vmem:[%s6489_s14 + $0x308] sm:$0xff] %v2716_v48  ;;  %4728 = vst [vmem:[%s6489_s14 + $0xb08] sm:$0xff] %v3740_v49  ;;  %5707 = vmatprep.mubr.bf16.mxu0 %v6251_v42  ;;  %5963 = vmatprep.mubr.bf16.mxu1 %v6252_v43 }
 0x1c1   : > { %v5601_v50 = vpop.f32.mrb[100].mxu0  ;;  %v5857_v51 = vpop.f32.mrb[100].mxu1 }
 0x1c2   : > { %v2737_v52 = vadd.f32 %v6814_v54, %v5601_v50  ;;  %v3761_v53 = vadd.f32 %v6814_v54, %v5857_v51  ;;  %v2728_v55 = vpop.f32.mrb[101].mxu0  ;;  %v3752_v56 = vpop.f32.mrb[101].mxu1 }
 0x1c3   : > { %v2729_v59 = vadd.f32 %v6814_v54, %v2728_v55  ;;  %v3753_v60 = vadd.f32 %v6814_v54, %v3752_v56  ;;  %v5602_v61 = vpop.f32.mrb[102].mxu0  ;;  %v5858_v62 = vpop.f32.mrb[102].mxu1  ;;  %v6266_v55 = vld [vmem:[%s6353_s24 + $0x778] sm:$0xff]  }
 0x1c4   : > { %4477 = vst [vmem:[%s6489_s14 + $0x330] sm:$0xff] %v2737_v52  ;;  %4733 = vst [vmem:[%s6489_s14 + $0xb30] sm:$0xff] %v3761_v53  ;;  %v2740_v1 = vadd.f32 %v6814_v54, %v5602_v61  ;;  %v3764_v2 = vadd.f32 %v6814_v54, %v5858_v62  ;;  %v2731_v3 = vpop.f32.mrb[103].mxu0  ;;  %v3755_v4 = vpop.f32.mrb[103].mxu1  ;;  %v6265_v53 = vld [vmem:[%s6353_s24 + $0x378] sm:$0xff]   ;;  %v6268_v61 = vld [vmem:[%s6353_s24 + $0x780] sm:$0xff]  }
 0x1c5   : > { %4475 = vst [vmem:[%s6489_s14 + $0x320] sm:$0xff] %v2729_v59  ;;  %4731 = vst [vmem:[%s6489_s14 + $0xb20] sm:$0xff] %v3753_v60  ;;  %v2732_v5 = vadd.f32 %v6814_v54, %v2731_v3  ;;  %v3756_v6 = vadd.f32 %v6814_v54, %v3755_v4  ;;  %v6267_v60 = vld [vmem:[%s6353_s24 + $0x380] sm:$0xff]  }
 0x1c6   : > { %4478 = vst [vmem:[%s6489_s14 + $0x338] sm:$0xff] %v2740_v1  ;;  %4734 = vst [vmem:[%s6489_s14 + $0xb38] sm:$0xff] %v3764_v2  ;;  %5708 = vmatmul.mubr.bf16.gmra.mrb[208].mxu0 %v6253_v57  ;;  %5964 = vmatmul.mubr.bf16.gmra.mrb[208].mxu1 %v6254_v58 }
 0x1c7   : > { %4476 = vst [vmem:[%s6489_s14 + $0x328] sm:$0xff] %v2732_v5  ;;  %4732 = vst [vmem:[%s6489_s14 + $0xb28] sm:$0xff] %v3756_v6  ;;  %5711 = vmatprep.mubr.bf16.mxu0 %v6255_v63  ;;  %5967 = vmatprep.mubr.bf16.mxu1 %v6256_v0 }
 0x1c9   : > { %v5605_v7 = vpop.f32.mrb[104].mxu0  ;;  %v5861_v8 = vpop.f32.mrb[104].mxu1 }
 0x1ca   : > { %v2753_v9 = vadd.f32 %v6814_v54, %v5605_v7  ;;  %v3777_v10 = vadd.f32 %v6814_v54, %v5861_v8  ;;  %v2744_v11 = vpop.f32.mrb[105].mxu0  ;;  %v3768_v12 = vpop.f32.mrb[105].mxu1 }
 0x1cb   : > { %v2745_v15 = vadd.f32 %v6814_v54, %v2744_v11  ;;  %v3769_v16 = vadd.f32 %v6814_v54, %v3768_v12  ;;  %v5606_v17 = vpop.f32.mrb[106].mxu0  ;;  %v5862_v18 = vpop.f32.mrb[106].mxu1  ;;  %v6270_v11 = vld [vmem:[%s6353_s24 + $0x788] sm:$0xff]  }
 0x1cc   : > { %4481 = vst [vmem:[%s6489_s14 + $0x350] sm:$0xff] %v2753_v9  ;;  %4737 = vst [vmem:[%s6489_s14 + $0xb50] sm:$0xff] %v3777_v10  ;;  %v2756_v21 = vadd.f32 %v6814_v54, %v5606_v17  ;;  %v3780_v22 = vadd.f32 %v6814_v54, %v5862_v18  ;;  %v2747_v23 = vpop.f32.mrb[107].mxu0  ;;  %v3771_v24 = vpop.f32.mrb[107].mxu1  ;;  %v6269_v10 = vld [vmem:[%s6353_s24 + $0x388] sm:$0xff]   ;;  %v6272_v17 = vld [vmem:[%s6353_s24 + $0x790] sm:$0xff]  }
 0x1cd   : > { %4479 = vst [vmem:[%s6489_s14 + $0x340] sm:$0xff] %v2745_v15  ;;  %4735 = vst [vmem:[%s6489_s14 + $0xb40] sm:$0xff] %v3769_v16  ;;  %v2748_v25 = vadd.f32 %v6814_v54, %v2747_v23  ;;  %v3772_v26 = vadd.f32 %v6814_v54, %v3771_v24  ;;  %v6271_v16 = vld [vmem:[%s6353_s24 + $0x390] sm:$0xff]  }
 0x1ce   : > { %4482 = vst [vmem:[%s6489_s14 + $0x358] sm:$0xff] %v2756_v21  ;;  %4738 = vst [vmem:[%s6489_s14 + $0xb58] sm:$0xff] %v3780_v22  ;;  %5712 = vmatmul.mubr.bf16.gmra.mrb[212].mxu0 %v6257_v13  ;;  %5968 = vmatmul.mubr.bf16.gmra.mrb[212].mxu1 %v6258_v14 }
 0x1cf   : > { %4480 = vst [vmem:[%s6489_s14 + $0x348] sm:$0xff] %v2748_v25  ;;  %4736 = vst [vmem:[%s6489_s14 + $0xb48] sm:$0xff] %v3772_v26  ;;  %5715 = vmatprep.mubr.bf16.mxu0 %v6259_v19  ;;  %5971 = vmatprep.mubr.bf16.mxu1 %v6260_v20 }
 0x1d1   : > { %v5609_v27 = vpop.f32.mrb[108].mxu0  ;;  %v5865_v28 = vpop.f32.mrb[108].mxu1 }
 0x1d2   : > { %v2769_v29 = vadd.f32 %v6814_v54, %v5609_v27  ;;  %v3793_v30 = vadd.f32 %v6814_v54, %v5865_v28  ;;  %v2760_v31 = vpop.f32.mrb[109].mxu0  ;;  %v3784_v32 = vpop.f32.mrb[109].mxu1 }
 0x1d3   : > { %v2761_v35 = vadd.f32 %v6814_v54, %v2760_v31  ;;  %v3785_v36 = vadd.f32 %v6814_v54, %v3784_v32  ;;  %v5610_v37 = vpop.f32.mrb[110].mxu0  ;;  %v5866_v38 = vpop.f32.mrb[110].mxu1  ;;  %v6274_v31 = vld [vmem:[%s6353_s24 + $0x798] sm:$0xff]  }
 0x1d4   : > { %4485 = vst [vmem:[%s6489_s14 + $0x370] sm:$0xff] %v2769_v29  ;;  %4741 = vst [vmem:[%s6489_s14 + $0xb70] sm:$0xff] %v3793_v30  ;;  %v2772_v41 = vadd.f32 %v6814_v54, %v5610_v37  ;;  %v3796_v42 = vadd.f32 %v6814_v54, %v5866_v38  ;;  %v2763_v43 = vpop.f32.mrb[111].mxu0  ;;  %v3787_v44 = vpop.f32.mrb[111].mxu1  ;;  %v6273_v30 = vld [vmem:[%s6353_s24 + $0x398] sm:$0xff]   ;;  %v6276_v37 = vld [vmem:[%s6353_s24 + $0x7a0] sm:$0xff]  }
 0x1d5   : > { %4483 = vst [vmem:[%s6489_s14 + $0x360] sm:$0xff] %v2761_v35  ;;  %4739 = vst [vmem:[%s6489_s14 + $0xb60] sm:$0xff] %v3785_v36  ;;  %v2764_v45 = vadd.f32 %v6814_v54, %v2763_v43  ;;  %v3788_v46 = vadd.f32 %v6814_v54, %v3787_v44  ;;  %v6275_v36 = vld [vmem:[%s6353_s24 + $0x3a0] sm:$0xff]  }
 0x1d6   : > { %4486 = vst [vmem:[%s6489_s14 + $0x378] sm:$0xff] %v2772_v41  ;;  %4742 = vst [vmem:[%s6489_s14 + $0xb78] sm:$0xff] %v3796_v42  ;;  %5716 = vmatmul.mubr.bf16.gmra.mrb[216].mxu0 %v6261_v33  ;;  %5972 = vmatmul.mubr.bf16.gmra.mrb[216].mxu1 %v6262_v34 }
 0x1d7   : > { %4484 = vst [vmem:[%s6489_s14 + $0x368] sm:$0xff] %v2764_v45  ;;  %4740 = vst [vmem:[%s6489_s14 + $0xb68] sm:$0xff] %v3788_v46  ;;  %5719 = vmatprep.mubr.bf16.mxu0 %v6263_v39  ;;  %5975 = vmatprep.mubr.bf16.mxu1 %v6264_v40 }
 0x1d9   : > { %v5613_v47 = vpop.f32.mrb[112].mxu0  ;;  %v5869_v48 = vpop.f32.mrb[112].mxu1 }
 0x1da   : > { %v2785_v49 = vadd.f32 %v6814_v54, %v5613_v47  ;;  %v3809_v50 = vadd.f32 %v6814_v54, %v5869_v48  ;;  %v2776_v51 = vpop.f32.mrb[113].mxu0  ;;  %v3800_v52 = vpop.f32.mrb[113].mxu1 }
 0x1db   : > { %v2777_v56 = vadd.f32 %v6814_v54, %v2776_v51  ;;  %v3801_v57 = vadd.f32 %v6814_v54, %v3800_v52  ;;  %v5614_v58 = vpop.f32.mrb[114].mxu0  ;;  %v5870_v59 = vpop.f32.mrb[114].mxu1  ;;  %v6278_v51 = vld [vmem:[%s6353_s24 + $0x7a8] sm:$0xff]  }
 0x1dc   : > { %4489 = vst [vmem:[%s6489_s14 + $0x390] sm:$0xff] %v2785_v49  ;;  %4745 = vst [vmem:[%s6489_s14 + $0xb90] sm:$0xff] %v3809_v50  ;;  %v2788_v62 = vadd.f32 %v6814_v54, %v5614_v58  ;;  %v3812_v63 = vadd.f32 %v6814_v54, %v5870_v59  ;;  %v2779_v0 = vpop.f32.mrb[115].mxu0  ;;  %v3803_v1 = vpop.f32.mrb[115].mxu1  ;;  %v6277_v50 = vld [vmem:[%s6353_s24 + $0x3a8] sm:$0xff]   ;;  %v6280_v58 = vld [vmem:[%s6353_s24 + $0x7b0] sm:$0xff]  }
 0x1dd   : > { %4487 = vst [vmem:[%s6489_s14 + $0x380] sm:$0xff] %v2777_v56  ;;  %4743 = vst [vmem:[%s6489_s14 + $0xb80] sm:$0xff] %v3801_v57  ;;  %v2780_v2 = vadd.f32 %v6814_v54, %v2779_v0  ;;  %v3804_v3 = vadd.f32 %v6814_v54, %v3803_v1  ;;  %v6279_v57 = vld [vmem:[%s6353_s24 + $0x3b0] sm:$0xff]  }
 0x1de   : > { %4490 = vst [vmem:[%s6489_s14 + $0x398] sm:$0xff] %v2788_v62  ;;  %4746 = vst [vmem:[%s6489_s14 + $0xb98] sm:$0xff] %v3812_v63  ;;  %5720 = vmatmul.mubr.bf16.gmra.mrb[220].mxu0 %v6265_v53  ;;  %5976 = vmatmul.mubr.bf16.gmra.mrb[220].mxu1 %v6266_v55 }
 0x1df   : > { %4488 = vst [vmem:[%s6489_s14 + $0x388] sm:$0xff] %v2780_v2  ;;  %4744 = vst [vmem:[%s6489_s14 + $0xb88] sm:$0xff] %v3804_v3  ;;  %5723 = vmatprep.mubr.bf16.mxu0 %v6267_v60  ;;  %5979 = vmatprep.mubr.bf16.mxu1 %v6268_v61 }
 0x1e1   : > { %v5617_v4 = vpop.f32.mrb[116].mxu0  ;;  %v5873_v5 = vpop.f32.mrb[116].mxu1 }
 0x1e2   : > { %v2801_v6 = vadd.f32 %v6814_v54, %v5617_v4  ;;  %v3825_v7 = vadd.f32 %v6814_v54, %v5873_v5  ;;  %v2792_v8 = vpop.f32.mrb[117].mxu0  ;;  %v3816_v9 = vpop.f32.mrb[117].mxu1 }
 0x1e3   : > { %v2793_v12 = vadd.f32 %v6814_v54, %v2792_v8  ;;  %v3817_v13 = vadd.f32 %v6814_v54, %v3816_v9  ;;  %v5618_v14 = vpop.f32.mrb[118].mxu0  ;;  %v5874_v15 = vpop.f32.mrb[118].mxu1  ;;  %v6282_v8 = vld [vmem:[%s6353_s24 + $0x7b8] sm:$0xff]  }
 0x1e4   : > { %4493 = vst [vmem:[%s6489_s14 + $0x3b0] sm:$0xff] %v2801_v6  ;;  %4749 = vst [vmem:[%s6489_s14 + $0xbb0] sm:$0xff] %v3825_v7  ;;  %v2804_v18 = vadd.f32 %v6814_v54, %v5618_v14  ;;  %v3828_v19 = vadd.f32 %v6814_v54, %v5874_v15  ;;  %v2795_v20 = vpop.f32.mrb[119].mxu0  ;;  %v3819_v21 = vpop.f32.mrb[119].mxu1  ;;  %v6281_v7 = vld [vmem:[%s6353_s24 + $0x3b8] sm:$0xff]   ;;  %v6284_v14 = vld [vmem:[%s6353_s24 + $0x7c0] sm:$0xff]  }
 0x1e5   : > { %4491 = vst [vmem:[%s6489_s14 + $0x3a0] sm:$0xff] %v2793_v12  ;;  %4747 = vst [vmem:[%s6489_s14 + $0xba0] sm:$0xff] %v3817_v13  ;;  %v2796_v22 = vadd.f32 %v6814_v54, %v2795_v20  ;;  %v3820_v23 = vadd.f32 %v6814_v54, %v3819_v21  ;;  %v6283_v13 = vld [vmem:[%s6353_s24 + $0x3c0] sm:$0xff]  }
 0x1e6   : > { %4494 = vst [vmem:[%s6489_s14 + $0x3b8] sm:$0xff] %v2804_v18  ;;  %4750 = vst [vmem:[%s6489_s14 + $0xbb8] sm:$0xff] %v3828_v19  ;;  %5724 = vmatmul.mubr.bf16.gmra.mrb[224].mxu0 %v6269_v10  ;;  %5980 = vmatmul.mubr.bf16.gmra.mrb[224].mxu1 %v6270_v11 }
 0x1e7   : > { %4492 = vst [vmem:[%s6489_s14 + $0x3a8] sm:$0xff] %v2796_v22  ;;  %4748 = vst [vmem:[%s6489_s14 + $0xba8] sm:$0xff] %v3820_v23  ;;  %5727 = vmatprep.mubr.bf16.mxu0 %v6271_v16  ;;  %5983 = vmatprep.mubr.bf16.mxu1 %v6272_v17 }
 0x1e9   : > { %v5621_v24 = vpop.f32.mrb[120].mxu0  ;;  %v5877_v25 = vpop.f32.mrb[120].mxu1 }
 0x1ea   : > { %v2817_v26 = vadd.f32 %v6814_v54, %v5621_v24  ;;  %v3841_v27 = vadd.f32 %v6814_v54, %v5877_v25  ;;  %v2808_v28 = vpop.f32.mrb[121].mxu0  ;;  %v3832_v29 = vpop.f32.mrb[121].mxu1 }
 0x1eb   : > { %v2809_v32 = vadd.f32 %v6814_v54, %v2808_v28  ;;  %v3833_v33 = vadd.f32 %v6814_v54, %v3832_v29  ;;  %v5622_v34 = vpop.f32.mrb[122].mxu0  ;;  %v5878_v35 = vpop.f32.mrb[122].mxu1  ;;  %v6286_v28 = vld [vmem:[%s6353_s24 + $0x7c8] sm:$0xff]  }
 0x1ec   : > { %4497 = vst [vmem:[%s6489_s14 + $0x3d0] sm:$0xff] %v2817_v26  ;;  %4753 = vst [vmem:[%s6489_s14 + $0xbd0] sm:$0xff] %v3841_v27  ;;  %v2820_v38 = vadd.f32 %v6814_v54, %v5622_v34  ;;  %v3844_v39 = vadd.f32 %v6814_v54, %v5878_v35  ;;  %v2811_v40 = vpop.f32.mrb[123].mxu0  ;;  %v3835_v41 = vpop.f32.mrb[123].mxu1  ;;  %v6285_v27 = vld [vmem:[%s6353_s24 + $0x3c8] sm:$0xff]   ;;  %v6288_v34 = vld [vmem:[%s6353_s24 + $0x7d0] sm:$0xff]  }
 0x1ed   : > { %4495 = vst [vmem:[%s6489_s14 + $0x3c0] sm:$0xff] %v2809_v32  ;;  %4751 = vst [vmem:[%s6489_s14 + $0xbc0] sm:$0xff] %v3833_v33  ;;  %v2812_v42 = vadd.f32 %v6814_v54, %v2811_v40  ;;  %v3836_v43 = vadd.f32 %v6814_v54, %v3835_v41  ;;  %v6287_v33 = vld [vmem:[%s6353_s24 + $0x3d0] sm:$0xff]  }
 0x1ee   : > { %4498 = vst [vmem:[%s6489_s14 + $0x3d8] sm:$0xff] %v2820_v38  ;;  %4754 = vst [vmem:[%s6489_s14 + $0xbd8] sm:$0xff] %v3844_v39  ;;  %5728 = vmatmul.mubr.bf16.gmra.mrb[228].mxu0 %v6273_v30  ;;  %5984 = vmatmul.mubr.bf16.gmra.mrb[228].mxu1 %v6274_v31 }
 0x1ef   : > { %4496 = vst [vmem:[%s6489_s14 + $0x3c8] sm:$0xff] %v2812_v42  ;;  %4752 = vst [vmem:[%s6489_s14 + $0xbc8] sm:$0xff] %v3836_v43  ;;  %5731 = vmatprep.mubr.bf16.mxu0 %v6275_v36  ;;  %5987 = vmatprep.mubr.bf16.mxu1 %v6276_v37 }
 0x1f1   : > { %v5625_v44 = vpop.f32.mrb[124].mxu0  ;;  %v5881_v45 = vpop.f32.mrb[124].mxu1 }
 0x1f2   : > { %v2833_v46 = vadd.f32 %v6814_v54, %v5625_v44  ;;  %v3857_v47 = vadd.f32 %v6814_v54, %v5881_v45  ;;  %v2824_v48 = vpop.f32.mrb[125].mxu0  ;;  %v3848_v49 = vpop.f32.mrb[125].mxu1 }
 0x1f3   : > { %v2825_v52 = vadd.f32 %v6814_v54, %v2824_v48  ;;  %v3849_v53 = vadd.f32 %v6814_v54, %v3848_v49  ;;  %v5626_v55 = vpop.f32.mrb[126].mxu0  ;;  %v5882_v56 = vpop.f32.mrb[126].mxu1  ;;  %v6290_v48 = vld [vmem:[%s6353_s24 + $0x7d8] sm:$0xff]  }
 0x1f4   : > { %4501 = vst [vmem:[%s6489_s14 + $0x3f0] sm:$0xff] %v2833_v46  ;;  %4757 = vst [vmem:[%s6489_s14 + $0xbf0] sm:$0xff] %v3857_v47  ;;  %v2836_v59 = vadd.f32 %v6814_v54, %v5626_v55  ;;  %v3860_v60 = vadd.f32 %v6814_v54, %v5882_v56  ;;  %v2827_v61 = vpop.f32.mrb[127].mxu0  ;;  %v3851_v62 = vpop.f32.mrb[127].mxu1  ;;  %v6289_v47 = vld [vmem:[%s6353_s24 + $0x3d8] sm:$0xff]   ;;  %v6292_v55 = vld [vmem:[%s6353_s24 + $0x7e0] sm:$0xff]  }
 0x1f5   : > { %4499 = vst [vmem:[%s6489_s14 + $0x3e0] sm:$0xff] %v2825_v52  ;;  %4755 = vst [vmem:[%s6489_s14 + $0xbe0] sm:$0xff] %v3849_v53  ;;  %v2828_v63 = vadd.f32 %v6814_v54, %v2827_v61  ;;  %v3852_v0 = vadd.f32 %v6814_v54, %v3851_v62  ;;  %v7139_v54 = vld [vmem:[%s7681_s2] ss:$0 sm:$0xff] }
 0x1f6   : > { %4502 = vst [vmem:[%s6489_s14 + $0x3f8] sm:$0xff] %v2836_v59  ;;  %4758 = vst [vmem:[%s6489_s14 + $0xbf8] sm:$0xff] %v3860_v60  ;;  %5732 = vmatmul.mubr.bf16.gmra.mrb[232].mxu0 %v6277_v50  ;;  %5988 = vmatmul.mubr.bf16.gmra.mrb[232].mxu1 %v6278_v51  ;;  %v6291_v53 = vld [vmem:[%s6353_s24 + $0x3e0] sm:$0xff]  }
 0x1f7   : > { %4500 = vst [vmem:[%s6489_s14 + $0x3e8] sm:$0xff] %v2828_v63  ;;  %4756 = vst [vmem:[%s6489_s14 + $0xbe8] sm:$0xff] %v3852_v0  ;;  %5735 = vmatprep.mubr.bf16.mxu0 %v6279_v57  ;;  %5991 = vmatprep.mubr.bf16.mxu1 %v6280_v58 }
 0x1f9   : > { %v5629_v1 = vpop.f32.mrb[128].mxu0  ;;  %v5885_v2 = vpop.f32.mrb[128].mxu1 }
 0x1fa   : > { %v2849_v3 = vadd.f32 %v7139_v54, %v5629_v1  ;;  %v3873_v4 = vadd.f32 %v7139_v54, %v5885_v2  ;;  %v2840_v5 = vpop.f32.mrb[129].mxu0  ;;  %v3864_v6 = vpop.f32.mrb[129].mxu1 }
 0x1fb   : > { %v2841_v9 = vadd.f32 %v7139_v54, %v2840_v5  ;;  %v3865_v10 = vadd.f32 %v7139_v54, %v3864_v6  ;;  %v5630_v11 = vpop.f32.mrb[130].mxu0  ;;  %v5886_v12 = vpop.f32.mrb[130].mxu1  ;;  %v6294_v5 = vld [vmem:[%s6353_s24 + $0x7e8] sm:$0xff]  }
 0x1fc   : > { %4505 = vst [vmem:[%s6489_s14 + $0x410] sm:$0xff] %v2849_v3  ;;  %4761 = vst [vmem:[%s6489_s14 + $0xc10] sm:$0xff] %v3873_v4  ;;  %v2852_v15 = vadd.f32 %v7139_v54, %v5630_v11  ;;  %v3876_v16 = vadd.f32 %v7139_v54, %v5886_v12  ;;  %v2843_v17 = vpop.f32.mrb[131].mxu0  ;;  %v3867_v18 = vpop.f32.mrb[131].mxu1  ;;  %v6293_v4 = vld [vmem:[%s6353_s24 + $0x3e8] sm:$0xff]   ;;  %v6296_v11 = vld [vmem:[%s6353_s24 + $0x7f0] sm:$0xff]  }
 0x1fd   : > { %4503 = vst [vmem:[%s6489_s14 + $0x400] sm:$0xff] %v2841_v9  ;;  %4759 = vst [vmem:[%s6489_s14 + $0xc00] sm:$0xff] %v3865_v10  ;;  %v2844_v19 = vadd.f32 %v7139_v54, %v2843_v17  ;;  %v3868_v20 = vadd.f32 %v7139_v54, %v3867_v18  ;;  %v6295_v10 = vld [vmem:[%s6353_s24 + $0x3f0] sm:$0xff]  }
 0x1fe   : > { %4506 = vst [vmem:[%s6489_s14 + $0x418] sm:$0xff] %v2852_v15  ;;  %4762 = vst [vmem:[%s6489_s14 + $0xc18] sm:$0xff] %v3876_v16  ;;  %5736 = vmatmul.mubr.bf16.gmra.mrb[236].mxu0 %v6281_v7  ;;  %5992 = vmatmul.mubr.bf16.gmra.mrb[236].mxu1 %v6282_v8 }
 0x1ff   : > { %4504 = vst [vmem:[%s6489_s14 + $0x408] sm:$0xff] %v2844_v19  ;;  %4760 = vst [vmem:[%s6489_s14 + $0xc08] sm:$0xff] %v3868_v20  ;;  %5739 = vmatprep.mubr.bf16.mxu0 %v6283_v13  ;;  %5995 = vmatprep.mubr.bf16.mxu1 %v6284_v14 }
 0x201   : > { %v5633_v21 = vpop.f32.mrb[132].mxu0  ;;  %v5889_v22 = vpop.f32.mrb[132].mxu1 }
 0x202   : > { %v2865_v23 = vadd.f32 %v7139_v54, %v5633_v21  ;;  %v3889_v24 = vadd.f32 %v7139_v54, %v5889_v22  ;;  %v2856_v25 = vpop.f32.mrb[133].mxu0  ;;  %v3880_v26 = vpop.f32.mrb[133].mxu1 }
 0x203   : > { %v2857_v29 = vadd.f32 %v7139_v54, %v2856_v25  ;;  %v3881_v30 = vadd.f32 %v7139_v54, %v3880_v26  ;;  %v5634_v31 = vpop.f32.mrb[134].mxu0  ;;  %v5890_v32 = vpop.f32.mrb[134].mxu1  ;;  %v6298_v25 = vld [vmem:[%s6353_s24 + $0x7f8] sm:$0xff]  }
 0x204   : > { %4509 = vst [vmem:[%s6489_s14 + $0x430] sm:$0xff] %v2865_v23  ;;  %4765 = vst [vmem:[%s6489_s14 + $0xc30] sm:$0xff] %v3889_v24  ;;  %v2868_v35 = vadd.f32 %v7139_v54, %v5634_v31  ;;  %v3892_v36 = vadd.f32 %v7139_v54, %v5890_v32  ;;  %v2859_v37 = vpop.f32.mrb[135].mxu0  ;;  %v3883_v38 = vpop.f32.mrb[135].mxu1  ;;  %v6297_v24 = vld [vmem:[%s6353_s24 + $0x3f8] sm:$0xff]  }
 0x205   : > { %4507 = vst [vmem:[%s6489_s14 + $0x420] sm:$0xff] %v2857_v29  ;;  %4763 = vst [vmem:[%s6489_s14 + $0xc20] sm:$0xff] %v3881_v30  ;;  %v2860_v39 = vadd.f32 %v7139_v54, %v2859_v37  ;;  %v3884_v40 = vadd.f32 %v7139_v54, %v3883_v38 }
 0x206   : > { %4510 = vst [vmem:[%s6489_s14 + $0x438] sm:$0xff] %v2868_v35  ;;  %4766 = vst [vmem:[%s6489_s14 + $0xc38] sm:$0xff] %v3892_v36  ;;  %5740 = vmatmul.mubr.bf16.gmra.mrb[240].mxu0 %v6285_v27  ;;  %5996 = vmatmul.mubr.bf16.gmra.mrb[240].mxu1 %v6286_v28 }
 0x207   : > { %4508 = vst [vmem:[%s6489_s14 + $0x428] sm:$0xff] %v2860_v39  ;;  %4764 = vst [vmem:[%s6489_s14 + $0xc28] sm:$0xff] %v3884_v40  ;;  %5743 = vmatprep.mubr.bf16.mxu0 %v6287_v33  ;;  %5999 = vmatprep.mubr.bf16.mxu1 %v6288_v34 }
 0x209   : > { %v5637_v41 = vpop.f32.mrb[136].mxu0  ;;  %v5893_v42 = vpop.f32.mrb[136].mxu1 }
 0x20a   : > { %v2881_v43 = vadd.f32 %v7139_v54, %v5637_v41  ;;  %v3905_v44 = vadd.f32 %v7139_v54, %v5893_v42  ;;  %v2872_v45 = vpop.f32.mrb[137].mxu0  ;;  %v3896_v46 = vpop.f32.mrb[137].mxu1 }
 0x20b   : > { %v2873_v49 = vadd.f32 %v7139_v54, %v2872_v45  ;;  %v3897_v50 = vadd.f32 %v7139_v54, %v3896_v46  ;;  %v5638_v51 = vpop.f32.mrb[138].mxu0  ;;  %v5894_v52 = vpop.f32.mrb[138].mxu1 }
 0x20c   : > { %4513 = vst [vmem:[%s6489_s14 + $0x450] sm:$0xff] %v2881_v43  ;;  %4769 = vst [vmem:[%s6489_s14 + $0xc50] sm:$0xff] %v3905_v44  ;;  %v2884_v56 = vadd.f32 %v7139_v54, %v5638_v51  ;;  %v3908_v57 = vadd.f32 %v7139_v54, %v5894_v52  ;;  %v2875_v58 = vpop.f32.mrb[139].mxu0  ;;  %v3899_v59 = vpop.f32.mrb[139].mxu1 }
 0x20d   : > { %4511 = vst [vmem:[%s6489_s14 + $0x440] sm:$0xff] %v2873_v49  ;;  %4767 = vst [vmem:[%s6489_s14 + $0xc40] sm:$0xff] %v3897_v50  ;;  %v2876_v60 = vadd.f32 %v7139_v54, %v2875_v58  ;;  %v3900_v61 = vadd.f32 %v7139_v54, %v3899_v59 }
 0x20e   : > { %4514 = vst [vmem:[%s6489_s14 + $0x458] sm:$0xff] %v2884_v56  ;;  %4770 = vst [vmem:[%s6489_s14 + $0xc58] sm:$0xff] %v3908_v57  ;;  %5744 = vmatmul.mubr.bf16.gmra.mrb[244].mxu0 %v6289_v47  ;;  %6000 = vmatmul.mubr.bf16.gmra.mrb[244].mxu1 %v6290_v48 }
 0x20f   : > { %4512 = vst [vmem:[%s6489_s14 + $0x448] sm:$0xff] %v2876_v60  ;;  %4768 = vst [vmem:[%s6489_s14 + $0xc48] sm:$0xff] %v3900_v61  ;;  %5747 = vmatprep.mubr.bf16.mxu0 %v6291_v53  ;;  %6003 = vmatprep.mubr.bf16.mxu1 %v6292_v55 }
 0x211   : > { %v5641_v62 = vpop.f32.mrb[140].mxu0  ;;  %v5897_v63 = vpop.f32.mrb[140].mxu1 }
 0x212   : > { %v2897_v0 = vadd.f32 %v7139_v54, %v5641_v62  ;;  %v3921_v1 = vadd.f32 %v7139_v54, %v5897_v63  ;;  %v2888_v2 = vpop.f32.mrb[141].mxu0  ;;  %v3912_v3 = vpop.f32.mrb[141].mxu1 }
 0x213   : > { %v2889_v6 = vadd.f32 %v7139_v54, %v2888_v2  ;;  %v3913_v7 = vadd.f32 %v7139_v54, %v3912_v3  ;;  %v5642_v8 = vpop.f32.mrb[142].mxu0  ;;  %v5898_v9 = vpop.f32.mrb[142].mxu1 }
 0x214   : > { %4517 = vst [vmem:[%s6489_s14 + $0x470] sm:$0xff] %v2897_v0  ;;  %4773 = vst [vmem:[%s6489_s14 + $0xc70] sm:$0xff] %v3921_v1  ;;  %v2900_v12 = vadd.f32 %v7139_v54, %v5642_v8  ;;  %v3924_v13 = vadd.f32 %v7139_v54, %v5898_v9  ;;  %v2891_v14 = vpop.f32.mrb[143].mxu0  ;;  %v3915_v15 = vpop.f32.mrb[143].mxu1 }
 0x215   : > { %4515 = vst [vmem:[%s6489_s14 + $0x460] sm:$0xff] %v2889_v6  ;;  %4771 = vst [vmem:[%s6489_s14 + $0xc60] sm:$0xff] %v3913_v7  ;;  %v2892_v16 = vadd.f32 %v7139_v54, %v2891_v14  ;;  %v3916_v17 = vadd.f32 %v7139_v54, %v3915_v15 }
 0x216   : > { %4518 = vst [vmem:[%s6489_s14 + $0x478] sm:$0xff] %v2900_v12  ;;  %4774 = vst [vmem:[%s6489_s14 + $0xc78] sm:$0xff] %v3924_v13  ;;  %5748 = vmatmul.mubr.bf16.gmra.mrb[248].mxu0 %v6293_v4  ;;  %6004 = vmatmul.mubr.bf16.gmra.mrb[248].mxu1 %v6294_v5 }
 0x217   : > { %4516 = vst [vmem:[%s6489_s14 + $0x468] sm:$0xff] %v2892_v16  ;;  %4772 = vst [vmem:[%s6489_s14 + $0xc68] sm:$0xff] %v3916_v17  ;;  %5751 = vmatprep.mubr.bf16.mxu0 %v6295_v10  ;;  %6007 = vmatprep.mubr.bf16.mxu1 %v6296_v11 }
 0x219   : > { %v5645_v18 = vpop.f32.mrb[144].mxu0  ;;  %v5901_v19 = vpop.f32.mrb[144].mxu1 }
 0x21a   : > { %v2913_v20 = vadd.f32 %v7139_v54, %v5645_v18  ;;  %v3937_v21 = vadd.f32 %v7139_v54, %v5901_v19  ;;  %v2904_v22 = vpop.f32.mrb[145].mxu0  ;;  %v3928_v23 = vpop.f32.mrb[145].mxu1 }
 0x21b   : > { %v2905_v26 = vadd.f32 %v7139_v54, %v2904_v22  ;;  %v3929_v27 = vadd.f32 %v7139_v54, %v3928_v23  ;;  %v5646_v28 = vpop.f32.mrb[146].mxu0  ;;  %v5902_v29 = vpop.f32.mrb[146].mxu1 }
 0x21c   : > { %4521 = vst [vmem:[%s6489_s14 + $0x490] sm:$0xff] %v2913_v20  ;;  %4777 = vst [vmem:[%s6489_s14 + $0xc90] sm:$0xff] %v3937_v21  ;;  %v2916_v30 = vadd.f32 %v7139_v54, %v5646_v28  ;;  %v3940_v31 = vadd.f32 %v7139_v54, %v5902_v29  ;;  %v2907_v32 = vpop.f32.mrb[147].mxu0  ;;  %v3931_v33 = vpop.f32.mrb[147].mxu1 }
 0x21d   : > { %4519 = vst [vmem:[%s6489_s14 + $0x480] sm:$0xff] %v2905_v26  ;;  %4775 = vst [vmem:[%s6489_s14 + $0xc80] sm:$0xff] %v3929_v27  ;;  %v2908_v34 = vadd.f32 %v7139_v54, %v2907_v32  ;;  %v3932_v35 = vadd.f32 %v7139_v54, %v3931_v33 }
 0x21e   : > { %4522 = vst [vmem:[%s6489_s14 + $0x498] sm:$0xff] %v2916_v30  ;;  %4778 = vst [vmem:[%s6489_s14 + $0xc98] sm:$0xff] %v3940_v31  ;;  %5752 = vmatmul.mubr.bf16.gmra.mrb[252].mxu0 %v6297_v24  ;;  %6008 = vmatmul.mubr.bf16.gmra.mrb[252].mxu1 %v6298_v25 }
 0x21f   : > { %4520 = vst [vmem:[%s6489_s14 + $0x488] sm:$0xff] %v2908_v34  ;;  %4776 = vst [vmem:[%s6489_s14 + $0xc88] sm:$0xff] %v3932_v35 }
 0x221   : > { %v5649_v36 = vpop.f32.mrb[148].mxu0  ;;  %v5905_v37 = vpop.f32.mrb[148].mxu1 }
 0x222   : > { %v2929_v38 = vadd.f32 %v7139_v54, %v5649_v36  ;;  %v3953_v39 = vadd.f32 %v7139_v54, %v5905_v37  ;;  %v2920_v40 = vpop.f32.mrb[149].mxu0  ;;  %v3944_v41 = vpop.f32.mrb[149].mxu1 }
 0x223   : > { %v2921_v42 = vadd.f32 %v7139_v54, %v2920_v40  ;;  %v3945_v43 = vadd.f32 %v7139_v54, %v3944_v41  ;;  %v5650_v44 = vpop.f32.mrb[150].mxu0  ;;  %v5906_v45 = vpop.f32.mrb[150].mxu1 }
 0x224   : > { %4525 = vst [vmem:[%s6489_s14 + $0x4b0] sm:$0xff] %v2929_v38  ;;  %4781 = vst [vmem:[%s6489_s14 + $0xcb0] sm:$0xff] %v3953_v39  ;;  %v2932_v46 = vadd.f32 %v7139_v54, %v5650_v44  ;;  %v3956_v47 = vadd.f32 %v7139_v54, %v5906_v45  ;;  %v2923_v48 = vpop.f32.mrb[151].mxu0  ;;  %v3947_v49 = vpop.f32.mrb[151].mxu1 }
 0x225   : > { %4523 = vst [vmem:[%s6489_s14 + $0x4a0] sm:$0xff] %v2921_v42  ;;  %4779 = vst [vmem:[%s6489_s14 + $0xca0] sm:$0xff] %v3945_v43  ;;  %v2924_v50 = vadd.f32 %v7139_v54, %v2923_v48  ;;  %v3948_v51 = vadd.f32 %v7139_v54, %v3947_v49 }
 0x226   : > { %4526 = vst [vmem:[%s6489_s14 + $0x4b8] sm:$0xff] %v2932_v46  ;;  %4782 = vst [vmem:[%s6489_s14 + $0xcb8] sm:$0xff] %v3956_v47 }
 0x227   : > { %4524 = vst [vmem:[%s6489_s14 + $0x4a8] sm:$0xff] %v2924_v50  ;;  %4780 = vst [vmem:[%s6489_s14 + $0xca8] sm:$0xff] %v3948_v51 }
 0x229   : > { %v5653_v52 = vpop.f32.mrb[152].mxu0  ;;  %v5909_v53 = vpop.f32.mrb[152].mxu1 }
 0x22a   : > { %v2945_v55 = vadd.f32 %v7139_v54, %v5653_v52  ;;  %v3969_v56 = vadd.f32 %v7139_v54, %v5909_v53  ;;  %v2936_v57 = vpop.f32.mrb[153].mxu0  ;;  %v3960_v58 = vpop.f32.mrb[153].mxu1 }
 0x22b   : > { %v2937_v59 = vadd.f32 %v7139_v54, %v2936_v57  ;;  %v3961_v60 = vadd.f32 %v7139_v54, %v3960_v58  ;;  %v5654_v61 = vpop.f32.mrb[154].mxu0  ;;  %v5910_v62 = vpop.f32.mrb[154].mxu1 }
 0x22c   : > { %4529 = vst [vmem:[%s6489_s14 + $0x4d0] sm:$0xff] %v2945_v55  ;;  %4785 = vst [vmem:[%s6489_s14 + $0xcd0] sm:$0xff] %v3969_v56  ;;  %v2948_v63 = vadd.f32 %v7139_v54, %v5654_v61  ;;  %v3972_v0 = vadd.f32 %v7139_v54, %v5910_v62  ;;  %v2939_v1 = vpop.f32.mrb[155].mxu0  ;;  %v3963_v2 = vpop.f32.mrb[155].mxu1 }
 0x22d   : > { %4527 = vst [vmem:[%s6489_s14 + $0x4c0] sm:$0xff] %v2937_v59  ;;  %4783 = vst [vmem:[%s6489_s14 + $0xcc0] sm:$0xff] %v3961_v60  ;;  %v2940_v3 = vadd.f32 %v7139_v54, %v2939_v1  ;;  %v3964_v4 = vadd.f32 %v7139_v54, %v3963_v2 }
 0x22e   : > { %4530 = vst [vmem:[%s6489_s14 + $0x4d8] sm:$0xff] %v2948_v63  ;;  %4786 = vst [vmem:[%s6489_s14 + $0xcd8] sm:$0xff] %v3972_v0 }
 0x22f   : > { %4528 = vst [vmem:[%s6489_s14 + $0x4c8] sm:$0xff] %v2940_v3  ;;  %4784 = vst [vmem:[%s6489_s14 + $0xcc8] sm:$0xff] %v3964_v4 }
 0x231   : > { %v5657_v5 = vpop.f32.mrb[156].mxu0  ;;  %v5913_v6 = vpop.f32.mrb[156].mxu1 }
 0x232   : > { %v2961_v7 = vadd.f32 %v7139_v54, %v5657_v5  ;;  %v3985_v8 = vadd.f32 %v7139_v54, %v5913_v6  ;;  %v2952_v9 = vpop.f32.mrb[157].mxu0  ;;  %v3976_v10 = vpop.f32.mrb[157].mxu1 }
 0x233   : > { %v2953_v11 = vadd.f32 %v7139_v54, %v2952_v9  ;;  %v3977_v12 = vadd.f32 %v7139_v54, %v3976_v10  ;;  %v5658_v13 = vpop.f32.mrb[158].mxu0  ;;  %v5914_v14 = vpop.f32.mrb[158].mxu1 }
 0x234   : > { %4533 = vst [vmem:[%s6489_s14 + $0x4f0] sm:$0xff] %v2961_v7  ;;  %4789 = vst [vmem:[%s6489_s14 + $0xcf0] sm:$0xff] %v3985_v8  ;;  %v2964_v15 = vadd.f32 %v7139_v54, %v5658_v13  ;;  %v3988_v16 = vadd.f32 %v7139_v54, %v5914_v14  ;;  %v2955_v17 = vpop.f32.mrb[159].mxu0  ;;  %v3979_v18 = vpop.f32.mrb[159].mxu1 }
 0x235   : > { %4531 = vst [vmem:[%s6489_s14 + $0x4e0] sm:$0xff] %v2953_v11  ;;  %4787 = vst [vmem:[%s6489_s14 + $0xce0] sm:$0xff] %v3977_v12  ;;  %v2956_v19 = vadd.f32 %v7139_v54, %v2955_v17  ;;  %v3980_v20 = vadd.f32 %v7139_v54, %v3979_v18 }
 0x236   : > { %4534 = vst [vmem:[%s6489_s14 + $0x4f8] sm:$0xff] %v2964_v15  ;;  %4790 = vst [vmem:[%s6489_s14 + $0xcf8] sm:$0xff] %v3988_v16 }
 0x237   : > { %4532 = vst [vmem:[%s6489_s14 + $0x4e8] sm:$0xff] %v2956_v19  ;;  %4788 = vst [vmem:[%s6489_s14 + $0xce8] sm:$0xff] %v3980_v20 }
 0x239   : > { %v5661_v21 = vpop.f32.mrb[160].mxu0  ;;  %v5917_v22 = vpop.f32.mrb[160].mxu1 }
 0x23a   : > { %v2977_v23 = vadd.f32 %v7139_v54, %v5661_v21  ;;  %v4001_v24 = vadd.f32 %v7139_v54, %v5917_v22  ;;  %v2968_v25 = vpop.f32.mrb[161].mxu0  ;;  %v3992_v26 = vpop.f32.mrb[161].mxu1 }
 0x23b   : > { %v2969_v27 = vadd.f32 %v7139_v54, %v2968_v25  ;;  %v3993_v28 = vadd.f32 %v7139_v54, %v3992_v26  ;;  %v5662_v29 = vpop.f32.mrb[162].mxu0  ;;  %v5918_v30 = vpop.f32.mrb[162].mxu1 }
 0x23c   : > { %4537 = vst [vmem:[%s6489_s14 + $0x510] sm:$0xff] %v2977_v23  ;;  %4793 = vst [vmem:[%s6489_s14 + $0xd10] sm:$0xff] %v4001_v24  ;;  %v2980_v31 = vadd.f32 %v7139_v54, %v5662_v29  ;;  %v4004_v32 = vadd.f32 %v7139_v54, %v5918_v30  ;;  %v2971_v33 = vpop.f32.mrb[163].mxu0  ;;  %v3995_v34 = vpop.f32.mrb[163].mxu1 }
 0x23d   : > { %4535 = vst [vmem:[%s6489_s14 + $0x500] sm:$0xff] %v2969_v27  ;;  %4791 = vst [vmem:[%s6489_s14 + $0xd00] sm:$0xff] %v3993_v28  ;;  %v2972_v35 = vadd.f32 %v7139_v54, %v2971_v33  ;;  %v3996_v36 = vadd.f32 %v7139_v54, %v3995_v34 }
 0x23e   : > { %4538 = vst [vmem:[%s6489_s14 + $0x518] sm:$0xff] %v2980_v31  ;;  %4794 = vst [vmem:[%s6489_s14 + $0xd18] sm:$0xff] %v4004_v32 }
 0x23f   : > { %4536 = vst [vmem:[%s6489_s14 + $0x508] sm:$0xff] %v2972_v35  ;;  %4792 = vst [vmem:[%s6489_s14 + $0xd08] sm:$0xff] %v3996_v36 }
 0x241   : > { %v5665_v37 = vpop.f32.mrb[164].mxu0  ;;  %v5921_v38 = vpop.f32.mrb[164].mxu1 }
 0x242   : > { %v2993_v39 = vadd.f32 %v7139_v54, %v5665_v37  ;;  %v4017_v40 = vadd.f32 %v7139_v54, %v5921_v38  ;;  %v2984_v41 = vpop.f32.mrb[165].mxu0  ;;  %v4008_v42 = vpop.f32.mrb[165].mxu1 }
 0x243   : > { %v2985_v43 = vadd.f32 %v7139_v54, %v2984_v41  ;;  %v4009_v44 = vadd.f32 %v7139_v54, %v4008_v42  ;;  %v5666_v45 = vpop.f32.mrb[166].mxu0  ;;  %v5922_v46 = vpop.f32.mrb[166].mxu1 }
 0x244   : > { %4541 = vst [vmem:[%s6489_s14 + $0x530] sm:$0xff] %v2993_v39  ;;  %4797 = vst [vmem:[%s6489_s14 + $0xd30] sm:$0xff] %v4017_v40  ;;  %v2996_v47 = vadd.f32 %v7139_v54, %v5666_v45  ;;  %v4020_v48 = vadd.f32 %v7139_v54, %v5922_v46  ;;  %v2987_v49 = vpop.f32.mrb[167].mxu0  ;;  %v4011_v50 = vpop.f32.mrb[167].mxu1 }
 0x245   : > { %4539 = vst [vmem:[%s6489_s14 + $0x520] sm:$0xff] %v2985_v43  ;;  %4795 = vst [vmem:[%s6489_s14 + $0xd20] sm:$0xff] %v4009_v44  ;;  %v2988_v51 = vadd.f32 %v7139_v54, %v2987_v49  ;;  %v4012_v52 = vadd.f32 %v7139_v54, %v4011_v50 }
 0x246   : > { %4542 = vst [vmem:[%s6489_s14 + $0x538] sm:$0xff] %v2996_v47  ;;  %4798 = vst [vmem:[%s6489_s14 + $0xd38] sm:$0xff] %v4020_v48 }
 0x247   : > { %4540 = vst [vmem:[%s6489_s14 + $0x528] sm:$0xff] %v2988_v51  ;;  %4796 = vst [vmem:[%s6489_s14 + $0xd28] sm:$0xff] %v4012_v52 }
 0x249   : > { %v5669_v53 = vpop.f32.mrb[168].mxu0  ;;  %v5925_v55 = vpop.f32.mrb[168].mxu1 }
 0x24a   : > { %v3009_v56 = vadd.f32 %v7139_v54, %v5669_v53  ;;  %v4033_v57 = vadd.f32 %v7139_v54, %v5925_v55  ;;  %v3000_v58 = vpop.f32.mrb[169].mxu0  ;;  %v4024_v59 = vpop.f32.mrb[169].mxu1 }
 0x24b   : > { %v3001_v60 = vadd.f32 %v7139_v54, %v3000_v58  ;;  %v4025_v61 = vadd.f32 %v7139_v54, %v4024_v59  ;;  %v5670_v62 = vpop.f32.mrb[170].mxu0  ;;  %v5926_v63 = vpop.f32.mrb[170].mxu1 }
 0x24c   : > { %4545 = vst [vmem:[%s6489_s14 + $0x550] sm:$0xff] %v3009_v56  ;;  %4801 = vst [vmem:[%s6489_s14 + $0xd50] sm:$0xff] %v4033_v57  ;;  %v3012_v0 = vadd.f32 %v7139_v54, %v5670_v62  ;;  %v4036_v1 = vadd.f32 %v7139_v54, %v5926_v63  ;;  %v3003_v2 = vpop.f32.mrb[171].mxu0  ;;  %v4027_v3 = vpop.f32.mrb[171].mxu1 }
 0x24d   : > { %4543 = vst [vmem:[%s6489_s14 + $0x540] sm:$0xff] %v3001_v60  ;;  %4799 = vst [vmem:[%s6489_s14 + $0xd40] sm:$0xff] %v4025_v61  ;;  %v3004_v4 = vadd.f32 %v7139_v54, %v3003_v2  ;;  %v4028_v5 = vadd.f32 %v7139_v54, %v4027_v3 }
 0x24e   : > { %4546 = vst [vmem:[%s6489_s14 + $0x558] sm:$0xff] %v3012_v0  ;;  %4802 = vst [vmem:[%s6489_s14 + $0xd58] sm:$0xff] %v4036_v1 }
 0x24f   : > { %4544 = vst [vmem:[%s6489_s14 + $0x548] sm:$0xff] %v3004_v4  ;;  %4800 = vst [vmem:[%s6489_s14 + $0xd48] sm:$0xff] %v4028_v5 }
 0x251   : > { %v5673_v6 = vpop.f32.mrb[172].mxu0  ;;  %v5929_v7 = vpop.f32.mrb[172].mxu1 }
 0x252   : > { %v3025_v8 = vadd.f32 %v7139_v54, %v5673_v6  ;;  %v4049_v9 = vadd.f32 %v7139_v54, %v5929_v7  ;;  %v3016_v10 = vpop.f32.mrb[173].mxu0  ;;  %v4040_v11 = vpop.f32.mrb[173].mxu1 }
 0x253   : > { %v3017_v12 = vadd.f32 %v7139_v54, %v3016_v10  ;;  %v4041_v13 = vadd.f32 %v7139_v54, %v4040_v11  ;;  %v5674_v14 = vpop.f32.mrb[174].mxu0  ;;  %v5930_v15 = vpop.f32.mrb[174].mxu1 }
 0x254   : > { %4549 = vst [vmem:[%s6489_s14 + $0x570] sm:$0xff] %v3025_v8  ;;  %4805 = vst [vmem:[%s6489_s14 + $0xd70] sm:$0xff] %v4049_v9  ;;  %v3028_v16 = vadd.f32 %v7139_v54, %v5674_v14  ;;  %v4052_v17 = vadd.f32 %v7139_v54, %v5930_v15  ;;  %v3019_v18 = vpop.f32.mrb[175].mxu0  ;;  %v4043_v19 = vpop.f32.mrb[175].mxu1 }
 0x255   : > { %4547 = vst [vmem:[%s6489_s14 + $0x560] sm:$0xff] %v3017_v12  ;;  %4803 = vst [vmem:[%s6489_s14 + $0xd60] sm:$0xff] %v4041_v13  ;;  %v3020_v20 = vadd.f32 %v7139_v54, %v3019_v18  ;;  %v4044_v21 = vadd.f32 %v7139_v54, %v4043_v19 }
 0x256   : > { %4550 = vst [vmem:[%s6489_s14 + $0x578] sm:$0xff] %v3028_v16  ;;  %4806 = vst [vmem:[%s6489_s14 + $0xd78] sm:$0xff] %v4052_v17 }
 0x257   : > { %4548 = vst [vmem:[%s6489_s14 + $0x568] sm:$0xff] %v3020_v20  ;;  %4804 = vst [vmem:[%s6489_s14 + $0xd68] sm:$0xff] %v4044_v21 }
 0x259   : > { %v5677_v22 = vpop.f32.mrb[176].mxu0  ;;  %v5933_v23 = vpop.f32.mrb[176].mxu1 }
 0x25a   : > { %v3041_v24 = vadd.f32 %v7139_v54, %v5677_v22  ;;  %v4065_v25 = vadd.f32 %v7139_v54, %v5933_v23  ;;  %v3032_v26 = vpop.f32.mrb[177].mxu0  ;;  %v4056_v27 = vpop.f32.mrb[177].mxu1 }
 0x25b   : > { %v3033_v28 = vadd.f32 %v7139_v54, %v3032_v26  ;;  %v4057_v29 = vadd.f32 %v7139_v54, %v4056_v27  ;;  %v5678_v30 = vpop.f32.mrb[178].mxu0  ;;  %v5934_v31 = vpop.f32.mrb[178].mxu1 }
 0x25c   : > { %4553 = vst [vmem:[%s6489_s14 + $0x590] sm:$0xff] %v3041_v24  ;;  %4809 = vst [vmem:[%s6489_s14 + $0xd90] sm:$0xff] %v4065_v25  ;;  %v3044_v32 = vadd.f32 %v7139_v54, %v5678_v30  ;;  %v4068_v33 = vadd.f32 %v7139_v54, %v5934_v31  ;;  %v3035_v34 = vpop.f32.mrb[179].mxu0  ;;  %v4059_v35 = vpop.f32.mrb[179].mxu1 }
 0x25d   : > { %4551 = vst [vmem:[%s6489_s14 + $0x580] sm:$0xff] %v3033_v28  ;;  %4807 = vst [vmem:[%s6489_s14 + $0xd80] sm:$0xff] %v4057_v29  ;;  %v3036_v36 = vadd.f32 %v7139_v54, %v3035_v34  ;;  %v4060_v37 = vadd.f32 %v7139_v54, %v4059_v35 }
 0x25e   : > { %4554 = vst [vmem:[%s6489_s14 + $0x598] sm:$0xff] %v3044_v32  ;;  %4810 = vst [vmem:[%s6489_s14 + $0xd98] sm:$0xff] %v4068_v33 }
 0x25f   : > { %4552 = vst [vmem:[%s6489_s14 + $0x588] sm:$0xff] %v3036_v36  ;;  %4808 = vst [vmem:[%s6489_s14 + $0xd88] sm:$0xff] %v4060_v37 }
 0x261   : > { %v5681_v38 = vpop.f32.mrb[180].mxu0  ;;  %v5937_v39 = vpop.f32.mrb[180].mxu1 }
 0x262   : > { %v3057_v40 = vadd.f32 %v7139_v54, %v5681_v38  ;;  %v4081_v41 = vadd.f32 %v7139_v54, %v5937_v39  ;;  %v3048_v42 = vpop.f32.mrb[181].mxu0  ;;  %v4072_v43 = vpop.f32.mrb[181].mxu1 }
 0x263   : > { %v3049_v44 = vadd.f32 %v7139_v54, %v3048_v42  ;;  %v4073_v45 = vadd.f32 %v7139_v54, %v4072_v43  ;;  %v5682_v46 = vpop.f32.mrb[182].mxu0  ;;  %v5938_v47 = vpop.f32.mrb[182].mxu1 }
 0x264   : > { %4557 = vst [vmem:[%s6489_s14 + $0x5b0] sm:$0xff] %v3057_v40  ;;  %4813 = vst [vmem:[%s6489_s14 + $0xdb0] sm:$0xff] %v4081_v41  ;;  %v3060_v48 = vadd.f32 %v7139_v54, %v5682_v46  ;;  %v4084_v49 = vadd.f32 %v7139_v54, %v5938_v47  ;;  %v3051_v50 = vpop.f32.mrb[183].mxu0  ;;  %v4075_v51 = vpop.f32.mrb[183].mxu1 }
 0x265   : > { %4555 = vst [vmem:[%s6489_s14 + $0x5a0] sm:$0xff] %v3049_v44  ;;  %4811 = vst [vmem:[%s6489_s14 + $0xda0] sm:$0xff] %v4073_v45  ;;  %v3052_v52 = vadd.f32 %v7139_v54, %v3051_v50  ;;  %v4076_v53 = vadd.f32 %v7139_v54, %v4075_v51 }
 0x266   : > { %4558 = vst [vmem:[%s6489_s14 + $0x5b8] sm:$0xff] %v3060_v48  ;;  %4814 = vst [vmem:[%s6489_s14 + $0xdb8] sm:$0xff] %v4084_v49 }
 0x267   : > { %4556 = vst [vmem:[%s6489_s14 + $0x5a8] sm:$0xff] %v3052_v52  ;;  %4812 = vst [vmem:[%s6489_s14 + $0xda8] sm:$0xff] %v4076_v53 }
 0x269   : > { %v5685_v55 = vpop.f32.mrb[184].mxu0  ;;  %v5941_v56 = vpop.f32.mrb[184].mxu1 }
 0x26a   : > { %v3073_v57 = vadd.f32 %v7139_v54, %v5685_v55  ;;  %v4097_v58 = vadd.f32 %v7139_v54, %v5941_v56  ;;  %v3064_v59 = vpop.f32.mrb[185].mxu0  ;;  %v4088_v60 = vpop.f32.mrb[185].mxu1 }
 0x26b   : > { %v3065_v61 = vadd.f32 %v7139_v54, %v3064_v59  ;;  %v4089_v62 = vadd.f32 %v7139_v54, %v4088_v60  ;;  %v5686_v63 = vpop.f32.mrb[186].mxu0  ;;  %v5942_v0 = vpop.f32.mrb[186].mxu1 }
 0x26c   : > { %4561 = vst [vmem:[%s6489_s14 + $0x5d0] sm:$0xff] %v3073_v57  ;;  %4817 = vst [vmem:[%s6489_s14 + $0xdd0] sm:$0xff] %v4097_v58  ;;  %v3076_v1 = vadd.f32 %v7139_v54, %v5686_v63  ;;  %v4100_v2 = vadd.f32 %v7139_v54, %v5942_v0  ;;  %v3067_v3 = vpop.f32.mrb[187].mxu0  ;;  %v4091_v4 = vpop.f32.mrb[187].mxu1 }
 0x26d   : > { %4559 = vst [vmem:[%s6489_s14 + $0x5c0] sm:$0xff] %v3065_v61  ;;  %4815 = vst [vmem:[%s6489_s14 + $0xdc0] sm:$0xff] %v4089_v62  ;;  %v3068_v5 = vadd.f32 %v7139_v54, %v3067_v3  ;;  %v4092_v6 = vadd.f32 %v7139_v54, %v4091_v4 }
 0x26e   : > { %4562 = vst [vmem:[%s6489_s14 + $0x5d8] sm:$0xff] %v3076_v1  ;;  %4818 = vst [vmem:[%s6489_s14 + $0xdd8] sm:$0xff] %v4100_v2 }
 0x26f   : > { %4560 = vst [vmem:[%s6489_s14 + $0x5c8] sm:$0xff] %v3068_v5  ;;  %4816 = vst [vmem:[%s6489_s14 + $0xdc8] sm:$0xff] %v4092_v6 }
 0x271   : > { %v5689_v7 = vpop.f32.mrb[188].mxu0  ;;  %v5945_v8 = vpop.f32.mrb[188].mxu1 }
 0x272   : > { %v3089_v9 = vadd.f32 %v7139_v54, %v5689_v7  ;;  %v4113_v10 = vadd.f32 %v7139_v54, %v5945_v8  ;;  %v3080_v11 = vpop.f32.mrb[189].mxu0  ;;  %v4104_v12 = vpop.f32.mrb[189].mxu1 }
 0x273   : > { %v3081_v13 = vadd.f32 %v7139_v54, %v3080_v11  ;;  %v4105_v14 = vadd.f32 %v7139_v54, %v4104_v12  ;;  %v5690_v15 = vpop.f32.mrb[190].mxu0  ;;  %v5946_v16 = vpop.f32.mrb[190].mxu1 }
 0x274   : > { %4565 = vst [vmem:[%s6489_s14 + $0x5f0] sm:$0xff] %v3089_v9  ;;  %4821 = vst [vmem:[%s6489_s14 + $0xdf0] sm:$0xff] %v4113_v10  ;;  %v3092_v17 = vadd.f32 %v7139_v54, %v5690_v15  ;;  %v4116_v18 = vadd.f32 %v7139_v54, %v5946_v16  ;;  %v3083_v19 = vpop.f32.mrb[191].mxu0  ;;  %v4107_v20 = vpop.f32.mrb[191].mxu1 }
 0x275   : > { %4563 = vst [vmem:[%s6489_s14 + $0x5e0] sm:$0xff] %v3081_v13  ;;  %4819 = vst [vmem:[%s6489_s14 + $0xde0] sm:$0xff] %v4105_v14  ;;  %v3084_v21 = vadd.f32 %v7139_v54, %v3083_v19  ;;  %v4108_v22 = vadd.f32 %v7139_v54, %v4107_v20 }
 0x276   : > { %4566 = vst [vmem:[%s6489_s14 + $0x5f8] sm:$0xff] %v3092_v17  ;;  %4822 = vst [vmem:[%s6489_s14 + $0xdf8] sm:$0xff] %v4116_v18 }
 0x277   : > { %4564 = vst [vmem:[%s6489_s14 + $0x5e8] sm:$0xff] %v3084_v21  ;;  %4820 = vst [vmem:[%s6489_s14 + $0xde8] sm:$0xff] %v4108_v22 }
 0x279   : > { %v5693_v23 = vpop.f32.mrb[192].mxu0  ;;  %v5949_v24 = vpop.f32.mrb[192].mxu1 }
 0x27a   : > { %v3105_v25 = vadd.f32 %v7139_v54, %v5693_v23  ;;  %v4129_v26 = vadd.f32 %v7139_v54, %v5949_v24  ;;  %v3096_v27 = vpop.f32.mrb[193].mxu0  ;;  %v4120_v28 = vpop.f32.mrb[193].mxu1 }
 0x27b   : > { %v3097_v29 = vadd.f32 %v7139_v54, %v3096_v27  ;;  %v4121_v30 = vadd.f32 %v7139_v54, %v4120_v28  ;;  %v5694_v31 = vpop.f32.mrb[194].mxu0  ;;  %v5950_v32 = vpop.f32.mrb[194].mxu1 }
 0x27c   : > { %4569 = vst [vmem:[%s6489_s14 + $0x610] sm:$0xff] %v3105_v25  ;;  %4825 = vst [vmem:[%s6489_s14 + $0xe10] sm:$0xff] %v4129_v26  ;;  %v3108_v33 = vadd.f32 %v7139_v54, %v5694_v31  ;;  %v4132_v34 = vadd.f32 %v7139_v54, %v5950_v32  ;;  %v3099_v35 = vpop.f32.mrb[195].mxu0  ;;  %v4123_v36 = vpop.f32.mrb[195].mxu1  ;;  %v7482_v26 = vld [vmem:[%s7681_s2] ss:$0 sm:$0xff] }
 0x27d   : > { %4567 = vst [vmem:[%s6489_s14 + $0x600] sm:$0xff] %v3097_v29  ;;  %4823 = vst [vmem:[%s6489_s14 + $0xe00] sm:$0xff] %v4121_v30  ;;  %v3100_v37 = vadd.f32 %v7139_v54, %v3099_v35  ;;  %v4124_v38 = vadd.f32 %v7139_v54, %v4123_v36 }
 0x27e   : > { %4570 = vst [vmem:[%s6489_s14 + $0x618] sm:$0xff] %v3108_v33  ;;  %4826 = vst [vmem:[%s6489_s14 + $0xe18] sm:$0xff] %v4132_v34 }
 0x27f   : > { %4568 = vst [vmem:[%s6489_s14 + $0x608] sm:$0xff] %v3100_v37  ;;  %4824 = vst [vmem:[%s6489_s14 + $0xe08] sm:$0xff] %v4124_v38 }
 0x281   : > { %v5697_v39 = vpop.f32.mrb[196].mxu0  ;;  %v5953_v40 = vpop.f32.mrb[196].mxu1 }
 0x282   : > { %v3121_v41 = vadd.f32 %v7139_v54, %v5697_v39  ;;  %v4145_v42 = vadd.f32 %v7139_v54, %v5953_v40  ;;  %v3112_v43 = vpop.f32.mrb[197].mxu0  ;;  %v4136_v44 = vpop.f32.mrb[197].mxu1 }
 0x283   : > { %v3113_v45 = vadd.f32 %v7139_v54, %v3112_v43  ;;  %v4137_v46 = vadd.f32 %v7139_v54, %v4136_v44  ;;  %v5698_v47 = vpop.f32.mrb[198].mxu0  ;;  %v5954_v48 = vpop.f32.mrb[198].mxu1 }
 0x284   : > { %4573 = vst [vmem:[%s6489_s14 + $0x630] sm:$0xff] %v3121_v41  ;;  %4829 = vst [vmem:[%s6489_s14 + $0xe30] sm:$0xff] %v4145_v42  ;;  %v3124_v49 = vadd.f32 %v7139_v54, %v5698_v47  ;;  %v4148_v50 = vadd.f32 %v7139_v54, %v5954_v48  ;;  %v3115_v51 = vpop.f32.mrb[199].mxu0  ;;  %v4139_v52 = vpop.f32.mrb[199].mxu1 }
 0x285   : > { %4571 = vst [vmem:[%s6489_s14 + $0x620] sm:$0xff] %v3113_v45  ;;  %4827 = vst [vmem:[%s6489_s14 + $0xe20] sm:$0xff] %v4137_v46  ;;  %v3116_v53 = vadd.f32 %v7139_v54, %v3115_v51  ;;  %v4140_v55 = vadd.f32 %v7139_v54, %v4139_v52 }
 0x286   : > { %4574 = vst [vmem:[%s6489_s14 + $0x638] sm:$0xff] %v3124_v49  ;;  %4830 = vst [vmem:[%s6489_s14 + $0xe38] sm:$0xff] %v4148_v50 }
 0x287   : > { %4572 = vst [vmem:[%s6489_s14 + $0x628] sm:$0xff] %v3116_v53  ;;  %4828 = vst [vmem:[%s6489_s14 + $0xe28] sm:$0xff] %v4140_v55 }
 0x289   : > { %v5701_v56 = vpop.f32.mrb[200].mxu0  ;;  %v5957_v57 = vpop.f32.mrb[200].mxu1 }
 0x28a   : > { %v3137_v58 = vadd.f32 %v7139_v54, %v5701_v56  ;;  %v4161_v59 = vadd.f32 %v7139_v54, %v5957_v57  ;;  %v3128_v60 = vpop.f32.mrb[201].mxu0  ;;  %v4152_v61 = vpop.f32.mrb[201].mxu1 }
 0x28b   : > { %v3129_v62 = vadd.f32 %v7139_v54, %v3128_v60  ;;  %v4153_v63 = vadd.f32 %v7139_v54, %v4152_v61  ;;  %v5702_v0 = vpop.f32.mrb[202].mxu0  ;;  %v5958_v1 = vpop.f32.mrb[202].mxu1 }
 0x28c   : > { %4577 = vst [vmem:[%s6489_s14 + $0x650] sm:$0xff] %v3137_v58  ;;  %4833 = vst [vmem:[%s6489_s14 + $0xe50] sm:$0xff] %v4161_v59  ;;  %v3140_v2 = vadd.f32 %v7139_v54, %v5702_v0  ;;  %v4164_v3 = vadd.f32 %v7139_v54, %v5958_v1  ;;  %v3131_v4 = vpop.f32.mrb[203].mxu0  ;;  %v4155_v5 = vpop.f32.mrb[203].mxu1 }
 0x28d   : > { %4575 = vst [vmem:[%s6489_s14 + $0x640] sm:$0xff] %v3129_v62  ;;  %4831 = vst [vmem:[%s6489_s14 + $0xe40] sm:$0xff] %v4153_v63  ;;  %v3132_v6 = vadd.f32 %v7139_v54, %v3131_v4  ;;  %v4156_v7 = vadd.f32 %v7139_v54, %v4155_v5 }
 0x28e   : > { %4578 = vst [vmem:[%s6489_s14 + $0x658] sm:$0xff] %v3140_v2  ;;  %4834 = vst [vmem:[%s6489_s14 + $0xe58] sm:$0xff] %v4164_v3 }
 0x28f   : > { %4576 = vst [vmem:[%s6489_s14 + $0x648] sm:$0xff] %v3132_v6  ;;  %4832 = vst [vmem:[%s6489_s14 + $0xe48] sm:$0xff] %v4156_v7 }
 0x291   : > { %v5705_v8 = vpop.f32.mrb[204].mxu0  ;;  %v5961_v9 = vpop.f32.mrb[204].mxu1 }
 0x292   : > { %v3153_v10 = vadd.f32 %v7139_v54, %v5705_v8  ;;  %v4177_v11 = vadd.f32 %v7139_v54, %v5961_v9  ;;  %v3144_v12 = vpop.f32.mrb[205].mxu0  ;;  %v4168_v13 = vpop.f32.mrb[205].mxu1 }
 0x293   : > { %v3145_v14 = vadd.f32 %v7139_v54, %v3144_v12  ;;  %v4169_v15 = vadd.f32 %v7139_v54, %v4168_v13  ;;  %v5706_v16 = vpop.f32.mrb[206].mxu0  ;;  %v5962_v17 = vpop.f32.mrb[206].mxu1 }
 0x294   : > { %4581 = vst [vmem:[%s6489_s14 + $0x670] sm:$0xff] %v3153_v10  ;;  %4837 = vst [vmem:[%s6489_s14 + $0xe70] sm:$0xff] %v4177_v11  ;;  %v3156_v18 = vadd.f32 %v7139_v54, %v5706_v16  ;;  %v4180_v19 = vadd.f32 %v7139_v54, %v5962_v17  ;;  %v3147_v20 = vpop.f32.mrb[207].mxu0  ;;  %v4171_v21 = vpop.f32.mrb[207].mxu1 }
 0x295   : > { %4579 = vst [vmem:[%s6489_s14 + $0x660] sm:$0xff] %v3145_v14  ;;  %4835 = vst [vmem:[%s6489_s14 + $0xe60] sm:$0xff] %v4169_v15  ;;  %v3148_v22 = vadd.f32 %v7139_v54, %v3147_v20  ;;  %v4172_v23 = vadd.f32 %v7139_v54, %v4171_v21 }
 0x296   : > { %4582 = vst [vmem:[%s6489_s14 + $0x678] sm:$0xff] %v3156_v18  ;;  %4838 = vst [vmem:[%s6489_s14 + $0xe78] sm:$0xff] %v4180_v19 }
 0x297   : > { %4580 = vst [vmem:[%s6489_s14 + $0x668] sm:$0xff] %v3148_v22  ;;  %4836 = vst [vmem:[%s6489_s14 + $0xe68] sm:$0xff] %v4172_v23 }
 0x299   : > { %v5709_v24 = vpop.f32.mrb[208].mxu0  ;;  %v5965_v25 = vpop.f32.mrb[208].mxu1 }
 0x29a   : > { %v3169_v27 = vadd.f32 %v7482_v26, %v5709_v24  ;;  %v4193_v28 = vadd.f32 %v7482_v26, %v5965_v25  ;;  %v3160_v54 = vpop.f32.mrb[209].mxu0  ;;  %v4184_v29 = vpop.f32.mrb[209].mxu1 }
 0x29b   : > { %v3161_v30 = vadd.f32 %v7482_v26, %v3160_v54  ;;  %v4185_v31 = vadd.f32 %v7482_v26, %v4184_v29  ;;  %v5710_v32 = vpop.f32.mrb[210].mxu0  ;;  %v5966_v33 = vpop.f32.mrb[210].mxu1 }
 0x29c   : > { %4585 = vst [vmem:[%s6489_s14 + $0x690] sm:$0xff] %v3169_v27  ;;  %4841 = vst [vmem:[%s6489_s14 + $0xe90] sm:$0xff] %v4193_v28  ;;  %v3172_v34 = vadd.f32 %v7482_v26, %v5710_v32  ;;  %v4196_v35 = vadd.f32 %v7482_v26, %v5966_v33  ;;  %v3163_v36 = vpop.f32.mrb[211].mxu0  ;;  %v4187_v37 = vpop.f32.mrb[211].mxu1 }
 0x29d   : > { %4583 = vst [vmem:[%s6489_s14 + $0x680] sm:$0xff] %v3161_v30  ;;  %4839 = vst [vmem:[%s6489_s14 + $0xe80] sm:$0xff] %v4185_v31  ;;  %v3164_v38 = vadd.f32 %v7482_v26, %v3163_v36  ;;  %v4188_v39 = vadd.f32 %v7482_v26, %v4187_v37 }
 0x29e   : > { %4586 = vst [vmem:[%s6489_s14 + $0x698] sm:$0xff] %v3172_v34  ;;  %4842 = vst [vmem:[%s6489_s14 + $0xe98] sm:$0xff] %v4196_v35 }
 0x29f   : > { %4584 = vst [vmem:[%s6489_s14 + $0x688] sm:$0xff] %v3164_v38  ;;  %4840 = vst [vmem:[%s6489_s14 + $0xe88] sm:$0xff] %v4188_v39 }
 0x2a1   : > { %v5713_v40 = vpop.f32.mrb[212].mxu0  ;;  %v5969_v41 = vpop.f32.mrb[212].mxu1 }
 0x2a2   : > { %v3185_v42 = vadd.f32 %v7482_v26, %v5713_v40  ;;  %v4209_v43 = vadd.f32 %v7482_v26, %v5969_v41  ;;  %v3176_v44 = vpop.f32.mrb[213].mxu0  ;;  %v4200_v45 = vpop.f32.mrb[213].mxu1 }
 0x2a3   : > { %v3177_v46 = vadd.f32 %v7482_v26, %v3176_v44  ;;  %v4201_v47 = vadd.f32 %v7482_v26, %v4200_v45  ;;  %v5714_v48 = vpop.f32.mrb[214].mxu0  ;;  %v5970_v49 = vpop.f32.mrb[214].mxu1 }
 0x2a4   : > { %4589 = vst [vmem:[%s6489_s14 + $0x6b0] sm:$0xff] %v3185_v42  ;;  %4845 = vst [vmem:[%s6489_s14 + $0xeb0] sm:$0xff] %v4209_v43  ;;  %v3188_v50 = vadd.f32 %v7482_v26, %v5714_v48  ;;  %v4212_v51 = vadd.f32 %v7482_v26, %v5970_v49  ;;  %v3179_v52 = vpop.f32.mrb[215].mxu0  ;;  %v4203_v53 = vpop.f32.mrb[215].mxu1 }
 0x2a5   : > { %4587 = vst [vmem:[%s6489_s14 + $0x6a0] sm:$0xff] %v3177_v46  ;;  %4843 = vst [vmem:[%s6489_s14 + $0xea0] sm:$0xff] %v4201_v47  ;;  %v3180_v55 = vadd.f32 %v7482_v26, %v3179_v52  ;;  %v4204_v56 = vadd.f32 %v7482_v26, %v4203_v53 }
 0x2a6   : > { %4590 = vst [vmem:[%s6489_s14 + $0x6b8] sm:$0xff] %v3188_v50  ;;  %4846 = vst [vmem:[%s6489_s14 + $0xeb8] sm:$0xff] %v4212_v51 }
 0x2a7   : > { %4588 = vst [vmem:[%s6489_s14 + $0x6a8] sm:$0xff] %v3180_v55  ;;  %4844 = vst [vmem:[%s6489_s14 + $0xea8] sm:$0xff] %v4204_v56 }
 0x2a9   : > { %v5717_v57 = vpop.f32.mrb[216].mxu0  ;;  %v5973_v58 = vpop.f32.mrb[216].mxu1 }
 0x2aa   : > { %v3201_v59 = vadd.f32 %v7482_v26, %v5717_v57  ;;  %v4225_v60 = vadd.f32 %v7482_v26, %v5973_v58  ;;  %v3192_v61 = vpop.f32.mrb[217].mxu0  ;;  %v4216_v62 = vpop.f32.mrb[217].mxu1 }
 0x2ab   : > { %v3193_v63 = vadd.f32 %v7482_v26, %v3192_v61  ;;  %v4217_v0 = vadd.f32 %v7482_v26, %v4216_v62  ;;  %v5718_v1 = vpop.f32.mrb[218].mxu0  ;;  %v5974_v2 = vpop.f32.mrb[218].mxu1 }
 0x2ac   : > { %4593 = vst [vmem:[%s6489_s14 + $0x6d0] sm:$0xff] %v3201_v59  ;;  %4849 = vst [vmem:[%s6489_s14 + $0xed0] sm:$0xff] %v4225_v60  ;;  %v3204_v3 = vadd.f32 %v7482_v26, %v5718_v1  ;;  %v4228_v4 = vadd.f32 %v7482_v26, %v5974_v2  ;;  %v3195_v5 = vpop.f32.mrb[219].mxu0  ;;  %v4219_v6 = vpop.f32.mrb[219].mxu1 }
 0x2ad   : > { %4591 = vst [vmem:[%s6489_s14 + $0x6c0] sm:$0xff] %v3193_v63  ;;  %4847 = vst [vmem:[%s6489_s14 + $0xec0] sm:$0xff] %v4217_v0  ;;  %v3196_v7 = vadd.f32 %v7482_v26, %v3195_v5  ;;  %v4220_v8 = vadd.f32 %v7482_v26, %v4219_v6 }
 0x2ae   : > { %4594 = vst [vmem:[%s6489_s14 + $0x6d8] sm:$0xff] %v3204_v3  ;;  %4850 = vst [vmem:[%s6489_s14 + $0xed8] sm:$0xff] %v4228_v4 }
 0x2af   : > { %4592 = vst [vmem:[%s6489_s14 + $0x6c8] sm:$0xff] %v3196_v7  ;;  %4848 = vst [vmem:[%s6489_s14 + $0xec8] sm:$0xff] %v4220_v8 }
 0x2b1   : > { %v5721_v9 = vpop.f32.mrb[220].mxu0  ;;  %v5977_v10 = vpop.f32.mrb[220].mxu1 }
 0x2b2   : > { %v3217_v11 = vadd.f32 %v7482_v26, %v5721_v9  ;;  %v4241_v12 = vadd.f32 %v7482_v26, %v5977_v10  ;;  %v3208_v13 = vpop.f32.mrb[221].mxu0  ;;  %v4232_v14 = vpop.f32.mrb[221].mxu1 }
 0x2b3   : > { %v3209_v15 = vadd.f32 %v7482_v26, %v3208_v13  ;;  %v4233_v16 = vadd.f32 %v7482_v26, %v4232_v14  ;;  %v5722_v17 = vpop.f32.mrb[222].mxu0  ;;  %v5978_v18 = vpop.f32.mrb[222].mxu1 }
 0x2b4   : > { %4597 = vst [vmem:[%s6489_s14 + $0x6f0] sm:$0xff] %v3217_v11  ;;  %4853 = vst [vmem:[%s6489_s14 + $0xef0] sm:$0xff] %v4241_v12  ;;  %v3220_v19 = vadd.f32 %v7482_v26, %v5722_v17  ;;  %v4244_v20 = vadd.f32 %v7482_v26, %v5978_v18  ;;  %v3211_v21 = vpop.f32.mrb[223].mxu0  ;;  %v4235_v22 = vpop.f32.mrb[223].mxu1 }
 0x2b5   : > { %4595 = vst [vmem:[%s6489_s14 + $0x6e0] sm:$0xff] %v3209_v15  ;;  %4851 = vst [vmem:[%s6489_s14 + $0xee0] sm:$0xff] %v4233_v16  ;;  %v3212_v23 = vadd.f32 %v7482_v26, %v3211_v21  ;;  %v4236_v24 = vadd.f32 %v7482_v26, %v4235_v22 }
 0x2b6   : > { %4598 = vst [vmem:[%s6489_s14 + $0x6f8] sm:$0xff] %v3220_v19  ;;  %4854 = vst [vmem:[%s6489_s14 + $0xef8] sm:$0xff] %v4244_v20 }
 0x2b7   : > { %4596 = vst [vmem:[%s6489_s14 + $0x6e8] sm:$0xff] %v3212_v23  ;;  %4852 = vst [vmem:[%s6489_s14 + $0xee8] sm:$0xff] %v4236_v24 }
 0x2b9   : > { %v5725_v25 = vpop.f32.mrb[224].mxu0  ;;  %v5981_v27 = vpop.f32.mrb[224].mxu1 }
 0x2ba   : > { %v3233_v28 = vadd.f32 %v7482_v26, %v5725_v25  ;;  %v4257_v54 = vadd.f32 %v7482_v26, %v5981_v27  ;;  %v3224_v29 = vpop.f32.mrb[225].mxu0  ;;  %v4248_v30 = vpop.f32.mrb[225].mxu1 }
 0x2bb   : > { %v3225_v31 = vadd.f32 %v7482_v26, %v3224_v29  ;;  %v4249_v32 = vadd.f32 %v7482_v26, %v4248_v30  ;;  %v5726_v33 = vpop.f32.mrb[226].mxu0  ;;  %v5982_v34 = vpop.f32.mrb[226].mxu1 }
 0x2bc   : > { %4601 = vst [vmem:[%s6489_s14 + $0x710] sm:$0xff] %v3233_v28  ;;  %4857 = vst [vmem:[%s6489_s14 + $0xf10] sm:$0xff] %v4257_v54  ;;  %v3236_v35 = vadd.f32 %v7482_v26, %v5726_v33  ;;  %v4260_v36 = vadd.f32 %v7482_v26, %v5982_v34  ;;  %v3227_v37 = vpop.f32.mrb[227].mxu0  ;;  %v4251_v38 = vpop.f32.mrb[227].mxu1 }
 0x2bd   : > { %4599 = vst [vmem:[%s6489_s14 + $0x700] sm:$0xff] %v3225_v31  ;;  %4855 = vst [vmem:[%s6489_s14 + $0xf00] sm:$0xff] %v4249_v32  ;;  %v3228_v39 = vadd.f32 %v7482_v26, %v3227_v37  ;;  %v4252_v40 = vadd.f32 %v7482_v26, %v4251_v38 }
 0x2be   : > { %4602 = vst [vmem:[%s6489_s14 + $0x718] sm:$0xff] %v3236_v35  ;;  %4858 = vst [vmem:[%s6489_s14 + $0xf18] sm:$0xff] %v4260_v36 }
 0x2bf   : > { %4600 = vst [vmem:[%s6489_s14 + $0x708] sm:$0xff] %v3228_v39  ;;  %4856 = vst [vmem:[%s6489_s14 + $0xf08] sm:$0xff] %v4252_v40 }
 0x2c1   : > { %v5729_v41 = vpop.f32.mrb[228].mxu0  ;;  %v5985_v42 = vpop.f32.mrb[228].mxu1 }
 0x2c2   : > { %v3249_v43 = vadd.f32 %v7482_v26, %v5729_v41  ;;  %v4273_v44 = vadd.f32 %v7482_v26, %v5985_v42  ;;  %v3240_v45 = vpop.f32.mrb[229].mxu0  ;;  %v4264_v46 = vpop.f32.mrb[229].mxu1 }
 0x2c3   : > { %v3241_v47 = vadd.f32 %v7482_v26, %v3240_v45  ;;  %v4265_v48 = vadd.f32 %v7482_v26, %v4264_v46  ;;  %v5730_v49 = vpop.f32.mrb[230].mxu0  ;;  %v5986_v50 = vpop.f32.mrb[230].mxu1 }
 0x2c4   : > { %4605 = vst [vmem:[%s6489_s14 + $0x730] sm:$0xff] %v3249_v43  ;;  %4861 = vst [vmem:[%s6489_s14 + $0xf30] sm:$0xff] %v4273_v44  ;;  %v3252_v51 = vadd.f32 %v7482_v26, %v5730_v49  ;;  %v4276_v52 = vadd.f32 %v7482_v26, %v5986_v50  ;;  %v3243_v53 = vpop.f32.mrb[231].mxu0  ;;  %v4267_v55 = vpop.f32.mrb[231].mxu1 }
 0x2c5   : > { %4603 = vst [vmem:[%s6489_s14 + $0x720] sm:$0xff] %v3241_v47  ;;  %4859 = vst [vmem:[%s6489_s14 + $0xf20] sm:$0xff] %v4265_v48  ;;  %v3244_v56 = vadd.f32 %v7482_v26, %v3243_v53  ;;  %v4268_v57 = vadd.f32 %v7482_v26, %v4267_v55 }
 0x2c6   : > { %4606 = vst [vmem:[%s6489_s14 + $0x738] sm:$0xff] %v3252_v51  ;;  %4862 = vst [vmem:[%s6489_s14 + $0xf38] sm:$0xff] %v4276_v52 }
 0x2c7   : > { %4604 = vst [vmem:[%s6489_s14 + $0x728] sm:$0xff] %v3244_v56  ;;  %4860 = vst [vmem:[%s6489_s14 + $0xf28] sm:$0xff] %v4268_v57 }
 0x2c9   : > { %v5733_v58 = vpop.f32.mrb[232].mxu0  ;;  %v5989_v59 = vpop.f32.mrb[232].mxu1 }
 0x2ca   : > { %v3265_v60 = vadd.f32 %v7482_v26, %v5733_v58  ;;  %v4289_v61 = vadd.f32 %v7482_v26, %v5989_v59  ;;  %v3256_v62 = vpop.f32.mrb[233].mxu0  ;;  %v4280_v63 = vpop.f32.mrb[233].mxu1 }
 0x2cb   : > { %v3257_v0 = vadd.f32 %v7482_v26, %v3256_v62  ;;  %v4281_v1 = vadd.f32 %v7482_v26, %v4280_v63  ;;  %v5734_v2 = vpop.f32.mrb[234].mxu0  ;;  %v5990_v3 = vpop.f32.mrb[234].mxu1 }
 0x2cc   : > { %4609 = vst [vmem:[%s6489_s14 + $0x750] sm:$0xff] %v3265_v60  ;;  %4865 = vst [vmem:[%s6489_s14 + $0xf50] sm:$0xff] %v4289_v61  ;;  %v3268_v4 = vadd.f32 %v7482_v26, %v5734_v2  ;;  %v4292_v5 = vadd.f32 %v7482_v26, %v5990_v3  ;;  %v3259_v6 = vpop.f32.mrb[235].mxu0  ;;  %v4283_v7 = vpop.f32.mrb[235].mxu1 }
 0x2cd   : > { %4607 = vst [vmem:[%s6489_s14 + $0x740] sm:$0xff] %v3257_v0  ;;  %4863 = vst [vmem:[%s6489_s14 + $0xf40] sm:$0xff] %v4281_v1  ;;  %v3260_v8 = vadd.f32 %v7482_v26, %v3259_v6  ;;  %v4284_v9 = vadd.f32 %v7482_v26, %v4283_v7 }
 0x2ce   : > { %4610 = vst [vmem:[%s6489_s14 + $0x758] sm:$0xff] %v3268_v4  ;;  %4866 = vst [vmem:[%s6489_s14 + $0xf58] sm:$0xff] %v4292_v5 }
 0x2cf   : > { %4608 = vst [vmem:[%s6489_s14 + $0x748] sm:$0xff] %v3260_v8  ;;  %4864 = vst [vmem:[%s6489_s14 + $0xf48] sm:$0xff] %v4284_v9 }
 0x2d1   : > { %v5737_v10 = vpop.f32.mrb[236].mxu0  ;;  %v5993_v11 = vpop.f32.mrb[236].mxu1 }
 0x2d2   : > { %v3281_v12 = vadd.f32 %v7482_v26, %v5737_v10  ;;  %v4305_v13 = vadd.f32 %v7482_v26, %v5993_v11  ;;  %v3272_v14 = vpop.f32.mrb[237].mxu0  ;;  %v4296_v15 = vpop.f32.mrb[237].mxu1 }
 0x2d3   : > { %v3273_v16 = vadd.f32 %v7482_v26, %v3272_v14  ;;  %v4297_v17 = vadd.f32 %v7482_v26, %v4296_v15  ;;  %v5738_v18 = vpop.f32.mrb[238].mxu0  ;;  %v5994_v19 = vpop.f32.mrb[238].mxu1 }
 0x2d4   : > { %4613 = vst [vmem:[%s6489_s14 + $0x770] sm:$0xff] %v3281_v12  ;;  %4869 = vst [vmem:[%s6489_s14 + $0xf70] sm:$0xff] %v4305_v13  ;;  %v3284_v20 = vadd.f32 %v7482_v26, %v5738_v18  ;;  %v4308_v21 = vadd.f32 %v7482_v26, %v5994_v19  ;;  %v3275_v22 = vpop.f32.mrb[239].mxu0  ;;  %v4299_v23 = vpop.f32.mrb[239].mxu1 }
 0x2d5   : > { %4611 = vst [vmem:[%s6489_s14 + $0x760] sm:$0xff] %v3273_v16  ;;  %4867 = vst [vmem:[%s6489_s14 + $0xf60] sm:$0xff] %v4297_v17  ;;  %v3276_v24 = vadd.f32 %v7482_v26, %v3275_v22  ;;  %v4300_v25 = vadd.f32 %v7482_v26, %v4299_v23 }
 0x2d6   : > { %4614 = vst [vmem:[%s6489_s14 + $0x778] sm:$0xff] %v3284_v20  ;;  %4870 = vst [vmem:[%s6489_s14 + $0xf78] sm:$0xff] %v4308_v21 }
 0x2d7   : > { %4612 = vst [vmem:[%s6489_s14 + $0x768] sm:$0xff] %v3276_v24  ;;  %4868 = vst [vmem:[%s6489_s14 + $0xf68] sm:$0xff] %v4300_v25 }
 0x2d9   : > { %v5741_v27 = vpop.f32.mrb[240].mxu0  ;;  %v5997_v28 = vpop.f32.mrb[240].mxu1 }
 0x2da   : > { %v3297_v54 = vadd.f32 %v7482_v26, %v5741_v27  ;;  %v4321_v29 = vadd.f32 %v7482_v26, %v5997_v28  ;;  %v3288_v30 = vpop.f32.mrb[241].mxu0  ;;  %v4312_v31 = vpop.f32.mrb[241].mxu1 }
 0x2db   : > { %v3289_v32 = vadd.f32 %v7482_v26, %v3288_v30  ;;  %v4313_v33 = vadd.f32 %v7482_v26, %v4312_v31  ;;  %v5742_v34 = vpop.f32.mrb[242].mxu0  ;;  %v5998_v35 = vpop.f32.mrb[242].mxu1 }
 0x2dc   : > { %4617 = vst [vmem:[%s6489_s14 + $0x790] sm:$0xff] %v3297_v54  ;;  %4873 = vst [vmem:[%s6489_s14 + $0xf90] sm:$0xff] %v4321_v29  ;;  %v3300_v36 = vadd.f32 %v7482_v26, %v5742_v34  ;;  %v4324_v37 = vadd.f32 %v7482_v26, %v5998_v35  ;;  %v3291_v38 = vpop.f32.mrb[243].mxu0  ;;  %v4315_v39 = vpop.f32.mrb[243].mxu1 }
 0x2dd   : > { %4615 = vst [vmem:[%s6489_s14 + $0x780] sm:$0xff] %v3289_v32  ;;  %4871 = vst [vmem:[%s6489_s14 + $0xf80] sm:$0xff] %v4313_v33  ;;  %v3292_v40 = vadd.f32 %v7482_v26, %v3291_v38  ;;  %v4316_v41 = vadd.f32 %v7482_v26, %v4315_v39 }
 0x2de   : > { %4618 = vst [vmem:[%s6489_s14 + $0x798] sm:$0xff] %v3300_v36  ;;  %4874 = vst [vmem:[%s6489_s14 + $0xf98] sm:$0xff] %v4324_v37 }
 0x2df   : > { %4616 = vst [vmem:[%s6489_s14 + $0x788] sm:$0xff] %v3292_v40  ;;  %4872 = vst [vmem:[%s6489_s14 + $0xf88] sm:$0xff] %v4316_v41 }
 0x2e1   : > { %v5745_v42 = vpop.f32.mrb[244].mxu0  ;;  %v6001_v43 = vpop.f32.mrb[244].mxu1 }
 0x2e2   : > { %v3313_v44 = vadd.f32 %v7482_v26, %v5745_v42  ;;  %v4337_v45 = vadd.f32 %v7482_v26, %v6001_v43  ;;  %v3304_v46 = vpop.f32.mrb[245].mxu0  ;;  %v4328_v47 = vpop.f32.mrb[245].mxu1 }
 0x2e3   : > { %v3305_v48 = vadd.f32 %v7482_v26, %v3304_v46  ;;  %v4329_v49 = vadd.f32 %v7482_v26, %v4328_v47  ;;  %v5746_v50 = vpop.f32.mrb[246].mxu0  ;;  %v6002_v51 = vpop.f32.mrb[246].mxu1 }
 0x2e4   : > { %4621 = vst [vmem:[%s6489_s14 + $0x7b0] sm:$0xff] %v3313_v44  ;;  %4877 = vst [vmem:[%s6489_s14 + $0xfb0] sm:$0xff] %v4337_v45  ;;  %v3316_v52 = vadd.f32 %v7482_v26, %v5746_v50  ;;  %v4340_v53 = vadd.f32 %v7482_v26, %v6002_v51  ;;  %v3307_v55 = vpop.f32.mrb[247].mxu0  ;;  %v4331_v56 = vpop.f32.mrb[247].mxu1 }
 0x2e5   : > { %4619 = vst [vmem:[%s6489_s14 + $0x7a0] sm:$0xff] %v3305_v48  ;;  %4875 = vst [vmem:[%s6489_s14 + $0xfa0] sm:$0xff] %v4329_v49  ;;  %v3308_v57 = vadd.f32 %v7482_v26, %v3307_v55  ;;  %v4332_v58 = vadd.f32 %v7482_v26, %v4331_v56 }
 0x2e6   : > { %4622 = vst [vmem:[%s6489_s14 + $0x7b8] sm:$0xff] %v3316_v52  ;;  %4878 = vst [vmem:[%s6489_s14 + $0xfb8] sm:$0xff] %v4340_v53 }
 0x2e7   : > { %4620 = vst [vmem:[%s6489_s14 + $0x7a8] sm:$0xff] %v3308_v57  ;;  %4876 = vst [vmem:[%s6489_s14 + $0xfa8] sm:$0xff] %v4332_v58 }
 0x2e9   : > { %v5749_v59 = vpop.f32.mrb[248].mxu0  ;;  %v6005_v60 = vpop.f32.mrb[248].mxu1 }
 0x2ea   : > { %v3329_v61 = vadd.f32 %v7482_v26, %v5749_v59  ;;  %v4353_v62 = vadd.f32 %v7482_v26, %v6005_v60  ;;  %v3320_v63 = vpop.f32.mrb[249].mxu0  ;;  %v4344_v0 = vpop.f32.mrb[249].mxu1 }
 0x2eb   : > { %v3321_v1 = vadd.f32 %v7482_v26, %v3320_v63  ;;  %v4345_v2 = vadd.f32 %v7482_v26, %v4344_v0  ;;  %v5750_v3 = vpop.f32.mrb[250].mxu0  ;;  %v6006_v4 = vpop.f32.mrb[250].mxu1 }
 0x2ec   : > { %4625 = vst [vmem:[%s6489_s14 + $0x7d0] sm:$0xff] %v3329_v61  ;;  %4881 = vst [vmem:[%s6489_s14 + $0xfd0] sm:$0xff] %v4353_v62  ;;  %v3332_v5 = vadd.f32 %v7482_v26, %v5750_v3  ;;  %v4356_v6 = vadd.f32 %v7482_v26, %v6006_v4  ;;  %v3323_v7 = vpop.f32.mrb[251].mxu0  ;;  %v4347_v8 = vpop.f32.mrb[251].mxu1 }
 0x2ed   : > { %4623 = vst [vmem:[%s6489_s14 + $0x7c0] sm:$0xff] %v3321_v1  ;;  %4879 = vst [vmem:[%s6489_s14 + $0xfc0] sm:$0xff] %v4345_v2  ;;  %v3324_v9 = vadd.f32 %v7482_v26, %v3323_v7  ;;  %v4348_v10 = vadd.f32 %v7482_v26, %v4347_v8 }
 0x2ee   : > { %4626 = vst [vmem:[%s6489_s14 + $0x7d8] sm:$0xff] %v3332_v5  ;;  %4882 = vst [vmem:[%s6489_s14 + $0xfd8] sm:$0xff] %v4356_v6 }
 0x2ef   : > { %4624 = vst [vmem:[%s6489_s14 + $0x7c8] sm:$0xff] %v3324_v9  ;;  %4880 = vst [vmem:[%s6489_s14 + $0xfc8] sm:$0xff] %v4348_v10 }
 0x2f1   : > { %v5753_v11 = vpop.f32.mrb[252].mxu0  ;;  %v6009_v12 = vpop.f32.mrb[252].mxu1 }
 0x2f2   : > { %v3345_v13 = vadd.f32 %v7482_v26, %v5753_v11  ;;  %v4369_v14 = vadd.f32 %v7482_v26, %v6009_v12  ;;  %v3336_v15 = vpop.f32.mrb[253].mxu0  ;;  %v4360_v16 = vpop.f32.mrb[253].mxu1 }
 0x2f3   : > { %v3337_v17 = vadd.f32 %v7482_v26, %v3336_v15  ;;  %v4361_v18 = vadd.f32 %v7482_v26, %v4360_v16  ;;  %v5754_v19 = vpop.f32.mrb[254].mxu0  ;;  %v6010_v20 = vpop.f32.mrb[254].mxu1 }
 0x2f4   : > { %4629 = vst [vmem:[%s6489_s14 + $0x7f0] sm:$0xff] %v3345_v13  ;;  %4885 = vst [vmem:[%s6489_s14 + $0xff0] sm:$0xff] %v4369_v14  ;;  %v3348_v21 = vadd.f32 %v7482_v26, %v5754_v19  ;;  %v4372_v22 = vadd.f32 %v7482_v26, %v6010_v20  ;;  %v3339_v23 = vpop.f32.mrb[255].mxu0  ;;  %v4363_v24 = vpop.f32.mrb[255].mxu1 }
 0x2f5   : > { %4627 = vst [vmem:[%s6489_s14 + $0x7e0] sm:$0xff] %v3337_v17  ;;  %4883 = vst [vmem:[%s6489_s14 + $0xfe0] sm:$0xff] %v4361_v18  ;;  %v3340_v25 = vadd.f32 %v7482_v26, %v3339_v23  ;;  %v4364_v27 = vadd.f32 %v7482_v26, %v4363_v24 }
 0x2f6   : > { %4630 = vst [vmem:[%s6489_s14 + $0x7f8] sm:$0xff] %v3348_v21  ;;  %4886 = vst [vmem:[%s6489_s14 + $0xff8] sm:$0xff] %v4372_v22 }
 0x2f7   : > { %4628 = vst [vmem:[%s6489_s14 + $0x7e8] sm:$0xff] %v3340_v25  ;;  %4884 = vst [vmem:[%s6489_s14 + $0xfe8] sm:$0xff] %v4364_v27 }
 0x2f8 PF: > { %s13_s12 = sadd.s32 1, %s6308_s12  }
 0x2f9   : > { %p10_p4 = scmp.ge.s32.totalorder %s13_s12, 4  }
 0x2fb   :  { %12 = sbr.rel (!%p10_p4) target bundleno = 1 (0x1), region = 62 }

</bundles_post_ra>
